<compile_context>
chip_gen: v5e
topology: v5e:2x2
jax: 0.10.0
libtpu: 0.0.40
codegen_flags: <defaults>
</compile_context>

<pallas_src>
import numpy as np
import jax
import jax.numpy as jnp
from jax import lax
from jax.experimental import pallas as pl
from jax.experimental.pallas import tpu as pltpu


# ---------------------------------------------------------------------------
# Fused Pallas kernel: one invocation == the whole S-step DDIM trajectory
# ---------------------------------------------------------------------------

def _ddim_fused_kernel(coef_ref,   # SMEM (4*S,)   flat [a, b, sigma, 0] per step
                       x_in_ref,   # VMEM (C, N)   initial x_T
                       w1t_ref,    # VMEM (Hd, C)  w1^T
                       bias_ref,   # VMEM (S*Hd,1) per-step b1 + temb[t]  (resident)
                       w2t_ref,    # VMEM (C, Hd)  w2^T
                       b2t_ref,    # VMEM (C, 1)   b2^T
                       noise_ref,  # VMEM (S, C, N) per-step noise        (resident)
                       o_ref):     # VMEM (C, N)   clipped final sample
    S = noise_ref.shape[0]
    Hd = w1t_ref.shape[0]

    # Load the constant weights once; they stay live across the unrolled loop.
    w1t = w1t_ref[...]
    w2t = w2t_ref[...]
    b2t = b2t_ref[...]

    def step(s, x):
        # ---- eps model: per-pixel channel MLP, lane-dense last dim N ----------
        bias = bias_ref[pl.ds(pl.multiple_of(s * Hd, Hd), Hd), :]          # (Hd, 1)
        h = jnp.dot(w1t, x, preferred_element_type=jnp.float32) + bias      # (Hd, N)
        h = h * jax.nn.sigmoid(h)                                            # SiLU
        eps = (jnp.dot(w2t, h, preferred_element_type=jnp.float32)
               + b2t)                                                        # (C, N)

        # ---- folded DDIM update: x_prev = a*x + b*eps + sigma*noise ------------
        a = coef_ref[4 * s]
        b = coef_ref[4 * s + 1]
        sigma = coef_ref[4 * s + 2]
        return a * x + b * eps + sigma * noise_ref[s]

    x = lax.fori_loop(0, S, step, x_in_ref[...], unroll=True)
    o_ref[...] = jnp.clip(x, -1.0, 1.0)   # single output store, clip fused in


# ---------------------------------------------------------------------------
# Layout helpers (NCHW <-> lane-dense (C, B*H*W)), applied once outside the loop
# ---------------------------------------------------------------------------

def nchw_to_cn(x):
    B, C, H, W = x.shape
    return jnp.transpose(x, (1, 0, 2, 3)).reshape(C, B * H * W)


def cn_to_nchw(x_cn, B, C, H, W):
    return jnp.transpose(x_cn.reshape(C, B, H, W), (1, 0, 2, 3))


# ---------------------------------------------------------------------------
# Wrapper: single gridless pallas_call for the whole sampling trajectory
# ---------------------------------------------------------------------------

@jax.jit
def ddim_sample_pallas(x_T, w1t, w2t, b2t, coef, bias_tab, noise_stack):
    B, C, H, W = x_T.shape
    N = B * H * W

    x_cn = nchw_to_cn(x_T.astype(jnp.float32))                      # (C, N)

    vmem = lambda: pl.BlockSpec(memory_space=pltpu.MemorySpace.VMEM)
    smem = lambda: pl.BlockSpec(memory_space=pltpu.MemorySpace.SMEM)

    out_cn = pl.pallas_call(
        _ddim_fused_kernel,
        out_shape=jax.ShapeDtypeStruct((C, N), jnp.float32),
        in_specs=[
            smem(),   # coef      (4*S,)    flat scalar table in SMEM
            vmem(),   # x_T       (C, N)
            vmem(),   # w1^T      (Hd, C)
            vmem(),   # bias tab  (S*Hd, 1)
            vmem(),   # w2^T      (C, Hd)
            vmem(),   # b2^T      (C, 1)
            vmem(),   # noise     (S, C, N)
        ],
        out_specs=vmem(),
    )(coef, x_cn, w1t, bias_tab, w2t, b2t, noise_stack)

    return cn_to_nchw(out_cn, B, C, H, W)


# ---------------------------------------------------------------------------
# Schedule / parameter / per-step table setup (host-side, done once)
# ---------------------------------------------------------------------------

def make_schedule(beta_1, beta_T, T, eta, steps):
    betas = np.linspace(beta_1, beta_T, T, dtype=np.float32)
    alphas = 1.0 - betas
    alphas_bar = np.cumprod(alphas).astype(np.float32)
    sqrt_alphas_bar = np.sqrt(alphas_bar).astype(np.float32)
    sqrt_one_minus_alphas_bar = np.sqrt(1.0 - alphas_bar).astype(np.float32)
    # torch.linspace(0, T-1, steps).round().long().unique()
    sampling_steps = np.unique(np.round(np.linspace(0, T - 1, steps)).astype(np.int64))
    # F.pad(alphas_bar[sampling_steps[:-1]], (1, 0), value=1.0)
    prev_alpha_bar = np.concatenate(
        [np.array([1.0], dtype=np.float32), alphas_bar[sampling_steps[:-1]]]
    ).astype(np.float32)
    current_alpha_bar = alphas_bar[sampling_steps].astype(np.float32)
    sigma2_t = (eta * (1.0 - prev_alpha_bar) / (1.0 - current_alpha_bar)
                * (1.0 - current_alpha_bar / prev_alpha_bar)).astype(np.float32)
    sigma2_t[0] = 0.0
    sigma_t = np.sqrt(sigma2_t).astype(np.float32)
    return dict(
        sqrt_alphas_bar=sqrt_alphas_bar,
        sqrt_one_minus_alphas_bar=sqrt_one_minus_alphas_bar,
        sampling_steps=sampling_steps,
        prev_alpha_bar=prev_alpha_bar,
        current_alpha_bar=current_alpha_bar,
        sigma_t=sigma_t,
    )


def make_params(key, T, C, hidden):
    k1, k2, k3, k4, k5 = jax.random.split(key, 5)
    return dict(
        w1=0.3 * jax.random.normal(k1, (C, hidden), jnp.float32),
        b1=0.1 * jax.random.normal(k2, (1, hidden), jnp.float32),
        w2=0.3 * jax.random.normal(k3, (hidden, C), jnp.float32),
        b2=0.1 * jax.random.normal(k4, (1, C), jnp.float32),
        temb=0.2 * jax.random.normal(k5, (T, hidden), jnp.float32),
    )


def make_step_tables(sched, params):
    """Folded per-step coefficients (flat 1-D) + per-step bias, in processing order.

    Loop index s processes step_index = S-1-s (reverse of the schedule), matching the
    PyTorch loop `for step_index in range(S-1, -1, -1)`.
    """
    S = sched["sampling_steps"].shape[0]
    Hd = params["w1"].shape[1]
    b1 = np.asarray(params["b1"]).reshape(-1)        # (Hd,)
    temb = np.asarray(params["temb"])                # (T, Hd)

    coef = np.zeros((S, 4), np.float32)
    bias = np.zeros((S * Hd, 1), np.float32)
    for s in range(S):
        si = S - 1 - s
        t = int(sched["sampling_steps"][si])
        sqrt_ab = float(sched["sqrt_alphas_bar"][t])
        sqrt_omab = float(sched["sqrt_one_minus_alphas_bar"][t])
        sigma = float(sched["sigma_t"][si])
        prev_ab = float(sched["prev_alpha_bar"][si])
        sqrt_prev_ab = float(np.sqrt(prev_ab))
        var_w = float(np.sqrt(max(1.0 - prev_ab - sigma * sigma, 0.0)))
        a = sqrt_prev_ab / sqrt_ab
        b = var_w - sqrt_prev_ab * sqrt_omab / sqrt_ab
        coef[s] = [a, b, sigma, 0.0]
        bias[s * Hd:(s + 1) * Hd, 0] = b1 + temb[t]
    return jnp.asarray(coef.reshape(-1)), jnp.asarray(bias)   # (4*S,), (S*Hd, 1)


# ---------------------------------------------------------------------------
# Pure-JAX reference (mirrors the PyTorch loop exactly, NCHW)
# ---------------------------------------------------------------------------

def ref_model(x, t, params):
    B, C, H, W = x.shape
    xf = jnp.transpose(x, (0, 2, 3, 1)).reshape(-1, C)
    h = xf @ params["w1"] + params["b1"] + params["temb"][t][None, :]
    h = h * jax.nn.sigmoid(h)
    eps = h @ params["w2"] + params["b2"]
    return jnp.transpose(eps.reshape(B, H, W, C), (0, 3, 1, 2))


def ddim_sample_ref(x_T, params, sched, noises):
    x = x_T.astype(jnp.float32)
    S = sched["sampling_steps"].shape[0]
    for si in range(S - 1, -1, -1):
        t = int(sched["sampling_steps"][si])
        eps = ref_model(x, t, params)
        x0 = (x - sched["sqrt_one_minus_alphas_bar"][t] * eps) / sched["sqrt_alphas_bar"][t]
        sigma = float(sched["sigma_t"][si])
        prev_ab = float(sched["prev_alpha_bar"][si])
        det = np.sqrt(prev_ab) * x0
        var_w = np.sqrt(max(1.0 - prev_ab - sigma * sigma, 0.0))
        if si > 0:
            x = det + var_w * eps + sigma * noises[si]
        else:
            x = det + var_w * eps
    return jnp.clip(x, -1.0, 1.0)


# ---------------------------------------------------------------------------
# Main
# ---------------------------------------------------------------------------

if __name__ == "__main__":
    B, C, H, W = 2, 4, 16, 16
    T, steps, hidden = 100, 10, 32
    beta_1, beta_T, eta = 1e-4, 0.02, 0.5

    key = jax.random.PRNGKey(0)
    k_params, k_x, k_noise = jax.random.split(key, 3)

    params = make_params(k_params, T, C, hidden)
    sched = make_schedule(beta_1, beta_T, T, eta, steps)
    S = int(sched["sampling_steps"].shape[0])

    x_T = jax.random.normal(k_x, (B, C, H, W), jnp.float32)

    # Deterministic per-step noise (stands in for torch.randn_like inside the loop),
    # keyed by step_index (as in the PyTorch loop).
    noises = {
        si: jax.random.normal(jax.random.fold_in(k_noise, si), (B, C, H, W), jnp.float32)
        for si in range(S)
    }

    # Host-side precomputation: flat folded coefficients, per-step bias table,
    # transposed weights, and one stacked noise array in processing order
    # (loop index s == step_index S-1-s).
    coef, bias_tab = make_step_tables(sched, params)
    noise_stack = jnp.stack(
        [nchw_to_cn(noises[S - 1 - s]) for s in range(S)], axis=0)      # (S, C, N)
    w1t = jnp.asarray(params["w1"]).T      # (Hd, C)
    w2t = jnp.asarray(params["w2"]).T      # (C, Hd)
    b2t = jnp.asarray(params["b2"]).T      # (C, 1)

    out = ddim_sample_pallas(x_T, w1t, w2t, b2t, coef, bias_tab, noise_stack)
    out = jax.block_until_ready(out)

    ref = jax.block_until_ready(ddim_sample_ref(x_T, params, sched, noises))

    assert out.shape == (B, C, H, W)
    # Loose tolerance: MXU f32 matmul + host-folded coefficients vs XLA reference.
    assert np.allclose(np.asarray(out), np.asarray(ref), atol=2e-2, rtol=2e-2), \
        "Pallas DDIM sampler mismatch vs reference"

    print("KERNEL_OK")
</pallas_src>

<mosaic_0001>
module attributes {stable_mosaic.version = 11 : i64} {
  func.func @_ddim_fused_kernel(%arg0: memref<40xf32, #tpu.memory_space<smem>>, %arg1: memref<4x512xf32, #tpu.memory_space<vmem>>, %arg2: memref<32x4xf32, #tpu.memory_space<vmem>>, %arg3: memref<320x1xf32, #tpu.memory_space<vmem>>, %arg4: memref<4x32xf32, #tpu.memory_space<vmem>>, %arg5: memref<4x1xf32, #tpu.memory_space<vmem>>, %arg6: memref<10x4x512xf32, #tpu.memory_space<vmem>>, %arg7: memref<4x512xf32, #tpu.memory_space<vmem>>) attributes {dimension_semantics = [], scalar_prefetch = 0 : i64, scratch_operands = 0 : i64, tpu.core_type = #tpu.core_type<tc>} {
    %c0 = arith.constant 0 : index
    %c0_0 = arith.constant 0 : index
    %0 = vector.load %arg2[%c0, %c0_0] : memref<32x4xf32, #tpu.memory_space<vmem>>, vector<32x4xf32>
    %c0_1 = arith.constant 0 : index
    %c0_2 = arith.constant 0 : index
    %1 = vector.load %arg4[%c0_1, %c0_2] : memref<4x32xf32, #tpu.memory_space<vmem>>, vector<4x32xf32>
    %c0_3 = arith.constant 0 : index
    %c0_4 = arith.constant 0 : index
    %2 = vector.load %arg5[%c0_3, %c0_4] : memref<4x1xf32, #tpu.memory_space<vmem>>, vector<4x1xf32>
    %c0_5 = arith.constant 0 : index
    %c0_6 = arith.constant 0 : index
    %3 = vector.load %arg1[%c0_5, %c0_6] : memref<4x512xf32, #tpu.memory_space<vmem>>, vector<4x512xf32>
    %c0_i32 = arith.constant 0 : i32
    %c32_i32 = arith.constant 32 : i32
    %4 = arith.muli %c0_i32, %c32_i32 : i32
    %5 = tpu.assume_multiple %4, 32 : i32
    %6 = arith.index_cast %5 : i32 to index
    %c0_7 = arith.constant 0 : index
    %7 = vector.load %arg3[%6, %c0_7] : memref<320x1xf32, #tpu.memory_space<vmem>>, vector<32x1xf32>
    %cst = arith.constant dense<0.000000e+00> : vector<32x512xf32>
    %8 = tpu.matmul %0, %3, %cst {dimension_numbers = #tpu.dot_dimension_numbers<[1], [0], [0], [1], [0, 0, 1, 1], [], []>} : vector<32x4xf32>, vector<4x512xf32>, vector<32x512xf32> -> vector<32x512xf32>
    %9 = vector.broadcast %7 : vector<32x1xf32> to vector<32x512xf32>
    %10 = arith.addf %8, %9 : vector<32x512xf32>
    %11 = arith.negf %10 : vector<32x512xf32>
    %12 = math.exp %11 : vector<32x512xf32>
    %cst_8 = arith.constant 1.000000e+00 : f32
    %13 = vector.broadcast %cst_8 : f32 to vector<32x512xf32>
    %14 = arith.addf %13, %12 : vector<32x512xf32>
    %15 = arith.divf %13, %14 : vector<32x512xf32>
    %16 = arith.mulf %10, %15 : vector<32x512xf32>
    %cst_9 = arith.constant dense<0.000000e+00> : vector<4x512xf32>
    %17 = tpu.matmul %1, %16, %cst_9 {dimension_numbers = #tpu.dot_dimension_numbers<[1], [0], [0], [1], [0, 0, 1, 1], [], []>} : vector<4x32xf32>, vector<32x512xf32>, vector<4x512xf32> -> vector<4x512xf32>
    %18 = vector.broadcast %2 : vector<4x1xf32> to vector<4x512xf32>
    %19 = arith.addf %17, %18 : vector<4x512xf32>
    %c4_i32 = arith.constant 4 : i32
    %20 = arith.muli %c4_i32, %c0_i32 : i32
    %21 = arith.index_cast %20 : i32 to index
    %22 = memref.load %arg0[%21] : memref<40xf32, #tpu.memory_space<smem>>
    %c4_i32_10 = arith.constant 4 : i32
    %23 = arith.muli %c4_i32_10, %c0_i32 : i32
    %c1_i32 = arith.constant 1 : i32
    %24 = arith.addi %23, %c1_i32 : i32
    %25 = arith.index_cast %24 : i32 to index
    %26 = memref.load %arg0[%25] : memref<40xf32, #tpu.memory_space<smem>>
    %c4_i32_11 = arith.constant 4 : i32
    %27 = arith.muli %c4_i32_11, %c0_i32 : i32
    %c2_i32 = arith.constant 2 : i32
    %28 = arith.addi %27, %c2_i32 : i32
    %29 = arith.index_cast %28 : i32 to index
    %30 = memref.load %arg0[%29] : memref<40xf32, #tpu.memory_space<smem>>
    %31 = vector.broadcast %22 : f32 to vector<4x512xf32>
    %32 = arith.mulf %31, %3 : vector<4x512xf32>
    %33 = vector.broadcast %26 : f32 to vector<4x512xf32>
    %34 = arith.mulf %33, %19 : vector<4x512xf32>
    %35 = arith.addf %32, %34 : vector<4x512xf32>
    %36 = arith.index_cast %c0_i32 : i32 to index
    %c0_12 = arith.constant 0 : index
    %c0_13 = arith.constant 0 : index
    %37 = vector.load %arg6[%36, %c0_12, %c0_13] : memref<10x4x512xf32, #tpu.memory_space<vmem>>, vector<1x4x512xf32>
    %38 = vector.shape_cast %37 : vector<1x4x512xf32> to vector<4x512xf32>
    %39 = vector.broadcast %30 : f32 to vector<4x512xf32>
    %40 = arith.mulf %39, %38 : vector<4x512xf32>
    %41 = arith.addf %35, %40 : vector<4x512xf32>
    %c1_i32_14 = arith.constant 1 : i32
    %c32_i32_15 = arith.constant 32 : i32
    %42 = arith.muli %c1_i32_14, %c32_i32_15 : i32
    %43 = tpu.assume_multiple %42, 32 : i32
    %44 = arith.index_cast %43 : i32 to index
    %c0_16 = arith.constant 0 : index
    %45 = vector.load %arg3[%44, %c0_16] : memref<320x1xf32, #tpu.memory_space<vmem>>, vector<32x1xf32>
    %cst_17 = arith.constant dense<0.000000e+00> : vector<32x512xf32>
    %46 = tpu.matmul %0, %41, %cst_17 {dimension_numbers = #tpu.dot_dimension_numbers<[1], [0], [0], [1], [0, 0, 1, 1], [], []>} : vector<32x4xf32>, vector<4x512xf32>, vector<32x512xf32> -> vector<32x512xf32>
    %47 = vector.broadcast %45 : vector<32x1xf32> to vector<32x512xf32>
    %48 = arith.addf %46, %47 : vector<32x512xf32>
    %49 = arith.negf %48 : vector<32x512xf32>
    %50 = math.exp %49 : vector<32x512xf32>
    %cst_18 = arith.constant 1.000000e+00 : f32
    %51 = vector.broadcast %cst_18 : f32 to vector<32x512xf32>
    %52 = arith.addf %51, %50 : vector<32x512xf32>
    %53 = arith.divf %51, %52 : vector<32x512xf32>
    %54 = arith.mulf %48, %53 : vector<32x512xf32>
    %cst_19 = arith.constant dense<0.000000e+00> : vector<4x512xf32>
    %55 = tpu.matmul %1, %54, %cst_19 {dimension_numbers = #tpu.dot_dimension_numbers<[1], [0], [0], [1], [0, 0, 1, 1], [], []>} : vector<4x32xf32>, vector<32x512xf32>, vector<4x512xf32> -> vector<4x512xf32>
    %56 = vector.broadcast %2 : vector<4x1xf32> to vector<4x512xf32>
    %57 = arith.addf %55, %56 : vector<4x512xf32>
    %c4_i32_20 = arith.constant 4 : i32
    %58 = arith.muli %c4_i32_20, %c1_i32_14 : i32
    %59 = arith.index_cast %58 : i32 to index
    %60 = memref.load %arg0[%59] : memref<40xf32, #tpu.memory_space<smem>>
    %c4_i32_21 = arith.constant 4 : i32
    %61 = arith.muli %c4_i32_21, %c1_i32_14 : i32
    %c1_i32_22 = arith.constant 1 : i32
    %62 = arith.addi %61, %c1_i32_22 : i32
    %63 = arith.index_cast %62 : i32 to index
    %64 = memref.load %arg0[%63] : memref<40xf32, #tpu.memory_space<smem>>
    %c4_i32_23 = arith.constant 4 : i32
    %65 = arith.muli %c4_i32_23, %c1_i32_14 : i32
    %c2_i32_24 = arith.constant 2 : i32
    %66 = arith.addi %65, %c2_i32_24 : i32
    %67 = arith.index_cast %66 : i32 to index
    %68 = memref.load %arg0[%67] : memref<40xf32, #tpu.memory_space<smem>>
    %69 = vector.broadcast %60 : f32 to vector<4x512xf32>
    %70 = arith.mulf %69, %41 : vector<4x512xf32>
    %71 = vector.broadcast %64 : f32 to vector<4x512xf32>
    %72 = arith.mulf %71, %57 : vector<4x512xf32>
    %73 = arith.addf %70, %72 : vector<4x512xf32>
    %74 = arith.index_cast %c1_i32_14 : i32 to index
    %c0_25 = arith.constant 0 : index
    %c0_26 = arith.constant 0 : index
    %75 = vector.load %arg6[%74, %c0_25, %c0_26] : memref<10x4x512xf32, #tpu.memory_space<vmem>>, vector<1x4x512xf32>
    %76 = vector.shape_cast %75 : vector<1x4x512xf32> to vector<4x512xf32>
    %77 = vector.broadcast %68 : f32 to vector<4x512xf32>
    %78 = arith.mulf %77, %76 : vector<4x512xf32>
    %79 = arith.addf %73, %78 : vector<4x512xf32>
    %c2_i32_27 = arith.constant 2 : i32
    %c32_i32_28 = arith.constant 32 : i32
    %80 = arith.muli %c2_i32_27, %c32_i32_28 : i32
    %81 = tpu.assume_multiple %80, 32 : i32
    %82 = arith.index_cast %81 : i32 to index
    %c0_29 = arith.constant 0 : index
    %83 = vector.load %arg3[%82, %c0_29] : memref<320x1xf32, #tpu.memory_space<vmem>>, vector<32x1xf32>
    %cst_30 = arith.constant dense<0.000000e+00> : vector<32x512xf32>
    %84 = tpu.matmul %0, %79, %cst_30 {dimension_numbers = #tpu.dot_dimension_numbers<[1], [0], [0], [1], [0, 0, 1, 1], [], []>} : vector<32x4xf32>, vector<4x512xf32>, vector<32x512xf32> -> vector<32x512xf32>
    %85 = vector.broadcast %83 : vector<32x1xf32> to vector<32x512xf32>
    %86 = arith.addf %84, %85 : vector<32x512xf32>
    %87 = arith.negf %86 : vector<32x512xf32>
    %88 = math.exp %87 : vector<32x512xf32>
    %cst_31 = arith.constant 1.000000e+00 : f32
    %89 = vector.broadcast %cst_31 : f32 to vector<32x512xf32>
    %90 = arith.addf %89, %88 : vector<32x512xf32>
    %91 = arith.divf %89, %90 : vector<32x512xf32>
    %92 = arith.mulf %86, %91 : vector<32x512xf32>
    %cst_32 = arith.constant dense<0.000000e+00> : vector<4x512xf32>
    %93 = tpu.matmul %1, %92, %cst_32 {dimension_numbers = #tpu.dot_dimension_numbers<[1], [0], [0], [1], [0, 0, 1, 1], [], []>} : vector<4x32xf32>, vector<32x512xf32>, vector<4x512xf32> -> vector<4x512xf32>
    %94 = vector.broadcast %2 : vector<4x1xf32> to vector<4x512xf32>
    %95 = arith.addf %93, %94 : vector<4x512xf32>
    %c4_i32_33 = arith.constant 4 : i32
    %96 = arith.muli %c4_i32_33, %c2_i32_27 : i32
    %97 = arith.index_cast %96 : i32 to index
    %98 = memref.load %arg0[%97] : memref<40xf32, #tpu.memory_space<smem>>
    %c4_i32_34 = arith.constant 4 : i32
    %99 = arith.muli %c4_i32_34, %c2_i32_27 : i32
    %c1_i32_35 = arith.constant 1 : i32
    %100 = arith.addi %99, %c1_i32_35 : i32
    %101 = arith.index_cast %100 : i32 to index
    %102 = memref.load %arg0[%101] : memref<40xf32, #tpu.memory_space<smem>>
    %c4_i32_36 = arith.constant 4 : i32
    %103 = arith.muli %c4_i32_36, %c2_i32_27 : i32
    %c2_i32_37 = arith.constant 2 : i32
    %104 = arith.addi %103, %c2_i32_37 : i32
    %105 = arith.index_cast %104 : i32 to index
    %106 = memref.load %arg0[%105] : memref<40xf32, #tpu.memory_space<smem>>
    %107 = vector.broadcast %98 : f32 to vector<4x512xf32>
    %108 = arith.mulf %107, %79 : vector<4x512xf32>
    %109 = vector.broadcast %102 : f32 to vector<4x512xf32>
    %110 = arith.mulf %109, %95 : vector<4x512xf32>
    %111 = arith.addf %108, %110 : vector<4x512xf32>
    %112 = arith.index_cast %c2_i32_27 : i32 to index
    %c0_38 = arith.constant 0 : index
    %c0_39 = arith.constant 0 : index
    %113 = vector.load %arg6[%112, %c0_38, %c0_39] : memref<10x4x512xf32, #tpu.memory_space<vmem>>, vector<1x4x512xf32>
    %114 = vector.shape_cast %113 : vector<1x4x512xf32> to vector<4x512xf32>
    %115 = vector.broadcast %106 : f32 to vector<4x512xf32>
    %116 = arith.mulf %115, %114 : vector<4x512xf32>
    %117 = arith.addf %111, %116 : vector<4x512xf32>
    %c3_i32 = arith.constant 3 : i32
    %c32_i32_40 = arith.constant 32 : i32
    %118 = arith.muli %c3_i32, %c32_i32_40 : i32
    %119 = tpu.assume_multiple %118, 32 : i32
    %120 = arith.index_cast %119 : i32 to index
    %c0_41 = arith.constant 0 : index
    %121 = vector.load %arg3[%120, %c0_41] : memref<320x1xf32, #tpu.memory_space<vmem>>, vector<32x1xf32>
    %cst_42 = arith.constant dense<0.000000e+00> : vector<32x512xf32>
    %122 = tpu.matmul %0, %117, %cst_42 {dimension_numbers = #tpu.dot_dimension_numbers<[1], [0], [0], [1], [0, 0, 1, 1], [], []>} : vector<32x4xf32>, vector<4x512xf32>, vector<32x512xf32> -> vector<32x512xf32>
    %123 = vector.broadcast %121 : vector<32x1xf32> to vector<32x512xf32>
    %124 = arith.addf %122, %123 : vector<32x512xf32>
    %125 = arith.negf %124 : vector<32x512xf32>
    %126 = math.exp %125 : vector<32x512xf32>
    %cst_43 = arith.constant 1.000000e+00 : f32
    %127 = vector.broadcast %cst_43 : f32 to vector<32x512xf32>
    %128 = arith.addf %127, %126 : vector<32x512xf32>
    %129 = arith.divf %127, %128 : vector<32x512xf32>
    %130 = arith.mulf %124, %129 : vector<32x512xf32>
    %cst_44 = arith.constant dense<0.000000e+00> : vector<4x512xf32>
    %131 = tpu.matmul %1, %130, %cst_44 {dimension_numbers = #tpu.dot_dimension_numbers<[1], [0], [0], [1], [0, 0, 1, 1], [], []>} : vector<4x32xf32>, vector<32x512xf32>, vector<4x512xf32> -> vector<4x512xf32>
    %132 = vector.broadcast %2 : vector<4x1xf32> to vector<4x512xf32>
    %133 = arith.addf %131, %132 : vector<4x512xf32>
    %c4_i32_45 = arith.constant 4 : i32
    %134 = arith.muli %c4_i32_45, %c3_i32 : i32
    %135 = arith.index_cast %134 : i32 to index
    %136 = memref.load %arg0[%135] : memref<40xf32, #tpu.memory_space<smem>>
    %c4_i32_46 = arith.constant 4 : i32
    %137 = arith.muli %c4_i32_46, %c3_i32 : i32
    %c1_i32_47 = arith.constant 1 : i32
    %138 = arith.addi %137, %c1_i32_47 : i32
    %139 = arith.index_cast %138 : i32 to index
    %140 = memref.load %arg0[%139] : memref<40xf32, #tpu.memory_space<smem>>
    %c4_i32_48 = arith.constant 4 : i32
    %141 = arith.muli %c4_i32_48, %c3_i32 : i32
    %c2_i32_49 = arith.constant 2 : i32
    %142 = arith.addi %141, %c2_i32_49 : i32
    %143 = arith.index_cast %142 : i32 to index
    %144 = memref.load %arg0[%143] : memref<40xf32, #tpu.memory_space<smem>>
    %145 = vector.broadcast %136 : f32 to vector<4x512xf32>
    %146 = arith.mulf %145, %117 : vector<4x512xf32>
    %147 = vector.broadcast %140 : f32 to vector<4x512xf32>
    %148 = arith.mulf %147, %133 : vector<4x512xf32>
    %149 = arith.addf %146, %148 : vector<4x512xf32>
    %150 = arith.index_cast %c3_i32 : i32 to index
    %c0_50 = arith.constant 0 : index
    %c0_51 = arith.constant 0 : index
    %151 = vector.load %arg6[%150, %c0_50, %c0_51] : memref<10x4x512xf32, #tpu.memory_space<vmem>>, vector<1x4x512xf32>
    %152 = vector.shape_cast %151 : vector<1x4x512xf32> to vector<4x512xf32>
    %153 = vector.broadcast %144 : f32 to vector<4x512xf32>
    %154 = arith.mulf %153, %152 : vector<4x512xf32>
    %155 = arith.addf %149, %154 : vector<4x512xf32>
    %c4_i32_52 = arith.constant 4 : i32
    %c32_i32_53 = arith.constant 32 : i32
    %156 = arith.muli %c4_i32_52, %c32_i32_53 : i32
    %157 = tpu.assume_multiple %156, 32 : i32
    %158 = arith.index_cast %157 : i32 to index
    %c0_54 = arith.constant 0 : index
    %159 = vector.load %arg3[%158, %c0_54] : memref<320x1xf32, #tpu.memory_space<vmem>>, vector<32x1xf32>
    %cst_55 = arith.constant dense<0.000000e+00> : vector<32x512xf32>
    %160 = tpu.matmul %0, %155, %cst_55 {dimension_numbers = #tpu.dot_dimension_numbers<[1], [0], [0], [1], [0, 0, 1, 1], [], []>} : vector<32x4xf32>, vector<4x512xf32>, vector<32x512xf32> -> vector<32x512xf32>
    %161 = vector.broadcast %159 : vector<32x1xf32> to vector<32x512xf32>
    %162 = arith.addf %160, %161 : vector<32x512xf32>
    %163 = arith.negf %162 : vector<32x512xf32>
    %164 = math.exp %163 : vector<32x512xf32>
    %cst_56 = arith.constant 1.000000e+00 : f32
    %165 = vector.broadcast %cst_56 : f32 to vector<32x512xf32>
    %166 = arith.addf %165, %164 : vector<32x512xf32>
    %167 = arith.divf %165, %166 : vector<32x512xf32>
    %168 = arith.mulf %162, %167 : vector<32x512xf32>
    %cst_57 = arith.constant dense<0.000000e+00> : vector<4x512xf32>
    %169 = tpu.matmul %1, %168, %cst_57 {dimension_numbers = #tpu.dot_dimension_numbers<[1], [0], [0], [1], [0, 0, 1, 1], [], []>} : vector<4x32xf32>, vector<32x512xf32>, vector<4x512xf32> -> vector<4x512xf32>
    %170 = vector.broadcast %2 : vector<4x1xf32> to vector<4x512xf32>
    %171 = arith.addf %169, %170 : vector<4x512xf32>
    %c4_i32_58 = arith.constant 4 : i32
    %172 = arith.muli %c4_i32_58, %c4_i32_52 : i32
    %173 = arith.index_cast %172 : i32 to index
    %174 = memref.load %arg0[%173] : memref<40xf32, #tpu.memory_space<smem>>
    %c4_i32_59 = arith.constant 4 : i32
    %175 = arith.muli %c4_i32_59, %c4_i32_52 : i32
    %c1_i32_60 = arith.constant 1 : i32
    %176 = arith.addi %175, %c1_i32_60 : i32
    %177 = arith.index_cast %176 : i32 to index
    %178 = memref.load %arg0[%177] : memref<40xf32, #tpu.memory_space<smem>>
    %c4_i32_61 = arith.constant 4 : i32
    %179 = arith.muli %c4_i32_61, %c4_i32_52 : i32
    %c2_i32_62 = arith.constant 2 : i32
    %180 = arith.addi %179, %c2_i32_62 : i32
    %181 = arith.index_cast %180 : i32 to index
    %182 = memref.load %arg0[%181] : memref<40xf32, #tpu.memory_space<smem>>
    %183 = vector.broadcast %174 : f32 to vector<4x512xf32>
    %184 = arith.mulf %183, %155 : vector<4x512xf32>
    %185 = vector.broadcast %178 : f32 to vector<4x512xf32>
    %186 = arith.mulf %185, %171 : vector<4x512xf32>
    %187 = arith.addf %184, %186 : vector<4x512xf32>
    %188 = arith.index_cast %c4_i32_52 : i32 to index
    %c0_63 = arith.constant 0 : index
    %c0_64 = arith.constant 0 : index
    %189 = vector.load %arg6[%188, %c0_63, %c0_64] : memref<10x4x512xf32, #tpu.memory_space<vmem>>, vector<1x4x512xf32>
    %190 = vector.shape_cast %189 : vector<1x4x512xf32> to vector<4x512xf32>
    %191 = vector.broadcast %182 : f32 to vector<4x512xf32>
    %192 = arith.mulf %191, %190 : vector<4x512xf32>
    %193 = arith.addf %187, %192 : vector<4x512xf32>
    %c5_i32 = arith.constant 5 : i32
    %c32_i32_65 = arith.constant 32 : i32
    %194 = arith.muli %c5_i32, %c32_i32_65 : i32
    %195 = tpu.assume_multiple %194, 32 : i32
    %196 = arith.index_cast %195 : i32 to index
    %c0_66 = arith.constant 0 : index
    %197 = vector.load %arg3[%196, %c0_66] : memref<320x1xf32, #tpu.memory_space<vmem>>, vector<32x1xf32>
    %cst_67 = arith.constant dense<0.000000e+00> : vector<32x512xf32>
    %198 = tpu.matmul %0, %193, %cst_67 {dimension_numbers = #tpu.dot_dimension_numbers<[1], [0], [0], [1], [0, 0, 1, 1], [], []>} : vector<32x4xf32>, vector<4x512xf32>, vector<32x512xf32> -> vector<32x512xf32>
    %199 = vector.broadcast %197 : vector<32x1xf32> to vector<32x512xf32>
    %200 = arith.addf %198, %199 : vector<32x512xf32>
    %201 = arith.negf %200 : vector<32x512xf32>
    %202 = math.exp %201 : vector<32x512xf32>
    %cst_68 = arith.constant 1.000000e+00 : f32
    %203 = vector.broadcast %cst_68 : f32 to vector<32x512xf32>
    %204 = arith.addf %203, %202 : vector<32x512xf32>
    %205 = arith.divf %203, %204 : vector<32x512xf32>
    %206 = arith.mulf %200, %205 : vector<32x512xf32>
    %cst_69 = arith.constant dense<0.000000e+00> : vector<4x512xf32>
    %207 = tpu.matmul %1, %206, %cst_69 {dimension_numbers = #tpu.dot_dimension_numbers<[1], [0], [0], [1], [0, 0, 1, 1], [], []>} : vector<4x32xf32>, vector<32x512xf32>, vector<4x512xf32> -> vector<4x512xf32>
    %208 = vector.broadcast %2 : vector<4x1xf32> to vector<4x512xf32>
    %209 = arith.addf %207, %208 : vector<4x512xf32>
    %c4_i32_70 = arith.constant 4 : i32
    %210 = arith.muli %c4_i32_70, %c5_i32 : i32
    %211 = arith.index_cast %210 : i32 to index
    %212 = memref.load %arg0[%211] : memref<40xf32, #tpu.memory_space<smem>>
    %c4_i32_71 = arith.constant 4 : i32
    %213 = arith.muli %c4_i32_71, %c5_i32 : i32
    %c1_i32_72 = arith.constant 1 : i32
    %214 = arith.addi %213, %c1_i32_72 : i32
    %215 = arith.index_cast %214 : i32 to index
    %216 = memref.load %arg0[%215] : memref<40xf32, #tpu.memory_space<smem>>
    %c4_i32_73 = arith.constant 4 : i32
    %217 = arith.muli %c4_i32_73, %c5_i32 : i32
    %c2_i32_74 = arith.constant 2 : i32
    %218 = arith.addi %217, %c2_i32_74 : i32
    %219 = arith.index_cast %218 : i32 to index
    %220 = memref.load %arg0[%219] : memref<40xf32, #tpu.memory_space<smem>>
    %221 = vector.broadcast %212 : f32 to vector<4x512xf32>
    %222 = arith.mulf %221, %193 : vector<4x512xf32>
    %223 = vector.broadcast %216 : f32 to vector<4x512xf32>
    %224 = arith.mulf %223, %209 : vector<4x512xf32>
    %225 = arith.addf %222, %224 : vector<4x512xf32>
    %226 = arith.index_cast %c5_i32 : i32 to index
    %c0_75 = arith.constant 0 : index
    %c0_76 = arith.constant 0 : index
    %227 = vector.load %arg6[%226, %c0_75, %c0_76] : memref<10x4x512xf32, #tpu.memory_space<vmem>>, vector<1x4x512xf32>
    %228 = vector.shape_cast %227 : vector<1x4x512xf32> to vector<4x512xf32>
    %229 = vector.broadcast %220 : f32 to vector<4x512xf32>
    %230 = arith.mulf %229, %228 : vector<4x512xf32>
    %231 = arith.addf %225, %230 : vector<4x512xf32>
    %c6_i32 = arith.constant 6 : i32
    %c32_i32_77 = arith.constant 32 : i32
    %232 = arith.muli %c6_i32, %c32_i32_77 : i32
    %233 = tpu.assume_multiple %232, 32 : i32
    %234 = arith.index_cast %233 : i32 to index
    %c0_78 = arith.constant 0 : index
    %235 = vector.load %arg3[%234, %c0_78] : memref<320x1xf32, #tpu.memory_space<vmem>>, vector<32x1xf32>
    %cst_79 = arith.constant dense<0.000000e+00> : vector<32x512xf32>
    %236 = tpu.matmul %0, %231, %cst_79 {dimension_numbers = #tpu.dot_dimension_numbers<[1], [0], [0], [1], [0, 0, 1, 1], [], []>} : vector<32x4xf32>, vector<4x512xf32>, vector<32x512xf32> -> vector<32x512xf32>
    %237 = vector.broadcast %235 : vector<32x1xf32> to vector<32x512xf32>
    %238 = arith.addf %236, %237 : vector<32x512xf32>
    %239 = arith.negf %238 : vector<32x512xf32>
    %240 = math.exp %239 : vector<32x512xf32>
    %cst_80 = arith.constant 1.000000e+00 : f32
    %241 = vector.broadcast %cst_80 : f32 to vector<32x512xf32>
    %242 = arith.addf %241, %240 : vector<32x512xf32>
    %243 = arith.divf %241, %242 : vector<32x512xf32>
    %244 = arith.mulf %238, %243 : vector<32x512xf32>
    %cst_81 = arith.constant dense<0.000000e+00> : vector<4x512xf32>
    %245 = tpu.matmul %1, %244, %cst_81 {dimension_numbers = #tpu.dot_dimension_numbers<[1], [0], [0], [1], [0, 0, 1, 1], [], []>} : vector<4x32xf32>, vector<32x512xf32>, vector<4x512xf32> -> vector<4x512xf32>
    %246 = vector.broadcast %2 : vector<4x1xf32> to vector<4x512xf32>
    %247 = arith.addf %245, %246 : vector<4x512xf32>
    %c4_i32_82 = arith.constant 4 : i32
    %248 = arith.muli %c4_i32_82, %c6_i32 : i32
    %249 = arith.index_cast %248 : i32 to index
    %250 = memref.load %arg0[%249] : memref<40xf32, #tpu.memory_space<smem>>
    %c4_i32_83 = arith.constant 4 : i32
    %251 = arith.muli %c4_i32_83, %c6_i32 : i32
    %c1_i32_84 = arith.constant 1 : i32
    %252 = arith.addi %251, %c1_i32_84 : i32
    %253 = arith.index_cast %252 : i32 to index
    %254 = memref.load %arg0[%253] : memref<40xf32, #tpu.memory_space<smem>>
    %c4_i32_85 = arith.constant 4 : i32
    %255 = arith.muli %c4_i32_85, %c6_i32 : i32
    %c2_i32_86 = arith.constant 2 : i32
    %256 = arith.addi %255, %c2_i32_86 : i32
    %257 = arith.index_cast %256 : i32 to index
    %258 = memref.load %arg0[%257] : memref<40xf32, #tpu.memory_space<smem>>
    %259 = vector.broadcast %250 : f32 to vector<4x512xf32>
    %260 = arith.mulf %259, %231 : vector<4x512xf32>
    %261 = vector.broadcast %254 : f32 to vector<4x512xf32>
    %262 = arith.mulf %261, %247 : vector<4x512xf32>
    %263 = arith.addf %260, %262 : vector<4x512xf32>
    %264 = arith.index_cast %c6_i32 : i32 to index
    %c0_87 = arith.constant 0 : index
    %c0_88 = arith.constant 0 : index
    %265 = vector.load %arg6[%264, %c0_87, %c0_88] : memref<10x4x512xf32, #tpu.memory_space<vmem>>, vector<1x4x512xf32>
    %266 = vector.shape_cast %265 : vector<1x4x512xf32> to vector<4x512xf32>
    %267 = vector.broadcast %258 : f32 to vector<4x512xf32>
    %268 = arith.mulf %267, %266 : vector<4x512xf32>
    %269 = arith.addf %263, %268 : vector<4x512xf32>
    %c7_i32 = arith.constant 7 : i32
    %c32_i32_89 = arith.constant 32 : i32
    %270 = arith.muli %c7_i32, %c32_i32_89 : i32
    %271 = tpu.assume_multiple %270, 32 : i32
    %272 = arith.index_cast %271 : i32 to index
    %c0_90 = arith.constant 0 : index
    %273 = vector.load %arg3[%272, %c0_90] : memref<320x1xf32, #tpu.memory_space<vmem>>, vector<32x1xf32>
    %cst_91 = arith.constant dense<0.000000e+00> : vector<32x512xf32>
    %274 = tpu.matmul %0, %269, %cst_91 {dimension_numbers = #tpu.dot_dimension_numbers<[1], [0], [0], [1], [0, 0, 1, 1], [], []>} : vector<32x4xf32>, vector<4x512xf32>, vector<32x512xf32> -> vector<32x512xf32>
    %275 = vector.broadcast %273 : vector<32x1xf32> to vector<32x512xf32>
    %276 = arith.addf %274, %275 : vector<32x512xf32>
    %277 = arith.negf %276 : vector<32x512xf32>
    %278 = math.exp %277 : vector<32x512xf32>
    %cst_92 = arith.constant 1.000000e+00 : f32
    %279 = vector.broadcast %cst_92 : f32 to vector<32x512xf32>
    %280 = arith.addf %279, %278 : vector<32x512xf32>
    %281 = arith.divf %279, %280 : vector<32x512xf32>
    %282 = arith.mulf %276, %281 : vector<32x512xf32>
    %cst_93 = arith.constant dense<0.000000e+00> : vector<4x512xf32>
    %283 = tpu.matmul %1, %282, %cst_93 {dimension_numbers = #tpu.dot_dimension_numbers<[1], [0], [0], [1], [0, 0, 1, 1], [], []>} : vector<4x32xf32>, vector<32x512xf32>, vector<4x512xf32> -> vector<4x512xf32>
    %284 = vector.broadcast %2 : vector<4x1xf32> to vector<4x512xf32>
    %285 = arith.addf %283, %284 : vector<4x512xf32>
    %c4_i32_94 = arith.constant 4 : i32
    %286 = arith.muli %c4_i32_94, %c7_i32 : i32
    %287 = arith.index_cast %286 : i32 to index
    %288 = memref.load %arg0[%287] : memref<40xf32, #tpu.memory_space<smem>>
    %c4_i32_95 = arith.constant 4 : i32
    %289 = arith.muli %c4_i32_95, %c7_i32 : i32
    %c1_i32_96 = arith.constant 1 : i32
    %290 = arith.addi %289, %c1_i32_96 : i32
    %291 = arith.index_cast %290 : i32 to index
    %292 = memref.load %arg0[%291] : memref<40xf32, #tpu.memory_space<smem>>
    %c4_i32_97 = arith.constant 4 : i32
    %293 = arith.muli %c4_i32_97, %c7_i32 : i32
    %c2_i32_98 = arith.constant 2 : i32
    %294 = arith.addi %293, %c2_i32_98 : i32
    %295 = arith.index_cast %294 : i32 to index
    %296 = memref.load %arg0[%295] : memref<40xf32, #tpu.memory_space<smem>>
    %297 = vector.broadcast %288 : f32 to vector<4x512xf32>
    %298 = arith.mulf %297, %269 : vector<4x512xf32>
    %299 = vector.broadcast %292 : f32 to vector<4x512xf32>
    %300 = arith.mulf %299, %285 : vector<4x512xf32>
    %301 = arith.addf %298, %300 : vector<4x512xf32>
    %302 = arith.index_cast %c7_i32 : i32 to index
    %c0_99 = arith.constant 0 : index
    %c0_100 = arith.constant 0 : index
    %303 = vector.load %arg6[%302, %c0_99, %c0_100] : memref<10x4x512xf32, #tpu.memory_space<vmem>>, vector<1x4x512xf32>
    %304 = vector.shape_cast %303 : vector<1x4x512xf32> to vector<4x512xf32>
    %305 = vector.broadcast %296 : f32 to vector<4x512xf32>
    %306 = arith.mulf %305, %304 : vector<4x512xf32>
    %307 = arith.addf %301, %306 : vector<4x512xf32>
    %c8_i32 = arith.constant 8 : i32
    %c32_i32_101 = arith.constant 32 : i32
    %308 = arith.muli %c8_i32, %c32_i32_101 : i32
    %309 = tpu.assume_multiple %308, 32 : i32
    %310 = arith.index_cast %309 : i32 to index
    %c0_102 = arith.constant 0 : index
    %311 = vector.load %arg3[%310, %c0_102] : memref<320x1xf32, #tpu.memory_space<vmem>>, vector<32x1xf32>
    %cst_103 = arith.constant dense<0.000000e+00> : vector<32x512xf32>
    %312 = tpu.matmul %0, %307, %cst_103 {dimension_numbers = #tpu.dot_dimension_numbers<[1], [0], [0], [1], [0, 0, 1, 1], [], []>} : vector<32x4xf32>, vector<4x512xf32>, vector<32x512xf32> -> vector<32x512xf32>
    %313 = vector.broadcast %311 : vector<32x1xf32> to vector<32x512xf32>
    %314 = arith.addf %312, %313 : vector<32x512xf32>
    %315 = arith.negf %314 : vector<32x512xf32>
    %316 = math.exp %315 : vector<32x512xf32>
    %cst_104 = arith.constant 1.000000e+00 : f32
    %317 = vector.broadcast %cst_104 : f32 to vector<32x512xf32>
    %318 = arith.addf %317, %316 : vector<32x512xf32>
    %319 = arith.divf %317, %318 : vector<32x512xf32>
    %320 = arith.mulf %314, %319 : vector<32x512xf32>
    %cst_105 = arith.constant dense<0.000000e+00> : vector<4x512xf32>
    %321 = tpu.matmul %1, %320, %cst_105 {dimension_numbers = #tpu.dot_dimension_numbers<[1], [0], [0], [1], [0, 0, 1, 1], [], []>} : vector<4x32xf32>, vector<32x512xf32>, vector<4x512xf32> -> vector<4x512xf32>
    %322 = vector.broadcast %2 : vector<4x1xf32> to vector<4x512xf32>
    %323 = arith.addf %321, %322 : vector<4x512xf32>
    %c4_i32_106 = arith.constant 4 : i32
    %324 = arith.muli %c4_i32_106, %c8_i32 : i32
    %325 = arith.index_cast %324 : i32 to index
    %326 = memref.load %arg0[%325] : memref<40xf32, #tpu.memory_space<smem>>
    %c4_i32_107 = arith.constant 4 : i32
    %327 = arith.muli %c4_i32_107, %c8_i32 : i32
    %c1_i32_108 = arith.constant 1 : i32
    %328 = arith.addi %327, %c1_i32_108 : i32
    %329 = arith.index_cast %328 : i32 to index
    %330 = memref.load %arg0[%329] : memref<40xf32, #tpu.memory_space<smem>>
    %c4_i32_109 = arith.constant 4 : i32
    %331 = arith.muli %c4_i32_109, %c8_i32 : i32
    %c2_i32_110 = arith.constant 2 : i32
    %332 = arith.addi %331, %c2_i32_110 : i32
    %333 = arith.index_cast %332 : i32 to index
    %334 = memref.load %arg0[%333] : memref<40xf32, #tpu.memory_space<smem>>
    %335 = vector.broadcast %326 : f32 to vector<4x512xf32>
    %336 = arith.mulf %335, %307 : vector<4x512xf32>
    %337 = vector.broadcast %330 : f32 to vector<4x512xf32>
    %338 = arith.mulf %337, %323 : vector<4x512xf32>
    %339 = arith.addf %336, %338 : vector<4x512xf32>
    %340 = arith.index_cast %c8_i32 : i32 to index
    %c0_111 = arith.constant 0 : index
    %c0_112 = arith.constant 0 : index
    %341 = vector.load %arg6[%340, %c0_111, %c0_112] : memref<10x4x512xf32, #tpu.memory_space<vmem>>, vector<1x4x512xf32>
    %342 = vector.shape_cast %341 : vector<1x4x512xf32> to vector<4x512xf32>
    %343 = vector.broadcast %334 : f32 to vector<4x512xf32>
    %344 = arith.mulf %343, %342 : vector<4x512xf32>
    %345 = arith.addf %339, %344 : vector<4x512xf32>
    %c9_i32 = arith.constant 9 : i32
    %c32_i32_113 = arith.constant 32 : i32
    %346 = arith.muli %c9_i32, %c32_i32_113 : i32
    %347 = tpu.assume_multiple %346, 32 : i32
    %348 = arith.index_cast %347 : i32 to index
    %c0_114 = arith.constant 0 : index
    %349 = vector.load %arg3[%348, %c0_114] : memref<320x1xf32, #tpu.memory_space<vmem>>, vector<32x1xf32>
    %cst_115 = arith.constant dense<0.000000e+00> : vector<32x512xf32>
    %350 = tpu.matmul %0, %345, %cst_115 {dimension_numbers = #tpu.dot_dimension_numbers<[1], [0], [0], [1], [0, 0, 1, 1], [], []>} : vector<32x4xf32>, vector<4x512xf32>, vector<32x512xf32> -> vector<32x512xf32>
    %351 = vector.broadcast %349 : vector<32x1xf32> to vector<32x512xf32>
    %352 = arith.addf %350, %351 : vector<32x512xf32>
    %353 = arith.negf %352 : vector<32x512xf32>
    %354 = math.exp %353 : vector<32x512xf32>
    %cst_116 = arith.constant 1.000000e+00 : f32
    %355 = vector.broadcast %cst_116 : f32 to vector<32x512xf32>
    %356 = arith.addf %355, %354 : vector<32x512xf32>
    %357 = arith.divf %355, %356 : vector<32x512xf32>
    %358 = arith.mulf %352, %357 : vector<32x512xf32>
    %cst_117 = arith.constant dense<0.000000e+00> : vector<4x512xf32>
    %359 = tpu.matmul %1, %358, %cst_117 {dimension_numbers = #tpu.dot_dimension_numbers<[1], [0], [0], [1], [0, 0, 1, 1], [], []>} : vector<4x32xf32>, vector<32x512xf32>, vector<4x512xf32> -> vector<4x512xf32>
    %360 = vector.broadcast %2 : vector<4x1xf32> to vector<4x512xf32>
    %361 = arith.addf %359, %360 : vector<4x512xf32>
    %c4_i32_118 = arith.constant 4 : i32
    %362 = arith.muli %c4_i32_118, %c9_i32 : i32
    %363 = arith.index_cast %362 : i32 to index
    %364 = memref.load %arg0[%363] : memref<40xf32, #tpu.memory_space<smem>>
    %c4_i32_119 = arith.constant 4 : i32
    %365 = arith.muli %c4_i32_119, %c9_i32 : i32
    %c1_i32_120 = arith.constant 1 : i32
    %366 = arith.addi %365, %c1_i32_120 : i32
    %367 = arith.index_cast %366 : i32 to index
    %368 = memref.load %arg0[%367] : memref<40xf32, #tpu.memory_space<smem>>
    %c4_i32_121 = arith.constant 4 : i32
    %369 = arith.muli %c4_i32_121, %c9_i32 : i32
    %c2_i32_122 = arith.constant 2 : i32
    %370 = arith.addi %369, %c2_i32_122 : i32
    %371 = arith.index_cast %370 : i32 to index
    %372 = memref.load %arg0[%371] : memref<40xf32, #tpu.memory_space<smem>>
    %373 = vector.broadcast %364 : f32 to vector<4x512xf32>
    %374 = arith.mulf %373, %345 : vector<4x512xf32>
    %375 = vector.broadcast %368 : f32 to vector<4x512xf32>
    %376 = arith.mulf %375, %361 : vector<4x512xf32>
    %377 = arith.addf %374, %376 : vector<4x512xf32>
    %378 = arith.index_cast %c9_i32 : i32 to index
    %c0_123 = arith.constant 0 : index
    %c0_124 = arith.constant 0 : index
    %379 = vector.load %arg6[%378, %c0_123, %c0_124] : memref<10x4x512xf32, #tpu.memory_space<vmem>>, vector<1x4x512xf32>
    %380 = vector.shape_cast %379 : vector<1x4x512xf32> to vector<4x512xf32>
    %381 = vector.broadcast %372 : f32 to vector<4x512xf32>
    %382 = arith.mulf %381, %380 : vector<4x512xf32>
    %383 = arith.addf %377, %382 : vector<4x512xf32>
    %c10_i32 = arith.constant 10 : i32
    %cst_125 = arith.constant -1.000000e+00 : f32
    %cst_126 = arith.constant 1.000000e+00 : f32
    %384 = vector.broadcast %cst_125 : f32 to vector<4x512xf32>
    %385 = arith.maximumf %384, %383 : vector<4x512xf32>
    %386 = vector.broadcast %cst_126 : f32 to vector<4x512xf32>
    %387 = arith.minimumf %386, %385 : vector<4x512xf32>
    %c0_127 = arith.constant 0 : index
    %c0_128 = arith.constant 0 : index
    %388 = vector.load %arg7[%c0_127, %c0_128] : memref<4x512xf32, #tpu.memory_space<vmem>>, vector<4x512xf32>
    tpu.vector_store %arg7[%c0_127, %c0_128], %387 {strides = array<i32>} : memref<4x512xf32, #tpu.memory_space<vmem>>, vector<4x512xf32>,
    return
  }
}

</mosaic_0001>

<bundles_post_ra>
// kernel: ddim_sample_pallas.1
= control target key start
LH: loop header
LB: loop body
LE: loop exit
PB: predicated region body
PF: predicated region fallthrough
CT: control target
= control target key end

     0   :  { %12 = vsyncpa [#allocation3], 0  ;;  %s7138_s27 = smov [#allocation2]   ;;  %s12924_s0 = inlined_call_operand.vmem [shape: f32[40], index: 0, kind: input, shape index: {}]   ;;  %s12925_s1 = inlined_call_operand.vmem [shape: f32[4,512], index: 1, kind: input, shape index: {}]   ;;  %s12926_s2 = inlined_call_operand.vmem [shape: f32[32,4], index: 2, kind: input, shape index: {}]   ;;  %s12927_s3 = inlined_call_operand.vmem [shape: f32[320,1], index: 3, kind: input, shape index: {}]   ;;  %s12928_s4 = inlined_call_operand.vmem [shape: f32[4,32], index: 4, kind: input, shape index: {}]   ;;  %s12929_s5 = inlined_call_operand.vmem [shape: f32[4,1], index: 5, kind: input, shape index: {}]   ;;  %s12930_s6 = inlined_call_operand.vmem [shape: f32[10,4,512], index: 6, kind: input, shape index: {}]   ;;  %s12931_s7 = inlined_call_operand.vmem [shape: f32[4,512], index: 7, kind: output, shape index: {}]  }
   0x1   :  { %s18_s26 = sshll.u32 %s12924_s0, 4  ;;  %s19_s26 = int_to_ptr.vmem [resolvable:$true] %s18_s26 }
   0x2   :  { %21 = dma.vmem_to_smem %s19_s26, 16, %s7138_s27, [#allocation3]  }
   0x3   :  { %7136 = dma.done.wait [#allocation3], 16  }
   0x4   :  { %7137 = vsyncadd [#allocation3], 4294967280 }
   0x5   :  { %38 = sfence }
   0x6   :  { %v50_v0 = vld [vmem:[%s12927_s3 + $0x18] sm:$0xff]  ;;  %v48_v1 = vld [vmem:[%s12927_s3 + $0x8] sm:$0xff]  ;;  %v7192_v2 = vld [vmem:[%s12925_s1] sm:$0xff]  ;;  %v7139_v3 = vmov 0   ;;  %vm12944_vm0 = vcmask 1043456   ;;  %vm12942_vm1 = vcmask 31744  }
   0x7   :  { %12958 = vst [vmem:[#allocation5_spill] sm:$0xff] %v7192_v2  ;;  %6457 = vset.pattern.permute.xlu1 %v7139_v3  ;;  %6456 = vset.pattern.permute.xlu0 %v7139_v3  ;;  %v7198_v4 = vld [vmem:[%s12925_s1 + $0x8] sm:$0xff]  ;;  %v49_v5 = vld [vmem:[%s12927_s3 + $0x10] sm:$0xff]  ;;  %v47_v6 = vld [vmem:[%s12927_s3] sm:$0xff]  ;;  %s6009_s23 = sld [smem:[#allocation2 + $0x1]] }
   0x8   :  { %73 = vst [vmem:[#allocation1] ss:$2 sm:$0xff] %v7192_v2  ;;  %68 = vperm.xlu0 %6456, %v50_v0   ;;  %58 = vperm.xlu1 %6457, %v48_v1   ;;  %v7210_v7 = vld [vmem:[%s12926_s2] sm:$0xff]  ;;  %v6013_v12 = vld [vmem:[%s12927_s3 + $0x30] sm:$0xff]  ;;  %v6012_v13 = vld [vmem:[%s12927_s3 + $0x28] sm:$0xff]  ;;  %s7807_s24 = sld [smem:[#allocation2]] }
   0x9   :  { %12959 = vst [vmem:[#allocation6_spill] sm:$0xff] %v7198_v4  ;;  %6458 = vset.pattern.permute.xlu2 %v7139_v3  ;;  %v7233_v14 = vld [vmem:[%s12926_s2 + $0x8] sm:$0xff]  ;;  %v6063_v15 = vld [vmem:[%s12927_s3 + $0x58] sm:$0xff]  ;;  %v6062_v16 = vld [vmem:[%s12927_s3 + $0x50] sm:$0xff]  ;;  %s6056_s12 = sld [smem:[#allocation2 + $0x5]] }
   0xa   :  { %75 = vst [vmem:[#allocation1 + $0x10] ss:$2 sm:$0xff] %v7198_v4  ;;  %v7252_v17 = vld [vmem:[%s12926_s2 + $0x10] sm:$0xff]  ;;  %v6060_v18 = vld [vmem:[%s12927_s3 + $0x40] sm:$0xff]  ;;  %v6112_v19 = vld [vmem:[%s12927_s3 + $0x78] sm:$0xff]  ;;  %s8407_s13 = sld [smem:[#allocation2 + $0x4]] }
   0xb   :  { %12960 = vst [vmem:[#allocation7_spill] sm:$0xff] %v7210_v7  ;;  %v7271_v20 = vld [vmem:[%s12926_s2 + $0x18] sm:$0xff]  ;;  %v6110_v21 = vld [vmem:[%s12927_s3 + $0x68] sm:$0xff]  ;;  %v6109_v22 = vld [vmem:[%s12927_s3 + $0x60] sm:$0xff]  ;;  %s8409_s14 = sld [smem:[#allocation2 + $0x6]] }
   0xc   :  { %12961 = vst [vmem:[#allocation8_spill] sm:$0xff] %v7233_v14  ;;  %v6160_v23 = vld [vmem:[%s12927_s3 + $0x90] sm:$0xff]  ;;  %v6159_v24 = vld [vmem:[%s12927_s3 + $0x88] sm:$0xff]  ;;  %v6210_v25 = vld [vmem:[%s12927_s3 + $0xb8] sm:$0xff]  ;;  %s6105_s20 = sld [smem:[#allocation2 + $0x9]] }
   0xd   :  { %12962 = vst [vmem:[#allocation9_spill] sm:$0xff] %v7252_v17  ;;  %v6209_v26 = vld [vmem:[%s12927_s3 + $0xb0] sm:$0xff]  ;;  %v6207_v27 = vld [vmem:[%s12927_s3 + $0xa0] sm:$0xff]  ;;  %v6259_v28 = vld [vmem:[%s12927_s3 + $0xd8] sm:$0xff]  ;;  %s8977_s21 = sld [smem:[#allocation2 + $0x8]] }
   0xe   :  { %12963 = vst [vmem:[#allocation10_spill] sm:$0xff] %v7271_v20  ;;  %v6257_v29 = vld [vmem:[%s12927_s3 + $0xc8] sm:$0xff]  ;;  %v6256_v30 = vld [vmem:[%s12927_s3 + $0xc0] sm:$0xff]  ;;  %v6307_v31 = vld [vmem:[%s12927_s3 + $0xf0] sm:$0xff]  ;;  %s8979_s22 = sld [smem:[#allocation2 + $0xa]] }
   0xf   :  { %v76_v8 = vld.sshfl [vmem:[#allocation1] sm:$0xff pattern:$0x75316420]  ;;  %v77_v9 = vld.sshfl [vmem:[#allocation1 + $0x8] sm:$0xff pattern:$0x75316420] }
  0x10   :  { %5969 = vmatpush.msk.msra.mxu0 %vm12944_vm0, %v76_v8  ;;  %5974 = vmatpush.msk.msra.mxu1 %vm12944_vm0, %v77_v9  ;;  %v6306_v32 = vld [vmem:[%s12927_s3 + $0xe8] sm:$0xff]  ;;  %v6357_v33 = vld [vmem:[%s12927_s3 + $0x118] sm:$0xff]  ;;  %v6356_v34 = vld [vmem:[%s12927_s3 + $0x110] sm:$0xff]  ;;  %s6154_s10 = sld [smem:[#allocation2 + $0xd]] }
  0x11   :  { %v78_v10 = vld.sshfl [vmem:[#allocation1 + $0x10] sm:$0xff pattern:$0x75316420]  ;;  %v79_v11 = vld.sshfl [vmem:[#allocation1 + $0x18] sm:$0xff pattern:$0x75316420]  ;;  %63 = vperm.xlu0 %6456, %v49_v5   ;;  %53 = vperm.xlu1 %6457, %v47_v6  }
  0x12   :  { %5979 = vmatpush.msk.msra.mxu2 %vm12944_vm0, %v78_v10  ;;  %5984 = vmatpush.msk.msra.mxu3 %vm12944_vm0, %v79_v11  ;;  %v6354_v35 = vld [vmem:[%s12927_s3 + $0x100] sm:$0xff]  ;;  %v6406_v36 = vld [vmem:[%s12927_s3 + $0x138] sm:$0xff]  ;;  %v6404_v37 = vld [vmem:[%s12927_s3 + $0x128] sm:$0xff]  ;;  %s9557_s0 = sld [smem:[#allocation2 + $0xc]] }
  0x13   :  { %5970 = vmatmul.msk.f32.vlgmr.msra.gmra.mxu0 %vm12942_vm1, %v7210_v7  ;;  %5975 = vmatmul.msk.f32.vlgmr.msra.gmra.mxu1 %vm12942_vm1, %v7210_v7  ;;  %v6403_v38 = vld [vmem:[%s12927_s3 + $0x120] sm:$0xff]  ;;  %v6014_v41 = vld [vmem:[%s12927_s3 + $0x38] sm:$0xff]  ;;  %v6061_v63 = vld [vmem:[%s12927_s3 + $0x48] sm:$0xff]  ;;  %s9559_s11 = sld [smem:[#allocation2 + $0xe]] }
  0x14   :  { %5980 = vmatmul.msk.f32.vlgmr.msra.gmra.mxu2 %vm12942_vm1, %v7210_v7  ;;  %5985 = vmatmul.msk.f32.vlgmr.msra.gmra.mxu3 %vm12942_vm1, %v7210_v7  ;;  %v44_v39 = vld [vmem:[%s12929_s5] sm:$0xf]  ;;  %s7809_s5 = sld [smem:[#allocation2 + $0x2]] }
  0x15   :  { %540 = vperm.xlu2 %6458, %v44_v39   ;;  %v6011_v50 = vld [vmem:[%s12927_s3 + $0x20] sm:$0xff]  ;;  %s9601_s1 = sld [smem:[#allocation2 + $0x10]] }
  0x16   :  { %s6252_s30 = sld [smem:[#allocation2 + $0x15]] }
  0x17   :  { %s10677_s8 = sld [smem:[#allocation2 + $0x14]] }
  0x18   :  { %s10679_s9 = sld [smem:[#allocation2 + $0x16]] }
  0x19   :  { %674 = vperm.xlu0 %6456, %v6013_v12   ;;  %669 = vperm.xlu1 %6457, %v6012_v13   ;;  %s6301_s17 = sld [smem:[#allocation2 + $0x19]] }
  0x1a   :  { %s11235_s18 = sld [smem:[#allocation2 + $0x1a]] }
  0x1b   :  { %5971 = vmatmul.msk.f32.gmra.mxu0 %vm12942_vm1, %v7233_v14  ;;  %5976 = vmatmul.msk.f32.gmra.mxu1 %vm12942_vm1, %v7233_v14  ;;  %s6350_s29 = sld [smem:[#allocation2 + $0x1d]] }
  0x1c   :  { %5981 = vmatmul.msk.f32.gmra.mxu2 %vm12942_vm1, %v7233_v14  ;;  %5986 = vmatmul.msk.f32.gmra.mxu3 %vm12942_vm1, %v7233_v14  ;;  %s12350_s15 = sld [smem:[#allocation2 + $0x20]] }
  0x1d   :  { %679 = vperm.xlu2 %6458, %v6014_v41   ;;  %s12352_s16 = sld [smem:[#allocation2 + $0x22]] }
  0x1e   :  { %s12892_s25 = sld [smem:[#allocation2 + $0x24]] }
  0x1f   :  { %s12895_s26 = sld [smem:[#allocation2 + $0x26]] }
  0x21   :  { %1268 = vperm.xlu0 %6456, %v6063_v15   ;;  %1263 = vperm.xlu1 %6457, %v6062_v16  }
  0x23   :  { %5972 = vmatmul.msk.f32.gmra.mxu0 %vm12942_vm1, %v7252_v17  ;;  %5977 = vmatmul.msk.f32.gmra.mxu1 %vm12942_vm1, %v7252_v17 }
  0x24   :  { %5982 = vmatmul.msk.f32.gmra.mxu2 %vm12942_vm1, %v7252_v17  ;;  %5987 = vmatmul.msk.f32.gmra.mxu3 %vm12942_vm1, %v7252_v17 }
  0x25   :  { %664 = vperm.xlu2 %6458, %v6011_v50  }
  0x29   :  { %1253 = vperm.xlu0 %6456, %v6060_v18   ;;  %1857 = vperm.xlu1 %6457, %v6112_v19   ;;  %v6111_v19 = vld [vmem:[%s12927_s3 + $0x70] sm:$0xff] }
  0x2b   :  { %5973 = vmatmul.msk.f32.gmra.mxu0 %vm12942_vm1, %v7271_v20  ;;  %5978 = vmatmul.msk.f32.gmra.mxu1 %vm12942_vm1, %v7271_v20 }
  0x2c   :  { %5983 = vmatmul.msk.f32.gmra.mxu2 %vm12942_vm1, %v7271_v20  ;;  %5988 = vmatmul.msk.f32.gmra.mxu3 %vm12942_vm1, %v7271_v20 }
  0x2d   :  { %1258 = vperm.xlu2 %6458, %v6061_v63  }
  0x31   :  { %1847 = vperm.xlu0 %6456, %v6110_v21   ;;  %1842 = vperm.xlu1 %6457, %v6109_v22  }
  0x35   :  { %1852 = vperm.xlu2 %6458, %v6111_v19  }
  0x39   :  { %2441 = vperm.xlu0 %6456, %v6160_v23   ;;  %2436 = vperm.xlu1 %6457, %v6159_v24  }
  0x41   :  { %3035 = vperm.xlu0 %6456, %v6210_v25   ;;  %3030 = vperm.xlu1 %6457, %v6209_v26  }
  0x49   :  { %3020 = vperm.xlu0 %6456, %v6207_v27   ;;  %3624 = vperm.xlu1 %6457, %v6259_v28  }
  0x51   :  { %3614 = vperm.xlu0 %6456, %v6257_v29   ;;  %3609 = vperm.xlu1 %6457, %v6256_v30  }
  0x59   :  { %4208 = vperm.xlu0 %6456, %v6307_v31   ;;  %4203 = vperm.xlu1 %6457, %v6306_v32  }
  0x61   :  { %4802 = vperm.xlu0 %6456, %v6357_v33   ;;  %4797 = vperm.xlu1 %6457, %v6356_v34  }
  0x69   :  { %4787 = vperm.xlu0 %6456, %v6354_v35   ;;  %5391 = vperm.xlu1 %6457, %v6406_v36  }
  0x71   :  { %5381 = vperm.xlu0 %6456, %v6404_v37   ;;  %5376 = vperm.xlu1 %6457, %v6403_v38  }
  0x7a   :  { %v59_v40 = vpop.permute.xlu1 %58  ;;  %v7346_v48 = vpop.permute.xlu0 %68 }
  0x83   :  { %v54_v42 = vpop.permute.xlu1 %53  ;;  %v64_v3 = vpop.permute.xlu0 %63 }
  0x90   :  { %v119_v43 = vpop.f32.mrf.mxu0  ;;  %v148_v44 = vpop.f32.mrf.mxu1 }
  0x91   :  { %v7341_v45 = vadd.f32 %v119_v43, %v54_v42  ;;  %v7343_v46 = vadd.f32 %v148_v44, %v54_v42 }
  0x93   :  { %v5989_v47 = vmul.f32 -1.442695, %v7341_v45  ;;  %v5990_v49 = vmul.f32 -1.442695, %v7343_v46 }
  0x95   :  { %6459 = vpow2.f32 %v5989_v47 }
  0x96   :  { %6461 = vpow2.f32 %v5990_v49  ;;  %v6161_v49 = vld [vmem:[%s12927_s3 + $0x98] sm:$0xff] }
  0x97   :  { %v177_v51 = vpop.f32.mrf.mxu2  ;;  %v206_v52 = vpop.f32.mrf.mxu3  ;;  %2446 = vperm.xlu2 %6458, %v6161_v49  }
  0x98   :  { %v7352_v53 = vadd.f32 %v177_v51, %v54_v42  ;;  %v7354_v54 = vadd.f32 %v206_v52, %v54_v42  ;;  %v122_v55 = vpop.f32.mrf.mxu0  ;;  %v151_v56 = vpop.f32.mrf.mxu1 }
  0x99   :  { %v7356_v57 = vadd.f32 %v122_v55, %v59_v40  ;;  %v7358_v58 = vadd.f32 %v151_v56, %v59_v40 }
  0x9a   :  { %12964 = vst [vmem:[#allocation11_spill] sm:$0xff] %v7352_v53  ;;  %v5991_v59 = vmul.f32 -1.442695, %v7352_v53  ;;  %v5992_v60 = vmul.f32 -1.442695, %v7354_v54  ;;  %v6208_v53 = vld [vmem:[%s12927_s3 + $0xa8] sm:$0xff] }
  0x9b   :  { %12965 = vst [vmem:[#allocation12_spill] sm:$0xff] %v7354_v54  ;;  %v6460_v61 = vpop.eup %6459  ;;  %v5993_v62 = vmul.f32 -1.442695, %v7356_v57  ;;  %v5994_v0 = vmul.f32 -1.442695, %v7358_v58 }
  0x9c   :  { %6463 = vpow2.f32 %v5991_v59  ;;  %v6462_v1 = vpop.eup %6461  ;;  %v7367_v5 = vadd.f32 1.0, %v6460_v61 }
  0x9d   :  { %6465 = vpow2.f32 %v5992_v60  ;;  %v7373_v13 = vadd.f32 1.0, %v6462_v1 }
  0x9e   :  { %6467 = vpow2.f32 %v5993_v62  ;;  %v293_v38 = vand.u32 2147483648, %v7367_v5  ;;  %vm287_vm4 = vweird.f32 %v7367_v5  ;;  %v12977_v20 = vand.u32 2147483647, %v7367_v5 }
  0x9f   :  { %v180_v6 = vpop.f32.mrf.mxu2  ;;  %v209_v8 = vpop.f32.mrf.mxu3  ;;  %6469 = vpow2.f32 %v5994_v0  ;;  %v308_v41 = vand.u32 2147483648, %v7373_v13  ;;  %vm302_vm10 = vweird.f32 %v7373_v13 }
  0xa0   :  { %v7369_v9 = vadd.f32 %v180_v6, %v59_v40  ;;  %v7371_v10 = vadd.f32 %v209_v8, %v59_v40  ;;  %v125_v11 = vpop.f32.mrf.mxu0  ;;  %v154_v12 = vpop.f32.mrf.mxu1  ;;  %6471 = vrcp.f32 %v7367_v5  ;;  %v7429_v61 = vor.u32 1.1754944e-38, %v293_v38 }
  0xa1   :  { %v7375_v15 = vadd.f32 %v125_v11, %v64_v3  ;;  %v7385_v24 = vadd.f32 %v154_v12, %v64_v3  ;;  %v7432_v63 = vor.u32 1.1754944e-38, %v308_v41  ;;  %vm7531_vm13 = vcmp.eq.f32.partialorder %v12977_v20, 8.507059e+37 }
  0xa2   :  { %12966 = vst [vmem:[#allocation13_spill] sm:$0xff] %v7369_v9  ;;  %v6464_v16 = vpop.eup %6463  ;;  %v5995_v18 = vmul.f32 -1.442695, %v7369_v9  ;;  %v5996_v23 = vmul.f32 -1.442695, %v7371_v10 }
  0xa3   :  { %12967 = vst [vmem:[#allocation14_spill] sm:$0xff] %v7371_v10  ;;  %v6466_v21 = vpop.eup %6465  ;;  %v7382_v22 = vadd.f32 1.0, %v6464_v16  ;;  %v5997_v25 = vmul.f32 -1.442695, %v7375_v15  ;;  %v5998_v30 = vmul.f32 -1.442695, %v7385_v24 }
  0xa4   :  { %6473 = vpow2.f32 %v5995_v18  ;;  %v6468_v26 = vpop.eup %6467  ;;  %v7390_v27 = vadd.f32 1.0, %v6466_v21 }
  0xa5   :  { %6475 = vrcp.f32 %v7373_v13  ;;  %v6470_v28 = vpop.eup %6469  ;;  %v7392_v29 = vadd.f32 1.0, %v6468_v26 }
  0xa6   :  { %6477 = vrcp.f32 %v7382_v22  ;;  %12968 = vst [vmem:[#allocation15_spill] sm:$0xff] %v7390_v27  ;;  %v7395_v33 = vpop.eup %6471  ;;  %v7403_v39 = vadd.f32 1.0, %v6470_v28 }
  0xa7   :  { %6479 = vpow2.f32 %v5996_v23  ;;  %v183_v31 = vpop.f32.mrf.mxu2  ;;  %v212_v32 = vpop.f32.mrf.mxu3  ;;  %v283_v52 = vmul.f32 %v7395_v33, %v7367_v5  ;;  %v353_v18 = vand.u32 2147483648, %v7392_v29  ;;  %vm347_vm2 = vweird.f32 %v7392_v29 }
  0xa8   :  { %6481 = vpow2.f32 %v5997_v25  ;;  %v7397_v34 = vadd.f32 %v183_v31, %v64_v3  ;;  %v7399_v35 = vadd.f32 %v212_v32, %v64_v3  ;;  %v128_v36 = vpop.f32.mrf.mxu0  ;;  %v157_v37 = vpop.f32.mrf.mxu1  ;;  %v351_v3 = vand.u32 2147483647, %v7392_v29 }
  0xa9   :  { %6483 = vrcp.f32 %v7392_v29  ;;  %v7406_v40 = vadd.f32 %v128_v36, %v7346_v48  ;;  %v7413_v47 = vadd.f32 %v157_v37, %v7346_v48  ;;  %v284_v19 = vsub.f32 1.0, %v283_v52 }
  0xaa   :  { %v6474_v42 = vpop.eup %6473  ;;  %6485 = vrcp.f32 %v7390_v27  ;;  %v5999_v43 = vmul.f32 -1.442695, %v7397_v34  ;;  %v6000_v44 = vmul.f32 -1.442695, %v7399_v35  ;;  %v368_v26 = vand.u32 2147483648, %v7403_v39 }
  0xab   :  { %v7418_v50 = vpop.eup %6475  ;;  %6487 = vpow2.f32 %v5998_v30  ;;  %v6001_v51 = vmul.f32 -1.442695, %v7406_v40  ;;  %v7425_v56 = vadd.f32 1.0, %v6474_v42  ;;  %v6002_v1 = vmul.f32 -1.442695, %v7413_v47  ;;  %v6158_v42 = vld [vmem:[%s12927_s3 + $0x80] sm:$0xff] }
  0xac   :  { %v7423_v55 = vpop.eup %6477  ;;  %6489 = vpow2.f32 %v5999_v43  ;;  %v7438_v6 = vmul.f32 %v7418_v50, %v7373_v13  ;;  %vm7464_vm3 = vcmp.eq.f32.partialorder %v351_v3, 8.507059e+37  ;;  %v366_v41 = vand.u32 2147483647, %v7403_v39  ;;  %2431 = vperm.xlu2 %6458, %v6158_v42  }
  0xad   :  { %12969 = vst [vmem:[#allocation16_spill] sm:$0xff] %v7423_v55  ;;  %v6480_v60 = vpop.eup %6479  ;;  %6491 = vrcp.f32 %v7403_v39  ;;  %v7476_v49 = vor.u32 1.1754944e-38, %v353_v18  ;;  %vm288_vm5 = vweird.f32 %v7395_v33  ;;  %vm362_vm7 = vweird.f32 %v7403_v39 }
  0xae   :  { %v6482_v0 = vpop.eup %6481  ;;  %6493 = vpow2.f32 %v6000_v44  ;;  %v7454_v30 = vadd.f32 1.0, %v6480_v60  ;;  %vm303_vm11 = vweird.f32 %v7418_v50  ;;  %vm7525_vm12 = vcmp.eq.f32.partialorder %v366_v41, 8.507059e+37 }
  0xaf   :  { %v7440_v8 = vpop.eup %6483  ;;  %v7442_v11 = vadd.f32 1.0, %v6482_v0  ;;  %6495 = vpow2.f32 %v6001_v51  ;;  %v186_v12 = vpop.f32.mrf.mxu2  ;;  %v7479_v51 = vmul.f32 %v7395_v33, %v284_v19  ;;  %v7485_v0 = vor.u32 1.1754944e-38, %v368_v26 }
  0xb0   :  { %v215_v16 = vpop.f32.mrf.mxu3  ;;  %v7445_v21 = vpop.eup %6485  ;;  %6497 = vrcp.f32 %v7425_v56  ;;  %v7449_v23 = vadd.f32 %v186_v12, %v7346_v48  ;;  %v343_v25 = vmul.f32 %v7440_v8, %v7392_v29  ;;  %vm348_vm6 = vweird.f32 %v7440_v8 }
  0xb1   :  { %12970 = vst [vmem:[#allocation17_spill] sm:$0xff] %v7445_v21  ;;  %v6488_v28 = vpop.eup %6487  ;;  %6499 = vrcp.f32 %v7442_v11  ;;  %v7458_v31 = vadd.f32 %v215_v16, %v7346_v48  ;;  %v413_v60 = vand.u32 2147483648, %v7442_v11  ;;  %v411_v26 = vand.u32 2147483647, %v7442_v11  ;;  %vm7507_vm8 = vmor %vm347_vm2, %vm348_vm6 }
  0xb2   :  { %v6490_v32 = vpop.eup %6489  ;;  %v7461_v36 = vadd.f32 1.0, %v6488_v28  ;;  %6501 = vpow2.f32 %v6002_v1  ;;  %v6003_v37 = vmul.f32 -1.442695, %v7449_v23  ;;  %v344_v44 = vsub.f32 1.0, %v343_v25 }
  0xb3   :  { %v7472_v48 = vpop.eup %6491  ;;  %v7474_v43 = vadd.f32 1.0, %v6490_v32  ;;  %v6004_v12 = vmul.f32 -1.442695, %v7458_v31  ;;  %vm407_vm9 = vweird.f32 %v7442_v11  ;;  %v7516_v1 = vor.u32 1.1754944e-38, %v413_v60 }
  0xb4   :  { %v6494_v52 = vpop.eup %6493  ;;  %6503 = vrcp.f32 %v7461_v36  ;;  %v345_v16 = vmul.f32 %v7440_v8, %v344_v44  ;;  %v428_v32 = vand.u32 2147483648, %v7461_v36  ;;  %v426_v62 = vand.u32 2147483647, %v7461_v36  ;;  %3025 = vperm.xlu2 %6458, %v6208_v53   ;;  %v13004_v53 = vld [vmem:[#allocation13_spill] sm:$0xff] }
  0xb5   :  { %v6496_v3 = vpop.eup %6495  ;;  %6505 = vrcp.f32 %v7454_v30  ;;  %v7495_v19 = vadd.f32 1.0, %v6494_v52  ;;  %v358_v52 = vmul.f32 %v7472_v48, %v7403_v39  ;;  %vm7546_vm15 = vcmp.eq.f32.partialorder %v411_v26, 8.507059e+37 }
  0xb6   :  { %v7493_v18 = vpop.eup %6497  ;;  %v7497_v25 = vadd.f32 1.0, %v6496_v3  ;;  %6507 = vpow2.f32 %v6003_v37  ;;  %v346_v44 = vadd.f32 %v7440_v8, %v345_v16  ;;  %v7550_v14 = vor.u32 1.1754944e-38, %v428_v32 }
  0xb7   :  { %v7500_v28 = vpop.eup %6499  ;;  %6509 = vrcp.f32 %v7474_v43  ;;  %v359_v41 = vsub.f32 1.0, %v358_v52  ;;  %vm363_vm2 = vweird.f32 %v7472_v48  ;;  %vm7565_vm1 = vcmp.eq.f32.partialorder %v426_v62, 8.507059e+37 }
  0xb8   :  { %v6502_v37 = vpop.eup %6501  ;;  %6511 = vrcp.f32 %v7497_v25  ;;  %v473_v3 = vand.u32 2147483648, %v7497_v25  ;;  %v403_v16 = vmul.f32 %v7500_v28, %v7442_v11  ;;  %v471_v20 = vand.u32 2147483647, %v7497_v25 }
  0xb9   :  { %v7520_v29 = vadd.f32 1.0, %v6502_v37  ;;  %6513 = vpow2.f32 %v6004_v12  ;;  %v350_v12 = vsel %vm7507_vm8, %v7440_v8, %v346_v44  ;;  %vm408_vm6 = vweird.f32 %v7500_v28 }
  0xba   :  { %v7535_v17 = vpop.eup %6503  ;;  %6515 = vrcp.f32 %v7495_v19  ;;  %v7553_v2 = vor.u32 1.1754944e-38, %v473_v3  ;;  %v404_v42 = vsub.f32 1.0, %v403_v16  ;;  %v355_v3 = vsel %vm7464_vm3, %v7476_v49, %v350_v12  ;;  %vm7586_vm3 = vmor %vm287_vm4, %vm288_vm5 }
  0xbb   :  { %v7542_v37 = vpop.eup %6505  ;;  %6517 = vrcp.f32 %v7520_v29  ;;  %v418_v8 = vmul.f32 %v7535_v17, %v7461_v36  ;;  %v486_v26 = vand.u32 2147483647, %v7520_v29  ;;  %v488_v32 = vand.u32 2147483648, %v7520_v29  ;;  %vm7612_vm5 = vmor %vm362_vm7, %vm363_vm2 }
  0xbc   :  { %v6508_v7 = vpop.eup %6507  ;;  %v12984_v16 = vand.u32 2147483647, %v7373_v13  ;;  %v405_v10 = vmul.f32 %v7500_v28, %v404_v42  ;;  %v360_v27 = vmul.f32 %v7472_v48, %v359_v41  ;;  %v286_v62 = vadd.f32 %v7395_v33, %v7479_v51  ;;  %vm409_vm4 = vmor %vm407_vm9, %vm408_vm6 }
  0xbd   :  { %v7558_v44 = vpop.eup %6509  ;;  %v7560_v52 = vadd.f32 1.0, %v6508_v7  ;;  %v419_v21 = vsub.f32 1.0, %v418_v8  ;;  %vm7592_vm8 = vcmp.eq.f32.partialorder %v471_v20, 8.507059e+37  ;;  %vm423_vm14 = vweird.f32 %v7535_v17  ;;  %vm7642_vm2 = vmor %vm302_vm10, %vm303_vm11 }
  0xbe   :  { %vm7574_vm0 = vcmp.eq.f32.partialorder %v12984_v16, 8.507059e+37  ;;  %v6512_v7 = vpop.eup %6511  ;;  %v12991_v51 = vsub.f32 1.0, %v7438_v6  ;;  %v406_v16 = vadd.f32 %v7500_v28, %v405_v10  ;;  %v361_v20 = vadd.f32 %v7472_v48, %v360_v27 }
  0xbf   :  { %v6514_v49 = vpop.eup %6513  ;;  %6519 = vrcp.f32 %v7560_v52  ;;  %v463_v12 = vmul.f32 %v6512_v7, %v7497_v25  ;;  %v420_v9 = vmul.f32 %v7535_v17, %v419_v21  ;;  %v7621_v10 = vmul.f32 %v355_v3, %v7356_v57 }
  0xc0   :  { %v300_v41 = vmul.f32 %v7418_v50, %v12991_v51  ;;  %v7600_v5 = vpop.eup %6515  ;;  %v7602_v8 = vadd.f32 1.0, %v6514_v49  ;;  %v489_v49 = vor.u32 1.1754944e-38, %v488_v32  ;;  %v290_v27 = vsel %vm7586_vm3, %v7395_v33, %v286_v62 }
  0xc1   :  { %v6518_v51 = vpop.eup %6517  ;;  %v464_v55 = vsub.f32 1.0, %v463_v12  ;;  %vm7628_vm7 = vcmp.eq.f32.partialorder %v486_v26, 8.507059e+37  ;;  %v410_v32 = vsel %vm409_vm4, %v7500_v28, %v406_v16  ;;  %vm468_vm9 = vweird.f32 %v6512_v7  ;;  %v7719_v26 = vld [vmem:[%s12928_s4] sm:$0xf] }
  0xc2   :  { %6521 = vrcp.f32 %v7602_v8  ;;  %v478_v39 = vmul.f32 %v6518_v51, %v7520_v29  ;;  %v301_v11 = vadd.f32 %v7418_v50, %v300_v41  ;;  %v421_v57 = vadd.f32 %v7535_v17, %v420_v9 }
  0xc3   :  { %v465_v12 = vmul.f32 %v6512_v7, %v464_v55  ;;  %v365_v33 = vsel %vm7612_vm5, %v7472_v48, %v361_v20  ;;  %v415_v55 = vsel %vm7546_vm15, %v7516_v1, %v410_v32  ;;  %vm12998_vm6 = vweird.f32 %v7461_v36 }
  0xc4   :  { %v479_v3 = vsub.f32 1.0, %v478_v39  ;;  %vm424_vm3 = vmor %vm12998_vm6, %vm423_vm14  ;;  %v370_v9 = vsel %vm7525_vm12, %v7485_v0, %v365_v33  ;;  %v295_v13 = vsel %vm7531_vm13, %v7429_v61, %v290_v27  ;;  %vm483_vm10 = vweird.f32 %v6518_v51 }
  0xc5   :  { %v6520_v48 = vpop.eup %6519  ;;  %v466_v28 = vadd.f32 %v6512_v7, %v465_v12  ;;  %v425_v62 = vsel %vm424_vm3, %v7535_v17, %v421_v57  ;;  %vm497_vm11 = vweird.f32 %v7560_v52  ;;  %vm12999_vm15 = vweird.f32 %v7497_v25 }
  0xc6   :  { %vm469_vm4 = vmor %vm12999_vm15, %vm468_vm9  ;;  %v480_v4 = vmul.f32 %v6518_v51, %v479_v3  ;;  %v430_v59 = vsel %vm7565_vm1, %v7550_v14, %v425_v62  ;;  %v305_v36 = vsel %vm7642_vm2, %v7418_v50, %v301_v11  ;;  %v493_v61 = vmul.f32 %v6520_v48, %v7560_v52 }
  0xc7   :  { %v470_v0 = vsel %vm469_vm4, %v6512_v7, %v466_v28  ;;  %v530_v1 = vmul.f32 %v415_v55, %v7375_v15  ;;  %v527_v17 = vmul.f32 %v370_v9, %v7358_v58  ;;  %v522_v60 = vmul.f32 %v295_v13, %v7341_v45 }
  0xc8   :  { %v6522_v25 = vpop.eup %6521  ;;  %v475_v38 = vsel %vm7592_vm8, %v7553_v2, %v470_v0  ;;  %v481_v54 = vadd.f32 %v6518_v51, %v480_v4  ;;  %v310_v14 = vsel %vm7574_vm0, %v7432_v63, %v305_v36  ;;  %v494_v50 = vsub.f32 1.0, %v493_v61 }
  0xc9   :  { %v534_v41 = vmul.f32 %v475_v38, %v7406_v40  ;;  %vm13000_vm1 = vweird.f32 %v7520_v29  ;;  %v531_v58 = vmul.f32 %v430_v59, %v7385_v24  ;;  %v503_v45 = vand.u32 2147483648, %v7560_v52 }
  0xca   :  { %vm484_vm12 = vmor %vm13000_vm1, %vm483_vm10  ;;  %v508_v15 = vmul.f32 %v6522_v25, %v7602_v8  ;;  %v495_v2 = vmul.f32 %v6520_v48, %v494_v50  ;;  %vm498_vm13 = vweird.f32 %v6520_v48  ;;  %v501_v42 = vand.u32 2147483647, %v7560_v52  ;;  %v6308_v50 = vld [vmem:[%s12927_s3 + $0xf8] sm:$0xff] }
  0xcb   :  { %v485_v7 = vsel %vm484_vm12, %v6518_v51, %v481_v54  ;;  %559 = vmatpush.msrb.mxu0 %v534_v41  ;;  %v523_v63 = vmul.f32 %v310_v14, %v7343_v46  ;;  %vm512_vm0 = vweird.f32 %v7602_v8  ;;  %vm513_vm14 = vweird.f32 %v6522_v25  ;;  %vm499_vm8 = vmor %vm497_vm11, %vm498_vm13 }
  0xcc   :  { %v490_v40 = vsel %vm7628_vm7, %v489_v49, %v485_v7  ;;  %v509_v24 = vsub.f32 1.0, %v508_v15  ;;  %v496_v16 = vadd.f32 %v6520_v48, %v495_v2  ;;  %v518_v20 = vand.u32 2147483648, %v7602_v8  ;;  %vm514_vm2 = vmor %vm512_vm0, %vm513_vm14 }
  0xcd   :  { %v535_v29 = vmul.f32 %v490_v40, %v7413_v47  ;;  %560 = vmatpush.msrb.mxu0 %v530_v1  ;;  %v504_v6 = vor.u32 1.1754944e-38, %v503_v45  ;;  %v516_v49 = vand.u32 2147483647, %v7602_v8  ;;  %v433_v46 = vmul.f32 %v7558_v44, %v7474_v43  ;;  %v13003_v45 = vld [vmem:[#allocation16_spill] sm:$0xff] }
  0xce   :  { %v510_v51 = vmul.f32 %v6522_v25, %v509_v24  ;;  %v500_v27 = vsel %vm499_vm8, %v6520_v48, %v496_v16  ;;  %vm502_vm5 = vcmp.eq.f32.partialorder %v501_v42, 8.507059e+37  ;;  %vm12957_vm7 = vcmask 261120   ;;  %v13006_v16 = vld [vmem:[#allocation17_spill] sm:$0xff] }
  0xcf   :  { %579 = vmatpush.msrb.mxu1 %v535_v29  ;;  %vm437_vm9 = vweird.f32 %v7474_v43  ;;  %561 = vmatpush.msrb.mxu0 %v7621_v10  ;;  %v505_v47 = vsel %vm502_vm5, %v504_v6, %v500_v27  ;;  %v519_v21 = vor.u32 1.1754944e-38, %v518_v20  ;;  %v434_v52 = vsub.f32 1.0, %v433_v46  ;;  %v6258_v10 = vld [vmem:[%s12927_s3 + $0xd0] sm:$0xff]  ;;  %v13005_v29 = vld [vmem:[#allocation15_spill] sm:$0xff] }
  0xd0   :  { %v511_v39 = vadd.f32 %v6522_v25, %v510_v51  ;;  %v536_v32 = vmul.f32 %v505_v47, %v7449_v23  ;;  %v441_v11 = vand.u32 2147483647, %v7474_v43  ;;  %v443_v12 = vand.u32 2147483648, %v7474_v43  ;;  %3619 = vperm.xlu2 %6458, %v6258_v10   ;;  %v13007_v46 = vld [vmem:[#allocation14_spill] sm:$0xff] }
  0xd1   :  { %580 = vmatpush.msrb.mxu1 %v531_v58  ;;  %v448_v57 = vmul.f32 %v7600_v5, %v7495_v19  ;;  %562 = vmatpush.msrb.mxu0 %v522_v60  ;;  %vm517_vm6 = vcmp.eq.f32.partialorder %v516_v49, 8.507059e+37  ;;  %v435_v23 = vmul.f32 %v7558_v44, %v434_v52  ;;  %vm438_vm3 = vweird.f32 %v7558_v44 }
  0xd2   :  { %v515_v33 = vsel %vm514_vm2, %v6522_v25, %v511_v39  ;;  %599 = vmatpush.msrb.mxu2 %v536_v32  ;;  %vm452_vm10 = vweird.f32 %v7495_v19  ;;  %v456_v55 = vand.u32 2147483647, %v7495_v19  ;;  %v458_v48 = vand.u32 2147483648, %v7495_v19  ;;  %6005 = vmatmul.msk.f32.vlgmr.msrb.gmra.mxu0 %vm12957_vm7, %v7719_v26  ;;  %vm439_vm11 = vmor %vm437_vm9, %vm438_vm3 }
  0xd3   :  { %581 = vmatpush.msrb.mxu1 %v527_v17  ;;  %v520_v8 = vsel %vm517_vm6, %v519_v21, %v515_v33  ;;  %v449_v3 = vsub.f32 1.0, %v448_v57  ;;  %v436_v13 = vadd.f32 %v7558_v44, %v435_v23  ;;  %v373_v28 = vmul.f32 %v7493_v18, %v7425_v56  ;;  %v13008_v57 = vld [vmem:[#allocation11_spill] sm:$0xff] }
  0xd4   :  { %v537_v9 = vmul.f32 %v520_v8, %v7458_v31  ;;  %vm442_vm15 = vcmp.eq.f32.partialorder %v441_v11, 8.507059e+37  ;;  %v444_v62 = vor.u32 1.1754944e-38, %v443_v12  ;;  %vm453_vm4 = vweird.f32 %v7600_v5 }
  0xd5   :  { %582 = vmatpush.msrb.mxu1 %v523_v63  ;;  %v450_v31 = vmul.f32 %v7600_v5, %v449_v3  ;;  %v440_v4 = vsel %vm439_vm11, %v7558_v44, %v436_v13  ;;  %vm7739_vm1 = vcmp.eq.f32.partialorder %v456_v55, 8.507059e+37  ;;  %v374_v36 = vsub.f32 1.0, %v373_v28  ;;  %vm454_vm13 = vmor %vm452_vm10, %vm453_vm4  ;;  %v13009_v3 = vld [vmem:[#allocation12_spill] sm:$0xff]  ;;  %v6405_v13 = vld [vmem:[%s12927_s3 + $0x130] sm:$0xff] }
  0xd6   :  { %619 = vmatpush.msrb.mxu3 %v537_v9  ;;  %6006 = vmatmul.msk.f32.vlgmr.msrb.gmra.mxu1 %vm12957_vm7, %v7719_v26  ;;  %vm378_vm12 = vweird.f32 %v7493_v18  ;;  %v445_v43 = vsel %vm442_vm15, %v444_v62, %v440_v4  ;;  %v383_v0 = vand.u32 2147483648, %v7425_v56  ;;  %v388_v1 = vmul.f32 %v7542_v37, %v7454_v30  ;;  %v6355_v9 = vld [vmem:[%s12927_s3 + $0x108] sm:$0xff] }
  0xd7   :  { %v451_v61 = vadd.f32 %v7600_v5, %v450_v31  ;;  %v532_v17 = vmul.f32 %v445_v43, %v7397_v34  ;;  %v459_v44 = vor.u32 1.1754944e-38, %v458_v48  ;;  %v375_v60 = vmul.f32 %v7493_v18, %v374_v36  ;;  %v7811_v48 = vpop.permute.xlu2 %540 }
  0xd8   :  { %v381_v25 = vand.u32 2147483647, %v7425_v56  ;;  %vm377_vm0 = vweird.f32 %v7425_v56  ;;  %v384_v54 = vor.u32 1.1754944e-38, %v383_v0  ;;  %v389_v14 = vsub.f32 1.0, %v388_v1  ;;  %4213 = vperm.xlu2 %6458, %v6308_v50   ;;  %v650_v0 = vld [vmem:[%s12930_s6] sm:$0xff] }
  0xd9   :  { %v455_v38 = vsel %vm454_vm13, %v7600_v5, %v451_v61  ;;  %600 = vmatpush.msrb.mxu2 %v532_v17  ;;  %v376_v19 = vadd.f32 %v7493_v18, %v375_v60  ;;  %v396_v41 = vand.u32 2147483647, %v7454_v30  ;;  %v398_v58 = vand.u32 2147483648, %v7454_v30  ;;  %vm379_vm14 = vmor %vm377_vm0, %vm378_vm12  ;;  %v13010_v17 = vld [vmem:[#allocation5_spill] sm:$0xff] }
  0xda   :  { %v460_v34 = vsel %vm7739_vm1, %v459_v44, %v455_v38  ;;  %v390_v56 = vmul.f32 %v7542_v37, %v389_v14  ;;  %vm393_vm8 = vweird.f32 %v7542_v37  ;;  %v313_v15 = vmul.f32 %v13003_v45, %v7382_v22 }
  0xdb   :  { %v533_v5 = vmul.f32 %v460_v34, %v7399_v35  ;;  %v380_v7 = vsel %vm379_vm14, %v7493_v18, %v376_v19  ;;  %vm382_vm5 = vcmp.eq.f32.partialorder %v381_v25, 8.507059e+37  ;;  %vm392_vm9 = vweird.f32 %v7454_v30  ;;  %v13014_v19 = vld [vmem:[#allocation7_spill] sm:$0xff] }
  0xdc   :  { %v385_v2 = vsel %vm382_vm5, %v384_v54, %v380_v7  ;;  %v391_v35 = vadd.f32 %v7542_v37, %v390_v56  ;;  %vm397_vm2 = vcmp.eq.f32.partialorder %v396_v41, 8.507059e+37  ;;  %v314_v42 = vsub.f32 1.0, %v313_v15  ;;  %vm394_vm6 = vmor %vm392_vm9, %vm393_vm8  ;;  %v651_v7 = vld [vmem:[%s12930_s6 + $0x8] sm:$0xff] }
  0xdd   :  { %620 = vmatpush.msrb.mxu3 %v533_v5  ;;  %v528_v40 = vmul.f32 %v385_v2, %v13004_v53  ;;  %v399_v63 = vor.u32 1.1754944e-38, %v398_v58  ;;  %v323_v24 = vand.u32 2147483648, %v7382_v22  ;;  %v328_v20 = vmul.f32 %v13006_v16, %v13005_v29  ;;  %v13020_v2 = vld [vmem:[#allocation6_spill] sm:$0xff] }
  0xde   :  { %v395_v18 = vsel %vm394_vm6, %v7542_v37, %v391_v35  ;;  %v315_v30 = vmul.f32 %v13003_v45, %v314_v42  ;;  %vm318_vm3 = vweird.f32 %v13003_v45  ;;  %v321_v6 = vand.u32 2147483647, %v7382_v22  ;;  %v6305_v37 = vld [vmem:[%s12927_s3 + $0xe0] sm:$0xff] }
  0xdf   :  { %601 = vmatpush.msrb.mxu2 %v528_v40  ;;  %v400_v51 = vsel %vm397_vm2, %v399_v63, %v395_v18  ;;  %v329_v49 = vsub.f32 1.0, %v328_v20  ;;  %vm317_vm10 = vweird.f32 %v7382_v22  ;;  %v338_v39 = vand.u32 2147483648, %v13005_v29  ;;  %v13026_v20 = vld [vmem:[#allocation10_spill] sm:$0xff] }
  0xe0   :  { %v529_v27 = vmul.f32 %v400_v51, %v13007_v46  ;;  %v316_v47 = vadd.f32 %v13003_v45, %v315_v30  ;;  %vm319_vm11 = vmor %vm317_vm10, %vm318_vm3  ;;  %v324_v21 = vor.u32 1.1754944e-38, %v323_v24  ;;  %vm333_vm15 = vweird.f32 %v13006_v16  ;;  %4198 = vperm.xlu2 %6458, %v6305_v37   ;;  %v7867_v51 = vld [vmem:[%s12926_s2 + $0x8] sm:$0xff]  ;;  %v7886_v46 = vpop.permute.xlu2 %679 }
  0xe1   :  { %v330_v52 = vmul.f32 %v13006_v16, %v329_v49  ;;  %v336_v32 = vand.u32 2147483647, %v13005_v29  ;;  %vm322_vm4 = vcmp.eq.f32.partialorder %v321_v6, 8.507059e+37  ;;  %vm332_vm1 = vweird.f32 %v13005_v29  ;;  %v7858_v6 = vld [vmem:[%s12926_s2] sm:$0xff]  ;;  %13033 = vst [vmem:[#allocation13_spill] sm:$0xff] %v7867_v51  ;;  %v7878_v49 = vld [vmem:[%s12926_s2 + $0x10] sm:$0xff] }
  0xe2   :  { %621 = vmatpush.msrb.mxu3 %v529_v27  ;;  %v320_v11 = vsel %vm319_vm11, %v13003_v45, %v316_v47  ;;  %vm334_vm12 = vmor %vm332_vm1, %vm333_vm15  ;;  %v339_v33 = vor.u32 1.1754944e-38, %v338_v39  ;;  %v633_v4 = vstv %s6009_s23  ;;  %v630_v36 = vstv %s7807_s24  ;;  %v13017_v45 = vld [vmem:[#allocation8_spill] sm:$0xff]  ;;  %13037 = vst [vmem:[#allocation15_spill] sm:$0xff] %v7878_v49 }
  0xe3   :  { %v325_v12 = vsel %vm322_vm4, %v324_v21, %v320_v11  ;;  %v331_v22 = vadd.f32 %v13006_v16, %v330_v52  ;;  %vm337_vm13 = vcmp.eq.f32.partialorder %v336_v32, 8.507059e+37  ;;  %v652_v1 = vstv %s7809_s5  ;;  %v7892_v11 = vpop.permute.xlu1 %669 }
  0xe4   :  { %v524_v10 = vmul.f32 %v325_v12, %v13008_v57  ;;  %v631_v44 = vmul.f32 %v630_v36, %v13010_v17  ;;  %v653_v25 = vmul.f32 %v652_v1, %v650_v0  ;;  %vm13011_vm0 = vcmask 1043456  }
  0xe5   :  { %v335_v23 = vsel %vm334_vm12, %v13006_v16, %v331_v22  ;;  %vm13012_vm14 = vmmov %vm13011_vm0  ;;  %vm13015_vm5 = vcmask 31744   ;;  %v632_v35 = vmul.f32 %v630_v36, %v13020_v2  ;;  %v654_v40 = vmul.f32 %v652_v1, %v651_v7  ;;  %v13023_v16 = vld [vmem:[#allocation9_spill] sm:$0xff] }
  0xe6   :  { %602 = vmatpush.msrb.mxu2 %v524_v10  ;;  %v340_v8 = vsel %vm337_vm13, %v339_v33, %v335_v23  ;;  %vm13013_vm8 = vmmov %vm13011_vm0  ;;  %v7902_v33 = vpop.permute.xlu0 %674 }
  0xe7   :  { %v525_v55 = vmul.f32 %v340_v8, %v13009_v3  ;;  %6007 = vmatmul.msk.f32.vlgmr.msrb.gmra.mxu2 %vm12957_vm7, %v7719_v26  ;;  %vm13016_vm9 = vmmov %vm13015_vm5 }
  0xe8   :  { %4792 = vperm.xlu2 %6458, %v6355_v9   ;;  %vm13018_vm2 = vmmov %vm13015_vm5  ;;  %v665_v39 = vpop.permute.xlu2 %664 }
  0xe9   :  { %622 = vmatpush.msrb.mxu3 %v525_v55  ;;  %vm13019_vm6 = vmmov %vm13018_vm2 }
  0xea   :  { %6008 = vmatmul.msk.f32.vlgmr.msrb.gmra.mxu3 %vm12957_vm7, %v7719_v26  ;;  %vm13021_vm3 = vmmov %vm13011_vm0 }
  0xeb   :  { %vm13024_vm10 = vmmov %vm13018_vm2 }
  0xec   :  { %vm13025_vm11 = vmmov %vm13018_vm2 }
  0xed   :  { %vm13027_vm15 = vmmov %vm13018_vm2 }
  0xee   :  { %vm13028_vm4 = vmmov %vm13018_vm2 }
  0xef   :  { %vm13029_vm1 = vmmov %vm13011_vm0 }
  0xf0   :  { %5386 = vperm.xlu2 %6458, %v6405_v13   ;;  %vm13030_vm12 = vmmov %vm13011_vm0 }
  0xf1   :  { %vm13031_vm13 = vmmov %vm13018_vm2 }
 0x14f   :  { %v564_v28 = vpop.f32.mrf.mxu0 }
 0x150   :  { %v565_v62 = vadd.f32 %v564_v28, %v7811_v48 }
 0x152   :  { %v634_v61 = vmul.f32 %v633_v4, %v565_v62 }
 0x153   :  { %v584_v31 = vpop.f32.mrf.mxu1 }
 0x154   :  { %v585_v59 = vadd.f32 %v584_v31, %v7811_v48 }
 0x156   :  { %v635_v43 = vmul.f32 %v633_v4, %v585_v59 }
 0x158   :  { %v642_v60 = vrot.slane %v635_v43, 4 }
 0x15a   :  { %v644_v38 = vsel %vm13011_vm0, %v634_v61, %v642_v60  ;;  %vm13032_vm0 = vmmov %vm13018_vm2 }
 0x15b   :  { %v648_v54 = vadd.f32 %v644_v38, %v631_v44 }
 0x15d   :  { %v7822_v14 = vadd.f32 %v653_v25, %v648_v54 }
 0x15f   :  { %684 = vst [vmem:[#allocation1] ss:$2 sm:$0xff] %v7822_v14 }
 0x166   :  { %v687_v50 = vld.sshfl [vmem:[#allocation1] sm:$0xff pattern:$0x75316420]  ;;  %v688_v34 = vld.sshfl [vmem:[#allocation1 + $0x8] sm:$0xff pattern:$0x75316420] }
 0x167   :  { %6015 = vmatpush.msk.msra.mxu0 %vm13012_vm14, %v687_v50  ;;  %6020 = vmatpush.msk.msra.mxu1 %vm13013_vm8, %v688_v34  ;;  %vm13034_vm14 = vmmov %vm13032_vm0 }
 0x168   :  { %6016 = vmatmul.msk.f32.vlgmr.msra.gmra.mxu0 %vm13015_vm5, %v13014_v19  ;;  %6021 = vmatmul.msk.f32.vlgmr.msra.gmra.mxu1 %vm13016_vm9, %v13014_v19  ;;  %vm13035_vm8 = vmmov %vm13032_vm0 }
 0x169   :  { %vm13036_vm5 = vmmov %vm13032_vm0 }
 0x16a   :  { %v604_v41 = vpop.f32.mrf.mxu2  ;;  %vm13038_vm9 = vmmov %vm13032_vm0 }
 0x16b   :  { %v605_v5 = vadd.f32 %v604_v41, %v7811_v48 }
 0x16d   :  { %v624_v58 = vpop.f32.mrf.mxu3  ;;  %v636_v42 = vmul.f32 %v633_v4, %v605_v5 }
 0x16e   :  { %v625_v56 = vadd.f32 %v624_v58, %v7811_v48 }
 0x170   :  { %6017 = vmatmul.msk.f32.gmra.mxu0 %vm13018_vm2, %v13017_v45  ;;  %6022 = vmatmul.msk.f32.gmra.mxu1 %vm13019_vm6, %v13017_v45  ;;  %v637_v15 = vmul.f32 %v633_v4, %v625_v56  ;;  %vm13039_vm2 = vmmov %vm13032_vm0 }
 0x171   :  { %vm13040_vm6 = vmmov %vm13032_vm0 }
 0x172   :  { %v643_v53 = vrot.slane %v637_v15, 4 }
 0x174   :  { %v645_v63 = vsel %vm13021_vm3, %v636_v42, %v643_v53 }
 0x175   :  { %v649_v24 = vadd.f32 %v645_v63, %v632_v35 }
 0x177   :  { %v7842_v29 = vadd.f32 %v654_v40, %v649_v24 }
 0x178   :  { %6018 = vmatmul.msk.f32.gmra.mxu0 %vm13024_vm10, %v13023_v16  ;;  %6023 = vmatmul.msk.f32.gmra.mxu1 %vm13025_vm11, %v13023_v16 }
 0x179   :  { %13022 = vst [vmem:[#allocation16_spill] sm:$0xff] %v7842_v29 }
 0x17a   :  { %686 = vst [vmem:[#allocation1 + $0x10] ss:$2 sm:$0xff] %v7842_v29 }
 0x180   :  { %6019 = vmatmul.msk.f32.gmra.mxu0 %vm13027_vm15, %v13026_v20  ;;  %6024 = vmatmul.msk.f32.gmra.mxu1 %vm13028_vm4, %v13026_v20 }
 0x181   :  { %v689_v18 = vld.sshfl [vmem:[#allocation1 + $0x10] sm:$0xff pattern:$0x75316420]  ;;  %v690_v30 = vld.sshfl [vmem:[#allocation1 + $0x18] sm:$0xff pattern:$0x75316420] }
 0x182   :  { %6025 = vmatpush.msk.msra.mxu2 %vm13029_vm1, %v689_v18  ;;  %6030 = vmatpush.msk.msra.mxu3 %vm13030_vm12, %v690_v30 }
 0x183   :  { %6026 = vmatmul.msk.f32.vlgmr.msra.gmra.mxu2 %vm13031_vm13, %v7858_v6  ;;  %6031 = vmatmul.msk.f32.vlgmr.msra.gmra.mxu3 %vm13032_vm0, %v7858_v6 }
 0x18b   :  { %6027 = vmatmul.msk.f32.gmra.mxu2 %vm13034_vm14, %v7867_v51  ;;  %6032 = vmatmul.msk.f32.gmra.mxu3 %vm13035_vm8, %v7867_v51 }
 0x193   :  { %6028 = vmatmul.msk.f32.gmra.mxu2 %vm13036_vm5, %v13023_v16  ;;  %6033 = vmatmul.msk.f32.gmra.mxu3 %vm13038_vm9, %v7878_v49 }
 0x19b   :  { %6029 = vmatmul.msk.f32.gmra.mxu2 %vm13039_vm2, %v13026_v20  ;;  %6034 = vmatmul.msk.f32.gmra.mxu3 %vm13040_vm6, %v13026_v20 }
 0x1e5   :  { %v716_v27 = vpop.f32.mrf.mxu0  ;;  %v745_v47 = vpop.f32.mrf.mxu1 }
 0x1e6   :  { %v7888_v37 = vadd.f32 %v716_v27, %v665_v39  ;;  %v7890_v32 = vadd.f32 %v745_v47, %v665_v39 }
 0x1e8   :  { %v6035_v12 = vmul.f32 -1.442695, %v7888_v37  ;;  %v6036_v57 = vmul.f32 -1.442695, %v7890_v32 }
 0x1ea   :  { %6523 = vpow2.f32 %v6035_v12 }
 0x1eb   :  { %6525 = vpow2.f32 %v6036_v57 }
 0x1ed   :  { %v719_v21 = vpop.f32.mrf.mxu0  ;;  %v748_v52 = vpop.f32.mrf.mxu1 }
 0x1ee   :  { %v7896_v22 = vadd.f32 %v719_v21, %v7892_v11  ;;  %v7900_v10 = vadd.f32 %v748_v52, %v7892_v11 }
 0x1f0   :  { %v6039_v23 = vmul.f32 -1.442695, %v7896_v22  ;;  %v6040_v13 = vmul.f32 -1.442695, %v7900_v10  ;;  %v6524_v31 = vpop.eup %6523 }
 0x1f1   :  { %v6526_v4 = vpop.eup %6525  ;;  %v7914_v59 = vadd.f32 1.0, %v6524_v31 }
 0x1f2   :  { %6527 = vpow2.f32 %v6039_v23  ;;  %v7916_v61 = vadd.f32 1.0, %v6526_v4 }
 0x1f3   :  { %v890_v53 = vand.u32 2147483648, %v7914_v59  ;;  %vm884_vm3 = vweird.f32 %v7914_v59 }
 0x1f4   :  { %vm899_vm15 = vweird.f32 %v7916_v61 }
 0x1f5   :  { %v722_v8 = vpop.f32.mrf.mxu0  ;;  %v751_v3 = vpop.f32.mrf.mxu1  ;;  %v7973_v23 = vor.u32 1.1754944e-38, %v890_v53 }
 0x1f6   :  { %v7906_v55 = vadd.f32 %v722_v8, %v7902_v33  ;;  %v7909_v9 = vadd.f32 %v751_v3, %v7902_v33 }
 0x1f8   :  { %v6043_v28 = vmul.f32 -1.442695, %v7906_v55  ;;  %v6044_v62 = vmul.f32 -1.442695, %v7909_v9  ;;  %v6528_v36 = vpop.eup %6527 }
 0x1f9   :  { %v7921_v44 = vadd.f32 1.0, %v6528_v36 }
 0x1fa   :  { %6529 = vpow2.f32 %v6043_v28 }
 0x1fb   :  { %6531 = vpow2.f32 %v6040_v13  ;;  %v950_v13 = vand.u32 2147483648, %v7921_v44  ;;  %vm944_vm4 = vweird.f32 %v7921_v44 }
 0x1fc   :  { %6533 = vpow2.f32 %v6044_v62 }
 0x1fd   :  { %6535 = vrcp.f32 %v7914_v59  ;;  %v725_v34 = vpop.f32.mrf.mxu0  ;;  %v754_v41 = vpop.f32.mrf.mxu1 }
 0x1fe   :  { %6537 = vrcp.f32 %v7916_v61  ;;  %v7943_v45 = vadd.f32 %v725_v34, %v7886_v46  ;;  %v7952_v35 = vadd.f32 %v754_v41, %v7886_v46  ;;  %v7992_v34 = vor.u32 1.1754944e-38, %v950_v13 }
 0x200   :  { %v6530_v43 = vpop.eup %6529  ;;  %v6047_v40 = vmul.f32 -1.442695, %v7943_v45  ;;  %v6048_v18 = vmul.f32 -1.442695, %v7952_v35 }
 0x201   :  { %v6532_v0 = vpop.eup %6531  ;;  %v7919_v1 = vadd.f32 1.0, %v6530_v43 }
 0x202   :  { %v6534_v17 = vpop.eup %6533  ;;  %v7924_v60 = vadd.f32 1.0, %v6532_v0 }
 0x203   :  { %6539 = vrcp.f32 %v7919_v1  ;;  %v7927_v25 = vadd.f32 1.0, %v6534_v17  ;;  %v7930_v50 = vpop.eup %6535  ;;  %vm1004_vm14 = vweird.f32 %v7919_v1 }
 0x204   :  { %6541 = vrcp.f32 %v7921_v44  ;;  %v7933_v19 = vpop.eup %6537  ;;  %v880_v58 = vmul.f32 %v7930_v50, %v7914_v59  ;;  %vm885_vm10 = vweird.f32 %v7930_v50  ;;  %v965_v41 = vand.u32 2147483648, %v7924_v60 }
 0x205   :  { %6543 = vrcp.f32 %v7924_v60  ;;  %v895_v7 = vmul.f32 %v7933_v19, %v7916_v61  ;;  %vm900_vm11 = vweird.f32 %v7933_v19  ;;  %vm959_vm1 = vweird.f32 %v7924_v60  ;;  %vm8025_vm0 = vmor %vm884_vm3, %vm885_vm10 }
 0x206   :  { %v774_v38 = vpop.f32.mrf.mxu2  ;;  %v803_v54 = vpop.f32.mrf.mxu3  ;;  %6545 = vrcp.f32 %v7927_v25  ;;  %v881_v24 = vsub.f32 1.0, %v880_v58  ;;  %vm8038_vm8 = vmor %vm899_vm15, %vm900_vm11  ;;  %vm1019_vm11 = vweird.f32 %v7927_v25 }
 0x207   :  { %v7940_v56 = vadd.f32 %v774_v38, %v665_v39  ;;  %v7949_v2 = vadd.f32 %v803_v54, %v665_v39  ;;  %6547 = vpow2.f32 %v6047_v40  ;;  %v896_v21 = vsub.f32 1.0, %v895_v7 }
 0x208   :  { %6549 = vpow2.f32 %v6048_v18  ;;  %v882_v43 = vmul.f32 %v7930_v50, %v881_v24  ;;  %v948_v54 = vand.u32 2147483647, %v7921_v44 }
 0x209   :  { %v7938_v5 = vpop.eup %6539  ;;  %v6037_v47 = vmul.f32 -1.442695, %v7940_v56  ;;  %v6038_v12 = vmul.f32 -1.442695, %v7949_v2  ;;  %v897_v0 = vmul.f32 %v7933_v19, %v896_v21 }
 0x20a   :  { %v7945_v15 = vpop.eup %6541  ;;  %v1000_v20 = vmul.f32 %v7938_v5, %v7919_v1  ;;  %v8005_v18 = vadd.f32 %v7930_v50, %v882_v43  ;;  %vm1005_vm13 = vweird.f32 %v7938_v5  ;;  %v1025_v43 = vand.u32 2147483648, %v7927_v25 }
 0x20b   :  { %v7954_v42 = vpop.eup %6543  ;;  %v940_v27 = vmul.f32 %v7945_v15, %v7921_v44  ;;  %6551 = vpow2.f32 %v6037_v47  ;;  %vm945_vm12 = vweird.f32 %v7945_v15  ;;  %vm8059_vm9 = vmor %vm1004_vm14, %vm1005_vm13 }
 0x20c   :  { %v7962_v30 = vpop.eup %6545  ;;  %v955_v52 = vmul.f32 %v7954_v42, %v7924_v60  ;;  %v1001_v28 = vsub.f32 1.0, %v1000_v20  ;;  %6553 = vpow2.f32 %v6038_v12  ;;  %v1008_v12 = vand.u32 2147483647, %v7919_v1  ;;  %vm8073_vm6 = vmor %vm944_vm4, %vm945_vm12 }
 0x20d   :  { %v1015_v62 = vmul.f32 %v7962_v30, %v7927_v25  ;;  %v941_v31 = vsub.f32 1.0, %v940_v27  ;;  %v6548_v38 = vpop.eup %6547  ;;  %v8008_v27 = vadd.f32 %v7933_v19, %v897_v0  ;;  %vm960_vm5 = vweird.f32 %v7954_v42 }
 0x20e   :  { %v777_v63 = vpop.f32.mrf.mxu2  ;;  %v806_v57 = vpop.f32.mrf.mxu3  ;;  %v956_v17 = vsub.f32 1.0, %v955_v52  ;;  %v1002_v7 = vmul.f32 %v7938_v5, %v1001_v28  ;;  %v7998_v40 = vadd.f32 1.0, %v6548_v38  ;;  %v8013_v52 = vor.u32 1.1754944e-38, %v965_v41  ;;  %vm8090_vm10 = vmor %vm959_vm1, %vm960_vm5 }
 0x20f   :  { %v7968_v39 = vadd.f32 %v777_v63, %v7892_v11  ;;  %v7986_v36 = vadd.f32 %v806_v57, %v7892_v11  ;;  %v6550_v58 = vpop.eup %6549  ;;  %v963_v11 = vand.u32 2147483647, %v7924_v60  ;;  %v1016_v53 = vsub.f32 1.0, %v1015_v62 }
 0x210   :  { %v942_v63 = vmul.f32 %v7945_v15, %v941_v31  ;;  %v8001_v24 = vadd.f32 1.0, %v6550_v58  ;;  %v957_v47 = vmul.f32 %v7954_v42, %v956_v17  ;;  %v1003_v13 = vadd.f32 %v7938_v5, %v1002_v7 }
 0x211   :  { %v6041_v4 = vmul.f32 -1.442695, %v7968_v39  ;;  %v6042_v20 = vmul.f32 -1.442695, %v7986_v36  ;;  %v6552_v21 = vpop.eup %6551  ;;  %v1010_v28 = vand.u32 2147483648, %v7919_v1  ;;  %v1017_v62 = vmul.f32 %v7962_v30, %v1016_v53 }
 0x212   :  { %v6554_v57 = vpop.eup %6553  ;;  %v8043_v38 = vadd.f32 %v7954_v42, %v957_v47  ;;  %v1023_v41 = vand.u32 2147483647, %v7927_v25  ;;  %v8047_v1 = vadd.f32 1.0, %v6552_v21  ;;  %vm8063_vm2 = vcmp.eq.f32.partialorder %v1008_v12, 8.507059e+37 }
 0x213   :  { %6555 = vpow2.f32 %v6041_v4  ;;  %v8030_v4 = vadd.f32 %v7945_v15, %v942_v63  ;;  %v8067_v47 = vadd.f32 1.0, %v6554_v57  ;;  %v1007_v7 = vsel %vm8059_vm9, %v7938_v5, %v1003_v13 }
 0x214   :  { %6557 = vrcp.f32 %v7998_v40  ;;  %v1011_v12 = vor.u32 1.1754944e-38, %v1010_v28  ;;  %v1018_v8 = vadd.f32 %v7962_v30, %v1017_v62  ;;  %vm1020_vm3 = vweird.f32 %v7962_v30 }
 0x215   :  { %6559 = vrcp.f32 %v8001_v24  ;;  %v947_v16 = vsel %vm8073_vm6, %v7945_v15, %v8030_v4  ;;  %v1026_v5 = vor.u32 1.1754944e-38, %v1025_v43  ;;  %v962_v28 = vsel %vm8090_vm10, %v7954_v42, %v8043_v38  ;;  %vm8116_vm1 = vmor %vm1019_vm11, %vm1020_vm3 }
 0x216   :  { %6561 = vpow2.f32 %v6042_v20  ;;  %v780_v0 = vpop.f32.mrf.mxu2  ;;  %v809_v21 = vpop.f32.mrf.mxu3  ;;  %vm8100_vm15 = vcmp.eq.f32.partialorder %v1023_v41, 8.507059e+37  ;;  %vm8108_vm4 = vcmp.eq.f32.partialorder %v948_v54, 8.507059e+37  ;;  %v1012_v43 = vsel %vm8063_vm2, %v1011_v12, %v1007_v7 }
 0x217   :  { %6563 = vrcp.f32 %v8047_v1  ;;  %v1068_v41 = vand.u32 2147483647, %v7998_v40  ;;  %vm8124_vm12 = vcmp.eq.f32.partialorder %v963_v11, 8.507059e+37  ;;  %v1070_v7 = vand.u32 2147483648, %v7998_v40 }
 0x218   :  { %6565 = vrcp.f32 %v8067_v47  ;;  %v8133_v20 = vadd.f32 %v780_v0, %v7902_v33  ;;  %v13061_v12 = vand.u32 2147483647, %v7914_v59  ;;  %v1083_v11 = vand.u32 2147483647, %v8001_v24 }
 0x219   :  { %v6556_v58 = vpop.eup %6555  ;;  %vm1064_vm2 = vweird.f32 %v7998_v40  ;;  %vm8153_vm6 = vcmp.eq.f32.partialorder %v1068_v41, 8.507059e+37  ;;  %vm1079_vm3 = vweird.f32 %v8001_v24 }
 0x21a   :  { %v6558_v3 = vpop.eup %6557  ;;  %v8106_v4 = vadd.f32 1.0, %v6556_v58  ;;  %v1022_v58 = vsel %vm8116_vm1, %v7962_v30, %v1018_v8  ;;  %vm8137_vm13 = vcmp.eq.f32.partialorder %v13061_v12, 8.507059e+37  ;;  %v13064_v30 = vand.u32 2147483647, %v7916_v61 }
 0x21b   :  { %v6560_v57 = vpop.eup %6559  ;;  %v1060_v13 = vmul.f32 %v6558_v3, %v7998_v40  ;;  %vm1065_vm14 = vweird.f32 %v6558_v3  ;;  %vm1084_vm1 = vcmp.eq.f32.partialorder %v1083_v11, 8.507059e+37  ;;  %v13069_v11 = vand.u32 2147483648, %v7916_v61 }
 0x21c   :  { %v1075_v62 = vmul.f32 %v6560_v57, %v8001_v24  ;;  %v6562_v53 = vpop.eup %6561  ;;  %vm8145_vm5 = vcmp.eq.f32.partialorder %v13064_v30, 8.507059e+37  ;;  %vm1080_vm9 = vweird.f32 %v6560_v57  ;;  %6567 = vrcp.f32 %v8106_v4  ;;  %vm1066_vm10 = vmor %vm1064_vm2, %vm1065_vm14 }
 0x21d   :  { %v1061_v38 = vsub.f32 1.0, %v1060_v13  ;;  %v1085_v13 = vand.u32 2147483648, %v8001_v24  ;;  %v8150_v59 = vadd.f32 1.0, %v6562_v53  ;;  %v8158_v30 = vpop.eup %6563  ;;  %v6045_v53 = vmul.f32 -1.442695, %v8133_v20  ;;  %vm1081_vm11 = vmor %vm1079_vm3, %vm1080_vm9 }
 0x21e   :  { %v1076_v63 = vsub.f32 1.0, %v1075_v62  ;;  %v812_v12 = vpop.f32.mrf.mxu3  ;;  %v8165_v40 = vpop.eup %6565  ;;  %v906_v15 = vor.u32 1.1754944e-38, %v13069_v11 }
 0x21f   :  { %v1062_v60 = vmul.f32 %v6558_v3, %v1061_v38  ;;  %v783_v38 = vpop.f32.mrf.mxu2  ;;  %v1086_v49 = vor.u32 1.1754944e-38, %v1085_v13  ;;  %v8172_v51 = vadd.f32 %v812_v12, %v7886_v46  ;;  %6569 = vrcp.f32 %v8150_v59 }
 0x220   :  { %v1077_v0 = vmul.f32 %v6560_v57, %v1076_v63  ;;  %v1071_v63 = vor.u32 1.1754944e-38, %v1070_v7  ;;  %v8169_v24 = vadd.f32 %v783_v38, %v7886_v46  ;;  %6571 = vpow2.f32 %v6045_v53 }
 0x221   :  { %v1063_v62 = vadd.f32 %v6558_v3, %v1062_v60  ;;  %v8163_v60 = vadd.f32 %v809_v21, %v7902_v33  ;;  %v1027_v33 = vsel %vm8100_vm15, %v1026_v5, %v1022_v58  ;;  %v952_v46 = vsel %vm8108_vm4, %v7992_v34, %v947_v16 }
 0x222   :  { %v1078_v29 = vadd.f32 %v6560_v57, %v1077_v0  ;;  %v8180_v13 = vpop.eup %6567  ;;  %v6050_v5 = vmul.f32 -1.442695, %v8172_v51  ;;  %v1128_v61 = vmul.f32 %v1027_v33, %v7909_v9  ;;  %v910_v34 = vmul.f32 %v8158_v30, %v8047_v1 }
 0x223   :  { %v1067_v41 = vsel %vm1066_vm10, %v6558_v3, %v1063_v62  ;;  %v920_v38 = vand.u32 2147483648, %v8047_v1  ;;  %v980_v53 = vand.u32 2147483648, %v8106_v4  ;;  %v933_v33 = vand.u32 2147483647, %v8067_v47 }
 0x224   :  { %v1072_v7 = vsel %vm8153_vm6, %v1071_v63, %v1067_v41  ;;  %v1082_v0 = vsel %vm1081_vm11, %v6560_v57, %v1078_v29  ;;  %v6046_v29 = vmul.f32 -1.442695, %v8163_v60  ;;  %v6049_v57 = vmul.f32 -1.442695, %v8169_v24 }
 0x225   :  { %v1131_v3 = vmul.f32 %v1072_v7, %v7943_v45  ;;  %v1087_v21 = vsel %vm1084_vm1, %v1086_v49, %v1082_v0  ;;  %v967_v49 = vsel %vm8124_vm12, %v8013_v52, %v962_v28  ;;  %v1127_v45 = vmul.f32 %v1012_v43, %v7906_v55  ;;  %v8216_v9 = vpop.eup %6569 }
 0x226   :  { %v1132_v62 = vmul.f32 %v1087_v21, %v7952_v35  ;;  %v13070_v35 = vsel %vm8025_vm0, %v7930_v50, %v8005_v18  ;;  %6573 = vpow2.f32 %v6046_v29  ;;  %v13071_v55 = vsel %vm8038_vm8, %v7933_v19, %v8008_v27  ;;  %v6572_v31 = vpop.eup %6571 }
 0x227   :  { %1147 = vmatpush.msrb.mxu0 %v1131_v3  ;;  %v892_v16 = vsel %vm8137_vm13, %v7973_v23, %v13070_v35  ;;  %v907_v52 = vsel %vm8145_vm5, %v906_v15, %v13071_v55  ;;  %v1123_v50 = vmul.f32 %v952_v46, %v7896_v22  ;;  %v970_v23 = vmul.f32 %v8180_v13, %v8106_v4 }
 0x228   :  { %1167 = vmatpush.msrb.mxu1 %v1132_v62  ;;  %6575 = vpow2.f32 %v6049_v57  ;;  %v1124_v18 = vmul.f32 %v967_v49, %v7900_v10  ;;  %v1119_v17 = vmul.f32 %v892_v16, %v7888_v37  ;;  %v925_v19 = vmul.f32 %v8165_v40, %v8067_v47 }
 0x229   :  { %1148 = vmatpush.msrb.mxu0 %v1127_v45  ;;  %6577 = vpow2.f32 %v6050_v5  ;;  %v1120_v22 = vmul.f32 %v907_v52, %v7890_v32  ;;  %v911_v27 = vsub.f32 1.0, %v910_v34  ;;  %v8223_v28 = vadd.f32 1.0, %v6572_v31 }
 0x22a   :  { %1168 = vmatpush.msrb.mxu1 %v1128_v61  ;;  %v971_v25 = vsub.f32 1.0, %v970_v23  ;;  %v985_v10 = vmul.f32 %v8216_v9, %v8150_v59  ;;  %v926_v54 = vsub.f32 1.0, %v925_v19  ;;  %vm914_vm0 = vweird.f32 %v8047_v1 }
 0x22b   :  { %1149 = vmatpush.msrb.mxu0 %v1123_v50  ;;  %6579 = vrcp.f32 %v8223_v28  ;;  %v912_v44 = vmul.f32 %v8158_v30, %v911_v27  ;;  %v918_v63 = vand.u32 2147483647, %v8047_v1  ;;  %vm915_vm8 = vweird.f32 %v8158_v30 }
 0x22c   :  { %1169 = vmatpush.msrb.mxu1 %v1124_v18  ;;  %v6574_v43 = vpop.eup %6573  ;;  %v972_v42 = vmul.f32 %v8180_v13, %v971_v25  ;;  %v986_v12 = vsub.f32 1.0, %v985_v10  ;;  %v935_v3 = vand.u32 2147483648, %v8067_v47  ;;  %vm975_vm15 = vweird.f32 %v8180_v13  ;;  %vm8271_vm12 = vmor %vm914_vm0, %vm915_vm8 }
 0x22d   :  { %1150 = vmatpush.msrb.mxu0 %v1119_v17  ;;  %v8230_v58 = vadd.f32 1.0, %v6574_v43  ;;  %v8250_v0 = vadd.f32 %v8158_v30, %v912_v44  ;;  %v8262_v62 = vor.u32 1.1754944e-38, %v920_v38  ;;  %vm974_vm4 = vweird.f32 %v8106_v4 }
 0x22e   :  { %1170 = vmatpush.msrb.mxu1 %v1120_v22  ;;  %6051 = vmatmul.msk.f32.vlgmr.msrb.gmra.mxu0 %vm12957_vm7, %v7719_v26  ;;  %v6576_v37 = vpop.eup %6575  ;;  %v8256_v21 = vadd.f32 %v8180_v13, %v972_v42  ;;  %v978_v29 = vand.u32 2147483647, %v8106_v4  ;;  %v987_v57 = vmul.f32 %v8216_v9, %v986_v12  ;;  %v981_v45 = vor.u32 1.1754944e-38, %v980_v53  ;;  %vm8285_vm13 = vmor %vm974_vm4, %vm975_vm15 }
 0x22f   :  { %6052 = vmatmul.msk.f32.vlgmr.msrb.gmra.mxu1 %vm12957_vm7, %v7719_v26  ;;  %v6578_v32 = vpop.eup %6577  ;;  %v8235_v8 = vadd.f32 1.0, %v6576_v37  ;;  %6581 = vrcp.f32 %v8230_v58  ;;  %v927_v26 = vmul.f32 %v8165_v40, %v926_v54  ;;  %v1040_v35 = vand.u32 2147483648, %v8223_v28 }
 0x230   :  { %v8245_v41 = vadd.f32 1.0, %v6578_v32  ;;  %v917_v4 = vsel %vm8271_vm12, %v8158_v30, %v8250_v0  ;;  %v993_v61 = vand.u32 2147483647, %v8150_v59  ;;  %v995_v34 = vand.u32 2147483648, %v8150_v59 }
 0x231   :  { %6583 = vrcp.f32 %v8235_v8  ;;  %v8247_v7 = vpop.eup %6579  ;;  %v8276_v49 = vadd.f32 %v8165_v40, %v927_v26  ;;  %v977_v52 = vsel %vm8285_vm13, %v8180_v13, %v8256_v21  ;;  %vm989_vm14 = vweird.f32 %v8150_v59 }
 0x232   :  { %v1030_v46 = vmul.f32 %v8247_v7, %v8223_v28  ;;  %6585 = vrcp.f32 %v8245_v41  ;;  %vm990_vm5 = vweird.f32 %v8216_v9  ;;  %vm930_vm9 = vweird.f32 %v8165_v40 }
 0x233   :  { %vm8302_vm2 = vcmp.eq.f32.partialorder %v978_v29, 8.507059e+37  ;;  %v8307_v31 = vadd.f32 %v8216_v9, %v987_v57  ;;  %vm1034_vm6 = vweird.f32 %v8223_v28  ;;  %v1038_v13 = vand.u32 2147483647, %v8223_v28 }
 0x234   :  { %v1031_v5 = vsub.f32 1.0, %v1030_v46  ;;  %vm1035_vm3 = vweird.f32 %v8247_v7  ;;  %v1041_v27 = vor.u32 1.1754944e-38, %v1040_v35  ;;  %vm1049_vm11 = vweird.f32 %v8230_v58 }
 0x235   :  { %v8267_v11 = vpop.eup %6581  ;;  %v1100_v10 = vand.u32 2147483648, %v8235_v8  ;;  %vm8318_vm1 = vcmp.eq.f32.partialorder %v918_v63, 8.507059e+37  ;;  %v1053_v32 = vand.u32 2147483647, %v8230_v58  ;;  %v1098_v42 = vand.u32 2147483647, %v8235_v8  ;;  %vm8326_vm8 = vmor %vm1034_vm6, %vm1035_vm3 }
 0x236   :  { %v1045_v55 = vmul.f32 %v8267_v11, %v8230_v58  ;;  %v1032_v50 = vmul.f32 %v8247_v7, %v1031_v5  ;;  %vm1050_vm15 = vweird.f32 %v8267_v11  ;;  %v1055_v63 = vand.u32 2147483648, %v8230_v58  ;;  %v8447_v5 = vld [vmem:[%s12926_s2 + $0x18] sm:$0xff] }
 0x237   :  { %v6584_v16 = vpop.eup %6583  ;;  %vm1094_vm4 = vweird.f32 %v8235_v8  ;;  %v1115_v28 = vand.u32 2147483648, %v8245_v41  ;;  %v1101_v46 = vor.u32 1.1754944e-38, %v1100_v10  ;;  %v1113_v57 = vand.u32 2147483647, %v8245_v41  ;;  %vm8341_vm7 = vmor %vm1049_vm11, %vm1050_vm15 }
 0x238   :  { %v1090_v23 = vmul.f32 %v6584_v16, %v8235_v8  ;;  %v1046_v17 = vsub.f32 1.0, %v1045_v55  ;;  %v6586_v19 = vpop.eup %6585  ;;  %v1033_v22 = vadd.f32 %v8247_v7, %v1032_v50  ;;  %vm1095_vm0 = vweird.f32 %v6584_v16 }
 0x239   :  { %v1105_v37 = vmul.f32 %v6586_v19, %v8245_v41  ;;  %vm1096_vm13 = vmor %vm1094_vm4, %vm1095_vm0  ;;  %vm1110_vm6 = vweird.f32 %v6586_v19  ;;  %vm1039_vm3 = vcmp.eq.f32.partialorder %v1038_v13, 8.507059e+37  ;;  %vm1109_vm10 = vweird.f32 %v8245_v41 }
 0x23a   :  { %v1091_v25 = vsub.f32 1.0, %v1090_v23  ;;  %v1047_v43 = vmul.f32 %v8267_v11, %v1046_v17  ;;  %v1037_v53 = vsel %vm8326_vm8, %v8247_v7, %v1033_v22  ;;  %vm1099_vm8 = vcmp.eq.f32.partialorder %v1098_v42, 8.507059e+37  ;;  %vm8350_vm0 = vmor %vm989_vm14, %vm990_vm5 }
 0x23b   :  { %v1106_v26 = vsub.f32 1.0, %v1105_v37  ;;  %v1042_v7 = vsel %vm1039_vm3, %v1041_v27, %v1037_v53  ;;  %v1056_v50 = vor.u32 1.1754944e-38, %v1055_v63  ;;  %vm1111_vm11 = vmor %vm1109_vm10, %vm1110_vm6  ;;  %v1116_v23 = vor.u32 1.1754944e-38, %v1115_v28  ;;  %v13102_v28 = vld [vmem:[#allocation16_spill] sm:$0xff] }
 0x23c   :  { %v1092_v44 = vmul.f32 %v6584_v16, %v1091_v25  ;;  %v1048_v12 = vadd.f32 %v8267_v11, %v1047_v43  ;;  %v992_v13 = vsel %vm8350_vm0, %v8216_v9, %v8307_v31  ;;  %vm1054_vm14 = vcmp.eq.f32.partialorder %v1053_v32, 8.507059e+37 }
 0x23d   :  { %v1107_v29 = vmul.f32 %v6586_v19, %v1106_v26  ;;  %vm1114_vm5 = vcmp.eq.f32.partialorder %v1113_v57, 8.507059e+37  ;;  %v922_v9 = vsel %vm8318_vm1, %v8262_v62, %v917_v4  ;;  %v936_v15 = vor.u32 1.1754944e-38, %v935_v3  ;;  %v6059_v26 = vld [vmem:[%s12930_s6 + $0x18] sm:$0xff] }
 0x23e   :  { %v1093_v21 = vadd.f32 %v6584_v16, %v1092_v44  ;;  %v1052_v58 = vsel %vm8341_vm7, %v8267_v11, %v1048_v12  ;;  %vm13086_vm7 = vweird.f32 %v8067_v47  ;;  %vm934_vm12 = vcmp.eq.f32.partialorder %v933_v33, 8.507059e+37  ;;  %v13099_v44 = vld [vmem:[#allocation15_spill] sm:$0xff] }
 0x23f   :  { %v1108_v55 = vadd.f32 %v6586_v19, %v1107_v29  ;;  %vm8369_vm15 = vmor %vm13086_vm7, %vm930_vm9  ;;  %vm994_vm9 = vcmp.eq.f32.partialorder %v993_v61, 8.507059e+37  ;;  %v1218_v33 = vstv %s8407_s13  ;;  %v1241_v4 = vstv %s8409_s14  ;;  %s6399_s14 = sld [smem:[#allocation2 + $0x21]] }
 0x240   :  { %v1097_v35 = vsel %vm1096_vm13, %v6584_v16, %v1093_v21  ;;  %v982_v16 = vsel %vm8302_vm2, %v981_v45, %v977_v52  ;;  %v1129_v45 = vmul.f32 %v1042_v7, %v8133_v20  ;;  %v1057_v52 = vsel %vm1054_vm14, %v1056_v50, %v1052_v58 }
 0x241   :  { %v1102_v1 = vsel %vm1099_vm8, %v1101_v46, %v1097_v35  ;;  %v1112_v17 = vsel %vm1111_vm11, %v6586_v19, %v1108_v55  ;;  %v932_v31 = vsel %vm8369_vm15, %v8165_v40, %v8276_v49  ;;  %v1130_v0 = vmul.f32 %v1057_v52, %v8163_v60  ;;  %v6058_v49 = vld [vmem:[%s12930_s6 + $0x10] sm:$0xff] }
 0x242   :  { %v1133_v41 = vmul.f32 %v1102_v1, %v8169_v24  ;;  %v996_v24 = vor.u32 1.1754944e-38, %v995_v34  ;;  %v1117_v18 = vsel %vm1114_vm5, %v1116_v23, %v1112_v17  ;;  %v1125_v34 = vmul.f32 %v982_v16, %v7968_v39  ;;  %v8401_v39 = vld [vmem:[%s12928_s4] sm:$0xf]  ;;  %v8474_v1 = vpop.permute.xlu0 %1268 }
 0x243   :  { %v1134_v20 = vmul.f32 %v1117_v18, %v8172_v51  ;;  %v1121_v40 = vmul.f32 %v922_v9, %v7940_v56  ;;  %v937_v62 = vsel %vm934_vm12, %v936_v15, %v932_v31  ;;  %vm13089_vm2 = vcmask 261120  }
 0x244   :  { %1187 = vmatpush.msrb.mxu2 %v1133_v41  ;;  %v997_v30 = vsel %vm994_vm9, %v996_v24, %v992_v13  ;;  %v1122_v51 = vmul.f32 %v937_v62, %v7949_v2  ;;  %vm13090_vm10 = vmmov %vm13089_vm2  ;;  %v1221_v2 = vstv %s6056_s12  ;;  %v1219_v22 = vmul.f32 %v1218_v33, %v7822_v14  ;;  %v13096_v14 = vld [vmem:[#allocation13_spill] sm:$0xff]  ;;  %v8485_v13 = vpop.permute.xlu2 %1258 }
 0x245   :  { %1207 = vmatpush.msrb.mxu3 %v1134_v20  ;;  %v1126_v59 = vmul.f32 %v997_v30, %v7986_v36  ;;  %v1242_v27 = vmul.f32 %v6058_v49, %v1241_v4  ;;  %vm13091_vm1 = vcmask 1043456   ;;  %vm13094_vm6 = vcmask 31744   ;;  %v8496_v20 = vpop.permute.xlu1 %1263 }
 0x246   :  { %1188 = vmatpush.msrb.mxu2 %v1129_v45  ;;  %vm13092_vm4 = vmmov %vm13091_vm1  ;;  %v1220_v46 = vmul.f32 %v1218_v33, %v13102_v28  ;;  %v1243_v29 = vmul.f32 %v6059_v26, %v1241_v4 }
 0x247   :  { %1208 = vmatpush.msrb.mxu3 %v1130_v0  ;;  %vm13093_vm13 = vmmov %vm13091_vm1 }
 0x248   :  { %1189 = vmatpush.msrb.mxu2 %v1125_v34  ;;  %vm13095_vm3 = vmmov %vm13094_vm6 }
 0x249   :  { %1209 = vmatpush.msrb.mxu3 %v1126_v59  ;;  %vm13097_vm8 = vmmov %vm13095_vm3 }
 0x24a   :  { %1190 = vmatpush.msrb.mxu2 %v1121_v40  ;;  %vm13098_vm0 = vmmov %vm13095_vm3 }
 0x24b   :  { %6053 = vmatmul.msk.f32.vlgmr.msrb.gmra.mxu2 %vm13089_vm2, %v8401_v39  ;;  %1210 = vmatpush.msrb.mxu3 %v1122_v51  ;;  %vm13100_vm11 = vmmov %vm13098_vm0 }
 0x24c   :  { %6054 = vmatmul.msk.f32.vlgmr.msrb.gmra.mxu3 %vm13090_vm10, %v8401_v39  ;;  %vm13101_vm14 = vmmov %vm13098_vm0 }
 0x24d   :  { %vm13103_vm5 = vmmov %vm13091_vm1 }
 0x24e   :  { %vm13104_vm7 = vmmov %vm13098_vm0 }
 0x24f   :  { %vm13105_vm15 = vmmov %vm13098_vm0 }
 0x250   :  { %vm13106_vm9 = vmmov %vm13091_vm1 }
 0x251   :  { %vm13107_vm12 = vmmov %vm13091_vm1 }
 0x252   :  { %vm13108_vm2 = vmmov %vm13098_vm0 }
 0x253   :  { %vm13109_vm10 = vmmov %vm13098_vm0 }
 0x2ab   :  { %v1152_v56 = vpop.f32.mrf.mxu0 }
 0x2ac   :  { %v1172_v36 = vpop.f32.mrf.mxu1  ;;  %v1153_v47 = vadd.f32 %v1152_v56, %v7811_v48 }
 0x2ad   :  { %v1173_v60 = vadd.f32 %v1172_v36, %v7811_v48 }
 0x2ae   :  { %v1222_v61 = vmul.f32 %v1221_v2, %v1153_v47 }
 0x2af   :  { %v1223_v3 = vmul.f32 %v1221_v2, %v1173_v60 }
 0x2b1   :  { %v1230_v19 = vrot.slane %v1223_v3, 4 }
 0x2b3   :  { %v1232_v25 = vsel %vm13091_vm1, %v1222_v61, %v1230_v19  ;;  %vm13110_vm1 = vmmov %vm13098_vm0 }
 0x2b4   :  { %v1236_v43 = vadd.f32 %v1232_v25, %v1219_v22 }
 0x2b6   :  { %v8420_v10 = vadd.f32 %v1242_v27, %v1236_v43 }
 0x2b8   :  { %1273 = vst [vmem:[#allocation1] ss:$2 sm:$0xff] %v8420_v10 }
 0x2bf   :  { %v1276_v37 = vld.sshfl [vmem:[#allocation1] sm:$0xff pattern:$0x75316420]  ;;  %v1277_v54 = vld.sshfl [vmem:[#allocation1 + $0x8] sm:$0xff pattern:$0x75316420] }
 0x2c0   :  { %6064 = vmatpush.msk.msra.mxu0 %vm13092_vm4, %v1276_v37  ;;  %6069 = vmatpush.msk.msra.mxu1 %vm13093_vm13, %v1277_v54  ;;  %vm13111_vm4 = vmmov %vm13098_vm0 }
 0x2c1   :  { %6065 = vmatmul.msk.f32.vlgmr.msra.gmra.mxu0 %vm13094_vm6, %v7858_v6  ;;  %6070 = vmatmul.msk.f32.vlgmr.msra.gmra.mxu1 %vm13095_vm3, %v7858_v6  ;;  %vm13112_vm13 = vmmov %vm13098_vm0 }
 0x2c2   :  { %vm13113_vm6 = vmmov %vm13098_vm0 }
 0x2c3   :  { %vm13114_vm3 = vmmov %vm13098_vm0 }
 0x2c9   :  { %6066 = vmatmul.msk.f32.gmra.mxu0 %vm13097_vm8, %v13096_v14  ;;  %6071 = vmatmul.msk.f32.gmra.mxu1 %vm13098_vm0, %v13096_v14  ;;  %vm13115_vm8 = vmmov %vm13098_vm0 }
 0x2ce   :  { %v1192_v32 = vpop.f32.mrf.mxu2 }
 0x2cf   :  { %v1212_v42 = vpop.f32.mrf.mxu3  ;;  %v1193_v38 = vadd.f32 %v1192_v32, %v7811_v48 }
 0x2d0   :  { %v1213_v12 = vadd.f32 %v1212_v42, %v7811_v48 }
 0x2d1   :  { %6067 = vmatmul.msk.f32.gmra.mxu0 %vm13100_vm11, %v13099_v44  ;;  %6072 = vmatmul.msk.f32.gmra.mxu1 %vm13101_vm14, %v13099_v44  ;;  %v1224_v53 = vmul.f32 %v1221_v2, %v1193_v38 }
 0x2d2   :  { %v1225_v63 = vmul.f32 %v1221_v2, %v1213_v12 }
 0x2d4   :  { %v1231_v21 = vrot.slane %v1225_v63, 4 }
 0x2d6   :  { %v1233_v57 = vsel %vm13103_vm5, %v1224_v53, %v1231_v21 }
 0x2d7   :  { %v1237_v35 = vadd.f32 %v1233_v57, %v1220_v46 }
 0x2d9   :  { %6068 = vmatmul.msk.f32.gmra.mxu0 %vm13104_vm7, %v8447_v5  ;;  %6073 = vmatmul.msk.f32.gmra.mxu1 %vm13105_vm15, %v8447_v5  ;;  %v8453_v8 = vadd.f32 %v1243_v29, %v1237_v35 }
 0x2db   :  { %1275 = vst [vmem:[#allocation1 + $0x10] ss:$2 sm:$0xff] %v8453_v8 }
 0x2e2   :  { %v1278_v7 = vld.sshfl [vmem:[#allocation1 + $0x10] sm:$0xff pattern:$0x75316420]  ;;  %v1279_v58 = vld.sshfl [vmem:[#allocation1 + $0x18] sm:$0xff pattern:$0x75316420] }
 0x2e3   :  { %6074 = vmatpush.msk.msra.mxu2 %vm13106_vm9, %v1278_v7  ;;  %6079 = vmatpush.msk.msra.mxu3 %vm13107_vm12, %v1279_v58 }
 0x2e4   :  { %6075 = vmatmul.msk.f32.vlgmr.msra.gmra.mxu2 %vm13108_vm2, %v7858_v6  ;;  %6080 = vmatmul.msk.f32.vlgmr.msra.gmra.mxu3 %vm13109_vm10, %v7858_v6  ;;  %v8476_v6 = vpop.permute.xlu0 %1253 }
 0x2ec   :  { %6076 = vmatmul.msk.f32.gmra.mxu2 %vm13110_vm1, %v13096_v14  ;;  %6081 = vmatmul.msk.f32.gmra.mxu3 %vm13111_vm4, %v13096_v14 }
 0x2f4   :  { %6077 = vmatmul.msk.f32.gmra.mxu2 %vm13112_vm13, %v13099_v44  ;;  %6082 = vmatmul.msk.f32.gmra.mxu3 %vm13113_vm6, %v13099_v44 }
 0x2fc   :  { %6078 = vmatmul.msk.f32.gmra.mxu2 %vm13114_vm3, %v8447_v5  ;;  %6083 = vmatmul.msk.f32.gmra.mxu3 %vm13115_vm8, %v8447_v5 }
 0x33e   :  { %v1305_v55 = vpop.f32.mrf.mxu0  ;;  %v1334_v16 = vpop.f32.mrf.mxu1 }
 0x33f   :  { %v8479_v50 = vadd.f32 %v1305_v55, %v8476_v6  ;;  %v8483_v23 = vadd.f32 %v1334_v16, %v8476_v6 }
 0x341   :  { %v6084_v41 = vmul.f32 -1.442695, %v8479_v50  ;;  %v6085_v17 = vmul.f32 -1.442695, %v8483_v23 }
 0x343   :  { %6587 = vpow2.f32 %v6084_v41 }
 0x344   :  { %6589 = vpow2.f32 %v6085_v17 }
 0x346   :  { %v1308_v11 = vpop.f32.mrf.mxu0  ;;  %v1337_v24 = vpop.f32.mrf.mxu1 }
 0x347   :  { %v8489_v45 = vadd.f32 %v1308_v11, %v8485_v13  ;;  %v8492_v52 = vadd.f32 %v1337_v24, %v8485_v13 }
 0x349   :  { %v6088_v18 = vmul.f32 -1.442695, %v8489_v45  ;;  %v6588_v9 = vpop.eup %6587  ;;  %v6089_v31 = vmul.f32 -1.442695, %v8492_v52 }
 0x34a   :  { %v8498_v15 = vadd.f32 1.0, %v6588_v9  ;;  %v6590_v62 = vpop.eup %6589 }
 0x34b   :  { %6591 = vpow2.f32 %v6088_v18  ;;  %v8509_v2 = vadd.f32 1.0, %v6590_v62 }
 0x34c   :  { %6593 = vpow2.f32 %v6089_v31  ;;  %v1477_v21 = vand.u32 2147483647, %v8498_v15  ;;  %v1479_v29 = vand.u32 2147483648, %v8498_v15  ;;  %vm1473_vm11 = vweird.f32 %v8498_v15 }
 0x34d   :  { %6595 = vrcp.f32 %v8498_v15  ;;  %v1492_v41 = vand.u32 2147483647, %v8509_v2  ;;  %v1494_v17 = vand.u32 2147483648, %v8509_v2 }
 0x34e   :  { %v1311_v34 = vpop.f32.mrf.mxu0  ;;  %v1340_v30 = vpop.f32.mrf.mxu1  ;;  %vm8565_vm14 = vcmp.eq.f32.partialorder %v1477_v21, 8.507059e+37 }
 0x34f   :  { %v8501_v0 = vadd.f32 %v1311_v34, %v8496_v20  ;;  %v8504_v40 = vadd.f32 %v1340_v30, %v8496_v20 }
 0x351   :  { %v6592_v59 = vpop.eup %6591  ;;  %v6092_v51 = vmul.f32 -1.442695, %v8501_v0  ;;  %v6093_v56 = vmul.f32 -1.442695, %v8504_v40 }
 0x352   :  { %v8511_v36 = vadd.f32 1.0, %v6592_v59  ;;  %v6594_v47 = vpop.eup %6593 }
 0x353   :  { %6597 = vpow2.f32 %v6092_v51  ;;  %v8513_v33 = vpop.eup %6595  ;;  %v8517_v49 = vadd.f32 1.0, %v6594_v47 }
 0x354   :  { %6599 = vpow2.f32 %v6093_v56  ;;  %v1469_v61 = vmul.f32 %v8513_v33, %v8498_v15  ;;  %vm1474_vm0 = vweird.f32 %v8513_v33  ;;  %v1539_v11 = vand.u32 2147483648, %v8511_v36 }
 0x355   :  { %6601 = vrcp.f32 %v8509_v2  ;;  %v1554_v9 = vand.u32 2147483648, %v8517_v49  ;;  %vm8574_vm5 = vmor %vm1473_vm11, %vm1474_vm0  ;;  %v1480_v15 = vor.u32 1.1754944e-38, %v1479_v29  ;;  %vm1533_vm7 = vweird.f32 %v8511_v36 }
 0x356   :  { %v1314_v60 = vpop.f32.mrf.mxu0  ;;  %6603 = vrcp.f32 %v8511_v36  ;;  %v1343_v43 = vpop.f32.mrf.mxu1  ;;  %v1470_v54 = vsub.f32 1.0, %v1469_v61  ;;  %v1537_v30 = vand.u32 2147483647, %v8511_v36  ;;  %v8587_v61 = vor.u32 1.1754944e-38, %v1539_v11 }
 0x357   :  { %v8520_v4 = vadd.f32 %v1314_v60, %v8474_v1  ;;  %v8538_v44 = vadd.f32 %v1343_v43, %v8474_v1  ;;  %vm1548_vm6 = vweird.f32 %v8517_v49 }
 0x358   :  { %v1471_v12 = vmul.f32 %v8513_v33, %v1470_v54  ;;  %vm8624_vm4 = vcmp.eq.f32.partialorder %v1537_v30, 8.507059e+37 }
 0x359   :  { %v6598_v3 = vpop.eup %6597  ;;  %v6096_v22 = vmul.f32 -1.442695, %v8520_v4  ;;  %v6097_v63 = vmul.f32 -1.442695, %v8538_v44 }
 0x35a   :  { %v8524_v19 = vadd.f32 1.0, %v6598_v3  ;;  %v6600_v27 = vpop.eup %6599  ;;  %v1472_v35 = vadd.f32 %v8513_v33, %v1471_v12 }
 0x35b   :  { %v8528_v25 = vpop.eup %6601  ;;  %v8533_v14 = vadd.f32 1.0, %v6600_v27 }
 0x35c   :  { %6605 = vrcp.f32 %v8524_v19  ;;  %v8531_v37 = vpop.eup %6603  ;;  %v1484_v32 = vmul.f32 %v8528_v25, %v8509_v2  ;;  %v1476_v59 = vsel %vm8574_vm5, %v8513_v33, %v1472_v35  ;;  %v1599_v27 = vand.u32 2147483648, %v8524_v19 }
 0x35d   :  { %6607 = vrcp.f32 %v8517_v49  ;;  %v1529_v42 = vmul.f32 %v8531_v37, %v8511_v36  ;;  %vm1534_vm15 = vweird.f32 %v8531_v37  ;;  %v1552_v33 = vand.u32 2147483647, %v8517_v49 }
 0x35e   :  { %6609 = vpow2.f32 %v6096_v22  ;;  %v1485_v28 = vsub.f32 1.0, %v1484_v32  ;;  %v1597_v22 = vand.u32 2147483647, %v8524_v19  ;;  %v8598_v32 = vor.u32 1.1754944e-38, %v1554_v9  ;;  %vm8620_vm1 = vmor %vm1533_vm7, %vm1534_vm15 }
 0x35f   :  { %6611 = vrcp.f32 %v8533_v14  ;;  %v1530_v57 = vsub.f32 1.0, %v1529_v42  ;;  %v8602_v42 = vsel %vm8565_vm14, %v1480_v15, %v1476_v59  ;;  %vm1593_vm9 = vweird.f32 %v8524_v19 }
 0x360   :  { %6613 = vpow2.f32 %v6097_v63  ;;  %v1486_v18 = vmul.f32 %v8528_v25, %v1485_v28  ;;  %vm8611_vm10 = vcmp.eq.f32.partialorder %v1597_v22, 8.507059e+37  ;;  %v1600_v29 = vor.u32 1.1754944e-38, %v1599_v27 }
 0x361   :  { %v1531_v34 = vmul.f32 %v8531_v37, %v1530_v57  ;;  %vm1608_vm13 = vweird.f32 %v8533_v14  ;;  %v1614_v11 = vand.u32 2147483648, %v8533_v14  ;;  %vm1489_vm8 = vweird.f32 %v8528_v25 }
 0x362   :  { %v8543_v38 = vpop.eup %6605  ;;  %v8594_v54 = vadd.f32 %v8528_v25, %v1486_v18  ;;  %vm1488_vm14 = vweird.f32 %v8509_v2 }
 0x363   :  { %v8547_v26 = vpop.eup %6607  ;;  %v1589_v53 = vmul.f32 %v8543_v38, %v8524_v19  ;;  %v1532_v12 = vadd.f32 %v8531_v37, %v1531_v34  ;;  %vm1594_vm12 = vweird.f32 %v8543_v38 }
 0x364   :  { %v6610_v46 = vpop.eup %6609  ;;  %v1544_v7 = vmul.f32 %v8547_v26, %v8517_v49  ;;  %vm1549_vm2 = vweird.f32 %v8547_v26  ;;  %vm8643_vm3 = vmor %vm1593_vm9, %vm1594_vm12 }
 0x365   :  { %v1590_v58 = vsub.f32 1.0, %v1589_v53  ;;  %v8557_v55 = vadd.f32 1.0, %v6610_v46  ;;  %v8559_v16 = vpop.eup %6611  ;;  %v1536_v36 = vsel %vm8620_vm1, %v8531_v37, %v1532_v12  ;;  %vm8704_vm1 = vmor %vm1548_vm6, %vm1549_vm2 }
 0x366   :  { %v6614_v62 = vpop.eup %6613  ;;  %v1545_v51 = vsub.f32 1.0, %v1544_v7  ;;  %v1604_v47 = vmul.f32 %v8559_v16, %v8533_v14  ;;  %vm1609_vm0 = vweird.f32 %v8559_v16  ;;  %v1541_v46 = vsel %vm8624_vm4, %v8587_v61, %v1536_v36  ;;  %vm8728_vm6 = vmor %vm1488_vm14, %vm1489_vm8 }
 0x367   :  { %6615 = vrcp.f32 %v8557_v55  ;;  %v1591_v56 = vmul.f32 %v8543_v38, %v1590_v58  ;;  %v1363_v60 = vpop.f32.mrf.mxu2  ;;  %v1392_v3 = vpop.f32.mrf.mxu3  ;;  %v8591_v43 = vadd.f32 1.0, %v6614_v62  ;;  %v1612_v58 = vand.u32 2147483647, %v8533_v14  ;;  %vm8691_vm12 = vmor %vm1608_vm13, %vm1609_vm0 }
 0x368   :  { %v1546_v53 = vmul.f32 %v8547_v26, %v1545_v51  ;;  %v1605_v28 = vsub.f32 1.0, %v1604_v47  ;;  %v1657_v24 = vand.u32 2147483647, %v8557_v55  ;;  %v8633_v18 = vadd.f32 %v1363_v60, %v8476_v6 }
 0x369   :  { %6617 = vrcp.f32 %v8591_v43  ;;  %v1592_v21 = vadd.f32 %v8543_v38, %v1591_v56  ;;  %v1659_v15 = vand.u32 2147483648, %v8557_v55  ;;  %v8649_v34 = vadd.f32 %v1392_v3, %v8476_v6 }
 0x36a   :  { %v8653_v37 = vadd.f32 %v8547_v26, %v1546_v53  ;;  %v1606_v19 = vmul.f32 %v8559_v16, %v1605_v28  ;;  %vm1653_vm5 = vweird.f32 %v8557_v55  ;;  %vm8668_vm7 = vcmp.eq.f32.partialorder %v1657_v24, 8.507059e+37 }
 0x36b   :  { %v1596_v30 = vsel %vm8643_vm3, %v8543_v38, %v1592_v21  ;;  %v6086_v3 = vmul.f32 -1.442695, %v8633_v18  ;;  %v1660_v27 = vor.u32 1.1754944e-38, %v1659_v15  ;;  %v6087_v12 = vmul.f32 -1.442695, %v8649_v34 }
 0x36c   :  { %v1607_v21 = vadd.f32 %v8559_v16, %v1606_v19  ;;  %v1672_v28 = vand.u32 2147483647, %v8591_v43  ;;  %v1674_v35 = vand.u32 2147483648, %v8591_v43  ;;  %v1615_v7 = vor.u32 1.1754944e-38, %v1614_v11 }
 0x36d   :  { %v6616_v63 = vpop.eup %6615  ;;  %vm1668_vm4 = vweird.f32 %v8591_v43  ;;  %vm1553_vm3 = vcmp.eq.f32.partialorder %v1552_v33, 8.507059e+37  ;;  %vm1493_vm8 = vcmp.eq.f32.partialorder %v1492_v41, 8.507059e+37  ;;  %vm13138_vm0 = vcmask 261120  }
 0x36e   :  { %v1649_v57 = vmul.f32 %v6616_v63, %v8557_v55  ;;  %vm1654_vm11 = vweird.f32 %v6616_v63  ;;  %v1611_v14 = vsel %vm8691_vm12, %v8559_v16, %v1607_v21  ;;  %v1675_v19 = vor.u32 1.1754944e-38, %v1674_v35 }
 0x36f   :  { %v1366_v62 = vpop.f32.mrf.mxu2  ;;  %v1395_v59 = vpop.f32.mrf.mxu3  ;;  %vm1655_vm15 = vmor %vm1653_vm5, %vm1654_vm11  ;;  %v1551_v16 = vsel %vm8704_vm1, %v8547_v26, %v8653_v37  ;;  %vm1673_vm2 = vcmp.eq.f32.partialorder %v1672_v28, 8.507059e+37 }
 0x370   :  { %v1650_v31 = vsub.f32 1.0, %v1649_v57  ;;  %v6618_v51 = vpop.eup %6617  ;;  %v8661_v6 = vadd.f32 %v1366_v62, %v8485_v13  ;;  %v8664_v47 = vadd.f32 %v1395_v59, %v8485_v13  ;;  %v1601_v13 = vsel %vm8611_vm10, %v1600_v29, %v1596_v30  ;;  %vm13139_vm11 = vmmov %vm13138_vm0 }
 0x371   :  { %v1664_v60 = vmul.f32 %v6618_v51, %v8591_v43  ;;  %vm1669_vm9 = vweird.f32 %v6618_v51  ;;  %vm8695_vm10 = vcmp.eq.f32.partialorder %v1612_v58, 8.507059e+37 }
 0x372   :  { %v1651_v56 = vmul.f32 %v6616_v63, %v1650_v31  ;;  %v6090_v53 = vmul.f32 -1.442695, %v8661_v6  ;;  %v6091_v24 = vmul.f32 -1.442695, %v8664_v47  ;;  %vm1670_vm13 = vmor %vm1668_vm4, %vm1669_vm9  ;;  %v1616_v38 = vsel %vm8695_vm10, %v1615_v7, %v1611_v14 }
 0x373   :  { %v1665_v55 = vsub.f32 1.0, %v1664_v60  ;;  %v1495_v60 = vor.u32 1.1754944e-38, %v1494_v17 }
 0x374   :  { %v1652_v22 = vadd.f32 %v6616_v63, %v1651_v56  ;;  %6619 = vpow2.f32 %v6090_v53  ;;  %v1712_v56 = vmul.f32 %v1541_v46, %v8489_v45 }
 0x375   :  { %v1666_v31 = vmul.f32 %v6618_v51, %v1665_v55  ;;  %6621 = vpow2.f32 %v6086_v3 }
 0x376   :  { %v1656_v57 = vsel %vm1655_vm15, %v6616_v63, %v1652_v22  ;;  %6623 = vpow2.f32 %v6087_v12  ;;  %v1708_v22 = vmul.f32 %v8602_v42, %v8479_v50 }
 0x377   :  { %v1661_v9 = vsel %vm8668_vm7, %v1660_v27, %v1656_v57  ;;  %v1667_v58 = vadd.f32 %v6618_v51, %v1666_v31  ;;  %v1369_v36 = vpop.f32.mrf.mxu2  ;;  %v1398_v30 = vpop.f32.mrf.mxu3  ;;  %6625 = vpow2.f32 %v6091_v24  ;;  %v1556_v27 = vsel %vm1553_vm3, %v8598_v32, %v1551_v16 }
 0x378   :  { %v1720_v15 = vmul.f32 %v1661_v9, %v8520_v4  ;;  %v1716_v4 = vmul.f32 %v1601_v13, %v8501_v0  ;;  %v8715_v62 = vadd.f32 %v1369_v36, %v8496_v20  ;;  %v8722_v43 = vadd.f32 %v1398_v30, %v8496_v20 }
 0x379   :  { %v1671_v11 = vsel %vm1670_vm13, %v6618_v51, %v1667_v58  ;;  %v1491_v51 = vsel %vm8728_vm6, %v8528_v25, %v8594_v54  ;;  %v1717_v25 = vmul.f32 %v1616_v38, %v8504_v40  ;;  %v1713_v50 = vmul.f32 %v1556_v27, %v8492_v52 }
 0x37a   :  { %1736 = vmatpush.msrb.mxu0 %v1720_v15  ;;  %v6620_v59 = vpop.eup %6619  ;;  %v1676_v26 = vsel %vm1673_vm2, %v1675_v19, %v1671_v11  ;;  %v6094_v37 = vmul.f32 -1.442695, %v8715_v62  ;;  %v6095_v49 = vmul.f32 -1.442695, %v8722_v43 }
 0x37b   :  { %v6622_v20 = vpop.eup %6621  ;;  %v1721_v45 = vmul.f32 %v1676_v26, %v8538_v44  ;;  %v8748_v12 = vadd.f32 1.0, %v6620_v59  ;;  %v1496_v44 = vsel %vm1493_vm8, %v1495_v60, %v1491_v51 }
 0x37c   :  { %1737 = vmatpush.msrb.mxu0 %v1716_v4  ;;  %v6624_v3 = vpop.eup %6623  ;;  %6627 = vpow2.f32 %v6094_v37  ;;  %v8754_v54 = vadd.f32 1.0, %v6622_v20  ;;  %v1709_v40 = vmul.f32 %v1496_v44, %v8483_v23 }
 0x37d   :  { %1756 = vmatpush.msrb.mxu1 %v1721_v45  ;;  %v6626_v17 = vpop.eup %6625  ;;  %v8757_v33 = vadd.f32 1.0, %v6624_v3  ;;  %6629 = vrcp.f32 %v8748_v12  ;;  %v1569_v0 = vand.u32 2147483648, %v8748_v12  ;;  %vm1563_vm14 = vweird.f32 %v8748_v12 }
 0x37e   :  { %1738 = vmatpush.msrb.mxu0 %v1712_v56  ;;  %v8763_v2 = vadd.f32 1.0, %v6626_v17  ;;  %6631 = vpow2.f32 %v6095_v49  ;;  %v1507_v36 = vand.u32 2147483647, %v8754_v54  ;;  %v1509_v30 = vand.u32 2147483648, %v8754_v54 }
 0x37f   :  { %v1372_v32 = vpop.f32.mrf.mxu2  ;;  %v1401_v42 = vpop.f32.mrf.mxu3  ;;  %1757 = vmatpush.msrb.mxu1 %v1717_v25  ;;  %6633 = vrcp.f32 %v8754_v54  ;;  %v1522_v11 = vand.u32 2147483647, %v8757_v33  ;;  %v1524_v59 = vand.u32 2147483648, %v8757_v33  ;;  %v1567_v27 = vand.u32 2147483647, %v8748_v12 }
 0x380   :  { %1739 = vmatpush.msrb.mxu0 %v1708_v22  ;;  %v8766_v41 = vadd.f32 %v1372_v32, %v8474_v1  ;;  %v8770_v53 = vadd.f32 %v1401_v42, %v8474_v1  ;;  %6635 = vrcp.f32 %v8757_v33  ;;  %v1584_v26 = vand.u32 2147483648, %v8763_v2 }
 0x381   :  { %6100 = vmatmul.msk.f32.vlgmr.msrb.gmra.mxu0 %vm13138_vm0, %v8401_v39  ;;  %1758 = vmatpush.msrb.mxu1 %v1713_v50  ;;  %6637 = vrcp.f32 %v8763_v2  ;;  %v8822_v45 = vor.u32 1.1754944e-38, %v1509_v30  ;;  %vm1578_vm5 = vweird.f32 %v8763_v2  ;;  %v8834_v44 = vor.u32 1.1754944e-38, %v1569_v0 }
 0x382   :  { %v6628_v52 = vpop.eup %6627  ;;  %v6098_v23 = vmul.f32 -1.442695, %v8766_v41  ;;  %v6099_v55 = vmul.f32 -1.442695, %v8770_v53  ;;  %v1582_v50 = vand.u32 2147483647, %v8763_v2  ;;  %vm1503_vm1 = vweird.f32 %v8754_v54 }
 0x383   :  { %v8773_v13 = vadd.f32 1.0, %v6628_v52  ;;  %1759 = vmatpush.msrb.mxu1 %v1709_v40  ;;  %v8779_v21 = vpop.eup %6629  ;;  %v8842_v40 = vor.u32 1.1754944e-38, %v1584_v26  ;;  %vm8875_vm3 = vcmp.eq.f32.partialorder %v1567_v27, 8.507059e+37 }
 0x384   :  { %6101 = vmatmul.msk.f32.vlgmr.msrb.gmra.mxu1 %vm13139_vm11, %v8401_v39  ;;  %v6632_v1 = vpop.eup %6631  ;;  %v1559_v24 = vmul.f32 %v8779_v21, %v8748_v12  ;;  %vm1564_vm7 = vweird.f32 %v8779_v21 }
 0x385   :  { %6639 = vrcp.f32 %v8773_v13  ;;  %v8783_v28 = vpop.eup %6633  ;;  %v8787_v35 = vadd.f32 1.0, %v6632_v1  ;;  %v1627_v25 = vand.u32 2147483647, %v8773_v13  ;;  %v1629_v49 = vand.u32 2147483648, %v8773_v13  ;;  %vm8857_vm4 = vmor %vm1563_vm14, %vm1564_vm7 }
 0x386   :  { %v8785_v57 = vpop.eup %6635  ;;  %6641 = vpow2.f32 %v6098_v23  ;;  %v1499_v31 = vmul.f32 %v8783_v28, %v8754_v54  ;;  %v1560_v29 = vsub.f32 1.0, %v1559_v24  ;;  %vm1504_vm15 = vweird.f32 %v8783_v28 }
 0x387   :  { %6643 = vpow2.f32 %v6099_v55  ;;  %v8791_v9 = vpop.eup %6637  ;;  %v1514_v63 = vmul.f32 %v8785_v57, %v8757_v33  ;;  %vm1519_vm9 = vweird.f32 %v8785_v57  ;;  %vm1623_vm10 = vweird.f32 %v8773_v13 }
 0x388   :  { %6645 = vrcp.f32 %v8787_v35  ;;  %v1500_v61 = vsub.f32 1.0, %v1499_v31  ;;  %v1574_v14 = vmul.f32 %v8791_v9, %v8763_v2  ;;  %v1561_v38 = vmul.f32 %v8779_v21, %v1560_v29 }
 0x389   :  { %v1515_v4 = vsub.f32 1.0, %v1514_v63  ;;  %vm1579_vm12 = vweird.f32 %v8791_v9  ;;  %vm8861_vm13 = vcmp.eq.f32.partialorder %v1627_v25, 8.507059e+37  ;;  %v1630_v29 = vor.u32 1.1754944e-38, %v1629_v49 }
 0x38a   :  { %v1501_v20 = vmul.f32 %v8783_v28, %v1500_v61  ;;  %v1575_v51 = vsub.f32 1.0, %v1574_v14  ;;  %v8831_v17 = vadd.f32 %v8779_v21, %v1561_v38  ;;  %vm1638_vm2 = vweird.f32 %v8787_v35  ;;  %vm8889_vm11 = vmor %vm1578_vm5, %vm1579_vm12 }
 0x38b   :  { %v8796_v46 = vpop.eup %6639  ;;  %v1516_v3 = vmul.f32 %v8785_v57, %v1515_v4  ;;  %v1642_v61 = vand.u32 2147483647, %v8787_v35  ;;  %v1644_v14 = vand.u32 2147483648, %v8787_v35 }
 0x38c   :  { %v6642_v15 = vpop.eup %6641  ;;  %v1619_v7 = vmul.f32 %v8796_v46, %v8773_v13  ;;  %v8838_v32 = vadd.f32 %v8783_v28, %v1501_v20  ;;  %v1576_v42 = vmul.f32 %v8791_v9, %v1575_v51  ;;  %v1566_v12 = vsel %vm8857_vm4, %v8779_v21, %v8831_v17 }
 0x38d   :  { %v6644_v58 = vpop.eup %6643  ;;  %v8806_v19 = vadd.f32 1.0, %v6642_v15  ;;  %v8846_v55 = vadd.f32 %v8785_v57, %v1516_v3  ;;  %vm1624_vm8 = vweird.f32 %v8796_v46  ;;  %vm8901_vm4 = vcmp.eq.f32.partialorder %v1642_v61, 8.507059e+37 }
 0x38e   :  { %v8808_v16 = vpop.eup %6645  ;;  %v8813_v56 = vadd.f32 1.0, %v6644_v58  ;;  %v1620_v60 = vsub.f32 1.0, %v1619_v7  ;;  %v1577_v30 = vadd.f32 %v8791_v9, %v1576_v42  ;;  %vm8897_vm7 = vmor %vm1623_vm10, %vm1624_vm8  ;;  %v1645_v17 = vor.u32 1.1754944e-38, %v1644_v14 }
 0x38f   :  { %v1634_v37 = vmul.f32 %v8808_v16, %v8787_v35  ;;  %6647 = vrcp.f32 %v8806_v19  ;;  %vm1639_vm0 = vweird.f32 %v8808_v16  ;;  %v1689_v21 = vand.u32 2147483648, %v8806_v19 }
 0x390   :  { %6649 = vrcp.f32 %v8813_v56  ;;  %v1621_v52 = vmul.f32 %v8796_v46, %v1620_v60  ;;  %v1687_v51 = vand.u32 2147483647, %v8806_v19  ;;  %v1704_v60 = vand.u32 2147483648, %v8813_v56  ;;  %vm8911_vm12 = vmor %vm1638_vm2, %vm1639_vm0 }
 0x391   :  { %v1635_v22 = vsub.f32 1.0, %v1634_v37  ;;  %v1702_v25 = vand.u32 2147483647, %v8813_v56  ;;  %vm1683_vm10 = vweird.f32 %v8806_v19  ;;  %vm1698_vm6 = vweird.f32 %v8813_v56 }
 0x392   :  { %v1622_v4 = vadd.f32 %v8796_v46, %v1621_v52  ;;  %v1581_v35 = vsel %vm8889_vm11, %v8791_v9, %v1577_v30  ;;  %vm1688_vm2 = vcmp.eq.f32.partialorder %v1687_v51, 8.507059e+37 }
 0x393   :  { %v1636_v1 = vmul.f32 %v8808_v16, %v1635_v22  ;;  %v6108_v22 = vld [vmem:[%s12930_s6 + $0x28] sm:$0xff] }
 0x394   :  { %v1626_v49 = vsel %vm8897_vm7, %v8796_v46, %v1622_v4  ;;  %vm8928_vm7 = vmor %vm1503_vm1, %vm1504_vm15  ;;  %vm1583_vm15 = vcmp.eq.f32.partialorder %v1582_v50, 8.507059e+37  ;;  %vm1523_vm1 = vcmp.eq.f32.partialorder %v1522_v11, 8.507059e+37 }
 0x395   :  { %v6648_v23 = vpop.eup %6647  ;;  %v1637_v38 = vadd.f32 %v8808_v16, %v1636_v1  ;;  %v1690_v1 = vor.u32 1.1754944e-38, %v1689_v21  ;;  %v1506_v9 = vsel %vm8928_vm7, %v8783_v28, %v8838_v32  ;;  %v1571_v28 = vsel %vm8875_vm3, %v8834_v44, %v1566_v12  ;;  %v8998_v21 = vld [vmem:[%s12926_s2] sm:$0xff] }
 0x396   :  { %v6650_v24 = vpop.eup %6649  ;;  %v1679_v15 = vmul.f32 %v6648_v23, %v8806_v19  ;;  %vm1684_vm14 = vweird.f32 %v6648_v23  ;;  %v1714_v54 = vmul.f32 %v1571_v28, %v8661_v6  ;;  %v1810_v6 = vstv %s6105_s20  ;;  %s6203_s20 = sld [smem:[#allocation2 + $0x11]] }
 0x397   :  { %v1694_v7 = vmul.f32 %v6650_v24, %v8813_v56  ;;  %vm1699_vm5 = vweird.f32 %v6650_v24  ;;  %v1641_v52 = vsel %vm8911_vm12, %v8808_v16, %v1637_v38  ;;  %vm1685_vm8 = vmor %vm1683_vm10, %vm1684_vm14  ;;  %v1631_v16 = vsel %vm8861_vm13, %v1630_v29, %v1626_v49 }
 0x398   :  { %v1680_v0 = vsub.f32 1.0, %v1679_v15  ;;  %vm1700_vm0 = vmor %vm1698_vm6, %vm1699_vm5  ;;  %v1705_v15 = vor.u32 1.1754944e-38, %v1704_v60  ;;  %vm1703_vm14 = vcmp.eq.f32.partialorder %v1702_v25, 8.507059e+37  ;;  %vm13156_vm6 = vweird.f32 %v8757_v33 }
 0x399   :  { %v1695_v26 = vsub.f32 1.0, %v1694_v7  ;;  %vm8942_vm11 = vmor %vm13156_vm6, %vm1519_vm9  ;;  %v1646_v63 = vsel %vm8901_vm4, %v1645_v17, %v1641_v52  ;;  %vm1508_vm9 = vcmp.eq.f32.partialorder %v1507_v36, 8.507059e+37  ;;  %v1586_v7 = vsel %vm1583_vm15, %v8842_v40, %v1581_v35 }
 0x39a   :  { %v1681_v20 = vmul.f32 %v6648_v23, %v1680_v0  ;;  %v1521_v14 = vsel %vm8942_vm11, %v8785_v57, %v8846_v55  ;;  %v1718_v30 = vmul.f32 %v1631_v16, %v8715_v62  ;;  %v1511_v57 = vsel %vm1508_vm9, %v8822_v45, %v1506_v9 }
 0x39b   :  { %v1696_v27 = vmul.f32 %v6650_v24, %v1695_v26  ;;  %v1719_v2 = vmul.f32 %v1646_v63, %v8722_v43  ;;  %v1715_v36 = vmul.f32 %v1586_v7, %v8664_v47  ;;  %vm13159_vm13 = vcmask 261120   ;;  %v9016_v26 = vld [vmem:[%s12926_s2 + $0x10] sm:$0xff] }
 0x39c   :  { %v1682_v42 = vadd.f32 %v6648_v23, %v1681_v20  ;;  %vm13160_vm3 = vmmov %vm13159_vm13  ;;  %v1807_v33 = vstv %s8977_s21  ;;  %v1830_v45 = vstv %s8979_s22  ;;  %vm13161_vm4 = vcmask 1043456   ;;  %s10117_s21 = sld [smem:[#allocation2 + $0x12]] }
 0x39d   :  { %v1697_v31 = vadd.f32 %v6650_v24, %v1696_v27  ;;  %v1808_v40 = vmul.f32 %v1807_v33, %v8420_v10  ;;  %vm13162_vm5 = vmmov %vm13161_vm4  ;;  %vm13164_vm10 = vcmask 31744   ;;  %v9007_v10 = vld [vmem:[%s12926_s2 + $0x8] sm:$0xff]  ;;  %v1809_v49 = vmul.f32 %v1807_v33, %v8453_v8  ;;  %v9054_v8 = vpop.permute.xlu1 %1857 }
 0x39e   :  { %v1686_v46 = vsel %vm1685_vm8, %v6648_v23, %v1682_v42  ;;  %vm13163_vm12 = vmmov %vm13161_vm4  ;;  %v1832_v13 = vmul.f32 %v6108_v22, %v1830_v45 }
 0x39f   :  { %v1691_v56 = vsel %vm1688_vm2, %v1690_v1, %v1686_v46  ;;  %v1701_v61 = vsel %vm1700_vm0, %v6650_v24, %v1697_v31  ;;  %vm13165_vm8 = vmmov %vm13164_vm10 }
 0x3a0   :  { %v1722_v29 = vmul.f32 %v1691_v56, %v8766_v41  ;;  %v1706_v24 = vsel %vm1703_vm14, %v1705_v15, %v1701_v61  ;;  %v1525_v41 = vor.u32 1.1754944e-38, %v1524_v59  ;;  %v1710_v59 = vmul.f32 %v1511_v57, %v8633_v18  ;;  %vm13166_vm2 = vmmov %vm13165_vm8  ;;  %v9064_v56 = vpop.permute.xlu0 %1847 }
 0x3a1   :  { %v1723_v32 = vmul.f32 %v1706_v24, %v8770_v53  ;;  %vm13167_vm0 = vmmov %vm13166_vm2 }
 0x3a2   :  { %1776 = vmatpush.msrb.mxu2 %v1722_v29  ;;  %v1526_v53 = vsel %vm1523_vm1, %v1525_v41, %v1521_v14  ;;  %vm13168_vm7 = vmmov %vm13167_vm0  ;;  %v9075_v14 = vpop.permute.xlu2 %1852 }
 0x3a3   :  { %1796 = vmatpush.msrb.mxu3 %v1723_v32  ;;  %v1711_v62 = vmul.f32 %v1526_v53, %v8649_v34  ;;  %vm13169_vm14 = vmmov %vm13167_vm0 }
 0x3a4   :  { %1777 = vmatpush.msrb.mxu2 %v1718_v30  ;;  %vm13170_vm6 = vmmov %vm13167_vm0 }
 0x3a5   :  { %1797 = vmatpush.msrb.mxu3 %v1719_v2  ;;  %vm13171_vm11 = vmmov %vm13167_vm0  ;;  %v9056_v15 = vpop.permute.xlu1 %1842 }
 0x3a6   :  { %1778 = vmatpush.msrb.mxu2 %v1714_v54  ;;  %vm13172_vm15 = vmmov %vm13161_vm4 }
 0x3a7   :  { %1798 = vmatpush.msrb.mxu3 %v1715_v36  ;;  %vm13173_vm9 = vmmov %vm13161_vm4 }
 0x3a8   :  { %1779 = vmatpush.msrb.mxu2 %v1710_v59  ;;  %vm13174_vm1 = vmmov %vm13161_vm4 }
 0x3a9   :  { %1799 = vmatpush.msrb.mxu3 %v1711_v62  ;;  %6102 = vmatmul.msk.f32.vlgmr.msrb.gmra.mxu2 %vm13159_vm13, %v8401_v39  ;;  %vm13175_vm13 = vmmov %vm13167_vm0 }
 0x3aa   :  { %6103 = vmatmul.msk.f32.vlgmr.msrb.gmra.mxu3 %vm13160_vm3, %v8401_v39  ;;  %v6107_v39 = vld [vmem:[%s12930_s6 + $0x20] sm:$0xff]  ;;  %vm13176_vm3 = vmmov %vm13167_vm0 }
 0x3ab   :  { %v1831_v55 = vmul.f32 %v6107_v39, %v1830_v45 }
 0x3fe   :  { %v1741_v18 = vpop.f32.mrf.mxu0 }
 0x3ff   :  { %v1742_v34 = vadd.f32 %v1741_v18, %v7811_v48 }
 0x401   :  { %v1761_v47 = vpop.f32.mrf.mxu1  ;;  %v1811_v44 = vmul.f32 %v1810_v6, %v1742_v34 }
 0x402   :  { %v1762_v43 = vadd.f32 %v1761_v47, %v7811_v48 }
 0x404   :  { %v1812_v11 = vmul.f32 %v1810_v6, %v1762_v43 }
 0x406   :  { %v1819_v50 = vrot.slane %v1812_v11, 4 }
 0x408   :  { %v1821_v12 = vsel %vm13161_vm4, %v1811_v44, %v1819_v50  ;;  %vm13177_vm4 = vmmov %vm13167_vm0 }
 0x409   :  { %v1825_v58 = vadd.f32 %v1821_v12, %v1808_v40 }
 0x40b   :  { %v8990_v4 = vadd.f32 %v1831_v55, %v1825_v58 }
 0x40d   :  { %1862 = vst [vmem:[#allocation1] ss:$2 sm:$0xff] %v8990_v4 }
 0x414   :  { %v1865_v0 = vld.sshfl [vmem:[#allocation1] sm:$0xff pattern:$0x75316420]  ;;  %v1866_v38 = vld.sshfl [vmem:[#allocation1 + $0x8] sm:$0xff pattern:$0x75316420] }
 0x415   :  { %6113 = vmatpush.msk.msra.mxu0 %vm13162_vm5, %v1865_v0  ;;  %6118 = vmatpush.msk.msra.mxu1 %vm13163_vm12, %v1866_v38  ;;  %vm13178_vm5 = vmmov %vm13167_vm0 }
 0x416   :  { %6114 = vmatmul.msk.f32.vlgmr.msra.gmra.mxu0 %vm13164_vm10, %v8998_v21  ;;  %6119 = vmatmul.msk.f32.vlgmr.msra.gmra.mxu1 %vm13165_vm8, %v8998_v21  ;;  %vm13179_vm12 = vmmov %vm13167_vm0 }
 0x417   :  { %vm13180_vm10 = vmmov %vm13167_vm0 }
 0x418   :  { %vm13181_vm8 = vmmov %vm13167_vm0 }
 0x41e   :  { %6115 = vmatmul.msk.f32.gmra.mxu0 %vm13166_vm2, %v9007_v10  ;;  %6120 = vmatmul.msk.f32.gmra.mxu1 %vm13167_vm0, %v9007_v10  ;;  %vm13182_vm2 = vmmov %vm13167_vm0 }
 0x426   :  { %6116 = vmatmul.msk.f32.gmra.mxu0 %vm13168_vm7, %v9016_v26  ;;  %6121 = vmatmul.msk.f32.gmra.mxu1 %vm13169_vm14, %v9016_v26 }
 0x42c   :  { %v1781_v37 = vpop.f32.mrf.mxu2 }
 0x42d   :  { %v1801_v20 = vpop.f32.mrf.mxu3  ;;  %v1782_v51 = vadd.f32 %v1781_v37, %v7811_v48 }
 0x42e   :  { %6117 = vmatmul.msk.f32.gmra.mxu0 %vm13170_vm6, %v8447_v5  ;;  %6122 = vmatmul.msk.f32.gmra.mxu1 %vm13171_vm11, %v8447_v5  ;;  %v1802_v60 = vadd.f32 %v1801_v20, %v7811_v48 }
 0x42f   :  { %v1813_v27 = vmul.f32 %v1810_v6, %v1782_v51 }
 0x430   :  { %v1814_v3 = vmul.f32 %v1810_v6, %v1802_v60 }
 0x432   :  { %v1820_v25 = vrot.slane %v1814_v3, 4 }
 0x434   :  { %v1822_v17 = vsel %vm13172_vm15, %v1813_v27, %v1820_v25 }
 0x435   :  { %v1826_v42 = vadd.f32 %v1822_v17, %v1809_v49 }
 0x437   :  { %v9033_v52 = vadd.f32 %v1832_v13, %v1826_v42 }
 0x439   :  { %1864 = vst [vmem:[#allocation1 + $0x10] ss:$2 sm:$0xff] %v9033_v52 }
 0x440   :  { %v1867_v1 = vld.sshfl [vmem:[#allocation1 + $0x10] sm:$0xff pattern:$0x75316420]  ;;  %v1868_v31 = vld.sshfl [vmem:[#allocation1 + $0x18] sm:$0xff pattern:$0x75316420] }
 0x441   :  { %6123 = vmatpush.msk.msra.mxu2 %vm13173_vm9, %v1867_v1  ;;  %6128 = vmatpush.msk.msra.mxu3 %vm13174_vm1, %v1868_v31 }
 0x442   :  { %6124 = vmatmul.msk.f32.vlgmr.msra.gmra.mxu2 %vm13175_vm13, %v8998_v21  ;;  %6129 = vmatmul.msk.f32.vlgmr.msra.gmra.mxu3 %vm13176_vm3, %v8998_v21 }
 0x44a   :  { %6125 = vmatmul.msk.f32.gmra.mxu2 %vm13177_vm4, %v9007_v10  ;;  %6130 = vmatmul.msk.f32.gmra.mxu3 %vm13178_vm5, %v9007_v10 }
 0x452   :  { %6126 = vmatmul.msk.f32.gmra.mxu2 %vm13179_vm12, %v9016_v26  ;;  %6131 = vmatmul.msk.f32.gmra.mxu3 %vm13180_vm10, %v9016_v26 }
 0x45a   :  { %6127 = vmatmul.msk.f32.gmra.mxu2 %vm13181_vm8, %v8447_v5  ;;  %6132 = vmatmul.msk.f32.gmra.mxu3 %vm13182_vm2, %v8447_v5 }
 0x493   :  { %v1894_v35 = vpop.f32.mrf.mxu0  ;;  %v1923_v46 = vpop.f32.mrf.mxu1 }
 0x494   :  { %v9059_v19 = vadd.f32 %v1894_v35, %v9056_v15  ;;  %v9062_v16 = vadd.f32 %v1923_v46, %v9056_v15 }
 0x496   :  { %v6133_v23 = vmul.f32 -1.442695, %v9059_v19  ;;  %v6134_v63 = vmul.f32 -1.442695, %v9062_v16 }
 0x498   :  { %6651 = vpow2.f32 %v6133_v23 }
 0x499   :  { %6653 = vpow2.f32 %v6134_v63 }
 0x49b   :  { %v1897_v61 = vpop.f32.mrf.mxu0  ;;  %v1926_v9 = vpop.f32.mrf.mxu1 }
 0x49c   :  { %v9068_v5 = vadd.f32 %v1897_v61, %v9064_v56  ;;  %v9073_v24 = vadd.f32 %v1926_v9, %v9064_v56 }
 0x49e   :  { %v6137_v29 = vmul.f32 -1.442695, %v9068_v5  ;;  %v6138_v28 = vmul.f32 -1.442695, %v9073_v24  ;;  %v6652_v57 = vpop.eup %6651 }
 0x49f   :  { %v6654_v53 = vpop.eup %6653  ;;  %v9086_v59 = vadd.f32 1.0, %v6652_v57 }
 0x4a0   :  { %6655 = vpow2.f32 %v6137_v29  ;;  %v9088_v62 = vadd.f32 1.0, %v6654_v53 }
 0x4a1   :  { %6657 = vpow2.f32 %v6138_v28  ;;  %v2068_v17 = vand.u32 2147483648, %v9086_v59  ;;  %v2066_v1 = vand.u32 2147483647, %v9086_v59  ;;  %vm2062_vm14 = vweird.f32 %v9086_v59 }
 0x4a2   :  { %v2081_v35 = vand.u32 2147483647, %v9088_v62 }
 0x4a3   :  { %v1900_v32 = vpop.f32.mrf.mxu0  ;;  %v1929_v41 = vpop.f32.mrf.mxu1  ;;  %vm9193_vm12 = vcmp.eq.f32.partialorder %v2066_v1, 8.507059e+37 }
 0x4a4   :  { %v9079_v7 = vadd.f32 %v1900_v32, %v9075_v14  ;;  %v9082_v30 = vadd.f32 %v1929_v41, %v9075_v14  ;;  %v9147_v32 = vor.u32 1.1754944e-38, %v2068_v17  ;;  %v2083_v41 = vand.u32 2147483648, %v9088_v62 }
 0x4a6   :  { %v6141_v2 = vmul.f32 -1.442695, %v9079_v7  ;;  %v6142_v54 = vmul.f32 -1.442695, %v9082_v30  ;;  %v6656_v36 = vpop.eup %6655 }
 0x4a7   :  { %v9090_v6 = vadd.f32 1.0, %v6656_v36  ;;  %v6658_v47 = vpop.eup %6657 }
 0x4a8   :  { %6659 = vpow2.f32 %v6141_v2  ;;  %v9101_v44 = vadd.f32 1.0, %v6658_v47 }
 0x4a9   :  { %6661 = vpow2.f32 %v6142_v54  ;;  %v2128_v46 = vand.u32 2147483648, %v9090_v6  ;;  %vm2122_vm0 = vweird.f32 %v9090_v6  ;;  %v2126_v36 = vand.u32 2147483647, %v9090_v6 }
 0x4aa   :  { %6663 = vrcp.f32 %v9086_v59  ;;  %v2143_v57 = vand.u32 2147483648, %v9101_v44  ;;  %vm2137_vm15 = vweird.f32 %v9101_v44 }
 0x4ab   :  { %v1903_v18 = vpop.f32.mrf.mxu0  ;;  %6665 = vrcp.f32 %v9088_v62  ;;  %v1932_v33 = vpop.f32.mrf.mxu1  ;;  %vm9182_vm3 = vcmp.eq.f32.partialorder %v2126_v36, 8.507059e+37 }
 0x4ac   :  { %v9095_v43 = vadd.f32 %v1903_v18, %v9054_v8  ;;  %6667 = vrcp.f32 %v9090_v6  ;;  %v9105_v50 = vadd.f32 %v1932_v33, %v9054_v8  ;;  %v9158_v18 = vor.u32 1.1754944e-38, %v2128_v46 }
 0x4ae   :  { %v6660_v34 = vpop.eup %6659  ;;  %v6145_v39 = vmul.f32 -1.442695, %v9095_v43  ;;  %v6146_v58 = vmul.f32 -1.442695, %v9105_v50 }
 0x4af   :  { %v9097_v11 = vadd.f32 1.0, %v6660_v34  ;;  %v6662_v45 = vpop.eup %6661 }
 0x4b0   :  { %v9107_v40 = vpop.eup %6663  ;;  %v9111_v12 = vadd.f32 1.0, %v6662_v45 }
 0x4b1   :  { %6669 = vrcp.f32 %v9097_v11  ;;  %v9109_v55 = vpop.eup %6665  ;;  %v2058_v37 = vmul.f32 %v9107_v40, %v9086_v59  ;;  %vm2063_vm7 = vweird.f32 %v9107_v40  ;;  %v2186_v53 = vand.u32 2147483647, %v9097_v11 }
 0x4b2   :  { %6671 = vpow2.f32 %v6145_v39  ;;  %v9115_v0 = vpop.eup %6667  ;;  %v2073_v20 = vmul.f32 %v9109_v55, %v9088_v62  ;;  %v2188_v54 = vand.u32 2147483648, %v9097_v11  ;;  %vm2182_vm11 = vweird.f32 %v9097_v11 }
 0x4b3   :  { %6673 = vrcp.f32 %v9101_v44  ;;  %v2118_v51 = vmul.f32 %v9115_v0, %v9090_v6  ;;  %v2059_v27 = vsub.f32 1.0, %v2058_v37  ;;  %v2141_v37 = vand.u32 2147483647, %v9101_v44 }
 0x4b4   :  { %6675 = vrcp.f32 %v9111_v12  ;;  %v2074_v25 = vsub.f32 1.0, %v2073_v20  ;;  %vm2123_vm6 = vweird.f32 %v9115_v0  ;;  %v9170_v20 = vor.u32 1.1754944e-38, %v2143_v57 }
 0x4b5   :  { %6677 = vpow2.f32 %v6146_v58  ;;  %v2119_v31 = vsub.f32 1.0, %v2118_v51  ;;  %v2060_v23 = vmul.f32 %v9107_v40, %v2059_v27  ;;  %vm9177_vm1 = vcmp.eq.f32.partialorder %v2186_v53, 8.507059e+37  ;;  %vm9202_vm8 = vmor %vm2122_vm0, %vm2123_vm6 }
 0x4b6   :  { %v2075_v63 = vmul.f32 %v9109_v55, %v2074_v25  ;;  %v2189_v27 = vor.u32 1.1754944e-38, %v2188_v54  ;;  %vm2197_vm5 = vweird.f32 %v9111_v12  ;;  %v2201_v57 = vand.u32 2147483647, %v9111_v12 }
 0x4b7   :  { %v9118_v38 = vpop.eup %6669  ;;  %v2120_v2 = vmul.f32 %v9115_v0, %v2119_v31  ;;  %v9162_v39 = vadd.f32 %v9107_v40, %v2060_v23  ;;  %vm9222_vm13 = vcmp.eq.f32.partialorder %v2141_v37, 8.507059e+37  ;;  %v2084_v6 = vor.u32 1.1754944e-38, %v2083_v41 }
 0x4b8   :  { %v6672_v60 = vpop.eup %6671  ;;  %v2178_v3 = vmul.f32 %v9118_v38, %v9097_v11  ;;  %v9166_v45 = vadd.f32 %v9109_v55, %v2075_v63  ;;  %vm2183_vm4 = vweird.f32 %v9118_v38 }
 0x4b9   :  { %v9128_v22 = vpop.eup %6673  ;;  %v9130_v49 = vadd.f32 1.0, %v6672_v60  ;;  %v2121_v60 = vadd.f32 %v9115_v0, %v2120_v2  ;;  %vm9215_vm0 = vmor %vm2182_vm11, %vm2183_vm4 }
 0x4ba   :  { %v9132_v13 = vpop.eup %6675  ;;  %v2179_v61 = vsub.f32 1.0, %v2178_v3  ;;  %v2133_v29 = vmul.f32 %v9128_v22, %v9101_v44  ;;  %vm2138_vm9 = vweird.f32 %v9128_v22 }
 0x4bb   :  { %v6678_v42 = vpop.eup %6677  ;;  %6679 = vrcp.f32 %v9130_v49  ;;  %v2193_v9 = vmul.f32 %v9132_v13, %v9111_v12  ;;  %v2248_v23 = vand.u32 2147483648, %v9130_v49  ;;  %v2125_v36 = vsel %vm9202_vm8, %v9115_v0, %v2121_v60  ;;  %vm9237_vm8 = vmor %vm2062_vm14, %vm2063_vm7 }
 0x4bc   :  { %v9145_v28 = vadd.f32 1.0, %v6678_v42  ;;  %v2180_v47 = vmul.f32 %v9118_v38, %v2179_v61  ;;  %v2134_v58 = vsub.f32 1.0, %v2133_v29  ;;  %vm2198_vm6 = vweird.f32 %v9132_v13 }
 0x4bd   :  { %v2194_v34 = vsub.f32 1.0, %v2193_v9  ;;  %v2246_v9 = vand.u32 2147483647, %v9130_v49  ;;  %vm2242_vm10 = vweird.f32 %v9130_v49  ;;  %vm9252_vm7 = vmor %vm2197_vm5, %vm2198_vm6  ;;  %vm9256_vm14 = vcmp.eq.f32.partialorder %v2201_v57, 8.507059e+37 }
 0x4be   :  { %6681 = vrcp.f32 %v9145_v28  ;;  %v2181_v17 = vadd.f32 %v9118_v38, %v2180_v47  ;;  %v2135_v61 = vmul.f32 %v9128_v22, %v2134_v58  ;;  %v2203_v47 = vand.u32 2147483648, %v9111_v12 }
 0x4bf   :  { %v2195_v42 = vmul.f32 %v9132_v13, %v2194_v34  ;;  %vm2247_vm4 = vcmp.eq.f32.partialorder %v2246_v9, 8.507059e+37 }
 0x4c0   :  { %v2185_v0 = vsel %vm9215_vm0, %v9118_v38, %v2181_v17  ;;  %v2136_v60 = vadd.f32 %v9128_v22, %v2135_v61  ;;  %v2065_v61 = vsel %vm9237_vm8, %v9107_v40, %v9162_v39  ;;  %v2204_v29 = vor.u32 1.1754944e-38, %v2203_v47 }
 0x4c1   :  { %v6680_v33 = vpop.eup %6679  ;;  %v2196_v11 = vadd.f32 %v9132_v13, %v2195_v42  ;;  %v2261_v42 = vand.u32 2147483647, %v9145_v28  ;;  %v2190_v9 = vsel %vm9177_vm1, %v2189_v27, %v2185_v0  ;;  %vm2257_vm1 = vweird.f32 %v9145_v28 }
 0x4c2   :  { %v2238_v51 = vmul.f32 %v6680_v33, %v9130_v49  ;;  %vm2243_vm2 = vweird.f32 %v6680_v33  ;;  %v2263_v49 = vand.u32 2147483648, %v9145_v28  ;;  %v2130_v27 = vsel %vm9182_vm3, %v9158_v18, %v2125_v36 }
 0x4c3   :  { %vm2244_vm11 = vmor %vm2242_vm10, %vm2243_vm2  ;;  %v2200_v12 = vsel %vm9252_vm7, %v9132_v13, %v2196_v11  ;;  %v2305_v13 = vmul.f32 %v2190_v9, %v9079_v7  ;;  %v2070_v18 = vsel %vm9193_vm12, %v9147_v32, %v2065_v61  ;;  %vm13204_vm3 = vweird.f32 %v9088_v62 }
 0x4c4   :  { %v2239_v31 = vsub.f32 1.0, %v2238_v51  ;;  %v6682_v46 = vpop.eup %6681  ;;  %vm9264_vm10 = vmor %vm2137_vm15, %vm2138_vm9  ;;  %v2264_v44 = vor.u32 1.1754944e-38, %v2263_v49  ;;  %vm2262_vm15 = vcmp.eq.f32.partialorder %v2261_v42, 8.507059e+37  ;;  %vm13203_vm9 = vweird.f32 %v9109_v55 }
 0x4c5   :  { %v2253_v53 = vmul.f32 %v6682_v46, %v9145_v28  ;;  %v1952_v1 = vpop.f32.mrf.mxu2  ;;  %v1981_v54 = vpop.f32.mrf.mxu3  ;;  %vm2258_vm0 = vweird.f32 %v6682_v46  ;;  %vm9290_vm2 = vmor %vm13204_vm3, %vm13203_vm9  ;;  %v2205_v7 = vsel %vm9256_vm14, %v2204_v29, %v2200_v12  ;;  %v2301_v63 = vmul.f32 %v2130_v27, %v9068_v5 }
 0x4c6   :  { %v2240_v2 = vmul.f32 %v6680_v33, %v2239_v31  ;;  %v2249_v31 = vor.u32 1.1754944e-38, %v2248_v23  ;;  %vm2259_vm5 = vmor %vm2257_vm1, %vm2258_vm0  ;;  %v9277_v57 = vadd.f32 %v1952_v1, %v9056_v15  ;;  %v2080_v32 = vsel %vm9290_vm2, %v9109_v55, %v9166_v45 }
 0x4c7   :  { %v2254_v51 = vsub.f32 1.0, %v2253_v53  ;;  %v9306_v36 = vadd.f32 %v1981_v54, %v9056_v15  ;;  %vm2082_vm12 = vcmp.eq.f32.partialorder %v2081_v35, 8.507059e+37  ;;  %v2297_v5 = vmul.f32 %v2070_v18, %v9059_v19  ;;  %v9327_v19 = vld [vmem:[%s12928_s4] sm:$0xf] }
 0x4c8   :  { %v2241_v58 = vadd.f32 %v6680_v33, %v2240_v2  ;;  %v2140_v2 = vsel %vm9264_vm10, %v9128_v22, %v2136_v60  ;;  %v6135_v55 = vmul.f32 -1.442695, %v9277_v57  ;;  %v2085_v35 = vsel %vm2082_vm12, %v2084_v6, %v2080_v32 }
 0x4c9   :  { %v2255_v17 = vmul.f32 %v6682_v46, %v2254_v51  ;;  %v2145_v47 = vsel %vm9222_vm13, %v9170_v20, %v2140_v2  ;;  %v6136_v41 = vmul.f32 -1.442695, %v9306_v36  ;;  %vm13207_vm13 = vcmask 261120  }
 0x4ca   :  { %v2245_v38 = vsel %vm2244_vm11, %v6680_v33, %v2241_v58  ;;  %v2302_v62 = vmul.f32 %v2145_v47, %v9073_v24  ;;  %6683 = vpow2.f32 %v6135_v55  ;;  %vm13208_vm6 = vmmov %vm13207_vm13 }
 0x4cb   :  { %v2250_v23 = vsel %vm2247_vm4, %v2249_v31, %v2245_v38  ;;  %v2256_v3 = vadd.f32 %v6682_v46, %v2255_v17 }
 0x4cc   :  { %v2309_v39 = vmul.f32 %v2250_v23, %v9095_v43 }
 0x4cd   :  { %v2260_v43 = vsel %vm2259_vm5, %v6682_v46, %v2256_v3  ;;  %v1955_v53 = vpop.f32.mrf.mxu2  ;;  %v1984_v28 = vpop.f32.mrf.mxu3 }
 0x4ce   :  { %2325 = vmatpush.msrb.mxu0 %v2309_v39  ;;  %v2265_v22 = vsel %vm2262_vm15, %v2264_v44, %v2260_v43  ;;  %v9297_v46 = vadd.f32 %v1955_v53, %v9064_v56  ;;  %v9320_v45 = vadd.f32 %v1984_v28, %v9064_v56  ;;  %v2298_v56 = vmul.f32 %v2085_v35, %v9062_v16 }
 0x4cf   :  { %v2310_v1 = vmul.f32 %v2265_v22, %v9105_v50  ;;  %v2306_v50 = vmul.f32 %v2205_v7, %v9082_v30 }
 0x4d0   :  { %2326 = vmatpush.msrb.mxu0 %v2305_v13  ;;  %v6139_v15 = vmul.f32 -1.442695, %v9297_v46  ;;  %v6140_v30 = vmul.f32 -1.442695, %v9320_v45  ;;  %v6684_v11 = vpop.eup %6683 }
 0x4d1   :  { %2345 = vmatpush.msrb.mxu1 %v2310_v1  ;;  %v9343_v60 = vadd.f32 1.0, %v6684_v11 }
 0x4d2   :  { %2327 = vmatpush.msrb.mxu0 %v2301_v63  ;;  %6685 = vpow2.f32 %v6139_v15 }
 0x4d3   :  { %2346 = vmatpush.msrb.mxu1 %v2306_v50  ;;  %6687 = vpow2.f32 %v6136_v41  ;;  %v2098_v7 = vand.u32 2147483648, %v9343_v60  ;;  %v2096_v63 = vand.u32 2147483647, %v9343_v60  ;;  %vm2092_vm8 = vweird.f32 %v9343_v60 }
 0x4d4   :  { %2328 = vmatpush.msrb.mxu0 %v2297_v5  ;;  %6689 = vpow2.f32 %v6140_v30 }
 0x4d5   :  { %6149 = vmatmul.msk.f32.vlgmr.msrb.gmra.mxu0 %vm13207_vm13, %v9327_v19  ;;  %v1958_v20 = vpop.f32.mrf.mxu2  ;;  %v1987_v24 = vpop.f32.mrf.mxu3  ;;  %2347 = vmatpush.msrb.mxu1 %v2302_v62  ;;  %v9403_v62 = vor.u32 1.1754944e-38, %v2098_v7  ;;  %vm9445_vm2 = vcmp.eq.f32.partialorder %v2096_v63, 8.507059e+37 }
 0x4d6   :  { %v9334_v54 = vadd.f32 %v1958_v20, %v9075_v14  ;;  %v9337_v34 = vadd.f32 %v1987_v24, %v9075_v14 }
 0x4d7   :  { %2348 = vmatpush.msrb.mxu1 %v2298_v56 }
 0x4d8   :  { %v6143_v0 = vmul.f32 -1.442695, %v9334_v54  ;;  %6150 = vmatmul.msk.f32.vlgmr.msrb.gmra.mxu1 %vm13208_vm6, %v9327_v19  ;;  %v6144_v16 = vmul.f32 -1.442695, %v9337_v34  ;;  %v6686_v58 = vpop.eup %6685 }
 0x4d9   :  { %v6688_v51 = vpop.eup %6687  ;;  %v9345_v14 = vadd.f32 1.0, %v6686_v58 }
 0x4da   :  { %6691 = vpow2.f32 %v6143_v0  ;;  %v6690_v49 = vpop.eup %6689  ;;  %v9347_v38 = vadd.f32 1.0, %v6688_v51 }
 0x4db   :  { %6693 = vpow2.f32 %v6144_v16  ;;  %v9357_v33 = vadd.f32 1.0, %v6690_v49  ;;  %v2158_v1 = vand.u32 2147483648, %v9345_v14  ;;  %vm2152_vm11 = vweird.f32 %v9345_v14 }
 0x4dc   :  { %6695 = vrcp.f32 %v9343_v60  ;;  %v2111_v5 = vand.u32 2147483647, %v9347_v38  ;;  %v2113_v41 = vand.u32 2147483648, %v9347_v38  ;;  %v2156_v24 = vand.u32 2147483647, %v9345_v14 }
 0x4dd   :  { %v1961_v31 = vpop.f32.mrf.mxu2  ;;  %v1990_v42 = vpop.f32.mrf.mxu3  ;;  %6697 = vrcp.f32 %v9345_v14  ;;  %v9413_v0 = vor.u32 1.1754944e-38, %v2158_v1  ;;  %v2171_v49 = vand.u32 2147483647, %v9357_v33  ;;  %vm2167_vm14 = vweird.f32 %v9357_v33 }
 0x4de   :  { %v9350_v17 = vadd.f32 %v1961_v31, %v9054_v8  ;;  %v9361_v23 = vadd.f32 %v1990_v42, %v9054_v8  ;;  %vm9434_vm15 = vcmp.eq.f32.partialorder %v2156_v24, 8.507059e+37 }
 0x4e0   :  { %v6692_v37 = vpop.eup %6691  ;;  %v6147_v9 = vmul.f32 -1.442695, %v9350_v17  ;;  %v6148_v39 = vmul.f32 -1.442695, %v9361_v23 }
 0x4e1   :  { %v9353_v61 = vadd.f32 1.0, %v6692_v37  ;;  %v6694_v59 = vpop.eup %6693  ;;  %v2173_v37 = vand.u32 2147483648, %v9357_v33 }
 0x4e2   :  { %v9364_v40 = vadd.f32 1.0, %v6694_v59  ;;  %v9366_v12 = vpop.eup %6695 }
 0x4e3   :  { %6699 = vrcp.f32 %v9353_v61  ;;  %v9370_v3 = vpop.eup %6697  ;;  %v2088_v29 = vmul.f32 %v9366_v12, %v9343_v60  ;;  %vm2093_vm4 = vweird.f32 %v9366_v12  ;;  %v2216_v30 = vand.u32 2147483647, %v9353_v61 }
 0x4e4   :  { %6701 = vrcp.f32 %v9347_v38  ;;  %v2148_v44 = vmul.f32 %v9370_v3, %v9345_v14  ;;  %v2218_v20 = vand.u32 2147483648, %v9353_v61  ;;  %vm2153_vm0 = vweird.f32 %v9370_v3 }
 0x4e5   :  { %6703 = vpow2.f32 %v6147_v9  ;;  %v2089_v25 = vsub.f32 1.0, %v2088_v29  ;;  %vm2212_vm7 = vweird.f32 %v9353_v61  ;;  %vm9429_vm1 = vcmp.eq.f32.partialorder %v2216_v30, 8.507059e+37  ;;  %vm9454_vm13 = vmor %vm2152_vm11, %vm2153_vm0 }
 0x4e6   :  { %6705 = vrcp.f32 %v9357_v33  ;;  %v2149_v32 = vsub.f32 1.0, %v2148_v44  ;;  %v2219_v29 = vor.u32 1.1754944e-38, %v2218_v20  ;;  %vm2227_vm3 = vweird.f32 %v9364_v40 }
 0x4e7   :  { %6707 = vrcp.f32 %v9364_v40  ;;  %v2090_v35 = vmul.f32 %v9366_v12, %v2089_v25 }
 0x4e8   :  { %6709 = vpow2.f32 %v6148_v39  ;;  %v2150_v56 = vmul.f32 %v9370_v3, %v2149_v32 }
 0x4e9   :  { %v9373_v27 = vpop.eup %6699  ;;  %v9421_v42 = vadd.f32 %v9366_v12, %v2090_v35  ;;  %v2233_v35 = vand.u32 2147483648, %v9364_v40 }
 0x4ea   :  { %v9375_v8 = vpop.eup %6701  ;;  %v2208_v13 = vmul.f32 %v9373_v27, %v9353_v61  ;;  %v2151_v59 = vadd.f32 %v9370_v3, %v2150_v56  ;;  %vm2213_vm9 = vweird.f32 %v9373_v27 }
 0x4eb   :  { %v6704_v2 = vpop.eup %6703  ;;  %v2103_v53 = vmul.f32 %v9375_v8, %v9347_v38  ;;  %vm2108_vm5 = vweird.f32 %v9375_v8  ;;  %vm9467_vm12 = vmor %vm2212_vm7, %vm2213_vm9 }
 0x4ec   :  { %v9383_v43 = vpop.eup %6705  ;;  %v9387_v28 = vadd.f32 1.0, %v6704_v2  ;;  %v2209_v6 = vsub.f32 1.0, %v2208_v13  ;;  %v2155_v63 = vsel %vm9454_vm13, %v9370_v3, %v2151_v59  ;;  %vm9484_vm13 = vmor %vm2092_vm8, %vm2093_vm4 }
 0x4ed   :  { %v9389_v18 = vpop.eup %6707  ;;  %v2104_v55 = vsub.f32 1.0, %v2103_v53  ;;  %v2163_v50 = vmul.f32 %v9383_v43, %v9357_v33  ;;  %vm2168_vm10 = vweird.f32 %v9383_v43  ;;  %v2160_v39 = vsel %vm9434_vm15, %v9413_v0, %v2155_v63 }
 0x4ee   :  { %v6710_v22 = vpop.eup %6709  ;;  %6711 = vrcp.f32 %v9387_v28  ;;  %v2223_v47 = vmul.f32 %v9389_v18, %v9364_v40  ;;  %v2210_v16 = vmul.f32 %v9373_v27, %v2209_v6  ;;  %v2278_v32 = vand.u32 2147483648, %v9387_v28  ;;  %vm9508_vm8 = vmor %vm2167_vm14, %vm2168_vm10 }
 0x4ef   :  { %v9400_v15 = vadd.f32 1.0, %v6710_v22  ;;  %v2105_v51 = vmul.f32 %v9375_v8, %v2104_v55  ;;  %v2164_v31 = vsub.f32 1.0, %v2163_v50  ;;  %v2276_v22 = vand.u32 2147483647, %v9387_v28 }
 0x4f0   :  { %v2224_v11 = vsub.f32 1.0, %v2223_v47  ;;  %v2211_v2 = vadd.f32 %v9373_v27, %v2210_v16  ;;  %v2231_v47 = vand.u32 2147483647, %v9364_v40  ;;  %vm2228_vm11 = vweird.f32 %v9389_v18 }
 0x4f1   :  { %6713 = vrcp.f32 %v9400_v15  ;;  %v2165_v7 = vmul.f32 %v9383_v43, %v2164_v31  ;;  %vm2272_vm0 = vweird.f32 %v9387_v28  ;;  %vm2277_vm9 = vcmp.eq.f32.partialorder %v2276_v22, 8.507059e+37  ;;  %vm9500_vm4 = vmor %vm2227_vm3, %vm2228_vm11 }
 0x4f2   :  { %v2225_v13 = vmul.f32 %v9389_v18, %v2224_v11  ;;  %v2215_v56 = vsel %vm9467_vm12, %v9373_v27, %v2211_v2  ;;  %v2279_v24 = vor.u32 1.1754944e-38, %v2278_v32  ;;  %v2293_v16 = vand.u32 2147483648, %v9400_v15 }
 0x4f3   :  { %v2166_v61 = vadd.f32 %v9383_v43, %v2165_v7  ;;  %v2291_v31 = vand.u32 2147483647, %v9400_v15  ;;  %v2106_v59 = vadd.f32 %v9375_v8, %v2105_v51  ;;  %v2220_v2 = vsel %vm9429_vm1, %v2219_v29, %v2215_v56 }
 0x4f4   :  { %v6712_v58 = vpop.eup %6711  ;;  %v2226_v3 = vadd.f32 %v9389_v18, %v2225_v13  ;;  %vm2287_vm1 = vweird.f32 %v9400_v15  ;;  %vm2232_vm3 = vcmp.eq.f32.partialorder %v2231_v47, 8.507059e+37  ;;  %v2234_v29 = vor.u32 1.1754944e-38, %v2233_v35 }
 0x4f5   :  { %v2268_v9 = vmul.f32 %v6712_v58, %v9387_v28  ;;  %vm2273_vm6 = vweird.f32 %v6712_v58  ;;  %v2294_v13 = vor.u32 1.1754944e-38, %v2293_v16  ;;  %vm2292_vm10 = vcmp.eq.f32.partialorder %v2291_v31, 8.507059e+37  ;;  %v6157_v28 = vld [vmem:[%s12930_s6 + $0x38] sm:$0xff] }
 0x4f6   :  { %vm2274_vm7 = vmor %vm2272_vm0, %vm2273_vm6  ;;  %v2230_v51 = vsel %vm9500_vm4, %v9389_v18, %v2226_v3  ;;  %v2307_v18 = vmul.f32 %v2220_v2, %v9334_v54  ;;  %vm13225_vm15 = vweird.f32 %v9347_v38  ;;  %v2114_v22 = vor.u32 1.1754944e-38, %v2113_v41  ;;  %v6156_v41 = vld [vmem:[%s12930_s6 + $0x30] sm:$0xff] }
 0x4f7   :  { %v2269_v53 = vsub.f32 1.0, %v2268_v9  ;;  %v6714_v25 = vpop.eup %6713  ;;  %v2095_v9 = vsel %vm9484_vm13, %v9366_v12, %v9421_v42  ;;  %vm9532_vm6 = vmor %vm13225_vm15, %vm2108_vm5  ;;  %v2235_v0 = vsel %vm2232_vm3, %v2234_v29, %v2230_v51  ;;  %vm2112_vm5 = vcmp.eq.f32.partialorder %v2111_v5, 8.507059e+37  ;;  %v9632_v29 = vpop.permute.xlu1 %2436 }
 0x4f8   :  { %v2283_v50 = vmul.f32 %v6714_v25, %v9400_v15  ;;  %vm2288_vm12 = vweird.f32 %v6714_v25  ;;  %v2110_v44 = vsel %vm9532_vm6, %v9375_v8, %v2106_v59  ;;  %v2308_v1 = vmul.f32 %v2235_v0, %v9337_v34  ;;  %v9649_v0 = vpop.permute.xlu0 %2441 }
 0x4f9   :  { %v2270_v55 = vmul.f32 %v6712_v58, %v2269_v53  ;;  %vm2289_vm14 = vmor %vm2287_vm1, %vm2288_vm12  ;;  %v2170_v53 = vsel %vm9508_vm8, %v9383_v43, %v2166_v61  ;;  %v2174_v43 = vor.u32 1.1754944e-38, %v2173_v37  ;;  %vm13228_vm11 = vcmask 261120  }
 0x4fa   :  { %v2284_v20 = vsub.f32 1.0, %v2283_v50  ;;  %vm13229_vm0 = vmmov %vm13228_vm11  ;;  %vm13233_vm12 = vcmask 31744  }
 0x4fb   :  { %v2271_v30 = vadd.f32 %v6712_v58, %v2270_v55  ;;  %vm13234_vm4 = vmmov %vm13233_vm12 }
 0x4fc   :  { %v2285_v11 = vmul.f32 %v6714_v25, %v2284_v20  ;;  %vm13235_vm8 = vmmov %vm13234_vm4 }
 0x4fd   :  { %v2275_v27 = vsel %vm2274_vm7, %v6712_v58, %v2271_v30  ;;  %vm13230_vm7 = vcmask 1043456   ;;  %vm13236_vm1 = vmmov %vm13234_vm4 }
 0x4fe   :  { %v2280_v58 = vsel %vm2277_vm9, %v2279_v24, %v2275_v27  ;;  %v2286_v40 = vadd.f32 %v6714_v25, %v2285_v11  ;;  %vm13231_vm9 = vmmov %vm13230_vm7 }
 0x4ff   :  { %v2311_v42 = vmul.f32 %v2280_v58, %v9350_v17  ;;  %v2100_v17 = vsel %vm9445_vm2, %v9403_v62, %v2095_v9  ;;  %vm2172_vm2 = vcmp.eq.f32.partialorder %v2171_v49, 8.507059e+37  ;;  %v2419_v49 = vstv %s9559_s11  ;;  %vm13232_vm13 = vmmov %vm13230_vm7 }
 0x500   :  { %v2290_v7 = vsel %vm2289_vm14, %v6714_v25, %v2286_v40  ;;  %v2303_v25 = vmul.f32 %v2160_v39, %v9297_v46  ;;  %v2175_v32 = vsel %vm2172_vm2, %v2174_v43, %v2170_v53  ;;  %v2299_v37 = vmul.f32 %v2100_v17, %v9277_v57  ;;  %vm13237_vm3 = vmmov %vm13236_vm1 }
 0x501   :  { %2365 = vmatpush.msrb.mxu2 %v2311_v42  ;;  %v2295_v54 = vsel %vm2292_vm10, %v2294_v13, %v2290_v7  ;;  %v2115_v46 = vsel %vm2112_vm5, %v2114_v22, %v2110_v44  ;;  %v2304_v33 = vmul.f32 %v2175_v32, %v9320_v45  ;;  %v2399_v45 = vstv %s6154_s10  ;;  %vm13238_vm14 = vmmov %vm13236_vm1 }
 0x502   :  { %v2312_v62 = vmul.f32 %v2295_v54, %v9361_v23  ;;  %v2300_v23 = vmul.f32 %v2115_v46, %v9306_v36  ;;  %v2396_v36 = vstv %s9557_s0  ;;  %v2420_v50 = vmul.f32 %v6156_v41, %v2419_v49  ;;  %vm13239_vm10 = vmmov %vm13236_vm1 }
 0x503   :  { %2366 = vmatpush.msrb.mxu2 %v2307_v18  ;;  %v2397_v55 = vmul.f32 %v2396_v36, %v8990_v4  ;;  %v9590_v4 = vld [vmem:[%s12926_s2 + $0x18] sm:$0xff]  ;;  %vm13240_vm15 = vmmov %vm13236_vm1  ;;  %v2398_v31 = vmul.f32 %v2396_v36, %v9033_v52  ;;  %v2421_v9 = vmul.f32 %v6157_v28, %v2419_v49  ;;  %v2985_v58 = vstv %s9601_s1  ;;  %v9628_v52 = vpop.permute.xlu2 %2446  ;;  %s11233_s1 = sld [smem:[#allocation2 + $0x18]] }
 0x504   :  { %2385 = vmatpush.msrb.mxu3 %v2312_v62  ;;  %vm13241_vm6 = vmmov %vm13230_vm7 }
 0x505   :  { %2367 = vmatpush.msrb.mxu2 %v2303_v25  ;;  %vm13242_vm2 = vmmov %vm13241_vm6 }
 0x506   :  { %2386 = vmatpush.msrb.mxu3 %v2308_v1  ;;  %vm13243_vm5 = vmmov %vm13242_vm2 }
 0x507   :  { %2368 = vmatpush.msrb.mxu2 %v2299_v37 }
 0x508   :  { %6151 = vmatmul.msk.f32.vlgmr.msrb.gmra.mxu2 %vm13228_vm11, %v9327_v19  ;;  %2387 = vmatpush.msrb.mxu3 %v2304_v33  ;;  %vm13244_vm11 = vmmov %vm13236_vm1 }
 0x50a   :  { %2388 = vmatpush.msrb.mxu3 %v2300_v23 }
 0x50b   :  { %6152 = vmatmul.msk.f32.vlgmr.msrb.gmra.mxu3 %vm13229_vm0, %v9327_v19  ;;  %vm13245_vm0 = vmmov %vm13236_vm1  ;;  %v9630_v39 = vpop.permute.xlu2 %2431 }
 0x552   :  { %v2330_v57 = vpop.f32.mrf.mxu0 }
 0x553   :  { %v2331_v38 = vadd.f32 %v2330_v57, %v7811_v48 }
 0x555   :  { %v2350_v34 = vpop.f32.mrf.mxu1  ;;  %v2400_v6 = vmul.f32 %v2399_v45, %v2331_v38 }
 0x556   :  { %v2351_v8 = vadd.f32 %v2350_v34, %v7811_v48 }
 0x558   :  { %v2401_v5 = vmul.f32 %v2399_v45, %v2351_v8 }
 0x55a   :  { %v2408_v47 = vrot.slane %v2401_v5, 4 }
 0x55c   :  { %v2410_v63 = vsel %vm13230_vm7, %v2400_v6, %v2408_v47  ;;  %vm13246_vm7 = vmmov %vm13245_vm0 }
 0x55d   :  { %v2414_v14 = vadd.f32 %v2410_v63, %v2397_v55 }
 0x55f   :  { %v9570_v35 = vadd.f32 %v2420_v50, %v2414_v14 }
 0x561   :  { %2451 = vst [vmem:[#allocation1] ss:$2 sm:$0xff] %v9570_v35 }
 0x568   :  { %v2454_v56 = vld.sshfl [vmem:[#allocation1] sm:$0xff pattern:$0x75316420]  ;;  %v2455_v3 = vld.sshfl [vmem:[#allocation1 + $0x8] sm:$0xff pattern:$0x75316420] }
 0x569   :  { %6162 = vmatpush.msk.msra.mxu0 %vm13231_vm9, %v2454_v56  ;;  %6167 = vmatpush.msk.msra.mxu1 %vm13232_vm13, %v2455_v3  ;;  %vm13247_vm9 = vmmov %vm13245_vm0 }
 0x56a   :  { %6163 = vmatmul.msk.f32.vlgmr.msra.gmra.mxu0 %vm13233_vm12, %v8998_v21  ;;  %6168 = vmatmul.msk.f32.vlgmr.msra.gmra.mxu1 %vm13234_vm4, %v8998_v21  ;;  %vm13248_vm13 = vmmov %vm13245_vm0 }
 0x56b   :  { %vm13249_vm12 = vmmov %vm13245_vm0 }
 0x56c   :  { %vm13250_vm4 = vmmov %vm13245_vm0 }
 0x572   :  { %6164 = vmatmul.msk.f32.gmra.mxu0 %vm13235_vm8, %v9007_v10  ;;  %6169 = vmatmul.msk.f32.gmra.mxu1 %vm13236_vm1, %v9007_v10  ;;  %vm13251_vm8 = vmmov %vm13245_vm0 }
 0x57a   :  { %6165 = vmatmul.msk.f32.gmra.mxu0 %vm13237_vm3, %v9016_v26  ;;  %6170 = vmatmul.msk.f32.gmra.mxu1 %vm13238_vm14, %v9016_v26 }
 0x582   :  { %6166 = vmatmul.msk.f32.gmra.mxu0 %vm13239_vm10, %v9590_v4  ;;  %6171 = vmatmul.msk.f32.gmra.mxu1 %vm13240_vm15, %v9590_v4 }
 0x58b   :  { %v2370_v30 = vpop.f32.mrf.mxu2 }
 0x58c   :  { %v2371_v61 = vadd.f32 %v2370_v30, %v7811_v48 }
 0x58e   :  { %v2390_v20 = vpop.f32.mrf.mxu3  ;;  %v2402_v27 = vmul.f32 %v2399_v45, %v2371_v61 }
 0x58f   :  { %v2391_v24 = vadd.f32 %v2390_v20, %v7811_v48 }
 0x591   :  { %v2403_v16 = vmul.f32 %v2399_v45, %v2391_v24 }
 0x593   :  { %v2409_v11 = vrot.slane %v2403_v16, 4 }
 0x595   :  { %v2411_v59 = vsel %vm13241_vm6, %v2402_v27, %v2409_v11 }
 0x596   :  { %v2415_v2 = vadd.f32 %v2411_v59, %v2398_v31 }
 0x598   :  { %v2423_v60 = vadd.f32 %v2421_v9, %v2415_v2 }
 0x59a   :  { %2453 = vst [vmem:[#allocation1 + $0x10] ss:$2 sm:$0xff] %v2423_v60  ;;  %v9608_v12 = vmul.f32 %v2985_v58, %v2423_v60 }
 0x5a1   :  { %v2456_v51 = vld.sshfl [vmem:[#allocation1 + $0x10] sm:$0xff pattern:$0x75316420]  ;;  %v2457_v42 = vld.sshfl [vmem:[#allocation1 + $0x18] sm:$0xff pattern:$0x75316420] }
 0x5a2   :  { %6172 = vmatpush.msk.msra.mxu2 %vm13242_vm2, %v2456_v51  ;;  %6177 = vmatpush.msk.msra.mxu3 %vm13243_vm5, %v2457_v42 }
 0x5a3   :  { %6173 = vmatmul.msk.f32.vlgmr.msra.gmra.mxu2 %vm13244_vm11, %v8998_v21  ;;  %6178 = vmatmul.msk.f32.vlgmr.msra.gmra.mxu3 %vm13245_vm0, %v8998_v21 }
 0x5ab   :  { %6174 = vmatmul.msk.f32.gmra.mxu2 %vm13246_vm7, %v9007_v10  ;;  %6179 = vmatmul.msk.f32.gmra.mxu3 %vm13247_vm9, %v9007_v10 }
 0x5b3   :  { %6175 = vmatmul.msk.f32.gmra.mxu2 %vm13248_vm13, %v9016_v26  ;;  %6180 = vmatmul.msk.f32.gmra.mxu3 %vm13249_vm12, %v9016_v26 }
 0x5bb   :  { %6176 = vmatmul.msk.f32.gmra.mxu2 %vm13250_vm4, %v9590_v4  ;;  %6181 = vmatmul.msk.f32.gmra.mxu3 %vm13251_vm8, %v9590_v4 }
 0x5e7   :  { %v2483_v21 = vpop.f32.mrf.mxu0  ;;  %v2512_v40 = vpop.f32.mrf.mxu1 }
 0x5e8   :  { %v9635_v10 = vadd.f32 %v2483_v21, %v9630_v39  ;;  %v9641_v18 = vadd.f32 %v2512_v40, %v9630_v39 }
 0x5ea   :  { %v6182_v7 = vmul.f32 -1.442695, %v9635_v10  ;;  %v6183_v43 = vmul.f32 -1.442695, %v9641_v18 }
 0x5ec   :  { %6715 = vpow2.f32 %v6182_v7 }
 0x5ef   :  { %v2486_v13 = vpop.f32.mrf.mxu0  ;;  %v2515_v53 = vpop.f32.mrf.mxu1 }
 0x5f0   :  { %v9638_v26 = vadd.f32 %v2486_v13, %v9632_v29  ;;  %v9646_v15 = vadd.f32 %v2515_v53, %v9632_v29 }
 0x5f2   :  { %v6186_v17 = vmul.f32 -1.442695, %v9638_v26  ;;  %v6187_v54 = vmul.f32 -1.442695, %v9646_v15  ;;  %v6716_v1 = vpop.eup %6715 }
 0x5f3   :  { %v9660_v23 = vadd.f32 1.0, %v6716_v1 }
 0x5f4   :  { %6717 = vpow2.f32 %v6186_v17 }
 0x5f5   :  { %6719 = vpow2.f32 %v6183_v43  ;;  %v2657_v59 = vand.u32 2147483648, %v9660_v23  ;;  %v2655_v51 = vand.u32 2147483647, %v9660_v23  ;;  %vm2651_vm14 = vweird.f32 %v9660_v23 }
 0x5f6   :  { %6721 = vpow2.f32 %v6187_v54 }
 0x5f7   :  { %v2489_v44 = vpop.f32.mrf.mxu0  ;;  %v2518_v25 = vpop.f32.mrf.mxu1  ;;  %v9720_v54 = vor.u32 1.1754944e-38, %v2657_v59  ;;  %vm9762_vm13 = vcmp.eq.f32.partialorder %v2655_v51, 8.507059e+37 }
 0x5f8   :  { %v9653_v62 = vadd.f32 %v2489_v44, %v9649_v0  ;;  %v9656_v22 = vadd.f32 %v2518_v25, %v9649_v0 }
 0x5fa   :  { %v6190_v32 = vmul.f32 -1.442695, %v9653_v62  ;;  %v6191_v37 = vmul.f32 -1.442695, %v9656_v22  ;;  %v6718_v46 = vpop.eup %6717 }
 0x5fb   :  { %v6720_v33 = vpop.eup %6719  ;;  %v9662_v45 = vadd.f32 1.0, %v6718_v46 }
 0x5fc   :  { %6723 = vpow2.f32 %v6190_v32  ;;  %v6722_v34 = vpop.eup %6721  ;;  %v9664_v8 = vadd.f32 1.0, %v6720_v33 }
 0x5fd   :  { %6725 = vpow2.f32 %v6191_v37  ;;  %v9674_v47 = vadd.f32 1.0, %v6722_v34  ;;  %v2717_v42 = vand.u32 2147483648, %v9662_v45  ;;  %vm2711_vm1 = vweird.f32 %v9662_v45 }
 0x5fe   :  { %6727 = vrcp.f32 %v9660_v23  ;;  %v2670_v53 = vand.u32 2147483647, %v9664_v8  ;;  %v2672_v44 = vand.u32 2147483648, %v9664_v8  ;;  %v2715_v1 = vand.u32 2147483647, %v9662_v45 }
 0x5ff   :  { %v2492_v57 = vpop.f32.mrf.mxu0  ;;  %v2521_v5 = vpop.f32.mrf.mxu1  ;;  %6729 = vrcp.f32 %v9662_v45  ;;  %v9730_v46 = vor.u32 1.1754944e-38, %v2717_v42  ;;  %vm2726_vm6 = vweird.f32 %v9674_v47 }
 0x600   :  { %v9667_v36 = vadd.f32 %v2492_v57, %v9628_v52  ;;  %v9678_v55 = vadd.f32 %v2521_v5, %v9628_v52  ;;  %vm9751_vm0 = vcmp.eq.f32.partialorder %v2715_v1, 8.507059e+37 }
 0x602   :  { %v6724_v38 = vpop.eup %6723  ;;  %v6194_v49 = vmul.f32 -1.442695, %v9667_v36  ;;  %v6195_v14 = vmul.f32 -1.442695, %v9678_v55 }
 0x603   :  { %v9670_v41 = vadd.f32 1.0, %v6724_v38  ;;  %v6726_v6 = vpop.eup %6725 }
 0x604   :  { %v9681_v50 = vadd.f32 1.0, %v6726_v6  ;;  %v9683_v63 = vpop.eup %6727  ;;  %v2732_v6 = vand.u32 2147483648, %v9674_v47 }
 0x605   :  { %6731 = vrcp.f32 %v9670_v41  ;;  %v9687_v56 = vpop.eup %6729  ;;  %v2647_v20 = vmul.f32 %v9683_v63, %v9660_v23  ;;  %vm2652_vm3 = vweird.f32 %v9683_v63  ;;  %v2775_v32 = vand.u32 2147483647, %v9670_v41 }
 0x606   :  { %6733 = vrcp.f32 %v9664_v8  ;;  %v2707_v61 = vmul.f32 %v9687_v56, %v9662_v45  ;;  %v2777_v37 = vand.u32 2147483648, %v9670_v41  ;;  %vm2712_vm10 = vweird.f32 %v9687_v56 }
 0x607   :  { %6735 = vpow2.f32 %v6194_v49  ;;  %v2648_v9 = vsub.f32 1.0, %v2647_v20  ;;  %v2730_v49 = vand.u32 2147483647, %v9674_v47  ;;  %vm2771_vm15 = vweird.f32 %v9670_v41  ;;  %vm9771_vm4 = vmor %vm2711_vm1, %vm2712_vm10 }
 0x608   :  { %6737 = vrcp.f32 %v9674_v47  ;;  %v2708_v60 = vsub.f32 1.0, %v2707_v61  ;;  %vm9746_vm5 = vcmp.eq.f32.partialorder %v2775_v32, 8.507059e+37  ;;  %vm2786_vm9 = vweird.f32 %v9681_v50 }
 0x609   :  { %6739 = vrcp.f32 %v9681_v50  ;;  %v2649_v43 = vmul.f32 %v9683_v63, %v2648_v9 }
 0x60a   :  { %6741 = vpow2.f32 %v6195_v14  ;;  %v2709_v25 = vmul.f32 %v9687_v56, %v2708_v60 }
 0x60b   :  { %v9690_v3 = vpop.eup %6731  ;;  %v9738_v14 = vadd.f32 %v9683_v63, %v2649_v43  ;;  %v2790_v43 = vand.u32 2147483647, %v9681_v50 }
 0x60c   :  { %v9692_v30 = vpop.eup %6733  ;;  %v2767_v16 = vmul.f32 %v9690_v3, %v9670_v41  ;;  %v2710_v61 = vadd.f32 %v9687_v56, %v2709_v25  ;;  %vm2772_vm7 = vweird.f32 %v9690_v3 }
 0x60d   :  { %v6736_v24 = vpop.eup %6735  ;;  %v2662_v27 = vmul.f32 %v9692_v30, %v9664_v8  ;;  %vm2667_vm11 = vweird.f32 %v9692_v30  ;;  %vm9784_vm12 = vmor %vm2771_vm15, %vm2772_vm7 }
 0x60e   :  { %v9700_v28 = vpop.eup %6737  ;;  %v9704_v11 = vadd.f32 1.0, %v6736_v24  ;;  %v2768_v21 = vsub.f32 1.0, %v2767_v16  ;;  %v2778_v16 = vor.u32 1.1754944e-38, %v2777_v37  ;;  %v2714_v51 = vsel %vm9771_vm4, %v9687_v56, %v2710_v61  ;;  %vm9801_vm4 = vmor %vm2651_vm14, %vm2652_vm3 }
 0x60f   :  { %v9706_v31 = vpop.eup %6739  ;;  %v2663_v13 = vsub.f32 1.0, %v2662_v27  ;;  %v2722_v7 = vmul.f32 %v9700_v28, %v9674_v47  ;;  %vm2727_vm2 = vweird.f32 %v9700_v28  ;;  %v2792_v37 = vand.u32 2147483648, %v9681_v50 }
 0x610   :  { %v6742_v2 = vpop.eup %6741  ;;  %6743 = vrcp.f32 %v9704_v11  ;;  %v2782_v40 = vmul.f32 %v9706_v31, %v9681_v50  ;;  %v2769_v33 = vmul.f32 %v9690_v3, %v2768_v21  ;;  %v2835_v21 = vand.u32 2147483647, %v9704_v11  ;;  %vm9825_vm14 = vmor %vm2726_vm6, %vm2727_vm2 }
 0x611   :  { %v9717_v17 = vadd.f32 1.0, %v6742_v2  ;;  %v2664_v38 = vmul.f32 %v9692_v30, %v2663_v13  ;;  %v2723_v5 = vsub.f32 1.0, %v2722_v7  ;;  %vm2787_vm1 = vweird.f32 %v9706_v31 }
 0x612   :  { %v2783_v57 = vsub.f32 1.0, %v2782_v40  ;;  %v2770_v9 = vadd.f32 %v9690_v3, %v2769_v33  ;;  %v2837_v40 = vand.u32 2147483648, %v9704_v11  ;;  %vm2831_vm10 = vweird.f32 %v9704_v11  ;;  %vm9817_vm3 = vmor %vm2786_vm9, %vm2787_vm1 }
 0x613   :  { %6745 = vrcp.f32 %v9717_v17  ;;  %v2724_v42 = vmul.f32 %v9700_v28, %v2723_v5  ;;  %vm2836_vm7 = vcmp.eq.f32.partialorder %v2835_v21, 8.507059e+37  ;;  %v2719_v24 = vsel %vm9751_vm0, %v9730_v46, %v2714_v51 }
 0x614   :  { %v2784_v59 = vmul.f32 %v9706_v31, %v2783_v57  ;;  %v2774_v1 = vsel %vm9784_vm12, %v9690_v3, %v2770_v9  ;;  %v2838_v5 = vor.u32 1.1754944e-38, %v2837_v40  ;;  %v2850_v9 = vand.u32 2147483647, %v9717_v17 }
 0x615   :  { %v2725_v41 = vadd.f32 %v9700_v28, %v2724_v42  ;;  %v2779_v42 = vsel %vm9746_vm5, %v2778_v16, %v2774_v1  ;;  %vm2846_vm5 = vweird.f32 %v9717_v17  ;;  %vm2791_vm9 = vcmp.eq.f32.partialorder %v2790_v43, 8.507059e+37 }
 0x616   :  { %v6744_v34 = vpop.eup %6743  ;;  %v2785_v56 = vadd.f32 %v9706_v31, %v2784_v59  ;;  %v2654_v59 = vsel %vm9801_vm4, %v9683_v63, %v9738_v14  ;;  %v2793_v16 = vor.u32 1.1754944e-38, %v2792_v37  ;;  %vm2851_vm2 = vcmp.eq.f32.partialorder %v2850_v9, 8.507059e+37 }
 0x617   :  { %v2827_v20 = vmul.f32 %v6744_v34, %v9704_v11  ;;  %vm2832_vm8 = vweird.f32 %v6744_v34  ;;  %v2729_v40 = vsel %vm9825_vm14, %v9700_v28, %v2725_v41  ;;  %vm13268_vm0 = vweird.f32 %v9664_v8 }
 0x618   :  { %vm2833_vm15 = vmor %vm2831_vm10, %vm2832_vm8  ;;  %v2733_v28 = vor.u32 1.1754944e-38, %v2732_v6  ;;  %v2673_v13 = vor.u32 1.1754944e-38, %v2672_v44  ;;  %vm13271_vm1 = vcmask 261120  }
 0x619   :  { %v2828_v2 = vsub.f32 1.0, %v2827_v20  ;;  %v6746_v60 = vpop.eup %6745  ;;  %v2852_v20 = vand.u32 2147483648, %v9717_v17  ;;  %vm9849_vm8 = vmor %vm13268_vm0, %vm2667_vm11  ;;  %vm2671_vm11 = vcmp.eq.f32.partialorder %v2670_v53, 8.507059e+37 }
 0x61a   :  { %v2842_v32 = vmul.f32 %v6746_v60, %v9717_v17  ;;  %vm2847_vm12 = vweird.f32 %v6746_v60  ;;  %vm13272_vm10 = vmmov %vm13271_vm1 }
 0x61b   :  { %v2829_v25 = vmul.f32 %v6744_v34, %v2828_v2  ;;  %v2665_v2 = vadd.f32 %v9692_v30, %v2664_v38  ;;  %v2789_v38 = vsel %vm9817_vm3, %v9706_v31, %v2785_v56  ;;  %vm2848_vm6 = vmor %vm2846_vm5, %vm2847_vm12  ;;  %v2853_v21 = vor.u32 1.1754944e-38, %v2852_v20 }
 0x61c   :  { %v2843_v57 = vsub.f32 1.0, %v2842_v32  ;;  %v2894_v31 = vmul.f32 %v2779_v42, %v9653_v62  ;;  %v2794_v46 = vsel %vm2791_vm9, %v2793_v16, %v2789_v38 }
 0x61d   :  { %v2830_v33 = vadd.f32 %v6744_v34, %v2829_v25  ;;  %v2669_v27 = vsel %vm9849_vm8, %v9692_v30, %v2665_v2  ;;  %v2895_v25 = vmul.f32 %v2794_v46, %v9656_v22 }
 0x61e   :  { %v2844_v61 = vmul.f32 %v6746_v60, %v2843_v57 }
 0x61f   :  { %v2834_v3 = vsel %vm2833_vm15, %v6744_v34, %v2830_v33 }
 0x620   :  { %v2839_v34 = vsel %vm2836_vm7, %v2838_v5, %v2834_v3  ;;  %v2845_v50 = vadd.f32 %v6746_v60, %v2844_v61 }
 0x621   :  { %v2898_v14 = vmul.f32 %v2839_v34, %v9667_v36  ;;  %v2659_v36 = vsel %vm9762_vm13, %v9720_v54, %v2654_v59  ;;  %vm2731_vm13 = vcmp.eq.f32.partialorder %v2730_v49, 8.507059e+37 }
 0x622   :  { %v2849_v7 = vsel %vm2848_vm6, %v6746_v60, %v2845_v50  ;;  %v2890_v60 = vmul.f32 %v2719_v24, %v9638_v26  ;;  %v2734_v43 = vsel %vm2731_vm13, %v2733_v28, %v2729_v40  ;;  %v2886_v6 = vmul.f32 %v2659_v36, %v9635_v10 }
 0x623   :  { %2914 = vmatpush.msrb.mxu0 %v2898_v14  ;;  %v2854_v62 = vsel %vm2851_vm2, %v2853_v21, %v2849_v7  ;;  %v2674_v26 = vsel %vm2671_vm11, %v2673_v13, %v2669_v27  ;;  %v2891_v47 = vmul.f32 %v2734_v43, %v9646_v15 }
 0x624   :  { %v2899_v54 = vmul.f32 %v2854_v62, %v9678_v55  ;;  %v2887_v55 = vmul.f32 %v2674_v26, %v9641_v18 }
 0x625   :  { %2915 = vmatpush.msrb.mxu0 %v2894_v31 }
 0x626   :  { %v2541_v30 = vpop.f32.mrf.mxu2  ;;  %v2570_v32 = vpop.f32.mrf.mxu3  ;;  %2934 = vmatpush.msrb.mxu1 %v2899_v54 }
 0x627   :  { %2916 = vmatpush.msrb.mxu0 %v2890_v60  ;;  %v9873_v10 = vadd.f32 %v2541_v30, %v9630_v39  ;;  %v9881_v15 = vadd.f32 %v2570_v32, %v9630_v39 }
 0x628   :  { %2935 = vmatpush.msrb.mxu1 %v2895_v25 }
 0x629   :  { %2917 = vmatpush.msrb.mxu0 %v2886_v6  ;;  %v6184_v44 = vmul.f32 -1.442695, %v9873_v10  ;;  %v6185_v51 = vmul.f32 -1.442695, %v9881_v15 }
 0x62a   :  { %6198 = vmatmul.msk.f32.vlgmr.msrb.gmra.mxu0 %vm13271_vm1, %v9327_v19  ;;  %2936 = vmatpush.msrb.mxu1 %v2891_v47 }
 0x62b   :  { %6747 = vpow2.f32 %v6184_v44 }
 0x62c   :  { %2937 = vmatpush.msrb.mxu1 %v2887_v55 }
 0x62d   :  { %6199 = vmatmul.msk.f32.vlgmr.msrb.gmra.mxu1 %vm13272_vm10, %v9327_v19 }
 0x62e   :  { %v2544_v22 = vpop.f32.mrf.mxu2  ;;  %v2573_v8 = vpop.f32.mrf.mxu3 }
 0x62f   :  { %v9878_v53 = vadd.f32 %v2544_v22, %v9632_v29  ;;  %v9886_v49 = vadd.f32 %v2573_v8, %v9632_v29 }
 0x631   :  { %v6188_v18 = vmul.f32 -1.442695, %v9878_v53  ;;  %v6189_v19 = vmul.f32 -1.442695, %v9886_v49  ;;  %v6748_v33 = vpop.eup %6747 }
 0x632   :  { %v9898_v5 = vadd.f32 1.0, %v6748_v33 }
 0x633   :  { %6749 = vpow2.f32 %v6188_v18 }
 0x634   :  { %6751 = vpow2.f32 %v6185_v51  ;;  %v2687_v27 = vand.u32 2147483648, %v9898_v5  ;;  %v2685_v13 = vand.u32 2147483647, %v9898_v5  ;;  %vm2681_vm4 = vweird.f32 %v9898_v5 }
 0x635   :  { %6753 = vpow2.f32 %v6189_v19 }
 0x636   :  { %v2547_v45 = vpop.f32.mrf.mxu2  ;;  %v2576_v37 = vpop.f32.mrf.mxu3  ;;  %v9958_v22 = vor.u32 1.1754944e-38, %v2687_v27  ;;  %vm10000_vm13 = vcmp.eq.f32.partialorder %v2685_v13, 8.507059e+37 }
 0x637   :  { %v9891_v1 = vadd.f32 %v2547_v45, %v9649_v0  ;;  %v9894_v39 = vadd.f32 %v2576_v37, %v9649_v0 }
 0x639   :  { %v6192_v56 = vmul.f32 -1.442695, %v9891_v1  ;;  %v6193_v29 = vmul.f32 -1.442695, %v9894_v39  ;;  %v6750_v57 = vpop.eup %6749 }
 0x63a   :  { %v6752_v41 = vpop.eup %6751  ;;  %v9900_v11 = vadd.f32 1.0, %v6750_v57 }
 0x63b   :  { %6755 = vpow2.f32 %v6192_v56  ;;  %v6754_v3 = vpop.eup %6753  ;;  %v9902_v0 = vadd.f32 1.0, %v6752_v41 }
 0x63c   :  { %6757 = vpow2.f32 %v6193_v29  ;;  %v9912_v34 = vadd.f32 1.0, %v6754_v3  ;;  %v2747_v43 = vand.u32 2147483648, %v9900_v11  ;;  %vm2741_vm15 = vweird.f32 %v9900_v11 }
 0x63d   :  { %6759 = vrcp.f32 %v9898_v5  ;;  %v2700_v32 = vand.u32 2147483647, %v9902_v0  ;;  %v2702_v8 = vand.u32 2147483648, %v9902_v0  ;;  %v2745_v19 = vand.u32 2147483647, %v9900_v11 }
 0x63e   :  { %v2550_v20 = vpop.f32.mrf.mxu2  ;;  %v2579_v59 = vpop.f32.mrf.mxu3  ;;  %6761 = vrcp.f32 %v9900_v11  ;;  %v9968_v45 = vor.u32 1.1754944e-38, %v2747_v43  ;;  %v2760_v41 = vand.u32 2147483647, %v9912_v34  ;;  %vm2756_vm14 = vweird.f32 %v9912_v34 }
 0x63f   :  { %v9905_v9 = vadd.f32 %v2550_v20, %v9628_v52  ;;  %v9916_v63 = vadd.f32 %v2579_v59, %v9628_v52  ;;  %v2762_v20 = vand.u32 2147483648, %v9912_v34  ;;  %vm9989_vm2 = vcmp.eq.f32.partialorder %v2745_v19, 8.507059e+37 }
 0x641   :  { %v6756_v61 = vpop.eup %6755  ;;  %v6196_v42 = vmul.f32 -1.442695, %v9905_v9  ;;  %v6197_v50 = vmul.f32 -1.442695, %v9916_v63 }
 0x642   :  { %v9908_v2 = vadd.f32 1.0, %v6756_v61  ;;  %v6758_v23 = vpop.eup %6757 }
 0x643   :  { %v9919_v38 = vadd.f32 1.0, %v6758_v23  ;;  %v9921_v14 = vpop.eup %6759 }
 0x644   :  { %6763 = vrcp.f32 %v9908_v2  ;;  %v9925_v24 = vpop.eup %6761  ;;  %v2677_v21 = vmul.f32 %v9921_v14, %v9898_v5  ;;  %vm2682_vm7 = vweird.f32 %v9921_v14  ;;  %v2805_v18 = vand.u32 2147483647, %v9908_v2 }
 0x645   :  { %6765 = vrcp.f32 %v9902_v0  ;;  %v2737_v40 = vmul.f32 %v9925_v24, %v9900_v11  ;;  %v2807_v51 = vand.u32 2147483648, %v9908_v2  ;;  %vm2742_vm12 = vweird.f32 %v9925_v24 }
 0x646   :  { %6767 = vpow2.f32 %v6196_v42  ;;  %v2678_v62 = vsub.f32 1.0, %v2677_v21  ;;  %vm2801_vm3 = vweird.f32 %v9908_v2  ;;  %vm9984_vm9 = vcmp.eq.f32.partialorder %v2805_v18, 8.507059e+37  ;;  %vm10009_vm1 = vmor %vm2741_vm15, %vm2742_vm12 }
 0x647   :  { %6769 = vrcp.f32 %v9912_v34  ;;  %v2738_v54 = vsub.f32 1.0, %v2737_v40  ;;  %v2808_v23 = vor.u32 1.1754944e-38, %v2807_v51  ;;  %vm2816_vm8 = vweird.f32 %v9919_v38 }
 0x648   :  { %6771 = vrcp.f32 %v9919_v38  ;;  %v2679_v55 = vmul.f32 %v9921_v14, %v2678_v62  ;;  %v2820_v43 = vand.u32 2147483647, %v9919_v38 }
 0x649   :  { %6773 = vpow2.f32 %v6197_v50  ;;  %v2739_v44 = vmul.f32 %v9925_v24, %v2738_v54  ;;  %v2986_v54 = vmul.f32 %v2985_v58, %v9570_v35  ;;  %v10146_v35 = vld [vmem:[%s12926_s2 + $0x8] sm:$0xff]  ;;  %v10155_v58 = vld [vmem:[%s12926_s2 + $0x10] sm:$0xff] }
 0x64a   :  { %v9928_v16 = vpop.eup %6763  ;;  %v9976_v3 = vadd.f32 %v9921_v14, %v2679_v55 }
 0x64b   :  { %v9930_v52 = vpop.eup %6765  ;;  %v2797_v7 = vmul.f32 %v9928_v16, %v9908_v2  ;;  %v2740_v59 = vadd.f32 %v9925_v24, %v2739_v44  ;;  %vm2802_vm0 = vweird.f32 %v9928_v16 }
 0x64c   :  { %v6768_v31 = vpop.eup %6767  ;;  %v2692_v17 = vmul.f32 %v9930_v52, %v9902_v0  ;;  %vm2697_vm6 = vweird.f32 %v9930_v52  ;;  %vm10022_vm11 = vmor %vm2801_vm3, %vm2802_vm0 }
 0x64d   :  { %v9938_v36 = vpop.eup %6769  ;;  %v9942_v28 = vadd.f32 1.0, %v6768_v31  ;;  %v2798_v6 = vsub.f32 1.0, %v2797_v7  ;;  %v2744_v13 = vsel %vm10009_vm1, %v9925_v24, %v2740_v59  ;;  %vm10039_vm1 = vmor %vm2681_vm4, %vm2682_vm7 }
 0x64e   :  { %v9944_v46 = vpop.eup %6771  ;;  %v2693_v30 = vsub.f32 1.0, %v2692_v17  ;;  %v2752_v26 = vmul.f32 %v9938_v36, %v9912_v34  ;;  %vm2757_vm5 = vweird.f32 %v9938_v36  ;;  %v2749_v59 = vsel %vm9989_vm2, %v9968_v45, %v2744_v13 }
 0x64f   :  { %v6774_v60 = vpop.eup %6773  ;;  %6775 = vrcp.f32 %v9942_v28  ;;  %v2812_v25 = vmul.f32 %v9944_v46, %v9919_v38  ;;  %v2799_v37 = vmul.f32 %v9928_v16, %v2798_v6  ;;  %v2865_v62 = vand.u32 2147483647, %v9942_v28  ;;  %vm10063_vm4 = vmor %vm2756_vm14, %vm2757_vm5 }
 0x650   :  { %v9955_v47 = vadd.f32 1.0, %v6774_v60  ;;  %v2694_v33 = vmul.f32 %v9930_v52, %v2693_v30  ;;  %v2753_v57 = vsub.f32 1.0, %v2752_v26  ;;  %v2867_v27 = vand.u32 2147483648, %v9942_v28 }
 0x651   :  { %v2813_v56 = vsub.f32 1.0, %v2812_v25  ;;  %v2800_v21 = vadd.f32 %v9928_v16, %v2799_v37  ;;  %vm2817_vm15 = vweird.f32 %v9944_v46  ;;  %v2822_v30 = vand.u32 2147483648, %v9919_v38 }
 0x652   :  { %6777 = vrcp.f32 %v9955_v47  ;;  %v2754_v17 = vmul.f32 %v9938_v36, %v2753_v57  ;;  %vm2861_vm12 = vweird.f32 %v9942_v28  ;;  %vm2866_vm0 = vcmp.eq.f32.partialorder %v2865_v62, 8.507059e+37  ;;  %vm10055_vm7 = vmor %vm2816_vm8, %vm2817_vm15 }
 0x653   :  { %v2814_v40 = vmul.f32 %v9944_v46, %v2813_v56  ;;  %v2804_v26 = vsel %vm10022_vm11, %v9928_v16, %v2800_v21  ;;  %v2868_v18 = vor.u32 1.1754944e-38, %v2867_v27  ;;  %v2882_v51 = vand.u32 2147483648, %v9955_v47 }
 0x654   :  { %v2755_v2 = vadd.f32 %v9938_v36, %v2754_v17  ;;  %v2880_v37 = vand.u32 2147483647, %v9955_v47  ;;  %v2684_v56 = vsel %vm10039_vm1, %v9921_v14, %v9976_v3  ;;  %v2695_v57 = vadd.f32 %v9930_v52, %v2694_v33 }
 0x655   :  { %v6776_v29 = vpop.eup %6775  ;;  %v2815_v24 = vadd.f32 %v9944_v46, %v2814_v40  ;;  %vm2821_vm8 = vcmp.eq.f32.partialorder %v2820_v43, 8.507059e+37  ;;  %v2823_v42 = vor.u32 1.1754944e-38, %v2822_v30  ;;  %vm13289_vm2 = vweird.f32 %v9902_v0 }
 0x656   :  { %v2857_v61 = vmul.f32 %v6776_v29, %v9942_v28  ;;  %vm2862_vm10 = vweird.f32 %v6776_v29  ;;  %v2759_v21 = vsel %vm10063_vm4, %v9938_v36, %v2755_v2  ;;  %vm2881_vm5 = vcmp.eq.f32.partialorder %v2880_v37, 8.507059e+37 }
 0x657   :  { %vm2863_vm3 = vmor %vm2861_vm12, %vm2862_vm10  ;;  %v2819_v33 = vsel %vm10055_vm7, %v9944_v46, %v2815_v24  ;;  %v2763_v36 = vor.u32 1.1754944e-38, %v2762_v20  ;;  %vm13292_vm15 = vcmask 261120  }
 0x658   :  { %v2858_v31 = vsub.f32 1.0, %v2857_v61  ;;  %v6778_v7 = vpop.eup %6777  ;;  %v2809_v61 = vsel %vm9984_vm9, %v2808_v23, %v2804_v26  ;;  %vm2876_vm9 = vweird.f32 %v9955_v47  ;;  %v2883_v23 = vor.u32 1.1754944e-38, %v2882_v51  ;;  %vm10087_vm10 = vmor %vm13289_vm2, %vm2697_vm6  ;;  %v10137_v26 = vld [vmem:[%s12926_s2] sm:$0xff]  ;;  %v6206_v51 = vld [vmem:[%s12930_s6 + $0x48] sm:$0xff] }
 0x659   :  { %v2872_v25 = vmul.f32 %v6778_v7, %v9955_v47  ;;  %vm2877_vm11 = vweird.f32 %v6778_v7  ;;  %v2896_v46 = vmul.f32 %v2809_v61, %v9891_v1  ;;  %v2824_v45 = vsel %vm2821_vm8, %v2823_v42, %v2819_v33  ;;  %vm13293_vm12 = vmmov %vm13292_vm15  ;;  %v10214_v47 = vpop.permute.xlu1 %3030 }
 0x65a   :  { %v2859_v6 = vmul.f32 %v6776_v29, %v2858_v31  ;;  %vm2878_vm14 = vmor %vm2876_vm9, %vm2877_vm11  ;;  %v2699_v50 = vsel %vm10087_vm10, %v9930_v52, %v2695_v57  ;;  %v2892_v31 = vmul.f32 %v2749_v59, %v9878_v53  ;;  %vm2701_vm6 = vcmp.eq.f32.partialorder %v2700_v32, 8.507059e+37 }
 0x65b   :  { %v2873_v44 = vsub.f32 1.0, %v2872_v25  ;;  %v2897_v62 = vmul.f32 %v2824_v45, %v9894_v39  ;;  %v2988_v39 = vstv %s6203_s20  ;;  %vm13297_vm11 = vcmask 31744  }
 0x65c   :  { %v2860_v55 = vadd.f32 %v6776_v29, %v2859_v6  ;;  %vm13298_vm7 = vmmov %vm13297_vm11 }
 0x65d   :  { %v2874_v19 = vmul.f32 %v6778_v7, %v2873_v44  ;;  %vm13299_vm4 = vmmov %vm13298_vm7 }
 0x65e   :  { %v2864_v16 = vsel %vm2863_vm3, %v6776_v29, %v2860_v55  ;;  %vm13294_vm3 = vcmask 1043456   ;;  %vm13300_vm9 = vmmov %vm13299_vm4 }
 0x65f   :  { %v2869_v29 = vsel %vm2866_vm0, %v2868_v18, %v2864_v16  ;;  %v2875_v38 = vadd.f32 %v6778_v7, %v2874_v19  ;;  %vm13295_vm0 = vmmov %vm13294_vm3 }
 0x660   :  { %v2900_v3 = vmul.f32 %v2869_v29, %v9905_v9  ;;  %v2689_v9 = vsel %vm10000_vm13, %v9958_v22, %v2684_v56  ;;  %vm2761_vm13 = vcmp.eq.f32.partialorder %v2760_v41, 8.507059e+37  ;;  %v3008_v41 = vstv %s10117_s21  ;;  %vm13296_vm1 = vmmov %vm13295_vm0 }
 0x661   :  { %v2879_v40 = vsel %vm2878_vm14, %v6778_v7, %v2875_v38  ;;  %v2703_v7 = vor.u32 1.1754944e-38, %v2702_v8  ;;  %v2764_v17 = vsel %vm2761_vm13, %v2763_v36, %v2759_v21  ;;  %v2888_v20 = vmul.f32 %v2689_v9, %v9873_v10  ;;  %vm13301_vm8 = vmmov %vm13299_vm4 }
 0x662   :  { %2954 = vmatpush.msrb.mxu2 %v2900_v3  ;;  %v2884_v1 = vsel %vm2881_vm5, %v2883_v23, %v2879_v40  ;;  %v2893_v34 = vmul.f32 %v2764_v17, %v9886_v49  ;;  %vm13302_vm14 = vmmov %vm13299_vm4  ;;  %v3010_v19 = vmul.f32 %v6206_v51, %v3008_v41  ;;  %v10197_v3 = vpop.permute.xlu2 %3025 }
 0x663   :  { %v2901_v22 = vmul.f32 %v2884_v1, %v9916_v63  ;;  %v2704_v53 = vsel %vm2701_vm6, %v2703_v7, %v2699_v50  ;;  %v10110_v63 = vld [vmem:[%s12928_s4] sm:$0xf]  ;;  %vm13303_vm5 = vmmov %vm13299_vm4 }
 0x664   :  { %2955 = vmatpush.msrb.mxu2 %v2896_v46  ;;  %v2889_v10 = vmul.f32 %v2704_v53, %v9881_v15  ;;  %v6205_v15 = vld [vmem:[%s12930_s6 + $0x40] sm:$0xff]  ;;  %vm13304_vm2 = vmmov %vm13299_vm4 }
 0x665   :  { %2974 = vmatpush.msrb.mxu3 %v2901_v22  ;;  %v3009_v43 = vmul.f32 %v6205_v15, %v3008_v41  ;;  %vm13305_vm10 = vmmov %vm13295_vm0 }
 0x666   :  { %2956 = vmatpush.msrb.mxu2 %v2892_v31  ;;  %vm13306_vm13 = vmmov %vm13295_vm0 }
 0x667   :  { %2975 = vmatpush.msrb.mxu3 %v2897_v62  ;;  %vm13307_vm6 = vmmov %vm13295_vm0 }
 0x668   :  { %2957 = vmatpush.msrb.mxu2 %v2888_v20 }
 0x669   :  { %6200 = vmatmul.msk.f32.vlgmr.msrb.gmra.mxu2 %vm13292_vm15, %v10110_v63  ;;  %2976 = vmatpush.msrb.mxu3 %v2893_v34  ;;  %vm13308_vm15 = vmmov %vm13304_vm2 }
 0x66b   :  { %2977 = vmatpush.msrb.mxu3 %v2889_v10 }
 0x66c   :  { %6201 = vmatmul.msk.f32.vlgmr.msrb.gmra.mxu3 %vm13293_vm12, %v10110_v63  ;;  %vm13309_vm12 = vmmov %vm13304_vm2 }
 0x6a7   :  { %v2919_v49 = vpop.f32.mrf.mxu0 }
 0x6a8   :  { %v2920_v52 = vadd.f32 %v2919_v49, %v7811_v48 }
 0x6aa   :  { %v2939_v0 = vpop.f32.mrf.mxu1  ;;  %v2989_v27 = vmul.f32 %v2988_v39, %v2920_v52 }
 0x6ab   :  { %v2940_v32 = vadd.f32 %v2939_v0, %v7811_v48 }
 0x6ad   :  { %v2990_v8 = vmul.f32 %v2988_v39, %v2940_v32 }
 0x6af   :  { %v2997_v60 = vrot.slane %v2990_v8, 4 }
 0x6b1   :  { %v2999_v6 = vsel %vm13294_vm3, %v2989_v27, %v2997_v60  ;;  %vm13310_vm3 = vmmov %vm13304_vm2 }
 0x6b2   :  { %v3003_v25 = vadd.f32 %v2999_v6, %v2986_v54 }
 0x6b4   :  { %v10129_v13 = vadd.f32 %v3009_v43, %v3003_v25 }
 0x6b6   :  { %3040 = vst [vmem:[#allocation1] ss:$2 sm:$0xff] %v10129_v13 }
 0x6bd   :  { %v3043_v11 = vld.sshfl [vmem:[#allocation1] sm:$0xff pattern:$0x75316420]  ;;  %v3044_v30 = vld.sshfl [vmem:[#allocation1 + $0x8] sm:$0xff pattern:$0x75316420] }
 0x6be   :  { %6211 = vmatpush.msk.msra.mxu0 %vm13295_vm0, %v3043_v11  ;;  %6216 = vmatpush.msk.msra.mxu1 %vm13296_vm1, %v3044_v30  ;;  %vm13311_vm0 = vmmov %vm13304_vm2 }
 0x6bf   :  { %6212 = vmatmul.msk.f32.vlgmr.msra.gmra.mxu0 %vm13297_vm11, %v10137_v26  ;;  %6217 = vmatmul.msk.f32.vlgmr.msra.gmra.mxu1 %vm13298_vm7, %v10137_v26  ;;  %vm13312_vm1 = vmmov %vm13311_vm0 }
 0x6c0   :  { %vm13313_vm11 = vmmov %vm13311_vm0 }
 0x6c1   :  { %vm13314_vm7 = vmmov %vm13311_vm0 }
 0x6c7   :  { %6213 = vmatmul.msk.f32.gmra.mxu0 %vm13299_vm4, %v10146_v35  ;;  %6218 = vmatmul.msk.f32.gmra.mxu1 %vm13300_vm9, %v10146_v35  ;;  %vm13315_vm4 = vmmov %vm13311_vm0 }
 0x6cf   :  { %6214 = vmatmul.msk.f32.gmra.mxu0 %vm13301_vm8, %v10155_v58  ;;  %6219 = vmatmul.msk.f32.gmra.mxu1 %vm13302_vm14, %v10155_v58 }
 0x6d7   :  { %6215 = vmatmul.msk.f32.gmra.mxu0 %vm13303_vm5, %v9590_v4  ;;  %6220 = vmatmul.msk.f32.gmra.mxu1 %vm13304_vm2, %v9590_v4 }
 0x6ec   :  { %v2959_v24 = vpop.f32.mrf.mxu2 }
 0x6ed   :  { %v2960_v44 = vadd.f32 %v2959_v24, %v7811_v48 }
 0x6ef   :  { %v2979_v55 = vpop.f32.mrf.mxu3  ;;  %v2991_v28 = vmul.f32 %v2988_v39, %v2960_v44 }
 0x6f0   :  { %v2980_v2 = vadd.f32 %v2979_v55, %v7811_v48 }
 0x6f2   :  { %v2992_v18 = vmul.f32 %v2988_v39, %v2980_v2 }
 0x6f4   :  { %v2998_v16 = vrot.slane %v2992_v18, 4 }
 0x6f6   :  { %v3000_v37 = vsel %vm13305_vm10, %v2991_v28, %v2998_v16 }
 0x6f7   :  { %v3004_v56 = vadd.f32 %v3000_v37, %v9608_v12  ;;  %v10193_v12 = vpop.permute.xlu0 %3035 }
 0x6f9   :  { %v10172_v57 = vadd.f32 %v3010_v19, %v3004_v56 }
 0x6fb   :  { %3042 = vst [vmem:[#allocation1 + $0x10] ss:$2 sm:$0xff] %v10172_v57 }
 0x6ff   :  { %v10195_v33 = vpop.permute.xlu0 %3020 }
 0x702   :  { %v3045_v61 = vld.sshfl [vmem:[#allocation1 + $0x10] sm:$0xff pattern:$0x75316420]  ;;  %v3046_v5 = vld.sshfl [vmem:[#allocation1 + $0x18] sm:$0xff pattern:$0x75316420] }
 0x703   :  { %6221 = vmatpush.msk.msra.mxu2 %vm13306_vm13, %v3045_v61  ;;  %6226 = vmatpush.msk.msra.mxu3 %vm13307_vm6, %v3046_v5 }
 0x704   :  { %6222 = vmatmul.msk.f32.vlgmr.msra.gmra.mxu2 %vm13308_vm15, %v10137_v26  ;;  %6227 = vmatmul.msk.f32.vlgmr.msra.gmra.mxu3 %vm13309_vm12, %v10137_v26 }
 0x70c   :  { %6223 = vmatmul.msk.f32.gmra.mxu2 %vm13310_vm3, %v10146_v35  ;;  %6228 = vmatmul.msk.f32.gmra.mxu3 %vm13311_vm0, %v10146_v35 }
 0x714   :  { %6224 = vmatmul.msk.f32.gmra.mxu2 %vm13312_vm1, %v10155_v58  ;;  %6229 = vmatmul.msk.f32.gmra.mxu3 %vm13313_vm11, %v10155_v58 }
 0x71c   :  { %6225 = vmatmul.msk.f32.gmra.mxu2 %vm13314_vm7, %v9590_v4  ;;  %6230 = vmatmul.msk.f32.gmra.mxu3 %vm13315_vm4, %v9590_v4 }
 0x73c   :  { %v3072_v29 = vpop.f32.mrf.mxu0  ;;  %v3101_v14 = vpop.f32.mrf.mxu1 }
 0x73d   :  { %v10200_v38 = vadd.f32 %v3072_v29, %v10195_v33  ;;  %v10206_v21 = vadd.f32 %v3101_v14, %v10195_v33 }
 0x73f   :  { %v6231_v4 = vmul.f32 -1.442695, %v10200_v38  ;;  %v6232_v9 = vmul.f32 -1.442695, %v10206_v21 }
 0x741   :  { %6779 = vpow2.f32 %v6231_v4 }
 0x744   :  { %v3075_v59 = vpop.f32.mrf.mxu0  ;;  %v3104_v42 = vpop.f32.mrf.mxu1 }
 0x745   :  { %v10203_v23 = vadd.f32 %v3075_v59, %v10197_v3  ;;  %v10211_v40 = vadd.f32 %v3104_v42, %v10197_v3 }
 0x747   :  { %v6235_v46 = vmul.f32 -1.442695, %v10203_v23  ;;  %v6236_v36 = vmul.f32 -1.442695, %v10211_v40  ;;  %v6780_v17 = vpop.eup %6779 }
 0x748   :  { %v10225_v53 = vadd.f32 1.0, %v6780_v17 }
 0x749   :  { %6781 = vpow2.f32 %v6235_v46 }
 0x74a   :  { %6783 = vpow2.f32 %v6232_v9  ;;  %v3246_v37 = vand.u32 2147483648, %v10225_v53  ;;  %v3244_v5 = vand.u32 2147483647, %v10225_v53  ;;  %vm3240_vm14 = vweird.f32 %v10225_v53 }
 0x74b   :  { %6785 = vpow2.f32 %v6236_v36 }
 0x74c   :  { %v3078_v45 = vpop.f32.mrf.mxu0  ;;  %v3107_v1 = vpop.f32.mrf.mxu1  ;;  %vm10327_vm1 = vcmp.eq.f32.partialorder %v3244_v5, 8.507059e+37 }
 0x74d   :  { %v10218_v50 = vadd.f32 %v3078_v45, %v10214_v47  ;;  %v10221_v31 = vadd.f32 %v3107_v1, %v10214_v47  ;;  %v10285_v45 = vor.u32 1.1754944e-38, %v3246_v37 }
 0x74f   :  { %v6239_v22 = vmul.f32 -1.442695, %v10218_v50  ;;  %v6240_v7 = vmul.f32 -1.442695, %v10221_v31  ;;  %v6782_v20 = vpop.eup %6781 }
 0x750   :  { %v6784_v62 = vpop.eup %6783  ;;  %v10227_v10 = vadd.f32 1.0, %v6782_v20 }
 0x751   :  { %6787 = vpow2.f32 %v6239_v22  ;;  %v6786_v49 = vpop.eup %6785  ;;  %v10229_v0 = vadd.f32 1.0, %v6784_v62 }
 0x752   :  { %6789 = vpow2.f32 %v6240_v7  ;;  %v10239_v27 = vadd.f32 1.0, %v6786_v49  ;;  %v3306_v29 = vand.u32 2147483648, %v10227_v10  ;;  %vm3300_vm9 = vweird.f32 %v10227_v10 }
 0x753   :  { %6791 = vrcp.f32 %v10225_v53  ;;  %v3259_v4 = vand.u32 2147483647, %v10229_v0  ;;  %v3261_v1 = vand.u32 2147483648, %v10229_v0  ;;  %v3304_v20 = vand.u32 2147483647, %v10227_v10 }
 0x754   :  { %v3081_v34 = vpop.f32.mrf.mxu0  ;;  %v3110_v32 = vpop.f32.mrf.mxu1  ;;  %6793 = vrcp.f32 %v10227_v10  ;;  %v10295_v62 = vor.u32 1.1754944e-38, %v3306_v29  ;;  %vm3315_vm10 = vweird.f32 %v10239_v27 }
 0x755   :  { %v10232_v52 = vadd.f32 %v3081_v34, %v10193_v12  ;;  %v10243_v60 = vadd.f32 %v3110_v32, %v10193_v12  ;;  %vm10316_vm12 = vcmp.eq.f32.partialorder %v3304_v20, 8.507059e+37 }
 0x757   :  { %v6788_v39 = vpop.eup %6787  ;;  %v6243_v15 = vmul.f32 -1.442695, %v10232_v52  ;;  %v6244_v6 = vmul.f32 -1.442695, %v10243_v60 }
 0x758   :  { %v10235_v8 = vadd.f32 1.0, %v6788_v39  ;;  %v6790_v41 = vpop.eup %6789 }
 0x759   :  { %v10246_v54 = vadd.f32 1.0, %v6790_v41  ;;  %v10248_v43 = vpop.eup %6791  ;;  %v3319_v41 = vand.u32 2147483647, %v10239_v27 }
 0x75a   :  { %6795 = vrcp.f32 %v10235_v8  ;;  %v10252_v25 = vpop.eup %6793  ;;  %v3236_v24 = vmul.f32 %v10248_v43, %v10225_v53  ;;  %vm3241_vm8 = vweird.f32 %v10248_v43  ;;  %v3364_v7 = vand.u32 2147483647, %v10235_v8 }
 0x75b   :  { %6797 = vrcp.f32 %v10229_v0  ;;  %v3296_v55 = vmul.f32 %v10252_v25, %v10227_v10  ;;  %v3366_v17 = vand.u32 2147483648, %v10235_v8  ;;  %vm3301_vm5 = vweird.f32 %v10252_v25 }
 0x75c   :  { %6799 = vpow2.f32 %v6243_v15  ;;  %v3237_v19 = vsub.f32 1.0, %v3236_v24  ;;  %vm3360_vm2 = vweird.f32 %v10235_v8  ;;  %vm10311_vm6 = vcmp.eq.f32.partialorder %v3364_v7, 8.507059e+37  ;;  %vm10336_vm7 = vmor %vm3300_vm9, %vm3301_vm5 }
 0x75d   :  { %6801 = vrcp.f32 %v10239_v27  ;;  %v3297_v61 = vsub.f32 1.0, %v3296_v55  ;;  %vm3375_vm0 = vweird.f32 %v10246_v54  ;;  %v3381_v20 = vand.u32 2147483648, %v10246_v54 }
 0x75e   :  { %6803 = vrcp.f32 %v10246_v54  ;;  %v3238_v36 = vmul.f32 %v10248_v43, %v3237_v19 }
 0x75f   :  { %6805 = vpow2.f32 %v6244_v6  ;;  %v3298_v22 = vmul.f32 %v10252_v25, %v3297_v61  ;;  %v3321_v6 = vand.u32 2147483648, %v10239_v27 }
 0x760   :  { %v10255_v11 = vpop.eup %6795  ;;  %v10303_v24 = vadd.f32 %v10248_v43, %v3238_v36 }
 0x761   :  { %v10257_v30 = vpop.eup %6797  ;;  %v3356_v2 = vmul.f32 %v10255_v11, %v10235_v8  ;;  %vm3361_vm3 = vweird.f32 %v10255_v11 }
 0x762   :  { %v6800_v44 = vpop.eup %6799  ;;  %v3251_v51 = vmul.f32 %v10257_v30, %v10229_v0  ;;  %vm3256_vm15 = vweird.f32 %v10257_v30  ;;  %vm10349_vm11 = vmor %vm3360_vm2, %vm3361_vm3 }
 0x763   :  { %v10265_v18 = vpop.eup %6801  ;;  %v10269_v28 = vadd.f32 1.0, %v6800_v44  ;;  %v3357_v14 = vsub.f32 1.0, %v3356_v2  ;;  %v3299_v44 = vadd.f32 %v10252_v25, %v3298_v22  ;;  %v3379_v22 = vand.u32 2147483647, %v10246_v54 }
 0x764   :  { %v10271_v16 = vpop.eup %6803  ;;  %v3252_v42 = vsub.f32 1.0, %v3251_v51  ;;  %v3311_v46 = vmul.f32 %v10265_v18, %v10239_v27  ;;  %vm3316_vm13 = vweird.f32 %v10265_v18  ;;  %v3367_v51 = vor.u32 1.1754944e-38, %v3366_v17 }
 0x765   :  { %v6806_v56 = vpop.eup %6805  ;;  %6807 = vrcp.f32 %v10269_v28  ;;  %v3371_v59 = vmul.f32 %v10271_v16, %v10246_v54  ;;  %v3358_v34 = vmul.f32 %v10255_v11, %v3357_v14  ;;  %v3303_v5 = vsel %vm10336_vm7, %v10252_v25, %v3299_v44  ;;  %vm10366_vm7 = vmor %vm3240_vm14, %vm3241_vm8 }
 0x766   :  { %v10282_v9 = vadd.f32 1.0, %v6806_v56  ;;  %v3253_v32 = vmul.f32 %v10257_v30, %v3252_v42  ;;  %v3312_v15 = vsub.f32 1.0, %v3311_v46  ;;  %v3426_v42 = vand.u32 2147483648, %v10269_v28  ;;  %vm10390_vm14 = vmor %vm3315_vm10, %vm3316_vm13 }
 0x767   :  { %v3372_v49 = vsub.f32 1.0, %v3371_v59  ;;  %v3359_v37 = vadd.f32 %v10255_v11, %v3358_v34  ;;  %v3424_v59 = vand.u32 2147483647, %v10269_v28  ;;  %vm3376_vm9 = vweird.f32 %v10271_v16 }
 0x768   :  { %6809 = vrcp.f32 %v10282_v9  ;;  %v3313_v14 = vmul.f32 %v10265_v18, %v3312_v15  ;;  %vm3420_vm5 = vweird.f32 %v10269_v28  ;;  %v3441_v44 = vand.u32 2147483648, %v10282_v9  ;;  %vm10382_vm8 = vmor %vm3375_vm0, %vm3376_vm9 }
 0x769   :  { %v3373_v56 = vmul.f32 %v10271_v16, %v3372_v49  ;;  %v3363_v34 = vsel %vm10349_vm11, %v10255_v11, %v3359_v37  ;;  %vm3425_vm3 = vcmp.eq.f32.partialorder %v3424_v59, 8.507059e+37  ;;  %v3308_v2 = vsel %vm10316_vm12, %v10295_v62, %v3303_v5 }
 0x76a   :  { %v3314_v8 = vadd.f32 %v10265_v18, %v3313_v14  ;;  %v3254_v14 = vadd.f32 %v10257_v30, %v3253_v32  ;;  %v3368_v59 = vsel %vm10311_vm6, %v3367_v51, %v3363_v34  ;;  %vm3435_vm6 = vweird.f32 %v10282_v9 }
 0x76b   :  { %v6808_v39 = vpop.eup %6807  ;;  %v3374_v25 = vadd.f32 %v10271_v16, %v3373_v56  ;;  %v3439_v56 = vand.u32 2147483647, %v10282_v9  ;;  %vm3380_vm0 = vcmp.eq.f32.partialorder %v3379_v22, 8.507059e+37  ;;  %v3382_v51 = vor.u32 1.1754944e-38, %v3381_v20 }
 0x76c   :  { %v3416_v55 = vmul.f32 %v6808_v39, %v10269_v28  ;;  %vm3421_vm4 = vweird.f32 %v6808_v39  ;;  %v3318_v36 = vsel %vm10390_vm14, %v10265_v18, %v3314_v8  ;;  %vm13332_vm12 = vweird.f32 %v10229_v0 }
 0x76d   :  { %vm3422_vm2 = vmor %vm3420_vm5, %vm3421_vm4  ;;  %v3378_v32 = vsel %vm10382_vm8, %v10271_v16, %v3374_v25  ;;  %v3483_v16 = vmul.f32 %v3368_v59, %v10218_v50  ;;  %vm3440_vm13 = vcmp.eq.f32.partialorder %v3439_v56, 8.507059e+37  ;;  %v3322_v18 = vor.u32 1.1754944e-38, %v3321_v6 }
 0x76e   :  { %v3417_v61 = vsub.f32 1.0, %v3416_v55  ;;  %v6810_v29 = vpop.eup %6809  ;;  %v3427_v55 = vor.u32 1.1754944e-38, %v3426_v42  ;;  %v3442_v42 = vor.u32 1.1754944e-38, %v3441_v44  ;;  %vm10414_vm4 = vmor %vm13332_vm12, %vm3256_vm15  ;;  %v3383_v62 = vsel %vm3380_vm0, %v3382_v51, %v3378_v32 }
 0x76f   :  { %v3431_v17 = vmul.f32 %v6810_v29, %v10282_v9  ;;  %vm3436_vm11 = vweird.f32 %v6810_v29  ;;  %v3258_v19 = vsel %vm10414_vm4, %v10257_v30, %v3254_v14  ;;  %v3262_v46 = vor.u32 1.1754944e-38, %v3261_v1 }
 0x770   :  { %v3418_v7 = vmul.f32 %v6808_v39, %v3417_v61  ;;  %v3243_v61 = vsel %vm10366_vm7, %v10248_v43, %v10303_v24  ;;  %vm3437_vm10 = vmor %vm3435_vm6, %vm3436_vm11  ;;  %vm3260_vm15 = vcmp.eq.f32.partialorder %v3259_v4, 8.507059e+37  ;;  %vm13335_vm9 = vcmask 261120  }
 0x771   :  { %v3432_v15 = vsub.f32 1.0, %v3431_v17  ;;  %v3484_v17 = vmul.f32 %v3383_v62, %v10221_v31  ;;  %vm13336_vm5 = vmmov %vm13335_vm9 }
 0x772   :  { %v3419_v49 = vadd.f32 %v6808_v39, %v3418_v7 }
 0x773   :  { %v3433_v37 = vmul.f32 %v6810_v29, %v3432_v15 }
 0x774   :  { %v3423_v11 = vsel %vm3422_vm2, %v6808_v39, %v3419_v49 }
 0x775   :  { %v3428_v39 = vsel %vm3425_vm3, %v3427_v55, %v3423_v11  ;;  %v3434_v54 = vadd.f32 %v6810_v29, %v3433_v37 }
 0x776   :  { %v3487_v24 = vmul.f32 %v3428_v39, %v10232_v52  ;;  %v3248_v52 = vsel %vm10327_vm1, %v10285_v45, %v3243_v61  ;;  %vm3320_vm1 = vcmp.eq.f32.partialorder %v3319_v41, 8.507059e+37 }
 0x777   :  { %v3438_v7 = vsel %vm3437_vm10, %v6810_v29, %v3434_v54  ;;  %v3479_v29 = vmul.f32 %v3308_v2, %v10203_v23  ;;  %v3323_v22 = vsel %vm3320_vm1, %v3322_v18, %v3318_v36  ;;  %v3475_v6 = vmul.f32 %v3248_v52, %v10200_v38 }
 0x778   :  { %3503 = vmatpush.msrb.mxu0 %v3487_v24  ;;  %v3443_v50 = vsel %vm3440_vm13, %v3442_v42, %v3438_v7  ;;  %v3263_v23 = vsel %vm3260_vm15, %v3262_v46, %v3258_v19  ;;  %v3480_v27 = vmul.f32 %v3323_v22, %v10211_v40 }
 0x779   :  { %v3488_v45 = vmul.f32 %v3443_v50, %v10243_v60  ;;  %v3476_v60 = vmul.f32 %v3263_v23, %v10206_v21 }
 0x77a   :  { %3504 = vmatpush.msrb.mxu0 %v3483_v16 }
 0x77b   :  { %3523 = vmatpush.msrb.mxu1 %v3488_v45 }
 0x77c   :  { %3505 = vmatpush.msrb.mxu0 %v3479_v29 }
 0x77d   :  { %3524 = vmatpush.msrb.mxu1 %v3484_v17 }
 0x77e   :  { %3506 = vmatpush.msrb.mxu0 %v3475_v6 }
 0x77f   :  { %6247 = vmatmul.msk.f32.vlgmr.msrb.gmra.mxu0 %vm13335_vm9, %v10110_v63  ;;  %3525 = vmatpush.msrb.mxu1 %v3480_v27 }
 0x781   :  { %3526 = vmatpush.msrb.mxu1 %v3476_v60 }
 0x782   :  { %6248 = vmatmul.msk.f32.vlgmr.msrb.gmra.mxu1 %vm13336_vm5, %v10110_v63 }
 0x787   :  { %v3130_v38 = vpop.f32.mrf.mxu2  ;;  %v3159_v0 = vpop.f32.mrf.mxu3 }
 0x788   :  { %v10440_v31 = vadd.f32 %v3130_v38, %v10195_v33  ;;  %v10446_v1 = vadd.f32 %v3159_v0, %v10195_v33 }
 0x78a   :  { %v6233_v21 = vmul.f32 -1.442695, %v10440_v31  ;;  %v6234_v10 = vmul.f32 -1.442695, %v10446_v1 }
 0x78c   :  { %6811 = vpow2.f32 %v6233_v21 }
 0x78f   :  { %v3133_v30 = vpop.f32.mrf.mxu2  ;;  %v3162_v4 = vpop.f32.mrf.mxu3 }
 0x790   :  { %v10443_v40 = vadd.f32 %v3133_v30, %v10197_v3  ;;  %v10451_v5 = vadd.f32 %v3162_v4, %v10197_v3 }
 0x792   :  { %v6237_v41 = vmul.f32 -1.442695, %v10443_v40  ;;  %v6238_v20 = vmul.f32 -1.442695, %v10451_v5  ;;  %v6812_v8 = vpop.eup %6811 }
 0x793   :  { %v10463_v28 = vadd.f32 1.0, %v6812_v8 }
 0x794   :  { %6813 = vpow2.f32 %v6237_v41 }
 0x795   :  { %6815 = vpow2.f32 %v6234_v10  ;;  %v3276_v45 = vand.u32 2147483648, %v10463_v28  ;;  %v3274_v6 = vand.u32 2147483647, %v10463_v28  ;;  %vm3270_vm7 = vweird.f32 %v10463_v28 }
 0x796   :  { %6817 = vpow2.f32 %v6238_v20 }
 0x797   :  { %v3136_v34 = vpop.f32.mrf.mxu2  ;;  %v3165_v25 = vpop.f32.mrf.mxu3  ;;  %v10523_v21 = vor.u32 1.1754944e-38, %v3276_v45  ;;  %vm10565_vm1 = vcmp.eq.f32.partialorder %v3274_v6, 8.507059e+37 }
 0x798   :  { %v10456_v49 = vadd.f32 %v3136_v34, %v10214_v47  ;;  %v10459_v33 = vadd.f32 %v3165_v25, %v10214_v47 }
 0x79a   :  { %v6241_v15 = vmul.f32 -1.442695, %v10456_v49  ;;  %v6242_v3 = vmul.f32 -1.442695, %v10459_v33  ;;  %v6814_v55 = vpop.eup %6813 }
 0x79b   :  { %v6816_v44 = vpop.eup %6815  ;;  %v10465_v37 = vadd.f32 1.0, %v6814_v55 }
 0x79c   :  { %6819 = vpow2.f32 %v6241_v15  ;;  %v6818_v56 = vpop.eup %6817  ;;  %v10467_v47 = vadd.f32 1.0, %v6816_v44 }
 0x79d   :  { %6821 = vpow2.f32 %v6242_v3  ;;  %v10477_v32 = vadd.f32 1.0, %v6818_v56  ;;  %v3336_v17 = vand.u32 2147483648, %v10465_v37  ;;  %vm3330_vm2 = vweird.f32 %v10465_v37 }
 0x79e   :  { %6823 = vrcp.f32 %v10463_v28  ;;  %v3289_v38 = vand.u32 2147483647, %v10467_v47  ;;  %v3291_v41 = vand.u32 2147483648, %v10467_v47  ;;  %v3334_v25 = vand.u32 2147483647, %v10465_v37 }
 0x79f   :  { %v3139_v11 = vpop.f32.mrf.mxu2  ;;  %v3168_v59 = vpop.f32.mrf.mxu3  ;;  %6825 = vrcp.f32 %v10465_v37  ;;  %v10533_v15 = vor.u32 1.1754944e-38, %v3336_v17  ;;  %v3349_v56 = vand.u32 2147483647, %v10477_v32  ;;  %vm3345_vm14 = vweird.f32 %v10477_v32 }
 0x7a0   :  { %v10470_v14 = vadd.f32 %v3139_v11, %v10193_v12  ;;  %v10481_v24 = vadd.f32 %v3168_v59, %v10193_v12  ;;  %vm10554_vm13 = vcmp.eq.f32.partialorder %v3334_v25, 8.507059e+37 }
 0x7a2   :  { %v6820_v61 = vpop.eup %6819  ;;  %v6245_v39 = vmul.f32 -1.442695, %v10470_v14  ;;  %v6246_v51 = vmul.f32 -1.442695, %v10481_v24 }
 0x7a3   :  { %v10473_v53 = vadd.f32 1.0, %v6820_v61  ;;  %v6822_v43 = vpop.eup %6821  ;;  %v3351_v61 = vand.u32 2147483648, %v10477_v32 }
 0x7a4   :  { %v10484_v54 = vadd.f32 1.0, %v6822_v43  ;;  %v10486_v2 = vpop.eup %6823 }
 0x7a5   :  { %6827 = vrcp.f32 %v10473_v53  ;;  %v10490_v42 = vpop.eup %6825  ;;  %v3266_v16 = vmul.f32 %v10486_v2, %v10463_v28  ;;  %vm3271_vm3 = vweird.f32 %v10486_v2  ;;  %v3394_v20 = vand.u32 2147483647, %v10473_v53 }
 0x7a6   :  { %6829 = vrcp.f32 %v10467_v47  ;;  %v3326_v7 = vmul.f32 %v10490_v42, %v10465_v37  ;;  %v3396_v34 = vand.u32 2147483648, %v10473_v53  ;;  %vm3331_vm11 = vweird.f32 %v10490_v42 }
 0x7a7   :  { %6831 = vpow2.f32 %v6245_v39  ;;  %v3267_v29 = vsub.f32 1.0, %v3266_v16  ;;  %vm3390_vm8 = vweird.f32 %v10473_v53  ;;  %vm10549_vm0 = vcmp.eq.f32.partialorder %v3394_v20, 8.507059e+37  ;;  %vm10574_vm9 = vmor %vm3330_vm2, %vm3331_vm11 }
 0x7a8   :  { %6833 = vrcp.f32 %v10477_v32  ;;  %v3327_v22 = vsub.f32 1.0, %v3326_v7  ;;  %v3397_v16 = vor.u32 1.1754944e-38, %v3396_v34  ;;  %vm3405_vm4 = vweird.f32 %v10484_v54 }
 0x7a9   :  { %6835 = vrcp.f32 %v10484_v54  ;;  %v3268_v4 = vmul.f32 %v10486_v2, %v3267_v29 }
 0x7aa   :  { %6837 = vpow2.f32 %v6246_v51  ;;  %v3328_v10 = vmul.f32 %v10490_v42, %v3327_v22 }
 0x7ab   :  { %v10493_v36 = vpop.eup %6827  ;;  %v10541_v59 = vadd.f32 %v10486_v2, %v3268_v4  ;;  %v3411_v4 = vand.u32 2147483648, %v10484_v54 }
 0x7ac   :  { %v10495_v12 = vpop.eup %6829  ;;  %v3386_v9 = vmul.f32 %v10493_v36, %v10473_v53  ;;  %v3329_v43 = vadd.f32 %v10490_v42, %v3328_v10  ;;  %vm3391_vm12 = vweird.f32 %v10493_v36 }
 0x7ad   :  { %v6832_v52 = vpop.eup %6831  ;;  %v3281_v62 = vmul.f32 %v10495_v12, %v10467_v47  ;;  %vm3286_vm10 = vweird.f32 %v10495_v12  ;;  %vm10587_vm15 = vmor %vm3390_vm8, %vm3391_vm12 }
 0x7ae   :  { %v10503_v18 = vpop.eup %6833  ;;  %v10507_v50 = vadd.f32 1.0, %v6832_v52  ;;  %v3387_v23 = vsub.f32 1.0, %v3386_v9  ;;  %v3333_v6 = vsel %vm10574_vm9, %v10490_v42, %v3329_v43  ;;  %vm10604_vm9 = vmor %vm3270_vm7, %vm3271_vm3 }
 0x7af   :  { %v10509_v19 = vpop.eup %6835  ;;  %v3282_v60 = vsub.f32 1.0, %v3281_v62  ;;  %v3341_v0 = vmul.f32 %v10503_v18, %v10477_v32  ;;  %vm3346_vm6 = vweird.f32 %v10503_v18  ;;  %v3338_v51 = vsel %vm10554_vm13, %v10533_v15, %v3333_v6 }
 0x7b0   :  { %v6838_v46 = vpop.eup %6837  ;;  %6839 = vrcp.f32 %v10507_v50  ;;  %v3401_v27 = vmul.f32 %v10509_v19, %v10484_v54  ;;  %v3388_v3 = vmul.f32 %v10493_v36, %v3387_v23  ;;  %v3456_v22 = vand.u32 2147483648, %v10507_v50  ;;  %vm10628_vm7 = vmor %vm3345_vm14, %vm3346_vm6 }
 0x7b1   :  { %v10520_v30 = vadd.f32 1.0, %v6838_v46  ;;  %v3283_v44 = vmul.f32 %v10495_v12, %v3282_v60  ;;  %v3342_v11 = vsub.f32 1.0, %v3341_v0  ;;  %v3454_v46 = vand.u32 2147483647, %v10507_v50 }
 0x7b2   :  { %v3402_v8 = vsub.f32 1.0, %v3401_v27  ;;  %v3389_v52 = vadd.f32 %v10493_v36, %v3388_v3  ;;  %v3409_v27 = vand.u32 2147483647, %v10484_v54  ;;  %vm3406_vm2 = vweird.f32 %v10509_v19 }
 0x7b3   :  { %6841 = vrcp.f32 %v10520_v30  ;;  %v3343_v45 = vmul.f32 %v10503_v18, %v3342_v11  ;;  %vm3450_vm11 = vweird.f32 %v10507_v50  ;;  %vm3455_vm12 = vcmp.eq.f32.partialorder %v3454_v46, 8.507059e+37  ;;  %vm10620_vm3 = vmor %vm3405_vm4, %vm3406_vm2 }
 0x7b4   :  { %v3403_v9 = vmul.f32 %v10509_v19, %v3402_v8  ;;  %v3393_v10 = vsel %vm10587_vm15, %v10493_v36, %v3389_v52  ;;  %v3457_v25 = vor.u32 1.1754944e-38, %v3456_v22  ;;  %v3471_v3 = vand.u32 2147483648, %v10520_v30 }
 0x7b5   :  { %v3344_v53 = vadd.f32 %v10503_v18, %v3343_v45  ;;  %v3469_v11 = vand.u32 2147483647, %v10520_v30  ;;  %v3284_v43 = vadd.f32 %v10495_v12, %v3283_v44  ;;  %v3398_v52 = vsel %vm10549_vm0, %v3397_v16, %v3393_v10 }
 0x7b6   :  { %v6840_v55 = vpop.eup %6839  ;;  %v3404_v42 = vadd.f32 %v10509_v19, %v3403_v9  ;;  %vm3465_vm0 = vweird.f32 %v10520_v30  ;;  %vm3410_vm4 = vcmp.eq.f32.partialorder %v3409_v27, 8.507059e+37  ;;  %v3412_v16 = vor.u32 1.1754944e-38, %v3411_v4 }
 0x7b7   :  { %v3446_v39 = vmul.f32 %v6840_v55, %v10507_v50  ;;  %vm3451_vm5 = vweird.f32 %v6840_v55  ;;  %v3472_v9 = vor.u32 1.1754944e-38, %v3471_v3  ;;  %vm3470_vm6 = vcmp.eq.f32.partialorder %v3469_v11, 8.507059e+37  ;;  %v6255_v3 = vld [vmem:[%s12930_s6 + $0x58] sm:$0xff] }
 0x7b8   :  { %vm3452_vm8 = vmor %vm3450_vm11, %vm3451_vm5  ;;  %v3408_v44 = vsel %vm10620_vm3, %v10509_v19, %v3404_v42  ;;  %v3485_v19 = vmul.f32 %v3398_v52, %v10456_v49  ;;  %vm13353_vm13 = vweird.f32 %v10467_v47  ;;  %v3292_v46 = vor.u32 1.1754944e-38, %v3291_v41 }
 0x7b9   :  { %v3447_v62 = vsub.f32 1.0, %v3446_v39  ;;  %v6842_v29 = vpop.eup %6841  ;;  %v3273_v39 = vsel %vm10604_vm9, %v10486_v2, %v10541_v59  ;;  %vm10652_vm5 = vmor %vm13353_vm13, %vm3286_vm10  ;;  %v3413_v15 = vsel %vm3410_vm4, %v3412_v16, %v3408_v44  ;;  %vm3290_vm10 = vcmp.eq.f32.partialorder %v3289_v38, 8.507059e+37 }
 0x7ba   :  { %v3461_v0 = vmul.f32 %v6842_v29, %v10520_v30  ;;  %vm3466_vm15 = vweird.f32 %v6842_v29  ;;  %v3288_v7 = vsel %vm10652_vm5, %v10495_v12, %v3284_v43  ;;  %v3486_v17 = vmul.f32 %v3413_v15, %v10459_v33 }
 0x7bb   :  { %v3448_v60 = vmul.f32 %v6840_v55, %v3447_v62  ;;  %vm3467_vm14 = vmor %vm3465_vm0, %vm3466_vm15  ;;  %v3348_v62 = vsel %vm10628_vm7, %v10503_v18, %v3344_v53  ;;  %v3352_v18 = vor.u32 1.1754944e-38, %v3351_v61  ;;  %vm13356_vm2 = vcmask 261120  }
 0x7bc   :  { %v3462_v34 = vsub.f32 1.0, %v3461_v0  ;;  %vm13357_vm11 = vmmov %vm13356_vm2  ;;  %v3597_v41 = vstv %s10679_s9  ;;  %vm13361_vm15 = vcmask 31744  }
 0x7bd   :  { %v3449_v20 = vadd.f32 %v6840_v55, %v3448_v60  ;;  %vm13362_vm3 = vmmov %vm13361_vm15  ;;  %v3599_v11 = vmul.f32 %v6255_v3, %v3597_v41 }
 0x7be   :  { %v3463_v8 = vmul.f32 %v6842_v29, %v3462_v34  ;;  %vm13363_vm7 = vmmov %vm13362_vm3 }
 0x7bf   :  { %v3453_v36 = vsel %vm3452_vm8, %v6840_v55, %v3449_v20  ;;  %vm13358_vm8 = vcmask 1043456   ;;  %vm13364_vm0 = vmmov %vm13362_vm3 }
 0x7c0   :  { %v3458_v55 = vsel %vm3455_vm12, %v3457_v25, %v3453_v36  ;;  %v3464_v54 = vadd.f32 %v6842_v29, %v3463_v8  ;;  %vm13359_vm12 = vmmov %vm13358_vm8 }
 0x7c1   :  { %v3489_v59 = vmul.f32 %v3458_v55, %v10470_v14  ;;  %v3278_v14 = vsel %vm10565_vm1, %v10523_v21, %v3273_v39  ;;  %vm3350_vm1 = vcmp.eq.f32.partialorder %v3349_v56, 8.507059e+37  ;;  %vm13360_vm9 = vmmov %vm13358_vm8 }
 0x7c2   :  { %v3468_v45 = vsel %vm3467_vm14, %v6842_v29, %v3464_v54  ;;  %v3481_v29 = vmul.f32 %v3338_v51, %v10443_v40  ;;  %v3353_v22 = vsel %vm3350_vm1, %v3352_v18, %v3348_v62  ;;  %v3477_v61 = vmul.f32 %v3278_v14, %v10440_v31  ;;  %vm13365_vm4 = vmmov %vm13364_vm0  ;;  %v10765_v14 = vpop.permute.xlu2 %3619 }
 0x7c3   :  { %3543 = vmatpush.msrb.mxu2 %v3489_v59  ;;  %v3473_v49 = vsel %vm3470_vm6, %v3472_v9, %v3468_v45  ;;  %v3293_v40 = vsel %vm3290_vm10, %v3292_v46, %v3288_v7  ;;  %v3482_v32 = vmul.f32 %v3353_v22, %v10451_v5  ;;  %v3577_v5 = vstv %s6252_s30  ;;  %vm13366_vm14 = vmmov %vm13364_vm0  ;;  %v10748_v59 = vpop.permute.xlu0 %3614  ;;  %s11799_s30 = sld [smem:[#allocation2 + $0x1c]] }
 0x7c4   :  { %v3490_v21 = vmul.f32 %v3473_v49, %v10481_v24  ;;  %v3478_v24 = vmul.f32 %v3293_v40, %v10446_v1  ;;  %v3574_v1 = vstv %s10677_s8  ;;  %vm13367_vm6 = vmmov %vm13364_vm0  ;;  %s11801_s8 = sld [smem:[#allocation2 + $0x1e]] }
 0x7c5   :  { %3544 = vmatpush.msrb.mxu2 %v3485_v19  ;;  %v3575_v27 = vmul.f32 %v3574_v1, %v10129_v13  ;;  %v10710_v13 = vld [vmem:[%s12926_s2 + $0x18] sm:$0xff]  ;;  %vm13368_vm13 = vmmov %vm13364_vm0  ;;  %v3576_v8 = vmul.f32 %v3574_v1, %v10172_v57  ;;  %v10744_v57 = vpop.permute.xlu1 %3624 }
 0x7c6   :  { %3563 = vmatpush.msrb.mxu3 %v3490_v21  ;;  %vm13369_vm5 = vmmov %vm13358_vm8 }
 0x7c7   :  { %3545 = vmatpush.msrb.mxu2 %v3481_v29  ;;  %vm13370_vm1 = vmmov %vm13369_vm5 }
 0x7c8   :  { %3564 = vmatpush.msrb.mxu3 %v3486_v17  ;;  %vm13371_vm10 = vmmov %vm13370_vm1 }
 0x7c9   :  { %3546 = vmatpush.msrb.mxu2 %v3477_v61 }
 0x7ca   :  { %6249 = vmatmul.msk.f32.vlgmr.msrb.gmra.mxu2 %vm13356_vm2, %v10110_v63  ;;  %3565 = vmatpush.msrb.mxu3 %v3482_v32  ;;  %vm13372_vm2 = vmmov %vm13364_vm0 }
 0x7cc   :  { %3566 = vmatpush.msrb.mxu3 %v3478_v24 }
 0x7cd   :  { %6250 = vmatmul.msk.f32.vlgmr.msrb.gmra.mxu3 %vm13357_vm11, %v10110_v63  ;;  %v6254_v63 = vld [vmem:[%s12930_s6 + $0x50] sm:$0xff]  ;;  %vm13373_vm11 = vmmov %vm13364_vm0  ;;  %v10746_v44 = vpop.permute.xlu1 %3609 }
 0x7ce   :  { %v3598_v60 = vmul.f32 %v6254_v63, %v3597_v41 }
 0x7fc   :  { %v3508_v31 = vpop.f32.mrf.mxu0 }
 0x7fd   :  { %v3509_v47 = vadd.f32 %v3508_v31, %v7811_v48 }
 0x7ff   :  { %v3528_v33 = vpop.f32.mrf.mxu1  ;;  %v3578_v56 = vmul.f32 %v3577_v5, %v3509_v47 }
 0x800   :  { %v3529_v12 = vadd.f32 %v3528_v33, %v7811_v48 }
 0x802   :  { %v3579_v38 = vmul.f32 %v3577_v5, %v3529_v12 }
 0x804   :  { %v3586_v23 = vrot.slane %v3579_v38, 4 }
 0x806   :  { %v3588_v0 = vsel %vm13358_vm8, %v3578_v56, %v3586_v23  ;;  %vm13374_vm8 = vmmov %vm13364_vm0 }
 0x807   :  { %v3592_v6 = vadd.f32 %v3588_v0, %v3575_v27 }
 0x809   :  { %v10690_v37 = vadd.f32 %v3598_v60, %v3592_v6 }
 0x80b   :  { %3629 = vst [vmem:[#allocation1] ss:$2 sm:$0xff] %v10690_v37 }
 0x812   :  { %v3632_v4 = vld.sshfl [vmem:[#allocation1] sm:$0xff pattern:$0x75316420]  ;;  %v3633_v10 = vld.sshfl [vmem:[#allocation1 + $0x8] sm:$0xff pattern:$0x75316420] }
 0x813   :  { %6260 = vmatpush.msk.msra.mxu0 %vm13359_vm12, %v3632_v4  ;;  %6265 = vmatpush.msk.msra.mxu1 %vm13360_vm9, %v3633_v10  ;;  %vm13375_vm12 = vmmov %vm13364_vm0 }
 0x814   :  { %6261 = vmatmul.msk.f32.vlgmr.msra.gmra.mxu0 %vm13361_vm15, %v10137_v26  ;;  %6266 = vmatmul.msk.f32.vlgmr.msra.gmra.mxu1 %vm13362_vm3, %v10137_v26  ;;  %vm13376_vm9 = vmmov %vm13364_vm0 }
 0x815   :  { %vm13377_vm15 = vmmov %vm13364_vm0 }
 0x816   :  { %vm13378_vm3 = vmmov %vm13364_vm0 }
 0x81c   :  { %6262 = vmatmul.msk.f32.gmra.mxu0 %vm13363_vm7, %v10146_v35  ;;  %6267 = vmatmul.msk.f32.gmra.mxu1 %vm13364_vm0, %v10146_v35  ;;  %vm13379_vm7 = vmmov %vm13364_vm0 }
 0x824   :  { %6263 = vmatmul.msk.f32.gmra.mxu0 %vm13365_vm4, %v10155_v58  ;;  %6268 = vmatmul.msk.f32.gmra.mxu1 %vm13366_vm14, %v10155_v58 }
 0x82c   :  { %6264 = vmatmul.msk.f32.gmra.mxu0 %vm13367_vm6, %v10710_v13  ;;  %6269 = vmatmul.msk.f32.gmra.mxu1 %vm13368_vm13, %v10710_v13 }
 0x84d   :  { %v3548_v42 = vpop.f32.mrf.mxu2 }
 0x84e   :  { %v3549_v34 = vadd.f32 %v3548_v42, %v7811_v48 }
 0x850   :  { %v3568_v20 = vpop.f32.mrf.mxu3  ;;  %v3580_v50 = vmul.f32 %v3577_v5, %v3549_v34 }
 0x851   :  { %v3569_v53 = vadd.f32 %v3568_v20, %v7811_v48 }
 0x853   :  { %v3581_v25 = vmul.f32 %v3577_v5, %v3569_v53 }
 0x855   :  { %v3587_v36 = vrot.slane %v3581_v25, 4 }
 0x857   :  { %v3589_v39 = vsel %vm13369_vm5, %v3580_v50, %v3587_v36 }
 0x858   :  { %v3593_v43 = vadd.f32 %v3589_v39, %v3576_v8 }
 0x85a   :  { %v10723_v52 = vadd.f32 %v3599_v11, %v3593_v43 }
 0x85c   :  { %3631 = vst [vmem:[#allocation1 + $0x10] ss:$2 sm:$0xff] %v10723_v52 }
 0x863   :  { %v3634_v28 = vld.sshfl [vmem:[#allocation1 + $0x10] sm:$0xff pattern:$0x75316420]  ;;  %v3635_v55 = vld.sshfl [vmem:[#allocation1 + $0x18] sm:$0xff pattern:$0x75316420] }
 0x864   :  { %6270 = vmatpush.msk.msra.mxu2 %vm13370_vm1, %v3634_v28  ;;  %6275 = vmatpush.msk.msra.mxu3 %vm13371_vm10, %v3635_v55 }
 0x865   :  { %6271 = vmatmul.msk.f32.vlgmr.msra.gmra.mxu2 %vm13372_vm2, %v10137_v26  ;;  %6276 = vmatmul.msk.f32.vlgmr.msra.gmra.mxu3 %vm13373_vm11, %v10137_v26 }
 0x86d   :  { %6272 = vmatmul.msk.f32.gmra.mxu2 %vm13374_vm8, %v10146_v35  ;;  %6277 = vmatmul.msk.f32.gmra.mxu3 %vm13375_vm12, %v10146_v35 }
 0x875   :  { %6273 = vmatmul.msk.f32.gmra.mxu2 %vm13376_vm9, %v10155_v58  ;;  %6278 = vmatmul.msk.f32.gmra.mxu3 %vm13377_vm15, %v10155_v58 }
 0x87d   :  { %6274 = vmatmul.msk.f32.gmra.mxu2 %vm13378_vm3, %v10710_v13  ;;  %6279 = vmatmul.msk.f32.gmra.mxu3 %vm13379_vm7, %v10710_v13 }
 0x891   :  { %v3661_v26 = vpop.f32.mrf.mxu0  ;;  %v3690_v2 = vpop.f32.mrf.mxu1 }
 0x892   :  { %v10751_v35 = vadd.f32 %v3661_v26, %v10746_v44  ;;  %v10757_v16 = vadd.f32 %v3690_v2, %v10746_v44 }
 0x894   :  { %v6280_v9 = vmul.f32 -1.442695, %v10751_v35  ;;  %v6281_v45 = vmul.f32 -1.442695, %v10757_v16 }
 0x896   :  { %6843 = vpow2.f32 %v6280_v9 }
 0x899   :  { %v3664_v54 = vpop.f32.mrf.mxu0  ;;  %v3693_v51 = vpop.f32.mrf.mxu1 }
 0x89a   :  { %v10754_v58 = vadd.f32 %v3664_v54, %v10748_v59  ;;  %v10762_v19 = vadd.f32 %v3693_v51, %v10748_v59 }
 0x89c   :  { %v6284_v62 = vmul.f32 -1.442695, %v10754_v58  ;;  %v6285_v30 = vmul.f32 -1.442695, %v10762_v19  ;;  %v6844_v46 = vpop.eup %6843 }
 0x89d   :  { %v10776_v17 = vadd.f32 1.0, %v6844_v46 }
 0x89e   :  { %6845 = vpow2.f32 %v6284_v62 }
 0x89f   :  { %6847 = vpow2.f32 %v6281_v45  ;;  %v3835_v36 = vand.u32 2147483648, %v10776_v17  ;;  %v3833_v39 = vand.u32 2147483647, %v10776_v17  ;;  %vm3829_vm14 = vweird.f32 %v10776_v17 }
 0x8a0   :  { %6849 = vpow2.f32 %v6285_v30 }
 0x8a1   :  { %v3667_v18 = vpop.f32.mrf.mxu0  ;;  %v3696_v15 = vpop.f32.mrf.mxu1  ;;  %v10836_v62 = vor.u32 1.1754944e-38, %v3835_v36  ;;  %vm10878_vm9 = vcmp.eq.f32.partialorder %v3833_v39, 8.507059e+37 }
 0x8a2   :  { %v10769_v49 = vadd.f32 %v3667_v18, %v10765_v14  ;;  %v10772_v7 = vadd.f32 %v3696_v15, %v10765_v14 }
 0x8a4   :  { %v6288_v29 = vmul.f32 -1.442695, %v10769_v49  ;;  %v6289_v21 = vmul.f32 -1.442695, %v10772_v7  ;;  %v6846_v22 = vpop.eup %6845 }
 0x8a5   :  { %v6848_v61 = vpop.eup %6847  ;;  %v10778_v32 = vadd.f32 1.0, %v6846_v22 }
 0x8a6   :  { %6851 = vpow2.f32 %v6288_v29  ;;  %v6850_v24 = vpop.eup %6849  ;;  %v10780_v5 = vadd.f32 1.0, %v6848_v61 }
 0x8a7   :  { %6853 = vpow2.f32 %v6289_v21  ;;  %v10790_v63 = vadd.f32 1.0, %v6850_v24  ;;  %v3895_v43 = vand.u32 2147483648, %v10778_v32  ;;  %vm3889_vm0 = vweird.f32 %v10778_v32 }
 0x8a8   :  { %6855 = vrcp.f32 %v10776_v17  ;;  %v3848_v2 = vand.u32 2147483647, %v10780_v5  ;;  %v3850_v45 = vand.u32 2147483648, %v10780_v5  ;;  %v3893_v29 = vand.u32 2147483647, %v10778_v32 }
 0x8a9   :  { %v3670_v40 = vpop.f32.mrf.mxu0  ;;  %v3699_v47 = vpop.f32.mrf.mxu1  ;;  %6857 = vrcp.f32 %v10778_v32  ;;  %v10846_v21 = vor.u32 1.1754944e-38, %v3895_v43  ;;  %vm3904_vm5 = vweird.f32 %v10790_v63 }
 0x8aa   :  { %v10783_v33 = vadd.f32 %v3670_v40, %v10744_v57  ;;  %v10794_v41 = vadd.f32 %v3699_v47, %v10744_v57  ;;  %v3910_v47 = vand.u32 2147483648, %v10790_v63  ;;  %vm10867_vm11 = vcmp.eq.f32.partialorder %v3893_v29, 8.507059e+37 }
 0x8ac   :  { %v6852_v31 = vpop.eup %6851  ;;  %v6292_v1 = vmul.f32 -1.442695, %v10783_v33  ;;  %v6293_v27 = vmul.f32 -1.442695, %v10794_v41 }
 0x8ad   :  { %v10786_v12 = vadd.f32 1.0, %v6852_v31  ;;  %v6854_v38 = vpop.eup %6853  ;;  %v3908_v31 = vand.u32 2147483647, %v10790_v63 }
 0x8ae   :  { %v10797_v56 = vadd.f32 1.0, %v6854_v38  ;;  %v10799_v23 = vpop.eup %6855 }
 0x8af   :  { %6859 = vrcp.f32 %v10786_v12  ;;  %v10803_v60 = vpop.eup %6857  ;;  %v3825_v4 = vmul.f32 %v10799_v23, %v10776_v17  ;;  %vm3830_vm4 = vweird.f32 %v10799_v23  ;;  %v3953_v18 = vand.u32 2147483647, %v10786_v12 }
 0x8b0   :  { %6861 = vrcp.f32 %v10780_v5  ;;  %v3885_v10 = vmul.f32 %v10803_v60, %v10778_v32  ;;  %v3955_v15 = vand.u32 2147483648, %v10786_v12  ;;  %vm3890_vm6 = vweird.f32 %v10803_v60 }
 0x8b1   :  { %6863 = vpow2.f32 %v6292_v1  ;;  %v3826_v50 = vsub.f32 1.0, %v3825_v4  ;;  %vm3949_vm13 = vweird.f32 %v10786_v12  ;;  %vm10862_vm10 = vcmp.eq.f32.partialorder %v3953_v18, 8.507059e+37  ;;  %vm10887_vm3 = vmor %vm3889_vm0, %vm3890_vm6 }
 0x8b2   :  { %6865 = vrcp.f32 %v10790_v63  ;;  %v3886_v11 = vsub.f32 1.0, %v3885_v10  ;;  %v3956_v10 = vor.u32 1.1754944e-38, %v3955_v15  ;;  %vm3964_vm12 = vweird.f32 %v10797_v56 }
 0x8b3   :  { %6867 = vrcp.f32 %v10797_v56  ;;  %v3827_v9 = vmul.f32 %v10799_v23, %v3826_v50 }
 0x8b4   :  { %6869 = vpow2.f32 %v6293_v27  ;;  %v3887_v30 = vmul.f32 %v10803_v60, %v3886_v11 }
 0x8b5   :  { %v10806_v0 = vpop.eup %6859  ;;  %v10854_v1 = vadd.f32 %v10799_v23, %v3827_v9 }
 0x8b6   :  { %v10808_v6 = vpop.eup %6861  ;;  %v3945_v20 = vmul.f32 %v10806_v0, %v10786_v12  ;;  %v3888_v27 = vadd.f32 %v10803_v60, %v3887_v30  ;;  %vm3950_vm8 = vweird.f32 %v10806_v0  ;;  %v3970_v30 = vand.u32 2147483648, %v10797_v56 }
 0x8b7   :  { %v6864_v42 = vpop.eup %6863  ;;  %v3840_v53 = vmul.f32 %v10808_v6, %v10780_v5  ;;  %vm3845_vm2 = vweird.f32 %v10808_v6  ;;  %vm10900_vm15 = vmor %vm3949_vm13, %vm3950_vm8 }
 0x8b8   :  { %v10816_v34 = vpop.eup %6865  ;;  %v10820_v25 = vadd.f32 1.0, %v6864_v42  ;;  %v3946_v28 = vsub.f32 1.0, %v3945_v20  ;;  %v3892_v39 = vsel %vm10887_vm3, %v10803_v60, %v3888_v27  ;;  %vm10917_vm3 = vmor %vm3829_vm14, %vm3830_vm4 }
 0x8b9   :  { %v10822_v3 = vpop.eup %6867  ;;  %v3841_v26 = vsub.f32 1.0, %v3840_v53  ;;  %v3900_v54 = vmul.f32 %v10816_v34, %v10790_v63  ;;  %vm3905_vm1 = vweird.f32 %v10816_v34  ;;  %v3832_v27 = vsel %vm10917_vm3, %v10799_v23, %v10854_v1 }
 0x8ba   :  { %v6870_v8 = vpop.eup %6869  ;;  %6871 = vrcp.f32 %v10820_v25  ;;  %v3960_v55 = vmul.f32 %v10822_v3, %v10797_v56  ;;  %v3947_v46 = vmul.f32 %v10806_v0, %v3946_v28  ;;  %v4013_v11 = vand.u32 2147483647, %v10820_v25  ;;  %vm10941_vm14 = vmor %vm3904_vm5, %vm3905_vm1 }
 0x8bb   :  { %v10833_v51 = vadd.f32 1.0, %v6870_v8  ;;  %v3842_v40 = vmul.f32 %v10808_v6, %v3841_v26  ;;  %v3901_v24 = vsub.f32 1.0, %v3900_v54  ;;  %v4015_v43 = vand.u32 2147483648, %v10820_v25 }
 0x8bc   :  { %v3961_v22 = vsub.f32 1.0, %v3960_v55  ;;  %v3948_v20 = vadd.f32 %v10806_v0, %v3947_v46  ;;  %v3968_v26 = vand.u32 2147483647, %v10797_v56  ;;  %vm3965_vm0 = vweird.f32 %v10822_v3 }
 0x8bd   :  { %6873 = vrcp.f32 %v10833_v51  ;;  %v3902_v8 = vmul.f32 %v10816_v34, %v3901_v24  ;;  %vm4009_vm6 = vweird.f32 %v10820_v25  ;;  %vm4014_vm8 = vcmp.eq.f32.partialorder %v4013_v11, 8.507059e+37  ;;  %vm10933_vm4 = vmor %vm3964_vm12, %vm3965_vm0 }
 0x8be   :  { %v3962_v53 = vmul.f32 %v10822_v3, %v3961_v22  ;;  %v3952_v18 = vsel %vm10900_vm15, %v10806_v0, %v3948_v20  ;;  %v4016_v46 = vor.u32 1.1754944e-38, %v4015_v43  ;;  %v4030_v22 = vand.u32 2147483648, %v10833_v51 }
 0x8bf   :  { %v3903_v12 = vadd.f32 %v10816_v34, %v3902_v8  ;;  %v3843_v20 = vadd.f32 %v10808_v6, %v3842_v40  ;;  %v3897_v4 = vsel %vm10867_vm11, %v10846_v21, %v3892_v39  ;;  %vm3969_vm12 = vcmp.eq.f32.partialorder %v3968_v26, 8.507059e+37 }
 0x8c0   :  { %v6872_v61 = vpop.eup %6871  ;;  %v3963_v60 = vadd.f32 %v10822_v3, %v3962_v53  ;;  %v3957_v53 = vsel %vm10862_vm10, %v3956_v10, %v3952_v18  ;;  %vm4024_vm10 = vweird.f32 %v10833_v51  ;;  %v3971_v10 = vor.u32 1.1754944e-38, %v3970_v30 }
 0x8c1   :  { %v4005_v38 = vmul.f32 %v6872_v61, %v10820_v25  ;;  %vm4010_vm7 = vweird.f32 %v6872_v61  ;;  %v3907_v8 = vsel %vm10941_vm14, %v10816_v34, %v3903_v12  ;;  %vm13396_vm11 = vweird.f32 %v10780_v5 }
 0x8c2   :  { %vm4011_vm13 = vmor %vm4009_vm6, %vm4010_vm7  ;;  %v3967_v40 = vsel %vm10933_vm4, %v10822_v3, %v3963_v60  ;;  %v4072_v3 = vmul.f32 %v3957_v53, %v10769_v49  ;;  %v3911_v34 = vor.u32 1.1754944e-38, %v3910_v47  ;;  %v3851_v43 = vor.u32 1.1754944e-38, %v3850_v45 }
 0x8c3   :  { %v4006_v50 = vsub.f32 1.0, %v4005_v38  ;;  %v6874_v36 = vpop.eup %6873  ;;  %v4028_v38 = vand.u32 2147483647, %v10833_v51  ;;  %vm10965_vm7 = vmor %vm13396_vm11, %vm3845_vm2  ;;  %v3972_v21 = vsel %vm3969_vm12, %v3971_v10, %v3967_v40  ;;  %vm3849_vm2 = vcmp.eq.f32.partialorder %v3848_v2, 8.507059e+37 }
 0x8c4   :  { %v4020_v9 = vmul.f32 %v6874_v36, %v10833_v51  ;;  %vm4025_vm15 = vweird.f32 %v6874_v36  ;;  %v3847_v42 = vsel %vm10965_vm7, %v10808_v6, %v3843_v20  ;;  %v4073_v55 = vmul.f32 %v3972_v21, %v10772_v7 }
 0x8c5   :  { %v4007_v54 = vmul.f32 %v6872_v61, %v4006_v50  ;;  %vm4026_vm5 = vmor %vm4024_vm10, %vm4025_vm15  ;;  %v4031_v50 = vor.u32 1.1754944e-38, %v4030_v22  ;;  %vm4029_vm1 = vcmp.eq.f32.partialorder %v4028_v38, 8.507059e+37  ;;  %vm13399_vm0 = vcmask 261120  }
 0x8c6   :  { %v4021_v29 = vsub.f32 1.0, %v4020_v9  ;;  %vm13400_vm6 = vmmov %vm13399_vm0 }
 0x8c7   :  { %v4008_v15 = vadd.f32 %v6872_v61, %v4007_v54 }
 0x8c8   :  { %v4022_v24 = vmul.f32 %v6874_v36, %v4021_v29 }
 0x8c9   :  { %v4012_v0 = vsel %vm4011_vm13, %v6872_v61, %v4008_v15 }
 0x8ca   :  { %v4017_v61 = vsel %vm4014_vm8, %v4016_v46, %v4012_v0  ;;  %v4023_v56 = vadd.f32 %v6874_v36, %v4022_v24 }
 0x8cb   :  { %v4076_v1 = vmul.f32 %v4017_v61, %v10783_v33  ;;  %v3837_v33 = vsel %vm10878_vm9, %v10836_v62, %v3832_v27  ;;  %vm3909_vm9 = vcmp.eq.f32.partialorder %v3908_v31, 8.507059e+37 }
 0x8cc   :  { %v4027_v11 = vsel %vm4026_vm5, %v6874_v36, %v4023_v56  ;;  %v4068_v36 = vmul.f32 %v3897_v4, %v10754_v58  ;;  %v3912_v28 = vsel %vm3909_vm9, %v3911_v34, %v3907_v8  ;;  %v4064_v47 = vmul.f32 %v3837_v33, %v10751_v35 }
 0x8cd   :  { %4092 = vmatpush.msrb.mxu0 %v4076_v1  ;;  %v4032_v49 = vsel %vm4029_vm1, %v4031_v50, %v4027_v11  ;;  %v3852_v58 = vsel %vm3849_vm2, %v3851_v43, %v3847_v42  ;;  %v4069_v63 = vmul.f32 %v3912_v28, %v10762_v19 }
 0x8ce   :  { %v4077_v62 = vmul.f32 %v4032_v49, %v10794_v41  ;;  %v10988_v41 = vld [vmem:[%s12928_s4] sm:$0xf]  ;;  %v4065_v35 = vmul.f32 %v3852_v58, %v10757_v16 }
 0x8cf   :  { %4093 = vmatpush.msrb.mxu0 %v4072_v3 }
 0x8d0   :  { %4112 = vmatpush.msrb.mxu1 %v4077_v62 }
 0x8d1   :  { %4094 = vmatpush.msrb.mxu0 %v4068_v36 }
 0x8d2   :  { %4113 = vmatpush.msrb.mxu1 %v4073_v55 }
 0x8d3   :  { %4095 = vmatpush.msrb.mxu0 %v4064_v47 }
 0x8d4   :  { %6296 = vmatmul.msk.f32.vlgmr.msrb.gmra.mxu0 %vm13399_vm0, %v10988_v41  ;;  %4114 = vmatpush.msrb.mxu1 %v4069_v63 }
 0x8d6   :  { %4115 = vmatpush.msrb.mxu1 %v4065_v35 }
 0x8d7   :  { %6297 = vmatmul.msk.f32.vlgmr.msrb.gmra.mxu1 %vm13400_vm6, %v10988_v41 }
 0x8e8   :  { %v3719_v7 = vpop.f32.mrf.mxu2  ;;  %v3748_v5 = vpop.f32.mrf.mxu3 }
 0x8e9   :  { %v10996_v19 = vadd.f32 %v3719_v7, %v10746_v44  ;;  %v11002_v31 = vadd.f32 %v3748_v5, %v10746_v44 }
 0x8eb   :  { %v6282_v16 = vmul.f32 -1.442695, %v10996_v19  ;;  %v6283_v9 = vmul.f32 -1.442695, %v11002_v31 }
 0x8ed   :  { %6875 = vpow2.f32 %v6282_v16 }
 0x8f0   :  { %v3722_v6 = vpop.f32.mrf.mxu2  ;;  %v3751_v2 = vpop.f32.mrf.mxu3 }
 0x8f1   :  { %v10999_v45 = vadd.f32 %v3722_v6, %v10748_v59  ;;  %v11007_v54 = vadd.f32 %v3751_v2, %v10748_v59 }
 0x8f3   :  { %v6286_v26 = vmul.f32 -1.442695, %v10999_v45  ;;  %v6287_v39 = vmul.f32 -1.442695, %v11007_v54  ;;  %v6876_v15 = vpop.eup %6875 }
 0x8f4   :  { %v11019_v46 = vadd.f32 1.0, %v6876_v15 }
 0x8f5   :  { %6877 = vpow2.f32 %v6286_v26 }
 0x8f6   :  { %6879 = vpow2.f32 %v6283_v9  ;;  %v3865_v42 = vand.u32 2147483648, %v11019_v46  ;;  %v3863_v43 = vand.u32 2147483647, %v11019_v46  ;;  %vm3859_vm3 = vweird.f32 %v11019_v46 }
 0x8f7   :  { %6881 = vpow2.f32 %v6287_v39 }
 0x8f8   :  { %v3725_v32 = vpop.f32.mrf.mxu2  ;;  %v3754_v30 = vpop.f32.mrf.mxu3  ;;  %v11079_v6 = vor.u32 1.1754944e-38, %v3865_v42  ;;  %vm11121_vm9 = vcmp.eq.f32.partialorder %v3863_v43, 8.507059e+37 }
 0x8f9   :  { %v11012_v18 = vadd.f32 %v3725_v32, %v10765_v14  ;;  %v11015_v44 = vadd.f32 %v3754_v30, %v10765_v14 }
 0x8fb   :  { %v6290_v60 = vmul.f32 -1.442695, %v11012_v18  ;;  %v6291_v59 = vmul.f32 -1.442695, %v11015_v44  ;;  %v6878_v29 = vpop.eup %6877 }
 0x8fc   :  { %v6880_v12 = vpop.eup %6879  ;;  %v11021_v25 = vadd.f32 1.0, %v6878_v29 }
 0x8fd   :  { %6883 = vpow2.f32 %v6290_v60  ;;  %v6882_v0 = vpop.eup %6881  ;;  %v11023_v14 = vadd.f32 1.0, %v6880_v12 }
 0x8fe   :  { %6885 = vpow2.f32 %v6291_v59  ;;  %v11033_v61 = vadd.f32 1.0, %v6882_v0  ;;  %v3925_v28 = vand.u32 2147483648, %v11021_v25  ;;  %vm3919_vm13 = vweird.f32 %v11021_v25 }
 0x8ff   :  { %6887 = vrcp.f32 %v11019_v46  ;;  %v3878_v63 = vand.u32 2147483647, %v11023_v14  ;;  %v3880_v2 = vand.u32 2147483648, %v11023_v14  ;;  %v3923_v39 = vand.u32 2147483647, %v11021_v25 }
 0x900   :  { %v3728_v22 = vpop.f32.mrf.mxu2  ;;  %v3757_v27 = vpop.f32.mrf.mxu3  ;;  %6889 = vrcp.f32 %v11021_v25  ;;  %v11089_v32 = vor.u32 1.1754944e-38, %v3925_v28  ;;  %v3938_v12 = vand.u32 2147483647, %v11033_v61  ;;  %vm3934_vm14 = vweird.f32 %v11033_v61 }
 0x901   :  { %v11026_v38 = vadd.f32 %v3728_v22, %v10744_v57  ;;  %v11037_v23 = vadd.f32 %v3757_v27, %v10744_v57  ;;  %v3940_v22 = vand.u32 2147483648, %v11033_v61  ;;  %vm11110_vm1 = vcmp.eq.f32.partialorder %v3923_v39, 8.507059e+37 }
 0x903   :  { %v6884_v24 = vpop.eup %6883  ;;  %v6294_v53 = vmul.f32 -1.442695, %v11026_v38  ;;  %v6295_v56 = vmul.f32 -1.442695, %v11037_v23 }
 0x904   :  { %v11029_v20 = vadd.f32 1.0, %v6884_v24  ;;  %v6886_v17 = vpop.eup %6885 }
 0x905   :  { %v11040_v40 = vadd.f32 1.0, %v6886_v17  ;;  %v11042_v1 = vpop.eup %6887 }
 0x906   :  { %6891 = vrcp.f32 %v11029_v20  ;;  %v11046_v4 = vpop.eup %6889  ;;  %v3855_v50 = vmul.f32 %v11042_v1, %v11019_v46  ;;  %vm3860_vm8 = vweird.f32 %v11042_v1  ;;  %v3983_v26 = vand.u32 2147483647, %v11029_v20 }
 0x907   :  { %6893 = vrcp.f32 %v11023_v14  ;;  %v3915_v8 = vmul.f32 %v11046_v4, %v11021_v25  ;;  %v3985_v9 = vand.u32 2147483648, %v11029_v20  ;;  %vm3920_vm15 = vweird.f32 %v11046_v4 }
 0x908   :  { %6895 = vpow2.f32 %v6294_v53  ;;  %v3856_v49 = vsub.f32 1.0, %v3855_v50  ;;  %vm3979_vm4 = vweird.f32 %v11029_v20  ;;  %vm11105_vm12 = vcmp.eq.f32.partialorder %v3983_v26, 8.507059e+37  ;;  %vm11130_vm0 = vmor %vm3919_vm13, %vm3920_vm15 }
 0x909   :  { %6897 = vrcp.f32 %v11033_v61  ;;  %v3916_v62 = vsub.f32 1.0, %v3915_v8  ;;  %v3986_v17 = vor.u32 1.1754944e-38, %v3985_v9  ;;  %vm3994_vm7 = vweird.f32 %v11040_v40 }
 0x90a   :  { %6899 = vrcp.f32 %v11040_v40  ;;  %v3857_v5 = vmul.f32 %v11042_v1, %v3856_v49  ;;  %v3998_v28 = vand.u32 2147483647, %v11040_v40 }
 0x90b   :  { %6901 = vpow2.f32 %v6295_v56  ;;  %v3917_v16 = vmul.f32 %v11046_v4, %v3916_v62 }
 0x90c   :  { %v11049_v10 = vpop.eup %6891  ;;  %v11097_v0 = vadd.f32 %v11042_v1, %v3857_v5 }
 0x90d   :  { %v11051_v57 = vpop.eup %6893  ;;  %v3975_v11 = vmul.f32 %v11049_v10, %v11029_v20  ;;  %v3918_v27 = vadd.f32 %v11046_v4, %v3917_v16  ;;  %vm3980_vm11 = vweird.f32 %v11049_v10 }
 0x90e   :  { %v6896_v3 = vpop.eup %6895  ;;  %v3870_v51 = vmul.f32 %v11051_v57, %v11023_v14  ;;  %vm3875_vm5 = vweird.f32 %v11051_v57  ;;  %vm11143_vm2 = vmor %vm3979_vm4, %vm3980_vm11 }
 0x90f   :  { %v11059_v33 = vpop.eup %6897  ;;  %v11063_v34 = vadd.f32 1.0, %v6896_v3  ;;  %v3976_v47 = vsub.f32 1.0, %v3975_v11  ;;  %v3922_v43 = vsel %vm11130_vm0, %v11046_v4, %v3918_v27  ;;  %vm11160_vm0 = vmor %vm3859_vm3, %vm3860_vm8 }
 0x910   :  { %v11065_v21 = vpop.eup %6899  ;;  %v3871_v58 = vsub.f32 1.0, %v3870_v51  ;;  %v3930_v35 = vmul.f32 %v11059_v33, %v11033_v61  ;;  %vm3935_vm10 = vweird.f32 %v11059_v33  ;;  %v3927_v27 = vsel %vm11110_vm1, %v11089_v32, %v3922_v43 }
 0x911   :  { %v6902_v36 = vpop.eup %6901  ;;  %6903 = vrcp.f32 %v11063_v34  ;;  %v3990_v55 = vmul.f32 %v11065_v21, %v11040_v40  ;;  %v3977_v30 = vmul.f32 %v11049_v10, %v3976_v47  ;;  %v4043_v49 = vand.u32 2147483647, %v11063_v34  ;;  %vm11184_vm3 = vmor %vm3934_vm14, %vm3935_vm10 }
 0x912   :  { %v11076_v7 = vadd.f32 1.0, %v6902_v36  ;;  %v3872_v15 = vmul.f32 %v11051_v57, %v3871_v58  ;;  %v3931_v29 = vsub.f32 1.0, %v3930_v35  ;;  %v4045_v42 = vand.u32 2147483648, %v11063_v34 }
 0x913   :  { %v3991_v60 = vsub.f32 1.0, %v3990_v55  ;;  %v3978_v50 = vadd.f32 %v11049_v10, %v3977_v30  ;;  %vm3995_vm13 = vweird.f32 %v11065_v21  ;;  %v4000_v58 = vand.u32 2147483648, %v11040_v40 }
 0x914   :  { %6905 = vrcp.f32 %v11076_v7  ;;  %v3932_v51 = vmul.f32 %v11059_v33, %v3931_v29  ;;  %vm4039_vm15 = vweird.f32 %v11063_v34  ;;  %vm4044_vm11 = vcmp.eq.f32.partialorder %v4043_v49, 8.507059e+37  ;;  %vm11176_vm8 = vmor %vm3994_vm7, %vm3995_vm13 }
 0x915   :  { %v3992_v8 = vmul.f32 %v11065_v21, %v3991_v60  ;;  %v3982_v35 = vsel %vm11143_vm2, %v11049_v10, %v3978_v50  ;;  %v4046_v26 = vor.u32 1.1754944e-38, %v4045_v42  ;;  %v4060_v9 = vand.u32 2147483648, %v11076_v7 }
 0x916   :  { %v3933_v20 = vadd.f32 %v11059_v33, %v3932_v51  ;;  %v4058_v30 = vand.u32 2147483647, %v11076_v7  ;;  %v3862_v60 = vsel %vm11160_vm0, %v11042_v1, %v11097_v0  ;;  %v3873_v29 = vadd.f32 %v11051_v57, %v3872_v15 }
 0x917   :  { %v6904_v59 = vpop.eup %6903  ;;  %v3993_v4 = vadd.f32 %v11065_v21, %v3992_v8  ;;  %vm3999_vm7 = vcmp.eq.f32.partialorder %v3998_v28, 8.507059e+37  ;;  %v4001_v53 = vor.u32 1.1754944e-38, %v4000_v58  ;;  %vm13417_vm1 = vweird.f32 %v11023_v14 }
 0x918   :  { %v4035_v24 = vmul.f32 %v6904_v59, %v11063_v34  ;;  %vm4040_vm6 = vweird.f32 %v6904_v59  ;;  %v3937_v50 = vsel %vm11184_vm3, %v11059_v33, %v3933_v20  ;;  %vm4059_vm10 = vcmp.eq.f32.partialorder %v4058_v30, 8.507059e+37  ;;  %v6304_v34 = vld [vmem:[%s12930_s6 + $0x68] sm:$0xff] }
 0x919   :  { %vm4041_vm4 = vmor %vm4039_vm15, %vm4040_vm6  ;;  %v3997_v15 = vsel %vm11176_vm8, %v11065_v21, %v3993_v4  ;;  %v3941_v33 = vor.u32 1.1754944e-38, %v3940_v22  ;;  %vm13420_vm13 = vcmask 261120   ;;  %v11272_v4 = vld [vmem:[%s12926_s2 + $0x10] sm:$0xff] }
 0x91a   :  { %v4036_v3 = vsub.f32 1.0, %v4035_v24  ;;  %v6906_v11 = vpop.eup %6905  ;;  %v3987_v24 = vsel %vm11105_vm12, %v3986_v17, %v3982_v35  ;;  %vm4054_vm12 = vweird.f32 %v11076_v7  ;;  %v4061_v17 = vor.u32 1.1754944e-38, %v4060_v9  ;;  %vm11208_vm6 = vmor %vm13417_vm1, %vm3875_vm5  ;;  %v11254_v35 = vld [vmem:[%s12926_s2] sm:$0xff] }
 0x91b   :  { %v4050_v55 = vmul.f32 %v6906_v11, %v11076_v7  ;;  %vm4055_vm2 = vweird.f32 %v6906_v11  ;;  %v4074_v21 = vmul.f32 %v3987_v24, %v11012_v18  ;;  %v4002_v32 = vsel %vm3999_vm7, %v4001_v53, %v3997_v15  ;;  %vm13421_vm15 = vmmov %vm13420_vm13 }
 0x91c   :  { %v4037_v47 = vmul.f32 %v6904_v59, %v4036_v3  ;;  %vm4056_vm14 = vmor %vm4054_vm12, %vm4055_vm2  ;;  %v3877_v56 = vsel %vm11208_vm6, %v11051_v57, %v3873_v29  ;;  %v4070_v3 = vmul.f32 %v3927_v27, %v10999_v45  ;;  %vm3879_vm5 = vcmp.eq.f32.partialorder %v3878_v63, 8.507059e+37  ;;  %v11314_v27 = vpop.permute.xlu1 %4203 }
 0x91d   :  { %v4051_v16 = vsub.f32 1.0, %v4050_v55  ;;  %v4075_v49 = vmul.f32 %v4002_v32, %v11015_v44  ;;  %vm13425_vm2 = vcmask 31744   ;;  %v11331_v32 = vpop.permute.xlu0 %4208 }
 0x91e   :  { %v4038_v5 = vadd.f32 %v6904_v59, %v4037_v47  ;;  %vm13426_vm8 = vmmov %vm13425_vm2 }
 0x91f   :  { %v4052_v39 = vmul.f32 %v6906_v11, %v4051_v16  ;;  %vm13427_vm3 = vmmov %vm13425_vm2 }
 0x920   :  { %v4042_v10 = vsel %vm4041_vm4, %v6904_v59, %v4038_v5  ;;  %vm13422_vm4 = vcmask 1043456   ;;  %vm13428_vm12 = vmmov %vm13425_vm2 }
 0x921   :  { %v4047_v59 = vsel %vm4044_vm11, %v4046_v26, %v4042_v10  ;;  %v4053_v40 = vadd.f32 %v6906_v11, %v4052_v39  ;;  %vm13423_vm11 = vmmov %vm13422_vm4 }
 0x922   :  { %v4078_v0 = vmul.f32 %v4047_v59, %v11026_v38  ;;  %v3867_v38 = vsel %vm11121_vm9, %v11079_v6, %v3862_v60  ;;  %vm3939_vm9 = vcmp.eq.f32.partialorder %v3938_v12, 8.507059e+37  ;;  %v4186_v12 = vstv %s11235_s18  ;;  %vm13424_vm0 = vmmov %vm13422_vm4 }
 0x923   :  { %v4057_v8 = vsel %vm4056_vm14, %v6906_v11, %v4053_v40  ;;  %v3881_v11 = vor.u32 1.1754944e-38, %v3880_v2  ;;  %v3942_v51 = vsel %vm3939_vm9, %v3941_v33, %v3937_v50  ;;  %v4066_v22 = vmul.f32 %v3867_v38, %v10996_v19  ;;  %v6303_v2 = vld [vmem:[%s12930_s6 + $0x60] sm:$0xff]  ;;  %vm13429_vm7 = vmmov %vm13425_vm2 }
 0x924   :  { %4132 = vmatpush.msrb.mxu2 %v4078_v0  ;;  %v4062_v18 = vsel %vm4059_vm10, %v4061_v17, %v4057_v8  ;;  %v4071_v61 = vmul.f32 %v3942_v51, %v11007_v54  ;;  %v4166_v54 = vstv %s6301_s17  ;;  %v4187_v28 = vmul.f32 %v6303_v2, %v4186_v12  ;;  %vm13430_vm14 = vmmov %vm13425_vm2 }
 0x925   :  { %v4079_v6 = vmul.f32 %v4062_v18, %v11037_v23  ;;  %v3882_v45 = vsel %vm3879_vm5, %v3881_v11, %v3877_v56  ;;  %vm13431_vm10 = vmmov %vm13425_vm2  ;;  %v4188_v60 = vmul.f32 %v6304_v34, %v4186_v12 }
 0x926   :  { %4133 = vmatpush.msrb.mxu2 %v4074_v21  ;;  %v4067_v23 = vmul.f32 %v3882_v45, %v11002_v31  ;;  %v4163_v31 = vstv %s11233_s1  ;;  %vm13432_vm1 = vmmov %vm13425_vm2 }
 0x927   :  { %4152 = vmatpush.msrb.mxu3 %v4079_v6  ;;  %v4164_v62 = vmul.f32 %v4163_v31, %v10690_v37  ;;  %v11263_v37 = vld [vmem:[%s12926_s2 + $0x8] sm:$0xff]  ;;  %v4165_v30 = vmul.f32 %v4163_v31, %v10723_v52  ;;  %vm13433_vm6 = vmmov %vm13424_vm0  ;;  %v11310_v52 = vpop.permute.xlu2 %4213 }
 0x928   :  { %4134 = vmatpush.msrb.mxu2 %v4070_v3  ;;  %vm13434_vm9 = vmmov %vm13424_vm0 }
 0x929   :  { %4153 = vmatpush.msrb.mxu3 %v4075_v49  ;;  %vm13435_vm5 = vmmov %vm13424_vm0 }
 0x92a   :  { %4135 = vmatpush.msrb.mxu2 %v4066_v22 }
 0x92b   :  { %6298 = vmatmul.msk.f32.vlgmr.msrb.gmra.mxu2 %vm13420_vm13, %v10988_v41  ;;  %4154 = vmatpush.msrb.mxu3 %v4071_v61  ;;  %vm13436_vm13 = vmmov %vm13432_vm1 }
 0x92d   :  { %4155 = vmatpush.msrb.mxu3 %v4067_v23 }
 0x92e   :  { %6299 = vmatmul.msk.f32.vlgmr.msrb.gmra.mxu3 %vm13421_vm15, %v10988_v41  ;;  %vm13437_vm15 = vmmov %vm13432_vm1 }
 0x92f   :  { %v11312_v40 = vpop.permute.xlu2 %4198 }
 0x951   :  { %v4097_v19 = vpop.f32.mrf.mxu0 }
 0x952   :  { %v4098_v14 = vadd.f32 %v4097_v19, %v7811_v48 }
 0x954   :  { %v4117_v44 = vpop.f32.mrf.mxu1  ;;  %v4167_v42 = vmul.f32 %v4166_v54, %v4098_v14 }
 0x955   :  { %v4118_v57 = vadd.f32 %v4117_v44, %v7811_v48 }
 0x957   :  { %v4168_v63 = vmul.f32 %v4166_v54, %v4118_v57 }
 0x959   :  { %v4175_v36 = vrot.slane %v4168_v63, 4 }
 0x95b   :  { %v4177_v47 = vsel %vm13422_vm4, %v4167_v42, %v4175_v36  ;;  %vm13438_vm4 = vmmov %vm13432_vm1 }
 0x95c   :  { %v4181_v55 = vadd.f32 %v4177_v47, %v4164_v62 }
 0x95e   :  { %v11246_v43 = vadd.f32 %v4187_v28, %v4181_v55 }
 0x960   :  { %4218 = vst [vmem:[#allocation1] ss:$2 sm:$0xff] %v11246_v43 }
 0x967   :  { %v4221_v25 = vld.sshfl [vmem:[#allocation1] sm:$0xff pattern:$0x75316420]  ;;  %v4222_v58 = vld.sshfl [vmem:[#allocation1 + $0x8] sm:$0xff pattern:$0x75316420] }
 0x968   :  { %6309 = vmatpush.msk.msra.mxu0 %vm13423_vm11, %v4221_v25  ;;  %6314 = vmatpush.msk.msra.mxu1 %vm13424_vm0, %v4222_v58  ;;  %vm13439_vm11 = vmmov %vm13432_vm1 }
 0x969   :  { %6310 = vmatmul.msk.f32.vlgmr.msra.gmra.mxu0 %vm13425_vm2, %v11254_v35  ;;  %6315 = vmatmul.msk.f32.vlgmr.msra.gmra.mxu1 %vm13426_vm8, %v11254_v35  ;;  %vm13440_vm0 = vmmov %vm13432_vm1 }
 0x96a   :  { %vm13441_vm2 = vmmov %vm13440_vm0 }
 0x96b   :  { %vm13442_vm8 = vmmov %vm13440_vm0 }
 0x971   :  { %6311 = vmatmul.msk.f32.gmra.mxu0 %vm13427_vm3, %v11263_v37  ;;  %6316 = vmatmul.msk.f32.gmra.mxu1 %vm13428_vm12, %v11263_v37  ;;  %vm13443_vm3 = vmmov %vm13440_vm0 }
 0x979   :  { %6312 = vmatmul.msk.f32.gmra.mxu0 %vm13429_vm7, %v11272_v4  ;;  %6317 = vmatmul.msk.f32.gmra.mxu1 %vm13430_vm14, %v11272_v4 }
 0x981   :  { %6313 = vmatmul.msk.f32.gmra.mxu0 %vm13431_vm10, %v10710_v13  ;;  %6318 = vmatmul.msk.f32.gmra.mxu1 %vm13432_vm1, %v10710_v13 }
 0x9ae   :  { %v4137_v5 = vpop.f32.mrf.mxu2 }
 0x9af   :  { %v4138_v20 = vadd.f32 %v4137_v5, %v7811_v48 }
 0x9b1   :  { %v4157_v16 = vpop.f32.mrf.mxu3  ;;  %v4169_v10 = vmul.f32 %v4166_v54, %v4138_v20 }
 0x9b2   :  { %v4158_v26 = vadd.f32 %v4157_v16, %v7811_v48 }
 0x9b4   :  { %v4170_v9 = vmul.f32 %v4166_v54, %v4158_v26 }
 0x9b6   :  { %v4176_v39 = vrot.slane %v4170_v9, 4 }
 0x9b8   :  { %v4178_v29 = vsel %vm13433_vm6, %v4169_v10, %v4176_v39 }
 0x9b9   :  { %v4182_v24 = vadd.f32 %v4178_v29, %v4165_v30 }
 0x9bb   :  { %v11289_v46 = vadd.f32 %v4188_v60, %v4182_v24 }
 0x9bd   :  { %4220 = vst [vmem:[#allocation1 + $0x10] ss:$2 sm:$0xff] %v11289_v46 }
 0x9c4   :  { %v4223_v59 = vld.sshfl [vmem:[#allocation1 + $0x10] sm:$0xff pattern:$0x75316420]  ;;  %v4224_v1 = vld.sshfl [vmem:[#allocation1 + $0x18] sm:$0xff pattern:$0x75316420] }
 0x9c5   :  { %6319 = vmatpush.msk.msra.mxu2 %vm13434_vm9, %v4223_v59  ;;  %6324 = vmatpush.msk.msra.mxu3 %vm13435_vm5, %v4224_v1 }
 0x9c6   :  { %6320 = vmatmul.msk.f32.vlgmr.msra.gmra.mxu2 %vm13436_vm13, %v11254_v35  ;;  %6325 = vmatmul.msk.f32.vlgmr.msra.gmra.mxu3 %vm13437_vm15, %v11254_v35 }
 0x9ce   :  { %6321 = vmatmul.msk.f32.gmra.mxu2 %vm13438_vm4, %v11263_v37  ;;  %6326 = vmatmul.msk.f32.gmra.mxu3 %vm13439_vm11, %v11263_v37 }
 0x9d6   :  { %6322 = vmatmul.msk.f32.gmra.mxu2 %vm13440_vm0, %v11272_v4  ;;  %6327 = vmatmul.msk.f32.gmra.mxu3 %vm13441_vm2, %v11272_v4 }
 0x9de   :  { %6323 = vmatmul.msk.f32.gmra.mxu2 %vm13442_vm8, %v10710_v13  ;;  %6328 = vmatmul.msk.f32.gmra.mxu3 %vm13443_vm3, %v10710_v13 }
 0x9e6   :  { %v4250_v15 = vpop.f32.mrf.mxu0  ;;  %v4279_v0 = vpop.f32.mrf.mxu1 }
 0x9e7   :  { %v11317_v53 = vadd.f32 %v4250_v15, %v11312_v40  ;;  %v11323_v8 = vadd.f32 %v4279_v0, %v11312_v40 }
 0x9e9   :  { %v6329_v13 = vmul.f32 -1.442695, %v11317_v53  ;;  %v6330_v33 = vmul.f32 -1.442695, %v11323_v8 }
 0x9eb   :  { %6907 = vpow2.f32 %v6329_v13 }
 0x9ee   :  { %v4253_v17 = vpop.f32.mrf.mxu0  ;;  %v4282_v50 = vpop.f32.mrf.mxu1 }
 0x9ef   :  { %v11320_v21 = vadd.f32 %v4253_v17, %v11314_v27  ;;  %v11328_v7 = vadd.f32 %v4282_v50, %v11314_v27 }
 0x9f1   :  { %v6333_v38 = vmul.f32 -1.442695, %v11320_v21  ;;  %v6334_v18 = vmul.f32 -1.442695, %v11328_v7  ;;  %v6908_v49 = vpop.eup %6907 }
 0x9f2   :  { %v11342_v23 = vadd.f32 1.0, %v6908_v49 }
 0x9f3   :  { %6909 = vpow2.f32 %v6333_v38 }
 0x9f4   :  { %6911 = vpow2.f32 %v6330_v33  ;;  %v4424_v29 = vand.u32 2147483648, %v11342_v23  ;;  %v4422_v1 = vand.u32 2147483647, %v11342_v23  ;;  %vm4418_vm14 = vweird.f32 %v11342_v23 }
 0x9f5   :  { %6913 = vpow2.f32 %v6334_v18 }
 0x9f6   :  { %v4256_v56 = vpop.f32.mrf.mxu0  ;;  %v4285_v3 = vpop.f32.mrf.mxu1  ;;  %vm11444_vm0 = vcmp.eq.f32.partialorder %v4422_v1, 8.507059e+37 }
 0x9f7   :  { %v11335_v6 = vadd.f32 %v4256_v56, %v11331_v32  ;;  %v11338_v11 = vadd.f32 %v4285_v3, %v11331_v32  ;;  %v11402_v56 = vor.u32 1.1754944e-38, %v4424_v29 }
 0x9f9   :  { %v6337_v51 = vmul.f32 -1.442695, %v11335_v6  ;;  %v6338_v22 = vmul.f32 -1.442695, %v11338_v11  ;;  %v6910_v45 = vpop.eup %6909 }
 0x9fa   :  { %v6912_v61 = vpop.eup %6911  ;;  %v11344_v54 = vadd.f32 1.0, %v6910_v45 }
 0x9fb   :  { %6915 = vpow2.f32 %v6337_v51  ;;  %v6914_v44 = vpop.eup %6913  ;;  %v11346_v57 = vadd.f32 1.0, %v6912_v61 }
 0x9fc   :  { %6917 = vpow2.f32 %v6338_v22  ;;  %v11356_v36 = vadd.f32 1.0, %v6914_v44  ;;  %v4484_v15 = vand.u32 2147483648, %v11344_v54  ;;  %vm4478_vm12 = vweird.f32 %v11344_v54 }
 0x9fd   :  { %6919 = vrcp.f32 %v11342_v23  ;;  %v4437_v13 = vand.u32 2147483647, %v11346_v57  ;;  %v4439_v3 = vand.u32 2147483648, %v11346_v57  ;;  %v4482_v45 = vand.u32 2147483647, %v11344_v54 }
 0x9fe   :  { %v4259_v19 = vpop.f32.mrf.mxu0  ;;  %v4288_v63 = vpop.f32.mrf.mxu1  ;;  %6921 = vrcp.f32 %v11344_v54  ;;  %v11412_v61 = vor.u32 1.1754944e-38, %v4484_v15  ;;  %vm4493_vm6 = vweird.f32 %v11356_v36 }
 0x9ff   :  { %v11349_v31 = vadd.f32 %v4259_v19, %v11310_v52  ;;  %v11360_v62 = vadd.f32 %v4288_v63, %v11310_v52  ;;  %vm11433_vm15 = vcmp.eq.f32.partialorder %v4482_v45, 8.507059e+37 }
 0xa01   :  { %v6916_v14 = vpop.eup %6915  ;;  %v6341_v12 = vmul.f32 -1.442695, %v11349_v31  ;;  %v6342_v55 = vmul.f32 -1.442695, %v11360_v62 }
 0xa02   :  { %v11352_v2 = vadd.f32 1.0, %v6916_v14  ;;  %v6918_v42 = vpop.eup %6917 }
 0xa03   :  { %v11363_v28 = vadd.f32 1.0, %v6918_v42  ;;  %v11365_v47 = vpop.eup %6919  ;;  %v4497_v42 = vand.u32 2147483647, %v11356_v36 }
 0xa04   :  { %6923 = vrcp.f32 %v11352_v2  ;;  %v11369_v25 = vpop.eup %6921  ;;  %v4414_v16 = vmul.f32 %v11365_v47, %v11342_v23  ;;  %vm4419_vm7 = vweird.f32 %v11365_v47  ;;  %v4542_v22 = vand.u32 2147483647, %v11352_v2 }
 0xa05   :  { %6925 = vrcp.f32 %v11346_v57  ;;  %v4474_v20 = vmul.f32 %v11369_v25, %v11344_v54  ;;  %v4544_v49 = vand.u32 2147483648, %v11352_v2  ;;  %vm4479_vm10 = vweird.f32 %v11369_v25 }
 0xa06   :  { %6927 = vpow2.f32 %v6341_v12  ;;  %v4415_v60 = vsub.f32 1.0, %v4414_v16  ;;  %vm4538_vm1 = vweird.f32 %v11352_v2  ;;  %vm11428_vm5 = vcmp.eq.f32.partialorder %v4542_v22, 8.507059e+37  ;;  %vm11453_vm8 = vmor %vm4478_vm12, %vm4479_vm10 }
 0xa07   :  { %6929 = vrcp.f32 %v11356_v36  ;;  %v4475_v59 = vsub.f32 1.0, %v4474_v20  ;;  %vm4553_vm11 = vweird.f32 %v11363_v28  ;;  %v4559_v45 = vand.u32 2147483648, %v11363_v28 }
 0xa08   :  { %6931 = vrcp.f32 %v11363_v28  ;;  %v4416_v18 = vmul.f32 %v11365_v47, %v4415_v60 }
 0xa09   :  { %6933 = vpow2.f32 %v6342_v55  ;;  %v4476_v51 = vmul.f32 %v11369_v25, %v4475_v59  ;;  %v4499_v55 = vand.u32 2147483648, %v11356_v36 }
 0xa0a   :  { %v11372_v58 = vpop.eup %6923  ;;  %v11420_v16 = vadd.f32 %v11365_v47, %v4416_v18 }
 0xa0b   :  { %v11374_v5 = vpop.eup %6925  ;;  %v4534_v9 = vmul.f32 %v11372_v58, %v11352_v2  ;;  %vm4539_vm4 = vweird.f32 %v11372_v58 }
 0xa0c   :  { %v6928_v26 = vpop.eup %6927  ;;  %v4429_v10 = vmul.f32 %v11374_v5, %v11346_v57  ;;  %vm4434_vm13 = vweird.f32 %v11374_v5  ;;  %vm11466_vm2 = vmor %vm4538_vm1, %vm4539_vm4 }
 0xa0d   :  { %v11382_v34 = vpop.eup %6929  ;;  %v11386_v39 = vadd.f32 1.0, %v6928_v26  ;;  %v4535_v0 = vsub.f32 1.0, %v4534_v9  ;;  %v4477_v26 = vadd.f32 %v11369_v25, %v4476_v51  ;;  %v4557_v51 = vand.u32 2147483647, %v11363_v28 }
 0xa0e   :  { %v11388_v30 = vpop.eup %6931  ;;  %v4430_v50 = vsub.f32 1.0, %v4429_v10  ;;  %v4489_v38 = vmul.f32 %v11382_v34, %v11356_v36  ;;  %vm4494_vm9 = vweird.f32 %v11382_v34  ;;  %v4545_v10 = vor.u32 1.1754944e-38, %v4544_v49 }
 0xa0f   :  { %v6934_v24 = vpop.eup %6933  ;;  %6935 = vrcp.f32 %v11386_v39  ;;  %v4549_v17 = vmul.f32 %v11388_v30, %v11363_v28  ;;  %v4536_v19 = vmul.f32 %v11372_v58, %v4535_v0  ;;  %v4481_v1 = vsel %vm11453_vm8, %v11369_v25, %v4477_v26  ;;  %vm11483_vm8 = vmor %vm4418_vm14, %vm4419_vm7 }
 0xa10   :  { %v11399_v33 = vadd.f32 1.0, %v6934_v24  ;;  %v4431_v63 = vmul.f32 %v11374_v5, %v4430_v50  ;;  %v4490_v12 = vsub.f32 1.0, %v4489_v38  ;;  %v4604_v50 = vand.u32 2147483648, %v11386_v39  ;;  %vm11507_vm14 = vmor %vm4493_vm6, %vm4494_vm9 }
 0xa11   :  { %v4550_v44 = vsub.f32 1.0, %v4549_v17  ;;  %v4537_v29 = vadd.f32 %v11372_v58, %v4536_v19  ;;  %v4602_v17 = vand.u32 2147483647, %v11386_v39  ;;  %vm4554_vm12 = vweird.f32 %v11388_v30 }
 0xa12   :  { %6937 = vrcp.f32 %v11399_v33  ;;  %v4491_v0 = vmul.f32 %v11382_v34, %v4490_v12  ;;  %vm4598_vm10 = vweird.f32 %v11386_v39  ;;  %v4619_v26 = vand.u32 2147483648, %v11399_v33  ;;  %vm11499_vm7 = vmor %vm4553_vm11, %vm4554_vm12 }
 0xa13   :  { %v4551_v24 = vmul.f32 %v11388_v30, %v4550_v44  ;;  %v4541_v19 = vsel %vm11466_vm2, %v11372_v58, %v4537_v29  ;;  %vm4603_vm4 = vcmp.eq.f32.partialorder %v4602_v17, 8.507059e+37  ;;  %v4486_v9 = vsel %vm11433_vm15, %v11412_v61, %v4481_v1 }
 0xa14   :  { %v4492_v2 = vadd.f32 %v11382_v34, %v4491_v0  ;;  %v4432_v0 = vadd.f32 %v11374_v5, %v4431_v63  ;;  %v4546_v17 = vsel %vm11428_vm5, %v4545_v10, %v4541_v19  ;;  %vm4613_vm5 = vweird.f32 %v11399_v33 }
 0xa15   :  { %v6936_v14 = vpop.eup %6935  ;;  %v4552_v25 = vadd.f32 %v11388_v30, %v4551_v24  ;;  %v4617_v24 = vand.u32 2147483647, %v11399_v33  ;;  %vm4558_vm11 = vcmp.eq.f32.partialorder %v4557_v51, 8.507059e+37  ;;  %v4560_v10 = vor.u32 1.1754944e-38, %v4559_v45 }
 0xa16   :  { %v4594_v20 = vmul.f32 %v6936_v14, %v11386_v39  ;;  %vm4599_vm3 = vweird.f32 %v6936_v14  ;;  %v4496_v18 = vsel %vm11507_vm14, %v11382_v34, %v4492_v2  ;;  %vm13460_vm15 = vweird.f32 %v11346_v57 }
 0xa17   :  { %vm4600_vm1 = vmor %vm4598_vm10, %vm4599_vm3  ;;  %v4556_v63 = vsel %vm11499_vm7, %v11388_v30, %v4552_v25  ;;  %v4661_v30 = vmul.f32 %v4546_v17, %v11335_v6  ;;  %vm4618_vm9 = vcmp.eq.f32.partialorder %v4617_v24, 8.507059e+37  ;;  %v4500_v34 = vor.u32 1.1754944e-38, %v4499_v55 }
 0xa18   :  { %v4595_v59 = vsub.f32 1.0, %v4594_v20  ;;  %v6938_v15 = vpop.eup %6937  ;;  %v4605_v20 = vor.u32 1.1754944e-38, %v4604_v50  ;;  %v4620_v50 = vor.u32 1.1754944e-38, %v4619_v26  ;;  %vm11531_vm3 = vmor %vm13460_vm15, %vm4434_vm13  ;;  %v4561_v61 = vsel %vm4558_vm11, %v4560_v10, %v4556_v63 }
 0xa19   :  { %v4609_v49 = vmul.f32 %v6938_v15, %v11399_v33  ;;  %vm4614_vm2 = vweird.f32 %v6938_v15  ;;  %v4436_v60 = vsel %vm11531_vm3, %v11374_v5, %v4432_v0  ;;  %v4440_v38 = vor.u32 1.1754944e-38, %v4439_v3 }
 0xa1a   :  { %v4596_v22 = vmul.f32 %v6936_v14, %v4595_v59  ;;  %v4421_v59 = vsel %vm11483_vm8, %v11365_v47, %v11420_v16  ;;  %vm4615_vm6 = vmor %vm4613_vm5, %vm4614_vm2  ;;  %vm4438_vm13 = vcmp.eq.f32.partialorder %v4437_v13, 8.507059e+37  ;;  %vm13463_vm12 = vcmask 261120  }
 0xa1b   :  { %v4610_v12 = vsub.f32 1.0, %v4609_v49  ;;  %v4662_v49 = vmul.f32 %v4561_v61, %v11338_v11  ;;  %vm13464_vm10 = vmmov %vm13463_vm12 }
 0xa1c   :  { %v4597_v44 = vadd.f32 %v6936_v14, %v4596_v22 }
 0xa1d   :  { %v4611_v29 = vmul.f32 %v6938_v15, %v4610_v12 }
 0xa1e   :  { %v4601_v58 = vsel %vm4600_vm1, %v6936_v14, %v4597_v44 }
 0xa1f   :  { %v4606_v14 = vsel %vm4603_vm4, %v4605_v20, %v4601_v58  ;;  %v4612_v28 = vadd.f32 %v6938_v15, %v4611_v29 }
 0xa20   :  { %v4665_v16 = vmul.f32 %v4606_v14, %v11349_v31  ;;  %v4426_v31 = vsel %vm11444_vm0, %v11402_v56, %v4421_v59  ;;  %vm4498_vm0 = vcmp.eq.f32.partialorder %v4497_v42, 8.507059e+37 }
 0xa21   :  { %v4616_v22 = vsel %vm4615_vm6, %v6938_v15, %v4612_v28  ;;  %v4657_v15 = vmul.f32 %v4486_v9, %v11320_v21  ;;  %v4501_v51 = vsel %vm4498_vm0, %v4500_v34, %v4496_v18  ;;  %v4653_v55 = vmul.f32 %v4426_v31, %v11317_v53 }
 0xa22   :  { %4681 = vmatpush.msrb.mxu0 %v4665_v16  ;;  %v4621_v6 = vsel %vm4618_vm9, %v4620_v50, %v4616_v22  ;;  %v4441_v21 = vsel %vm4438_vm13, %v4440_v38, %v4436_v60  ;;  %v4658_v36 = vmul.f32 %v4501_v51, %v11328_v7 }
 0xa23   :  { %v4666_v56 = vmul.f32 %v4621_v6, %v11360_v62  ;;  %v4654_v62 = vmul.f32 %v4441_v21, %v11323_v8 }
 0xa24   :  { %4682 = vmatpush.msrb.mxu0 %v4661_v30 }
 0xa25   :  { %4701 = vmatpush.msrb.mxu1 %v4666_v56 }
 0xa26   :  { %4683 = vmatpush.msrb.mxu0 %v4657_v15 }
 0xa27   :  { %4702 = vmatpush.msrb.mxu1 %v4662_v49 }
 0xa28   :  { %4684 = vmatpush.msrb.mxu0 %v4653_v55 }
 0xa29   :  { %6345 = vmatmul.msk.f32.vlgmr.msrb.gmra.mxu0 %vm13463_vm12, %v10988_v41  ;;  %4703 = vmatpush.msrb.mxu1 %v4658_v36 }
 0xa2b   :  { %4704 = vmatpush.msrb.mxu1 %v4654_v62 }
 0xa2c   :  { %6346 = vmatmul.msk.f32.vlgmr.msrb.gmra.mxu1 %vm13464_vm10, %v10988_v41 }
 0xa49   :  { %v4308_v53 = vpop.f32.mrf.mxu2  ;;  %v4337_v57 = vpop.f32.mrf.mxu3 }
 0xa4a   :  { %v11557_v11 = vadd.f32 %v4308_v53, %v11312_v40  ;;  %v11563_v3 = vadd.f32 %v4337_v57, %v11312_v40 }
 0xa4c   :  { %v6331_v8 = vmul.f32 -1.442695, %v11557_v11  ;;  %v6332_v41 = vmul.f32 -1.442695, %v11563_v3 }
 0xa4e   :  { %6939 = vpow2.f32 %v6331_v8 }
 0xa51   :  { %v4311_v5 = vpop.f32.mrf.mxu2  ;;  %v4340_v13 = vpop.f32.mrf.mxu3 }
 0xa52   :  { %v11560_v7 = vadd.f32 %v4311_v5, %v11314_v27  ;;  %v11568_v1 = vadd.f32 %v4340_v13, %v11314_v27 }
 0xa54   :  { %v6335_v42 = vmul.f32 -1.442695, %v11560_v7  ;;  %v6336_v54 = vmul.f32 -1.442695, %v11568_v1  ;;  %v6940_v12 = vpop.eup %6939 }
 0xa55   :  { %v11580_v26 = vadd.f32 1.0, %v6940_v12 }
 0xa56   :  { %6941 = vpow2.f32 %v6335_v42 }
 0xa57   :  { %6943 = vpow2.f32 %v6332_v41  ;;  %v4454_v15 = vand.u32 2147483648, %v11580_v26  ;;  %v4452_v51 = vand.u32 2147483647, %v11580_v26  ;;  %vm4448_vm8 = vweird.f32 %v11580_v26 }
 0xa58   :  { %6945 = vpow2.f32 %v6336_v54 }
 0xa59   :  { %v4314_v45 = vpop.f32.mrf.mxu2  ;;  %v4343_v19 = vpop.f32.mrf.mxu3  ;;  %v11640_v13 = vor.u32 1.1754944e-38, %v4454_v15  ;;  %vm11682_vm0 = vcmp.eq.f32.partialorder %v4452_v51, 8.507059e+37 }
 0xa5a   :  { %v11573_v25 = vadd.f32 %v4314_v45, %v11331_v32  ;;  %v11576_v40 = vadd.f32 %v4343_v19, %v11331_v32 }
 0xa5c   :  { %v6339_v44 = vmul.f32 -1.442695, %v11573_v25  ;;  %v6340_v27 = vmul.f32 -1.442695, %v11576_v40  ;;  %v6942_v2 = vpop.eup %6941 }
 0xa5d   :  { %v6944_v20 = vpop.eup %6943  ;;  %v11582_v58 = vadd.f32 1.0, %v6942_v2 }
 0xa5e   :  { %6947 = vpow2.f32 %v6339_v44  ;;  %v6946_v29 = vpop.eup %6945  ;;  %v11584_v32 = vadd.f32 1.0, %v6944_v20 }
 0xa5f   :  { %6949 = vpow2.f32 %v6340_v27  ;;  %v11594_v47 = vadd.f32 1.0, %v6946_v29  ;;  %v4514_v55 = vand.u32 2147483648, %v11582_v58  ;;  %vm4508_vm1 = vweird.f32 %v11582_v58 }
 0xa60   :  { %6951 = vrcp.f32 %v11580_v26  ;;  %v4467_v62 = vand.u32 2147483647, %v11584_v32  ;;  %v4469_v8 = vand.u32 2147483648, %v11584_v32  ;;  %v4512_v45 = vand.u32 2147483647, %v11582_v58 }
 0xa61   :  { %v4317_v39 = vpop.f32.mrf.mxu2  ;;  %v4346_v0 = vpop.f32.mrf.mxu3  ;;  %6953 = vrcp.f32 %v11582_v58  ;;  %v11650_v19 = vor.u32 1.1754944e-38, %v4514_v55  ;;  %v4529_v29 = vand.u32 2147483648, %v11594_v47  ;;  %vm4523_vm14 = vweird.f32 %v11594_v47 }
 0xa62   :  { %v11587_v59 = vadd.f32 %v4317_v39, %v11310_v52  ;;  %v11598_v63 = vadd.f32 %v4346_v0, %v11310_v52  ;;  %v4527_v39 = vand.u32 2147483647, %v11594_v47  ;;  %vm11671_vm9 = vcmp.eq.f32.partialorder %v4512_v45, 8.507059e+37 }
 0xa64   :  { %v6948_v24 = vpop.eup %6947  ;;  %v6343_v23 = vmul.f32 -1.442695, %v11587_v59  ;;  %v6344_v9 = vmul.f32 -1.442695, %v11598_v63 }
 0xa65   :  { %v11590_v17 = vadd.f32 1.0, %v6948_v24  ;;  %v6950_v14 = vpop.eup %6949 }
 0xa66   :  { %v11601_v16 = vadd.f32 1.0, %v6950_v14  ;;  %v11603_v28 = vpop.eup %6951 }
 0xa67   :  { %6955 = vrcp.f32 %v11590_v17  ;;  %v11607_v10 = vpop.eup %6953  ;;  %v4444_v18 = vmul.f32 %v11603_v28, %v11580_v26  ;;  %vm4449_vm4 = vweird.f32 %v11603_v28  ;;  %v4572_v41 = vand.u32 2147483647, %v11590_v17 }
 0xa68   :  { %6957 = vrcp.f32 %v11584_v32  ;;  %v4504_v30 = vmul.f32 %v11607_v10, %v11582_v58  ;;  %v4574_v54 = vand.u32 2147483648, %v11590_v17  ;;  %vm4509_vm2 = vweird.f32 %v11607_v10 }
 0xa69   :  { %6959 = vpow2.f32 %v6343_v23  ;;  %v4445_v60 = vsub.f32 1.0, %v4444_v18  ;;  %vm4568_vm7 = vweird.f32 %v11590_v17  ;;  %vm11666_vm11 = vcmp.eq.f32.partialorder %v4572_v41, 8.507059e+37  ;;  %vm11691_vm12 = vmor %vm4508_vm1, %vm4509_vm2 }
 0xa6a   :  { %6961 = vrcp.f32 %v11594_v47  ;;  %v4505_v38 = vsub.f32 1.0, %v4504_v30  ;;  %vm4583_vm3 = vweird.f32 %v11601_v16 }
 0xa6b   :  { %6963 = vrcp.f32 %v11601_v16  ;;  %v4446_v5 = vmul.f32 %v11603_v28, %v4445_v60 }
 0xa6c   :  { %6965 = vpow2.f32 %v6344_v9  ;;  %v4506_v42 = vmul.f32 %v11607_v10, %v4505_v38  ;;  %v4575_v9 = vor.u32 1.1754944e-38, %v4574_v54  ;;  %v4775_v38 = vstv %s11801_s8 }
 0xa6d   :  { %v11610_v50 = vpop.eup %6955  ;;  %v11658_v24 = vadd.f32 %v11603_v28, %v4446_v5 }
 0xa6e   :  { %v11612_v52 = vpop.eup %6957  ;;  %v4564_v31 = vmul.f32 %v11610_v50, %v11590_v17  ;;  %v4507_v23 = vadd.f32 %v11607_v10, %v4506_v42  ;;  %vm4569_vm15 = vweird.f32 %v11610_v50 }
 0xa6f   :  { %v6960_v22 = vpop.eup %6959  ;;  %v4459_v34 = vmul.f32 %v11612_v52, %v11584_v32  ;;  %vm4464_vm6 = vweird.f32 %v11612_v52  ;;  %vm11704_vm13 = vmor %vm4568_vm7, %vm4569_vm15 }
 0xa70   :  { %v11620_v33 = vpop.eup %6961  ;;  %v11624_v61 = vadd.f32 1.0, %v6960_v22  ;;  %v4565_v49 = vsub.f32 1.0, %v4564_v31  ;;  %v4511_v51 = vsel %vm11691_vm12, %v11607_v10, %v4507_v23  ;;  %vm11721_vm12 = vmor %vm4448_vm8, %vm4449_vm4 }
 0xa71   :  { %v11626_v6 = vpop.eup %6963  ;;  %v4460_v36 = vsub.f32 1.0, %v4459_v34  ;;  %v4519_v53 = vmul.f32 %v11620_v33, %v11594_v47  ;;  %vm4524_vm5 = vweird.f32 %v11620_v33  ;;  %v4516_v14 = vsel %vm11671_vm9, %v11650_v19, %v4511_v51 }
 0xa72   :  { %v6966_v56 = vpop.eup %6965  ;;  %6967 = vrcp.f32 %v11624_v61  ;;  %v4579_v21 = vmul.f32 %v11626_v6, %v11601_v16  ;;  %v4566_v44 = vmul.f32 %v11610_v50, %v4565_v49  ;;  %v4632_v15 = vand.u32 2147483647, %v11624_v61  ;;  %vm11745_vm8 = vmor %vm4523_vm14, %vm4524_vm5 }
 0xa73   :  { %v11637_v57 = vadd.f32 1.0, %v6966_v56  ;;  %v4461_v2 = vmul.f32 %v11612_v52, %v4460_v36  ;;  %v4520_v20 = vsub.f32 1.0, %v4519_v53  ;;  %v4634_v56 = vand.u32 2147483648, %v11624_v61 }
 0xa74   :  { %v4580_v27 = vsub.f32 1.0, %v4579_v21  ;;  %v4567_v30 = vadd.f32 %v11610_v50, %v4566_v44  ;;  %v4587_v49 = vand.u32 2147483647, %v11601_v16  ;;  %vm4584_vm1 = vweird.f32 %v11626_v6 }
 0xa75   :  { %6969 = vrcp.f32 %v11637_v57  ;;  %v4521_v60 = vmul.f32 %v11620_v33, %v4520_v20  ;;  %v4589_v53 = vand.u32 2147483648, %v11601_v16  ;;  %vm4628_vm2 = vweird.f32 %v11624_v61  ;;  %vm11737_vm4 = vmor %vm4583_vm3, %vm4584_vm1 }
 0xa76   :  { %v4581_v22 = vmul.f32 %v11626_v6, %v4580_v27  ;;  %v4571_v5 = vsel %vm11704_vm13, %v11610_v50, %v4567_v30  ;;  %vm4633_vm15 = vcmp.eq.f32.partialorder %v4632_v15, 8.507059e+37  ;;  %v4635_v54 = vor.u32 1.1754944e-38, %v4634_v56 }
 0xa77   :  { %v4522_v17 = vadd.f32 %v11620_v33, %v4521_v60  ;;  %v4649_v45 = vand.u32 2147483648, %v11637_v57  ;;  %v4647_v27 = vand.u32 2147483647, %v11637_v57  ;;  %v4451_v20 = vsel %vm11721_vm12, %v11603_v28, %v11658_v24 }
 0xa78   :  { %v6968_v12 = vpop.eup %6967  ;;  %v4582_v10 = vadd.f32 %v11626_v6, %v4581_v22  ;;  %v4576_v23 = vsel %vm11666_vm11, %v4575_v9, %v4571_v5  ;;  %vm4643_vm11 = vweird.f32 %v11637_v57  ;;  %vm4588_vm3 = vcmp.eq.f32.partialorder %v4587_v49, 8.507059e+37 }
 0xa79   :  { %v4624_v0 = vmul.f32 %v6968_v12, %v11624_v61  ;;  %vm4629_vm10 = vweird.f32 %v6968_v12  ;;  %v4590_v9 = vor.u32 1.1754944e-38, %v4589_v53  ;;  %v4650_v30 = vor.u32 1.1754944e-38, %v4649_v45  ;;  %v6353_v61 = vld [vmem:[%s12930_s6 + $0x78] sm:$0xff] }
 0xa7a   :  { %vm4630_vm7 = vmor %vm4628_vm2, %vm4629_vm10  ;;  %v4526_v22 = vsel %vm11745_vm8, %v11620_v33, %v4522_v17  ;;  %vm4648_vm5 = vcmp.eq.f32.partialorder %v4647_v27, 8.507059e+37  ;;  %vm13481_vm9 = vweird.f32 %v11584_v32  ;;  %v4530_v33 = vor.u32 1.1754944e-38, %v4529_v29 }
 0xa7b   :  { %v4625_v31 = vsub.f32 1.0, %v4624_v0  ;;  %v6970_v34 = vpop.eup %6969  ;;  %v4462_v0 = vadd.f32 %v11612_v52, %v4461_v2  ;;  %v4586_v2 = vsel %vm11737_vm4, %v11626_v6, %v4582_v10  ;;  %v4663_v6 = vmul.f32 %v4576_v23, %v11573_v25  ;;  %vm11769_vm10 = vmor %vm13481_vm9, %vm4464_vm6 }
 0xa7c   :  { %v4639_v36 = vmul.f32 %v6970_v34, %v11637_v57  ;;  %vm4644_vm13 = vweird.f32 %v6970_v34  ;;  %v4591_v19 = vsel %vm4588_vm3, %v4590_v9, %v4586_v2  ;;  %v4470_v60 = vor.u32 1.1754944e-38, %v4469_v8  ;;  %v11887_v57 = vpop.permute.xlu1 %4797 }
 0xa7d   :  { %v4626_v21 = vmul.f32 %v6968_v12, %v4625_v31  ;;  %vm4645_vm14 = vmor %vm4643_vm11, %vm4644_vm13  ;;  %v4466_v18 = vsel %vm11769_vm10, %v11612_v52, %v4462_v0  ;;  %vm4468_vm6 = vcmp.eq.f32.partialorder %v4467_v62, 8.507059e+37  ;;  %v4664_v56 = vmul.f32 %v4591_v19, %v11576_v40 }
 0xa7e   :  { %v4640_v41 = vsub.f32 1.0, %v4639_v36  ;;  %vm13484_vm1 = vcmask 261120   ;;  %v4755_v40 = vstv %s6350_s29  ;;  %vm13489_vm13 = vcmask 31744  }
 0xa7f   :  { %v4627_v42 = vadd.f32 %v6968_v12, %v4626_v21  ;;  %vm13485_vm2 = vmmov %vm13484_vm1 }
 0xa80   :  { %v4641_v44 = vmul.f32 %v6970_v34, %v4640_v41  ;;  %vm13490_vm4 = vmmov %vm13489_vm13 }
 0xa81   :  { %v4631_v50 = vsel %vm4630_vm7, %v6968_v12, %v4627_v42  ;;  %vm13486_vm7 = vcmask 1043456   ;;  %vm13491_vm8 = vmmov %vm13490_vm4 }
 0xa82   :  { %v4636_v12 = vsel %vm4633_vm15, %v4635_v54, %v4631_v50  ;;  %v4642_v16 = vadd.f32 %v6970_v34, %v4641_v44  ;;  %vm13487_vm15 = vmmov %vm13486_vm7 }
 0xa83   :  { %v4667_v24 = vmul.f32 %v4636_v12, %v11587_v59  ;;  %v4456_v59 = vsel %vm11682_vm0, %v11640_v13, %v4451_v20  ;;  %vm4528_vm0 = vcmp.eq.f32.partialorder %v4527_v39, 8.507059e+37  ;;  %v6352_v39 = vld [vmem:[%s12930_s6 + $0x70] sm:$0xff]  ;;  %vm13488_vm12 = vmmov %vm13486_vm7  ;;  %v4777_v20 = vmul.f32 %v6353_v61, %v4775_v38 }
 0xa84   :  { %v4646_v31 = vsel %vm4645_vm14, %v6970_v34, %v4642_v16  ;;  %v4659_v34 = vmul.f32 %v4516_v14, %v11560_v7  ;;  %v4531_v15 = vsel %vm4528_vm0, %v4530_v33, %v4526_v22  ;;  %v4655_v29 = vmul.f32 %v4456_v59, %v11557_v11  ;;  %vm13492_vm11 = vmmov %vm13490_vm4 }
 0xa85   :  { %4721 = vmatpush.msrb.mxu2 %v4667_v24  ;;  %v4651_v25 = vsel %vm4648_vm5, %v4650_v30, %v4646_v31  ;;  %v4471_v7 = vsel %vm4468_vm6, %v4470_v60, %v4466_v18  ;;  %v4660_v47 = vmul.f32 %v4531_v15, %v11568_v1  ;;  %v4776_v36 = vmul.f32 %v6352_v39, %v4775_v38  ;;  %vm13493_vm3 = vmmov %vm13490_vm4 }
 0xa86   :  { %v4668_v13 = vmul.f32 %v4651_v25, %v11598_v63  ;;  %v11792_v63 = vld [vmem:[%s12928_s4] sm:$0xf]  ;;  %v4656_v11 = vmul.f32 %v4471_v7, %v11563_v3  ;;  %v4752_v3 = vstv %s11799_s30  ;;  %vm13494_vm14 = vmmov %vm13493_vm3 }
 0xa87   :  { %4722 = vmatpush.msrb.mxu2 %v4663_v6  ;;  %v4753_v21 = vmul.f32 %v4752_v3, %v11246_v43  ;;  %v11832_v43 = vld [vmem:[%s12926_s2 + $0x18] sm:$0xff]  ;;  %vm13495_vm5 = vmmov %vm13493_vm3  ;;  %v4754_v27 = vmul.f32 %v4752_v3, %v11289_v46  ;;  %v11858_v46 = vpop.permute.xlu0 %4802 }
 0xa88   :  { %4741 = vmatpush.msrb.mxu3 %v4668_v13  ;;  %vm13496_vm9 = vmmov %vm13493_vm3 }
 0xa89   :  { %4723 = vmatpush.msrb.mxu2 %v4659_v34  ;;  %vm13497_vm10 = vmmov %vm13486_vm7 }
 0xa8a   :  { %4742 = vmatpush.msrb.mxu3 %v4664_v56  ;;  %vm13498_vm0 = vmmov %vm13486_vm7 }
 0xa8b   :  { %4724 = vmatpush.msrb.mxu2 %v4655_v29  ;;  %vm13499_vm6 = vmmov %vm13498_vm0 }
 0xa8c   :  { %6347 = vmatmul.msk.f32.vlgmr.msrb.gmra.mxu2 %vm13484_vm1, %v11792_v63  ;;  %4743 = vmatpush.msrb.mxu3 %v4660_v47  ;;  %vm13500_vm1 = vmmov %vm13493_vm3 }
 0xa8e   :  { %4744 = vmatpush.msrb.mxu3 %v4656_v11 }
 0xa8f   :  { %6348 = vmatmul.msk.f32.vlgmr.msrb.gmra.mxu3 %vm13485_vm2, %v11792_v63  ;;  %vm13501_vm2 = vmmov %vm13500_vm1  ;;  %v11864_v16 = vpop.permute.xlu0 %4787 }
 0xaa6   :  { %v4686_v1 = vpop.f32.mrf.mxu0 }
 0xaa7   :  { %v4687_v52 = vadd.f32 %v4686_v1, %v7811_v48 }
 0xaa9   :  { %v4706_v32 = vpop.f32.mrf.mxu1  ;;  %v4756_v55 = vmul.f32 %v4755_v40, %v4687_v52 }
 0xaaa   :  { %v4707_v62 = vadd.f32 %v4706_v32, %v7811_v48 }
 0xaac   :  { %v4757_v8 = vmul.f32 %v4755_v40, %v4707_v62 }
 0xaae   :  { %v4764_v49 = vrot.slane %v4757_v8, 4 }
 0xab0   :  { %v4766_v51 = vsel %vm13486_vm7, %v4756_v55, %v4764_v49  ;;  %vm13502_vm7 = vmmov %vm13500_vm1 }
 0xab1   :  { %v4770_v58 = vadd.f32 %v4766_v51, %v4753_v21 }
 0xab3   :  { %v11812_v53 = vadd.f32 %v4776_v36, %v4770_v58 }
 0xab5   :  { %4807 = vst [vmem:[#allocation1] ss:$2 sm:$0xff] %v11812_v53 }
 0xabc   :  { %v4810_v5 = vld.sshfl [vmem:[#allocation1] sm:$0xff pattern:$0x75316420]  ;;  %v4811_v10 = vld.sshfl [vmem:[#allocation1 + $0x8] sm:$0xff pattern:$0x75316420] }
 0xabd   :  { %6358 = vmatpush.msk.msra.mxu0 %vm13487_vm15, %v4810_v5  ;;  %6363 = vmatpush.msk.msra.mxu1 %vm13488_vm12, %v4811_v10  ;;  %vm13503_vm15 = vmmov %vm13500_vm1 }
 0xabe   :  { %6359 = vmatmul.msk.f32.vlgmr.msra.gmra.mxu0 %vm13489_vm13, %v11254_v35  ;;  %6364 = vmatmul.msk.f32.vlgmr.msra.gmra.mxu1 %vm13490_vm4, %v11254_v35  ;;  %vm13504_vm12 = vmmov %vm13500_vm1 }
 0xabf   :  { %vm13505_vm13 = vmmov %vm13500_vm1 }
 0xac0   :  { %vm13506_vm4 = vmmov %vm13500_vm1 }
 0xac6   :  { %6360 = vmatmul.msk.f32.gmra.mxu0 %vm13491_vm8, %v11263_v37  ;;  %6365 = vmatmul.msk.f32.gmra.mxu1 %vm13492_vm11, %v11263_v37  ;;  %vm13507_vm8 = vmmov %vm13500_vm1 }
 0xace   :  { %6361 = vmatmul.msk.f32.gmra.mxu0 %vm13493_vm3, %v11272_v4  ;;  %6366 = vmatmul.msk.f32.gmra.mxu1 %vm13494_vm14, %v11272_v4 }
 0xad6   :  { %6362 = vmatmul.msk.f32.gmra.mxu0 %vm13495_vm5, %v11832_v43  ;;  %6367 = vmatmul.msk.f32.gmra.mxu1 %vm13496_vm9, %v11832_v43 }
 0xb0f   :  { %v4726_v42 = vpop.f32.mrf.mxu2 }
 0xb10   :  { %v4727_v17 = vadd.f32 %v4726_v42, %v7811_v48 }
 0xb12   :  { %v4746_v41 = vpop.f32.mrf.mxu3  ;;  %v4758_v50 = vmul.f32 %v4755_v40, %v4727_v17 }
 0xb13   :  { %v4747_v54 = vadd.f32 %v4746_v41, %v7811_v48 }
 0xb15   :  { %v4759_v45 = vmul.f32 %v4755_v40, %v4747_v54 }
 0xb17   :  { %v4765_v44 = vrot.slane %v4759_v45, 4 }
 0xb19   :  { %v4767_v0 = vsel %vm13497_vm10, %v4758_v50, %v4765_v44 }
 0xb1a   :  { %v4771_v23 = vadd.f32 %v4767_v0, %v4754_v27 }
 0xb1c   :  { %v11845_v26 = vadd.f32 %v4777_v20, %v4771_v23 }
 0xb1e   :  { %4809 = vst [vmem:[#allocation1 + $0x10] ss:$2 sm:$0xff] %v11845_v26 }
 0xb25   :  { %v4812_v12 = vld.sshfl [vmem:[#allocation1 + $0x10] sm:$0xff pattern:$0x75316420]  ;;  %v4813_v28 = vld.sshfl [vmem:[#allocation1 + $0x18] sm:$0xff pattern:$0x75316420] }
 0xb26   :  { %6368 = vmatpush.msk.msra.mxu2 %vm13498_vm0, %v4812_v12  ;;  %6373 = vmatpush.msk.msra.mxu3 %vm13499_vm6, %v4813_v28 }
 0xb27   :  { %6369 = vmatmul.msk.f32.vlgmr.msra.gmra.mxu2 %vm13500_vm1, %v11254_v35  ;;  %6374 = vmatmul.msk.f32.vlgmr.msra.gmra.mxu3 %vm13501_vm2, %v11254_v35  ;;  %v11870_v35 = vpop.permute.xlu2 %4792 }
 0xb2f   :  { %6370 = vmatmul.msk.f32.gmra.mxu2 %vm13502_vm7, %v11263_v37  ;;  %6375 = vmatmul.msk.f32.gmra.mxu3 %vm13503_vm15, %v11263_v37 }
 0xb37   :  { %6371 = vmatmul.msk.f32.gmra.mxu2 %vm13504_vm12, %v11272_v4  ;;  %6376 = vmatmul.msk.f32.gmra.mxu3 %vm13505_vm13, %v11272_v4 }
 0xb3b   :  { %v4839_v2 = vpop.f32.mrf.mxu0  ;;  %v4868_v24 = vpop.f32.mrf.mxu1 }
 0xb3c   :  { %v11873_v37 = vadd.f32 %v4839_v2, %v11864_v16  ;;  %v11879_v4 = vadd.f32 %v4868_v24, %v11864_v16 }
 0xb3e   :  { %v6378_v22 = vmul.f32 -1.442695, %v11873_v37  ;;  %v6379_v59 = vmul.f32 -1.442695, %v11879_v4 }
 0xb3f   :  { %6372 = vmatmul.msk.f32.gmra.mxu2 %vm13506_vm4, %v11832_v43  ;;  %6377 = vmatmul.msk.f32.gmra.mxu3 %vm13507_vm8, %v11832_v43 }
 0xb40   :  { %6971 = vpow2.f32 %v6378_v22 }
 0xb43   :  { %v4842_v14 = vpop.f32.mrf.mxu0  ;;  %v4871_v9 = vpop.f32.mrf.mxu1 }
 0xb44   :  { %v11876_v30 = vadd.f32 %v4842_v14, %v11870_v35  ;;  %v11884_v31 = vadd.f32 %v4871_v9, %v11870_v35 }
 0xb46   :  { %v6382_v6 = vmul.f32 -1.442695, %v11876_v30  ;;  %v6383_v33 = vmul.f32 -1.442695, %v11884_v31  ;;  %v6972_v15 = vpop.eup %6971 }
 0xb47   :  { %v11898_v7 = vadd.f32 1.0, %v6972_v15 }
 0xb48   :  { %6973 = vpow2.f32 %v6382_v6 }
 0xb49   :  { %6975 = vpow2.f32 %v6379_v59  ;;  %v5013_v27 = vand.u32 2147483648, %v11898_v7  ;;  %v5011_v23 = vand.u32 2147483647, %v11898_v7  ;;  %vm5007_vm14 = vweird.f32 %v11898_v7 }
 0xb4a   :  { %6977 = vpow2.f32 %v6383_v33 }
 0xb4b   :  { %v4845_v19 = vpop.f32.mrf.mxu0  ;;  %v4874_v25 = vpop.f32.mrf.mxu1  ;;  %v11958_v59 = vor.u32 1.1754944e-38, %v5013_v27  ;;  %vm12000_vm12 = vcmp.eq.f32.partialorder %v5011_v23, 8.507059e+37 }
 0xb4c   :  { %v11891_v18 = vadd.f32 %v4845_v19, %v11887_v57  ;;  %v11894_v34 = vadd.f32 %v4874_v25, %v11887_v57 }
 0xb4e   :  { %v6386_v13 = vmul.f32 -1.442695, %v11891_v18  ;;  %v6387_v60 = vmul.f32 -1.442695, %v11894_v34  ;;  %v6974_v29 = vpop.eup %6973 }
 0xb4f   :  { %v6976_v56 = vpop.eup %6975  ;;  %v11900_v11 = vadd.f32 1.0, %v6974_v29 }
 0xb50   :  { %6979 = vpow2.f32 %v6386_v13  ;;  %v6978_v1 = vpop.eup %6977  ;;  %v11902_v32 = vadd.f32 1.0, %v6976_v56 }
 0xb51   :  { %6981 = vpow2.f32 %v6387_v60  ;;  %v11912_v38 = vadd.f32 1.0, %v6978_v1  ;;  %v5073_v12 = vand.u32 2147483648, %v11900_v11  ;;  %vm5067_vm11 = vweird.f32 %v11900_v11 }
 0xb52   :  { %6983 = vrcp.f32 %v11898_v7  ;;  %v5026_v14 = vand.u32 2147483647, %v11902_v32  ;;  %v5028_v33 = vand.u32 2147483648, %v11902_v32  ;;  %v5071_v60 = vand.u32 2147483647, %v11900_v11 }
 0xb53   :  { %v4848_v47 = vpop.f32.mrf.mxu0  ;;  %v4877_v62 = vpop.f32.mrf.mxu1  ;;  %6985 = vrcp.f32 %v11900_v11  ;;  %v11968_v15 = vor.u32 1.1754944e-38, %v5073_v12  ;;  %vm5082_vm10 = vweird.f32 %v11912_v38 }
 0xb54   :  { %v11905_v52 = vadd.f32 %v4848_v47, %v11858_v46  ;;  %v11916_v55 = vadd.f32 %v4877_v62, %v11858_v46  ;;  %v5086_v62 = vand.u32 2147483647, %v11912_v38  ;;  %vm11989_vm2 = vcmp.eq.f32.partialorder %v5071_v60, 8.507059e+37 }
 0xb56   :  { %v6980_v40 = vpop.eup %6979  ;;  %v6390_v8 = vmul.f32 -1.442695, %v11905_v52  ;;  %v6391_v36 = vmul.f32 -1.442695, %v11916_v55 }
 0xb57   :  { %v11908_v3 = vadd.f32 1.0, %v6980_v40  ;;  %v6982_v39 = vpop.eup %6981 }
 0xb58   :  { %v11919_v49 = vadd.f32 1.0, %v6982_v39  ;;  %v11921_v21 = vpop.eup %6983 }
 0xb59   :  { %6987 = vrcp.f32 %v11908_v3  ;;  %v11925_v51 = vpop.eup %6985  ;;  %v5003_v10 = vmul.f32 %v11921_v21, %v11898_v7  ;;  %vm5008_vm3 = vweird.f32 %v11921_v21  ;;  %v5131_v25 = vand.u32 2147483647, %v11908_v3 }
 0xb5a   :  { %6989 = vrcp.f32 %v11902_v32  ;;  %v5063_v42 = vmul.f32 %v11925_v51, %v11900_v11  ;;  %v5133_v13 = vand.u32 2147483648, %v11908_v3  ;;  %vm5068_vm5 = vweird.f32 %v11925_v51 }
 0xb5b   :  { %6991 = vpow2.f32 %v6390_v8  ;;  %v5004_v44 = vsub.f32 1.0, %v5003_v10  ;;  %v5088_v8 = vand.u32 2147483648, %v11912_v38  ;;  %vm5127_vm9 = vweird.f32 %v11908_v3  ;;  %vm12009_vm4 = vmor %vm5067_vm11, %vm5068_vm5 }
 0xb5c   :  { %6993 = vrcp.f32 %v11912_v38  ;;  %v5064_v0 = vsub.f32 1.0, %v5063_v42  ;;  %vm11984_vm6 = vcmp.eq.f32.partialorder %v5131_v25, 8.507059e+37  ;;  %vm5142_vm15 = vweird.f32 %v11919_v49 }
 0xb5d   :  { %6995 = vrcp.f32 %v11919_v49  ;;  %v5005_v6 = vmul.f32 %v11921_v21, %v5004_v44  ;;  %v5148_v25 = vand.u32 2147483648, %v11919_v49 }
 0xb5e   :  { %6997 = vpow2.f32 %v6391_v36  ;;  %v5065_v19 = vmul.f32 %v11925_v51, %v5064_v0 }
 0xb5f   :  { %v11928_v58 = vpop.eup %6987  ;;  %v11976_v39 = vadd.f32 %v11921_v21, %v5005_v6 }
 0xb60   :  { %v11930_v5 = vpop.eup %6989  ;;  %v5123_v17 = vmul.f32 %v11928_v58, %v11908_v3  ;;  %v5066_v10 = vadd.f32 %v11925_v51, %v5065_v19  ;;  %vm5128_vm7 = vweird.f32 %v11928_v58 }
 0xb61   :  { %v6992_v41 = vpop.eup %6991  ;;  %v5018_v45 = vmul.f32 %v11930_v5, %v11902_v32  ;;  %vm5023_vm1 = vweird.f32 %v11930_v5  ;;  %vm12022_vm13 = vmor %vm5127_vm9, %vm5128_vm7 }
 0xb62   :  { %v11938_v54 = vpop.eup %6993  ;;  %v11942_v61 = vadd.f32 1.0, %v6992_v41  ;;  %v5124_v28 = vsub.f32 1.0, %v5123_v17  ;;  %v5134_v41 = vor.u32 1.1754944e-38, %v5133_v13  ;;  %v5070_v23 = vsel %vm12009_vm4, %v11925_v51, %v5066_v10  ;;  %vm12039_vm4 = vmor %vm5007_vm14, %vm5008_vm3 }
 0xb63   :  { %v11944_v50 = vpop.eup %6995  ;;  %v5019_v24 = vsub.f32 1.0, %v5018_v45  ;;  %v5078_v9 = vmul.f32 %v11938_v54, %v11912_v38  ;;  %vm5083_vm0 = vweird.f32 %v11938_v54  ;;  %v5075_v42 = vsel %vm11989_vm2, %v11968_v15, %v5070_v23 }
 0xb64   :  { %v6998_v20 = vpop.eup %6997  ;;  %6999 = vrcp.f32 %v11942_v61  ;;  %v5138_v2 = vmul.f32 %v11944_v50, %v11919_v49  ;;  %v5125_v29 = vmul.f32 %v11928_v58, %v5124_v28  ;;  %v5191_v12 = vand.u32 2147483647, %v11942_v61  ;;  %vm12063_vm14 = vmor %vm5082_vm10, %vm5083_vm0 }
 0xb65   :  { %v11955_v22 = vadd.f32 1.0, %v6998_v20  ;;  %v5020_v1 = vmul.f32 %v11930_v5, %v5019_v24  ;;  %v5079_v40 = vsub.f32 1.0, %v5078_v9  ;;  %v5193_v28 = vand.u32 2147483648, %v11942_v61 }
 0xb66   :  { %v5139_v56 = vsub.f32 1.0, %v5138_v2  ;;  %v5126_v45 = vadd.f32 %v11928_v58, %v5125_v29  ;;  %v5146_v9 = vand.u32 2147483647, %v11919_v49  ;;  %vm5143_vm11 = vweird.f32 %v11944_v50 }
 0xb67   :  { %7001 = vrcp.f32 %v11955_v22  ;;  %v5080_v0 = vmul.f32 %v11938_v54, %v5079_v40  ;;  %vm5187_vm5 = vweird.f32 %v11942_v61  ;;  %vm5192_vm7 = vcmp.eq.f32.partialorder %v5191_v12, 8.507059e+37  ;;  %vm12055_vm3 = vmor %vm5142_vm15, %vm5143_vm11 }
 0xb68   :  { %v5140_v44 = vmul.f32 %v11944_v50, %v5139_v56  ;;  %v5130_v13 = vsel %vm12022_vm13, %v11928_v58, %v5126_v45  ;;  %v5194_v56 = vor.u32 1.1754944e-38, %v5193_v28  ;;  %v5208_v40 = vand.u32 2147483648, %v11955_v22 }
 0xb69   :  { %v5081_v3 = vadd.f32 %v11938_v54, %v5080_v0  ;;  %v5206_v10 = vand.u32 2147483647, %v11955_v22  ;;  %v5010_v45 = vsel %vm12039_vm4, %v11921_v21, %v11976_v39  ;;  %vm5147_vm15 = vcmp.eq.f32.partialorder %v5146_v9, 8.507059e+37 }
 0xb6a   :  { %v7000_v47 = vpop.eup %6999  ;;  %v5141_v51 = vadd.f32 %v11944_v50, %v5140_v44  ;;  %v5021_v44 = vadd.f32 %v11930_v5, %v5020_v1  ;;  %v5209_v0 = vor.u32 1.1754944e-38, %v5208_v40  ;;  %vm13524_vm2 = vweird.f32 %v11902_v32 }
 0xb6b   :  { %v5183_v36 = vmul.f32 %v7000_v47, %v11942_v61  ;;  %vm5188_vm8 = vweird.f32 %v7000_v47  ;;  %v5085_v12 = vsel %vm12063_vm14, %v11938_v54, %v5081_v3  ;;  %vm5207_vm0 = vcmp.eq.f32.partialorder %v5206_v10, 8.507059e+37 }
 0xb6c   :  { %vm5189_vm9 = vmor %vm5187_vm5, %vm5188_vm8  ;;  %v5145_v1 = vsel %vm12055_vm3, %v11944_v50, %v5141_v51  ;;  %v5089_v54 = vor.u32 1.1754944e-38, %v5088_v8  ;;  %v5029_v2 = vor.u32 1.1754944e-38, %v5028_v33  ;;  %vm13527_vm11 = vcmask 261120  }
 0xb6d   :  { %v5184_v27 = vsub.f32 1.0, %v5183_v36  ;;  %v7002_v20 = vpop.eup %7001  ;;  %vm12087_vm8 = vmor %vm13524_vm2, %vm5023_vm1  ;;  %vm5027_vm1 = vcmp.eq.f32.partialorder %v5026_v14, 8.507059e+37 }
 0xb6e   :  { %v5198_v19 = vmul.f32 %v7002_v20, %v11955_v22  ;;  %vm5203_vm13 = vweird.f32 %v7002_v20  ;;  %v5025_v17 = vsel %vm12087_vm8, %v11930_v5, %v5021_v44  ;;  %vm13528_vm5 = vmmov %vm13527_vm11 }
 0xb6f   :  { %v5185_v6 = vmul.f32 %v7000_v47, %v5184_v27  ;;  %v5135_v27 = vsel %vm11984_vm6, %v5134_v41, %v5130_v13  ;;  %vm5202_vm6 = vweird.f32 %v11955_v22  ;;  %v5149_v41 = vor.u32 1.1754944e-38, %v5148_v25 }
 0xb70   :  { %v5199_v29 = vsub.f32 1.0, %v5198_v19  ;;  %vm5204_vm10 = vmor %vm5202_vm6, %vm5203_vm13  ;;  %v5250_v50 = vmul.f32 %v5135_v27, %v11891_v18 }
 0xb71   :  { %v5186_v60 = vadd.f32 %v7000_v47, %v5185_v6  ;;  %v5150_v15 = vsel %vm5147_vm15, %v5149_v41, %v5145_v1 }
 0xb72   :  { %v5200_v36 = vmul.f32 %v7002_v20, %v5199_v29  ;;  %v5251_v9 = vmul.f32 %v5150_v15, %v11894_v34 }
 0xb73   :  { %v5190_v58 = vsel %vm5189_vm9, %v7000_v47, %v5186_v60 }
 0xb74   :  { %v5195_v47 = vsel %vm5192_vm7, %v5194_v56, %v5190_v58  ;;  %v5201_v49 = vadd.f32 %v7002_v20, %v5200_v36 }
 0xb75   :  { %v5254_v39 = vmul.f32 %v5195_v47, %v11905_v52  ;;  %v5015_v52 = vsel %vm12000_vm12, %v11958_v59, %v5010_v45  ;;  %vm5087_vm12 = vcmp.eq.f32.partialorder %v5086_v62, 8.507059e+37 }
 0xb76   :  { %v5205_v28 = vsel %vm5204_vm10, %v7002_v20, %v5201_v49  ;;  %v5246_v20 = vmul.f32 %v5075_v42, %v11876_v30  ;;  %v5090_v24 = vsel %vm5087_vm12, %v5089_v54, %v5085_v12  ;;  %v5242_v8 = vmul.f32 %v5015_v52, %v11873_v37 }
 0xb77   :  { %5270 = vmatpush.msrb.mxu0 %v5254_v39  ;;  %v5210_v18 = vsel %vm5207_vm0, %v5209_v0, %v5205_v28  ;;  %v5030_v30 = vsel %vm5027_vm1, %v5029_v2, %v5025_v17  ;;  %v5247_v38 = vmul.f32 %v5090_v24, %v11884_v31 }
 0xb78   :  { %v5255_v59 = vmul.f32 %v5210_v18, %v11916_v55  ;;  %v5243_v55 = vmul.f32 %v5030_v30, %v11879_v4 }
 0xb79   :  { %5271 = vmatpush.msrb.mxu0 %v5250_v50 }
 0xb7a   :  { %5290 = vmatpush.msrb.mxu1 %v5255_v59 }
 0xb7b   :  { %5272 = vmatpush.msrb.mxu0 %v5246_v20 }
 0xb7c   :  { %5291 = vmatpush.msrb.mxu1 %v5251_v9 }
 0xb7d   :  { %5273 = vmatpush.msrb.mxu0 %v5242_v8 }
 0xb7e   :  { %6394 = vmatmul.msk.f32.vlgmr.msrb.gmra.mxu0 %vm13527_vm11, %v11792_v63  ;;  %5292 = vmatpush.msrb.mxu1 %v5247_v38 }
 0xb80   :  { %5293 = vmatpush.msrb.mxu1 %v5243_v55 }
 0xb81   :  { %6395 = vmatmul.msk.f32.vlgmr.msrb.gmra.mxu1 %vm13528_vm5, %v11792_v63 }
 0xbaa   :  { %v4897_v37 = vpop.f32.mrf.mxu2  ;;  %v4926_v32 = vpop.f32.mrf.mxu3 }
 0xbab   :  { %v12113_v34 = vadd.f32 %v4897_v37, %v11864_v16  ;;  %v12119_v33 = vadd.f32 %v4926_v32, %v11864_v16 }
 0xbad   :  { %v6380_v4 = vmul.f32 -1.442695, %v12113_v34  ;;  %v6381_v19 = vmul.f32 -1.442695, %v12119_v33 }
 0xbaf   :  { %7003 = vpow2.f32 %v6380_v4 }
 0xbb2   :  { %v4900_v5 = vpop.f32.mrf.mxu2  ;;  %v4929_v14 = vpop.f32.mrf.mxu3 }
 0xbb3   :  { %v12116_v31 = vadd.f32 %v4900_v5, %v11870_v35  ;;  %v12124_v6 = vadd.f32 %v4929_v14, %v11870_v35 }
 0xbb5   :  { %v6384_v62 = vmul.f32 -1.442695, %v12116_v31  ;;  %v6385_v23 = vmul.f32 -1.442695, %v12124_v6  ;;  %v7004_v60 = vpop.eup %7003 }
 0xbb6   :  { %v12136_v56 = vadd.f32 1.0, %v7004_v60 }
 0xbb7   :  { %7005 = vpow2.f32 %v6384_v62 }
 0xbb8   :  { %7007 = vpow2.f32 %v6381_v19  ;;  %v5043_v17 = vand.u32 2147483648, %v12136_v56  ;;  %v5041_v2 = vand.u32 2147483647, %v12136_v56  ;;  %vm5037_vm4 = vweird.f32 %v12136_v56 }
 0xbb9   :  { %7009 = vpow2.f32 %v6385_v23 }
 0xbba   :  { %v4903_v11 = vpop.f32.mrf.mxu2  ;;  %v4932_v25 = vpop.f32.mrf.mxu3  ;;  %v12196_v5 = vor.u32 1.1754944e-38, %v5043_v17  ;;  %vm12238_vm12 = vcmp.eq.f32.partialorder %v5041_v2, 8.507059e+37 }
 0xbbb   :  { %v12129_v13 = vadd.f32 %v4903_v11, %v11887_v57  ;;  %v12132_v16 = vadd.f32 %v4932_v25, %v11887_v57 }
 0xbbd   :  { %v6388_v51 = vmul.f32 -1.442695, %v12129_v13  ;;  %v6389_v35 = vmul.f32 -1.442695, %v12132_v16  ;;  %v7006_v29 = vpop.eup %7005 }
 0xbbe   :  { %v7008_v3 = vpop.eup %7007  ;;  %v12138_v61 = vadd.f32 1.0, %v7006_v29 }
 0xbbf   :  { %7011 = vpow2.f32 %v6388_v51  ;;  %v7010_v58 = vpop.eup %7009  ;;  %v12140_v57 = vadd.f32 1.0, %v7008_v3 }
 0xbc0   :  { %7013 = vpow2.f32 %v6389_v35  ;;  %v12150_v47 = vadd.f32 1.0, %v7010_v58  ;;  %v5103_v24 = vand.u32 2147483648, %v12138_v61  ;;  %vm5097_vm9 = vweird.f32 %v12138_v61 }
 0xbc1   :  { %7015 = vrcp.f32 %v12136_v56  ;;  %v5056_v38 = vand.u32 2147483647, %v12140_v57  ;;  %v5058_v14 = vand.u32 2147483648, %v12140_v57  ;;  %v5101_v23 = vand.u32 2147483647, %v12138_v61 }
 0xbc2   :  { %v4906_v40 = vpop.f32.mrf.mxu2  ;;  %v4935_v45 = vpop.f32.mrf.mxu3  ;;  %7017 = vrcp.f32 %v12138_v61  ;;  %v12206_v11 = vor.u32 1.1754944e-38, %v5103_v24  ;;  %v5116_v3 = vand.u32 2147483647, %v12150_v47  ;;  %vm5112_vm14 = vweird.f32 %v12150_v47 }
 0xbc3   :  { %v12143_v10 = vadd.f32 %v4906_v40, %v11858_v46  ;;  %v12154_v21 = vadd.f32 %v4935_v45, %v11858_v46  ;;  %v5118_v40 = vand.u32 2147483648, %v12150_v47  ;;  %vm12227_vm0 = vcmp.eq.f32.partialorder %v5101_v23, 8.507059e+37 }
 0xbc5   :  { %v7012_v36 = vpop.eup %7011  ;;  %v6392_v27 = vmul.f32 -1.442695, %v12143_v10  ;;  %v6393_v49 = vmul.f32 -1.442695, %v12154_v21 }
 0xbc6   :  { %v12146_v44 = vadd.f32 1.0, %v7012_v36  ;;  %v7014_v7 = vpop.eup %7013 }
 0xbc7   :  { %v12157_v1 = vadd.f32 1.0, %v7014_v7  ;;  %v12159_v39 = vpop.eup %7015 }
 0xbc8   :  { %7019 = vrcp.f32 %v12146_v44  ;;  %v12163_v42 = vpop.eup %7017  ;;  %v5033_v0 = vmul.f32 %v12159_v39, %v12136_v56  ;;  %vm5038_vm7 = vweird.f32 %v12159_v39  ;;  %v5161_v62 = vand.u32 2147483647, %v12146_v44 }
 0xbc9   :  { %7021 = vrcp.f32 %v12140_v57  ;;  %v5093_v12 = vmul.f32 %v12163_v42, %v12138_v61  ;;  %v5163_v19 = vand.u32 2147483648, %v12146_v44  ;;  %vm5098_vm13 = vweird.f32 %v12163_v42 }
 0xbca   :  { %7023 = vpow2.f32 %v6392_v27  ;;  %v5034_v18 = vsub.f32 1.0, %v5033_v0  ;;  %vm5157_vm3 = vweird.f32 %v12146_v44  ;;  %vm12222_vm15 = vcmp.eq.f32.partialorder %v5161_v62, 8.507059e+37  ;;  %vm12247_vm11 = vmor %vm5097_vm9, %vm5098_vm13 }
 0xbcb   :  { %7025 = vrcp.f32 %v12150_v47  ;;  %v5094_v59 = vsub.f32 1.0, %v5093_v12  ;;  %v5164_v7 = vor.u32 1.1754944e-38, %v5163_v19  ;;  %vm5172_vm8 = vweird.f32 %v12157_v1 }
 0xbcc   :  { %7027 = vrcp.f32 %v12157_v1  ;;  %v5035_v32 = vmul.f32 %v12159_v39, %v5034_v18  ;;  %v5176_v24 = vand.u32 2147483647, %v12157_v1 }
 0xbcd   :  { %7029 = vpow2.f32 %v6393_v49  ;;  %v5095_v4 = vmul.f32 %v12163_v42, %v5094_v59 }
 0xbce   :  { %v12166_v41 = vpop.eup %7019  ;;  %v12214_v58 = vadd.f32 %v12159_v39, %v5035_v32 }
 0xbcf   :  { %v12168_v46 = vpop.eup %7021  ;;  %v5153_v28 = vmul.f32 %v12166_v41, %v12146_v44  ;;  %v5096_v45 = vadd.f32 %v12163_v42, %v5095_v4  ;;  %vm5158_vm2 = vweird.f32 %v12166_v41 }
 0xbd0   :  { %v7024_v50 = vpop.eup %7023  ;;  %v5048_v22 = vmul.f32 %v12168_v46, %v12140_v57  ;;  %vm5053_vm10 = vweird.f32 %v12168_v46  ;;  %vm12260_vm1 = vmor %vm5157_vm3, %vm5158_vm2 }
 0xbd1   :  { %v12176_v52 = vpop.eup %7025  ;;  %v12180_v54 = vadd.f32 1.0, %v7024_v50  ;;  %v5154_v8 = vsub.f32 1.0, %v5153_v28  ;;  %v5100_v2 = vsel %vm12247_vm11, %v12163_v42, %v5096_v45  ;;  %vm12277_vm11 = vmor %vm5037_vm4, %vm5038_vm7 }
 0xbd2   :  { %v12182_v15 = vpop.eup %7027  ;;  %v5049_v30 = vsub.f32 1.0, %v5048_v22  ;;  %v5108_v55 = vmul.f32 %v12176_v52, %v12150_v47  ;;  %vm5113_vm6 = vweird.f32 %v12176_v52  ;;  %v5105_v45 = vsel %vm12227_vm0, %v12206_v11, %v5100_v2 }
 0xbd3   :  { %v7030_v20 = vpop.eup %7029  ;;  %7031 = vrcp.f32 %v12180_v54  ;;  %v5168_v9 = vmul.f32 %v12182_v15, %v12157_v1  ;;  %v5155_v25 = vmul.f32 %v12166_v41, %v5154_v8  ;;  %v5221_v18 = vand.u32 2147483647, %v12180_v54  ;;  %vm12301_vm4 = vmor %vm5112_vm14, %vm5113_vm6 }
 0xbd4   :  { %v12193_v37 = vadd.f32 1.0, %v7030_v20  ;;  %v5050_v60 = vmul.f32 %v12168_v46, %v5049_v30  ;;  %v5109_v29 = vsub.f32 1.0, %v5108_v55  ;;  %v5223_v17 = vand.u32 2147483648, %v12180_v54 }
 0xbd5   :  { %v5169_v51 = vsub.f32 1.0, %v5168_v9  ;;  %v5156_v0 = vadd.f32 %v12166_v41, %v5155_v25  ;;  %vm5173_vm9 = vweird.f32 %v12182_v15  ;;  %v5178_v30 = vand.u32 2147483648, %v12157_v1 }
 0xbd6   :  { %7033 = vrcp.f32 %v12193_v37  ;;  %v5110_v22 = vmul.f32 %v12176_v52, %v5109_v29  ;;  %vm5217_vm13 = vweird.f32 %v12180_v54  ;;  %vm5222_vm2 = vcmp.eq.f32.partialorder %v5221_v18, 8.507059e+37  ;;  %vm12293_vm7 = vmor %vm5172_vm8, %vm5173_vm9 }
 0xbd7   :  { %v5170_v12 = vmul.f32 %v12182_v15, %v5169_v51  ;;  %v5160_v55 = vsel %vm12260_vm1, %v12166_v41, %v5156_v0  ;;  %v5224_v62 = vor.u32 1.1754944e-38, %v5223_v17  ;;  %v5238_v19 = vand.u32 2147483648, %v12193_v37 }
 0xbd8   :  { %v5111_v44 = vadd.f32 %v12176_v52, %v5110_v22  ;;  %v5236_v25 = vand.u32 2147483647, %v12193_v37  ;;  %v5040_v51 = vsel %vm12277_vm11, %v12159_v39, %v12214_v58  ;;  %v5051_v29 = vadd.f32 %v12168_v46, %v5050_v60  ;;  %v12401_v39 = vpop.permute.xlu1 %5391 }
 0xbd9   :  { %v7032_v35 = vpop.eup %7031  ;;  %v5171_v42 = vadd.f32 %v12182_v15, %v5170_v12  ;;  %vm5177_vm8 = vcmp.eq.f32.partialorder %v5176_v24, 8.507059e+37  ;;  %v5179_v27 = vor.u32 1.1754944e-38, %v5178_v30  ;;  %vm13545_vm0 = vweird.f32 %v12140_v57  ;;  %v7120_v30 = vld [vmem:[%s12926_s2] sm:$0xff] }
 0xbda   :  { %v5213_v36 = vmul.f32 %v7032_v35, %v12180_v54  ;;  %vm5218_vm5 = vweird.f32 %v7032_v35  ;;  %v5115_v0 = vsel %vm12301_vm4, %v12176_v52, %v5111_v44  ;;  %vm5237_vm6 = vcmp.eq.f32.partialorder %v5236_v25, 8.507059e+37 }
 0xbdb   :  { %vm5219_vm3 = vmor %vm5217_vm13, %vm5218_vm5  ;;  %v5175_v60 = vsel %vm12293_vm7, %v12182_v15, %v5171_v42  ;;  %v5119_v52 = vor.u32 1.1754944e-38, %v5118_v40  ;;  %vm13548_vm9 = vcmask 261120  }
 0xbdc   :  { %v5214_v50 = vsub.f32 1.0, %v5213_v36  ;;  %v7034_v28 = vpop.eup %7033  ;;  %v5165_v36 = vsel %vm12222_vm15, %v5164_v7, %v5160_v55  ;;  %vm5232_vm15 = vweird.f32 %v12193_v37  ;;  %v5239_v7 = vor.u32 1.1754944e-38, %v5238_v19  ;;  %vm12325_vm5 = vmor %vm13545_vm0, %vm5053_vm10  ;;  %v7122_v55 = vld [vmem:[%s12926_s2 + $0x10] sm:$0xff]  ;;  %v6402_v19 = vld [vmem:[%s12930_s6 + $0x88] sm:$0xff] }
 0xbdd   :  { %v5228_v9 = vmul.f32 %v7034_v28, %v12193_v37  ;;  %vm5233_vm1 = vweird.f32 %v7034_v28  ;;  %v5252_v15 = vmul.f32 %v5165_v36, %v12129_v13  ;;  %v5180_v11 = vsel %vm5177_vm8, %v5179_v27, %v5175_v60  ;;  %vm13549_vm13 = vmmov %vm13548_vm9 }
 0xbde   :  { %v5215_v8 = vmul.f32 %v7032_v35, %v5214_v50  ;;  %vm5234_vm14 = vmor %vm5232_vm15, %vm5233_vm1  ;;  %v5055_v49 = vsel %vm12325_vm5, %v12168_v46, %v5051_v29  ;;  %v5248_v50 = vmul.f32 %v5105_v45, %v12116_v31  ;;  %vm5057_vm10 = vcmp.eq.f32.partialorder %v5056_v38, 8.507059e+37 }
 0xbdf   :  { %v5229_v4 = vsub.f32 1.0, %v5228_v9  ;;  %v5253_v18 = vmul.f32 %v5180_v11, %v12132_v16  ;;  %vm13553_vm1 = vcmask 31744   ;;  %v12426_v11 = vpop.permute.xlu2 %5386 }
 0xbe0   :  { %v5216_v32 = vadd.f32 %v7032_v35, %v5215_v8  ;;  %vm13554_vm7 = vmmov %vm13553_vm1 }
 0xbe1   :  { %v5230_v23 = vmul.f32 %v7034_v28, %v5229_v4  ;;  %vm13555_vm4 = vmmov %vm13553_vm1 }
 0xbe2   :  { %v5220_v41 = vsel %vm5219_vm3, %v7032_v35, %v5216_v32  ;;  %vm13550_vm3 = vcmask 1043456   ;;  %vm13556_vm15 = vmmov %vm13553_vm1 }
 0xbe3   :  { %v5225_v35 = vsel %vm5222_vm2, %v5224_v62, %v5220_v41  ;;  %v5231_v1 = vadd.f32 %v7034_v28, %v5230_v23  ;;  %vm13551_vm2 = vmmov %vm13550_vm3 }
 0xbe4   :  { %v5256_v58 = vmul.f32 %v5225_v35, %v12143_v10  ;;  %v5045_v10 = vsel %vm12238_vm12, %v12196_v5, %v5040_v51  ;;  %vm5117_vm12 = vcmp.eq.f32.partialorder %v5116_v3, 8.507059e+37  ;;  %vm13552_vm11 = vmmov %vm13551_vm2 }
 0xbe5   :  { %v5235_v12 = vsel %vm5234_vm14, %v7034_v28, %v5231_v1  ;;  %v5059_v28 = vor.u32 1.1754944e-38, %v5058_v14  ;;  %v5120_v22 = vsel %vm5117_vm12, %v5119_v52, %v5115_v0  ;;  %v5244_v40 = vmul.f32 %v5045_v10, %v12113_v34  ;;  %vm13557_vm8 = vmmov %vm13553_vm1  ;;  %v12407_v1 = vpop.permute.xlu0 %5381 }
 0xbe6   :  { %5310 = vmatpush.msrb.mxu2 %v5256_v58  ;;  %v5240_v13 = vsel %vm5237_vm6, %v5239_v7, %v5235_v12  ;;  %v5249_v47 = vmul.f32 %v5120_v22, %v12124_v6  ;;  %v5344_v6 = vstv %s6399_s14  ;;  %v5364_v14 = vstv %s12352_s16  ;;  %vm13558_vm14 = vmmov %vm13553_vm1  ;;  %v12405_v58 = vpop.permute.xlu1 %5376 }
 0xbe7   :  { %v5257_v5 = vmul.f32 %v5240_v13, %v12154_v21  ;;  %v5060_v31 = vsel %vm5057_vm10, %v5059_v28, %v5055_v49  ;;  %vm13559_vm6 = vmmov %vm13553_vm1  ;;  %v5366_v25 = vmul.f32 %v6402_v19, %v5364_v14 }
 0xbe8   :  { %5311 = vmatpush.msrb.mxu2 %v5252_v15  ;;  %v5245_v21 = vmul.f32 %v5060_v31, %v12119_v33  ;;  %v5341_v33 = vstv %s12350_s15  ;;  %vm13560_vm0 = vmmov %vm13553_vm1 }
 0xbe9   :  { %5330 = vmatpush.msrb.mxu3 %v5257_v5  ;;  %v5342_v20 = vmul.f32 %v5341_v33, %v11812_v53  ;;  %v7121_v53 = vld [vmem:[%s12926_s2 + $0x8] sm:$0xff]  ;;  %v5343_v23 = vmul.f32 %v5341_v33, %v11845_v26  ;;  %vm13561_vm5 = vmmov %vm13551_vm2 }
 0xbea   :  { %5312 = vmatpush.msrb.mxu2 %v5248_v50  ;;  %vm13562_vm12 = vmmov %vm13551_vm2 }
 0xbeb   :  { %5331 = vmatpush.msrb.mxu3 %v5253_v18  ;;  %vm13563_vm10 = vmmov %vm13551_vm2 }
 0xbec   :  { %5313 = vmatpush.msrb.mxu2 %v5244_v40 }
 0xbed   :  { %6396 = vmatmul.msk.f32.vlgmr.msrb.gmra.mxu2 %vm13548_vm9, %v11792_v63  ;;  %5332 = vmatpush.msrb.mxu3 %v5249_v47  ;;  %vm13564_vm9 = vmmov %vm13560_vm0 }
 0xbef   :  { %5333 = vmatpush.msrb.mxu3 %v5245_v21 }
 0xbf0   :  { %6397 = vmatmul.msk.f32.vlgmr.msrb.gmra.mxu3 %vm13549_vm13, %v11792_v63  ;;  %v6401_v63 = vld [vmem:[%s12930_s6 + $0x80] sm:$0xff]  ;;  %vm13565_vm13 = vmmov %vm13560_vm0 }
 0xbf1   :  { %v5365_v59 = vmul.f32 %v6401_v63, %v5364_v14 }
 0xbfb   :  { %v5275_v34 = vpop.f32.mrf.mxu0 }
 0xbfc   :  { %v5276_v57 = vadd.f32 %v5275_v34, %v7811_v48 }
 0xbfe   :  { %v5295_v16 = vpop.f32.mrf.mxu1  ;;  %v5345_v3 = vmul.f32 %v5344_v6, %v5276_v57 }
 0xbff   :  { %v5296_v46 = vadd.f32 %v5295_v16, %v7811_v48 }
 0xc01   :  { %v5346_v38 = vmul.f32 %v5344_v6, %v5296_v46 }
 0xc03   :  { %v5353_v17 = vrot.slane %v5346_v38, 4 }
 0xc05   :  { %v5355_v24 = vsel %vm13550_vm3, %v5345_v3, %v5353_v17  ;;  %vm13566_vm3 = vmmov %vm13560_vm0 }
 0xc06   :  { %v5359_v8 = vadd.f32 %v5355_v24, %v5342_v20 }
 0xc08   :  { %v12363_v9 = vadd.f32 %v5365_v59, %v5359_v8 }
 0xc0a   :  { %5396 = vst [vmem:[#allocation1] ss:$2 sm:$0xff] %v12363_v9 }
 0xc11   :  { %v5399_v2 = vld.sshfl [vmem:[#allocation1] sm:$0xff pattern:$0x75316420]  ;;  %v5400_v61 = vld.sshfl [vmem:[#allocation1 + $0x8] sm:$0xff pattern:$0x75316420] }
 0xc12   :  { %6407 = vmatpush.msk.msra.mxu0 %vm13551_vm2, %v5399_v2  ;;  %6412 = vmatpush.msk.msra.mxu1 %vm13552_vm11, %v5400_v61  ;;  %vm13567_vm2 = vmmov %vm13560_vm0 }
 0xc13   :  { %6408 = vmatmul.msk.f32.vlgmr.msra.gmra.mxu0 %vm13553_vm1, %v7120_v30  ;;  %6413 = vmatmul.msk.f32.vlgmr.msra.gmra.mxu1 %vm13554_vm7, %v7120_v30  ;;  %vm13568_vm11 = vmmov %vm13560_vm0 }
 0xc14   :  { %vm13569_vm1 = vmmov %vm13560_vm0 }
 0xc15   :  { %vm13570_vm7 = vmmov %vm13560_vm0 }
 0xc1b   :  { %6409 = vmatmul.msk.f32.gmra.mxu0 %vm13555_vm4, %v7121_v53  ;;  %6414 = vmatmul.msk.f32.gmra.mxu1 %vm13556_vm15, %v7121_v53  ;;  %vm13571_vm4 = vmmov %vm13560_vm0 }
 0xc23   :  { %6410 = vmatmul.msk.f32.gmra.mxu0 %vm13557_vm8, %v7122_v55  ;;  %6415 = vmatmul.msk.f32.gmra.mxu1 %vm13558_vm14, %v7122_v55 }
 0xc2b   :  { %6411 = vmatmul.msk.f32.gmra.mxu0 %vm13559_vm6, %v11832_v43  ;;  %6416 = vmatmul.msk.f32.gmra.mxu1 %vm13560_vm0, %v11832_v43 }
 0xc70   :  { %v5315_v42 = vpop.f32.mrf.mxu2 }
 0xc71   :  { %v5316_v4 = vadd.f32 %v5315_v42, %v7811_v48 }
 0xc73   :  { %v5335_v32 = vpop.f32.mrf.mxu3  ;;  %v5347_v54 = vmul.f32 %v5344_v6, %v5316_v4 }
 0xc74   :  { %v5336_v44 = vadd.f32 %v5335_v32, %v7811_v48 }
 0xc76   :  { %v5348_v62 = vmul.f32 %v5344_v6, %v5336_v44 }
 0xc78   :  { %v5354_v41 = vrot.slane %v5348_v62, 4 }
 0xc7a   :  { %v5356_v51 = vsel %vm13561_vm5, %v5347_v54, %v5354_v41 }
 0xc7b   :  { %v5360_v29 = vadd.f32 %v5356_v51, %v5343_v23 }
 0xc7d   :  { %v12394_v36 = vadd.f32 %v5366_v25, %v5360_v29 }
 0xc7f   :  { %5398 = vst [vmem:[#allocation1 + $0x10] ss:$2 sm:$0xff] %v12394_v36 }
 0xc86   :  { %v5401_v56 = vld.sshfl [vmem:[#allocation1 + $0x10] sm:$0xff pattern:$0x75316420]  ;;  %v5402_v35 = vld.sshfl [vmem:[#allocation1 + $0x18] sm:$0xff pattern:$0x75316420] }
 0xc87   :  { %6417 = vmatpush.msk.msra.mxu2 %vm13562_vm12, %v5401_v56  ;;  %6422 = vmatpush.msk.msra.mxu3 %vm13563_vm10, %v5402_v35 }
 0xc88   :  { %6418 = vmatmul.msk.f32.vlgmr.msra.gmra.mxu2 %vm13564_vm9, %v7120_v30  ;;  %6423 = vmatmul.msk.f32.vlgmr.msra.gmra.mxu3 %vm13565_vm13, %v7120_v30 }
 0xc90   :  { %v5428_v26 = vpop.f32.mrf.mxu0  ;;  %v5457_v60 = vpop.f32.mrf.mxu1  ;;  %6419 = vmatmul.msk.f32.gmra.mxu2 %vm13566_vm3, %v7121_v53  ;;  %6424 = vmatmul.msk.f32.gmra.mxu3 %vm13567_vm2, %v7121_v53 }
 0xc91   :  { %v12410_v45 = vadd.f32 %v5428_v26, %v12405_v58  ;;  %v12418_v15 = vadd.f32 %v5457_v60, %v12405_v58 }
 0xc93   :  { %v6427_v12 = vmul.f32 -1.442695, %v12410_v45  ;;  %v6428_v52 = vmul.f32 -1.442695, %v12418_v15 }
 0xc95   :  { %7035 = vpow2.f32 %v6427_v12 }
 0xc98   :  { %v5431_v27 = vpop.f32.mrf.mxu0  ;;  %v5460_v7 = vpop.f32.mrf.mxu1  ;;  %6420 = vmatmul.msk.f32.gmra.mxu2 %vm13568_vm11, %v7122_v55  ;;  %6425 = vmatmul.msk.f32.gmra.mxu3 %vm13569_vm1, %v7122_v55 }
 0xc99   :  { %v12413_v0 = vadd.f32 %v5431_v27, %v12407_v1  ;;  %v12423_v37 = vadd.f32 %v5460_v7, %v12407_v1 }
 0xc9b   :  { %v6431_v10 = vmul.f32 -1.442695, %v12413_v0  ;;  %v6432_v13 = vmul.f32 -1.442695, %v12423_v37  ;;  %v7036_v18 = vpop.eup %7035 }
 0xc9c   :  { %v12441_v21 = vadd.f32 1.0, %v7036_v18 }
 0xc9d   :  { %7037 = vpow2.f32 %v6431_v10 }
 0xc9e   :  { %7039 = vpow2.f32 %v6428_v52  ;;  %v5602_v54 = vand.u32 2147483648, %v12441_v21  ;;  %v5600_v25 = vand.u32 2147483647, %v12441_v21  ;;  %vm5596_vm14 = vweird.f32 %v12441_v21 }
 0xc9f   :  { %7041 = vpow2.f32 %v6432_v13 }
 0xca0   :  { %v5434_v49 = vpop.f32.mrf.mxu0  ;;  %v5463_v50 = vpop.f32.mrf.mxu1  ;;  %6421 = vmatmul.msk.f32.gmra.mxu2 %vm13570_vm7, %v11832_v43  ;;  %6426 = vmatmul.msk.f32.gmra.mxu3 %vm13571_vm4, %v11832_v43  ;;  %v12501_v12 = vor.u32 1.1754944e-38, %v5602_v54  ;;  %vm12543_vm11 = vcmp.eq.f32.partialorder %v5600_v25, 8.507059e+37 }
 0xca1   :  { %v12430_v5 = vadd.f32 %v5434_v49, %v12426_v11  ;;  %v12433_v28 = vadd.f32 %v5463_v50, %v12426_v11 }
 0xca3   :  { %v6435_v22 = vmul.f32 -1.442695, %v12430_v5  ;;  %v6436_v40 = vmul.f32 -1.442695, %v12433_v28  ;;  %v7038_v31 = vpop.eup %7037 }
 0xca4   :  { %v7040_v47 = vpop.eup %7039  ;;  %v12443_v6 = vadd.f32 1.0, %v7038_v31 }
 0xca5   :  { %7043 = vpow2.f32 %v6435_v22  ;;  %v7042_v16 = vpop.eup %7041  ;;  %v12445_v46 = vadd.f32 1.0, %v7040_v47 }
 0xca6   :  { %7045 = vpow2.f32 %v6436_v40  ;;  %v12455_v3 = vadd.f32 1.0, %v7042_v16  ;;  %v5662_v51 = vand.u32 2147483648, %v12443_v6  ;;  %vm5656_vm15 = vweird.f32 %v12443_v6 }
 0xca7   :  { %7047 = vrcp.f32 %v12441_v21  ;;  %v5615_v26 = vand.u32 2147483647, %v12445_v46  ;;  %v5617_v10 = vand.u32 2147483648, %v12445_v46  ;;  %v5660_v50 = vand.u32 2147483647, %v12443_v6 }
 0xca8   :  { %v5437_v34 = vpop.f32.mrf.mxu0  ;;  %v5466_v33 = vpop.f32.mrf.mxu1  ;;  %7049 = vrcp.f32 %v12443_v6  ;;  %v12511_v22 = vor.u32 1.1754944e-38, %v5662_v51  ;;  %v5675_v16 = vand.u32 2147483647, %v12455_v3  ;;  %vm5671_vm5 = vweird.f32 %v12455_v3 }
 0xca9   :  { %v12448_v43 = vadd.f32 %v5437_v34, %v12401_v39  ;;  %v12459_v17 = vadd.f32 %v5466_v33, %v12401_v39  ;;  %vm12532_vm13 = vcmp.eq.f32.partialorder %v5660_v50, 8.507059e+37 }
 0xcab   :  { %v7044_v57 = vpop.eup %7043  ;;  %v6439_v63 = vmul.f32 -1.442695, %v12448_v43  ;;  %v6440_v24 = vmul.f32 -1.442695, %v12459_v17 }
 0xcac   :  { %v12451_v38 = vadd.f32 1.0, %v7044_v57  ;;  %v7046_v14 = vpop.eup %7045  ;;  %v5677_v57 = vand.u32 2147483648, %v12455_v3 }
 0xcad   :  { %v12462_v20 = vadd.f32 1.0, %v7046_v14  ;;  %v12464_v59 = vpop.eup %7047 }
 0xcae   :  { %7051 = vrcp.f32 %v12451_v38  ;;  %v12468_v8 = vpop.eup %7049  ;;  %v5592_v30 = vmul.f32 %v12464_v59, %v12441_v21  ;;  %vm5597_vm8 = vweird.f32 %v12464_v59  ;;  %v5720_v13 = vand.u32 2147483647, %v12451_v38 }
 0xcaf   :  { %7053 = vrcp.f32 %v12445_v46  ;;  %v5652_v53 = vmul.f32 %v12468_v8, %v12443_v6  ;;  %v5722_v49 = vand.u32 2147483648, %v12451_v38  ;;  %vm5657_vm6 = vweird.f32 %v12468_v8 }
 0xcb0   :  { %7055 = vpow2.f32 %v6439_v63  ;;  %v5593_v19 = vsub.f32 1.0, %v5592_v30  ;;  %vm5716_vm0 = vweird.f32 %v12451_v38  ;;  %vm12527_vm10 = vcmp.eq.f32.partialorder %v5720_v13, 8.507059e+37  ;;  %vm12552_vm7 = vmor %vm5656_vm15, %vm5657_vm6 }
 0xcb1   :  { %7057 = vrcp.f32 %v12455_v3  ;;  %v5653_v23 = vsub.f32 1.0, %v5652_v53  ;;  %v5723_v30 = vor.u32 1.1754944e-38, %v5722_v49  ;;  %vm5731_vm2 = vweird.f32 %v12462_v20 }
 0xcb2   :  { %7059 = vrcp.f32 %v12462_v20  ;;  %v5594_v7 = vmul.f32 %v12464_v59, %v5593_v19 }
 0xcb3   :  { %7061 = vpow2.f32 %v6440_v24  ;;  %v5654_v52 = vmul.f32 %v12468_v8, %v5653_v23 }
 0xcb4   :  { %v12471_v2 = vpop.eup %7051  ;;  %v12519_v33 = vadd.f32 %v12464_v59, %v5594_v7  ;;  %v5737_v7 = vand.u32 2147483648, %v12462_v20 }
 0xcb5   :  { %v12473_v61 = vpop.eup %7053  ;;  %v5712_v42 = vmul.f32 %v12471_v2, %v12451_v38  ;;  %v5655_v14 = vadd.f32 %v12468_v8, %v5654_v52  ;;  %vm5717_vm3 = vweird.f32 %v12471_v2 }
 0xcb6   :  { %v7056_v55 = vpop.eup %7055  ;;  %v5607_v4 = vmul.f32 %v12473_v61, %v12445_v46  ;;  %vm5612_vm9 = vweird.f32 %v12473_v61  ;;  %vm12565_vm1 = vmor %vm5716_vm0, %vm5717_vm3 }
 0xcb7   :  { %v12481_v32 = vpop.eup %7057  ;;  %v12485_v44 = vadd.f32 1.0, %v7056_v55  ;;  %v5713_v29 = vsub.f32 1.0, %v5712_v42  ;;  %v5659_v25 = vsel %vm12552_vm7, %v12468_v8, %v5655_v14  ;;  %vm12582_vm7 = vmor %vm5596_vm14, %vm5597_vm8 }
 0xcb8   :  { %v12487_v62 = vpop.eup %7059  ;;  %v5608_v35 = vsub.f32 1.0, %v5607_v4  ;;  %v5667_v60 = vmul.f32 %v12481_v32, %v12455_v3  ;;  %vm5672_vm12 = vweird.f32 %v12481_v32  ;;  %v5664_v24 = vsel %vm12532_vm13, %v12511_v22, %v5659_v25 }
 0xcb9   :  { %v7062_v41 = vpop.eup %7061  ;;  %7063 = vrcp.f32 %v12485_v44  ;;  %v5727_v56 = vmul.f32 %v12487_v62, %v12462_v20  ;;  %v5714_v40 = vmul.f32 %v12471_v2, %v5713_v29  ;;  %v5782_v23 = vand.u32 2147483648, %v12485_v44  ;;  %vm12606_vm14 = vmor %vm5671_vm5, %vm5672_vm12 }
 0xcba   :  { %v12498_v27 = vadd.f32 1.0, %v7062_v41  ;;  %v5609_v47 = vmul.f32 %v12473_v61, %v5608_v35  ;;  %v5668_v34 = vsub.f32 1.0, %v5667_v60  ;;  %v5780_v41 = vand.u32 2147483647, %v12485_v44 }
 0xcbb   :  { %v5728_v18 = vsub.f32 1.0, %v5727_v56  ;;  %v5715_v55 = vadd.f32 %v12471_v2, %v5714_v40  ;;  %v5735_v56 = vand.u32 2147483647, %v12462_v20  ;;  %vm5732_vm15 = vweird.f32 %v12487_v62 }
 0xcbc   :  { %7065 = vrcp.f32 %v12498_v27  ;;  %v5669_v54 = vmul.f32 %v12481_v32, %v5668_v34  ;;  %vm5776_vm6 = vweird.f32 %v12485_v44  ;;  %vm5781_vm3 = vcmp.eq.f32.partialorder %v5780_v41, 8.507059e+37  ;;  %vm12598_vm8 = vmor %vm5731_vm2, %vm5732_vm15 }
 0xcbd   :  { %v5729_v42 = vmul.f32 %v12487_v62, %v5728_v18  ;;  %v5719_v52 = vsel %vm12565_vm1, %v12471_v2, %v5715_v55  ;;  %v5783_v50 = vor.u32 1.1754944e-38, %v5782_v23  ;;  %v5797_v40 = vand.u32 2147483648, %v12498_v27 }
 0xcbe   :  { %v5670_v38 = vadd.f32 %v12481_v32, %v5669_v54  ;;  %v5795_v34 = vand.u32 2147483647, %v12498_v27  ;;  %v5610_v14 = vadd.f32 %v12473_v61, %v5609_v47  ;;  %v5724_v55 = vsel %vm12527_vm10, %v5723_v30, %v5719_v52 }
 0xcbf   :  { %v7064_v31 = vpop.eup %7063  ;;  %v5730_v8 = vadd.f32 %v12487_v62, %v5729_v42  ;;  %vm5791_vm10 = vweird.f32 %v12498_v27  ;;  %vm5736_vm2 = vcmp.eq.f32.partialorder %v5735_v56, 8.507059e+37  ;;  %v5738_v30 = vor.u32 1.1754944e-38, %v5737_v7 }
 0xcc0   :  { %v5772_v63 = vmul.f32 %v7064_v31, %v12485_v44  ;;  %vm5777_vm4 = vweird.f32 %v7064_v31  ;;  %v5798_v42 = vor.u32 1.1754944e-38, %v5797_v40  ;;  %vm5796_vm12 = vcmp.eq.f32.partialorder %v5795_v34, 8.507059e+37 }
 0xcc1   :  { %vm5778_vm0 = vmor %vm5776_vm6, %vm5777_vm4  ;;  %v5734_v47 = vsel %vm12598_vm8, %v12487_v62, %v5730_v8  ;;  %v5839_v62 = vmul.f32 %v5724_v55, %v12430_v5  ;;  %vm13588_vm13 = vweird.f32 %v12445_v46  ;;  %v5618_v41 = vor.u32 1.1754944e-38, %v5617_v10 }
 0xcc2   :  { %v5773_v4 = vsub.f32 1.0, %v5772_v63  ;;  %v7066_v19 = vpop.eup %7065  ;;  %v5599_v63 = vsel %vm12582_vm7, %v12464_v59, %v12519_v33  ;;  %vm12630_vm4 = vmor %vm13588_vm13, %vm5612_vm9  ;;  %v5739_v22 = vsel %vm5736_vm2, %v5738_v30, %v5734_v47  ;;  %vm5616_vm9 = vcmp.eq.f32.partialorder %v5615_v26, 8.507059e+37 }
 0xcc3   :  { %v5787_v60 = vmul.f32 %v7066_v19, %v12498_v27  ;;  %vm5792_vm1 = vweird.f32 %v7066_v19  ;;  %v5614_v53 = vsel %vm12630_vm4, %v12473_v61, %v5610_v14  ;;  %v5840_v51 = vmul.f32 %v5739_v22, %v12433_v28 }
 0xcc4   :  { %v5774_v35 = vmul.f32 %v7064_v31, %v5773_v4  ;;  %vm5793_vm5 = vmor %vm5791_vm10, %vm5792_vm1  ;;  %v5674_v4 = vsel %vm12606_vm14, %v12481_v32, %v5670_v38  ;;  %v5678_v32 = vor.u32 1.1754944e-38, %v5677_v57  ;;  %vm13591_vm15 = vcmask 261120  }
 0xcc5   :  { %v5788_v49 = vsub.f32 1.0, %v5787_v60  ;;  %vm13592_vm6 = vmmov %vm13591_vm15 }
 0xcc6   :  { %v5775_v13 = vadd.f32 %v7064_v31, %v5774_v35 }
 0xcc7   :  { %v5789_v18 = vmul.f32 %v7066_v19, %v5788_v49 }
 0xcc8   :  { %v5779_v2 = vsel %vm5778_vm0, %v7064_v31, %v5775_v13 }
 0xcc9   :  { %v5784_v31 = vsel %vm5781_vm3, %v5783_v50, %v5779_v2  ;;  %v5790_v20 = vadd.f32 %v7066_v19, %v5789_v18 }
 0xcca   :  { %v5843_v33 = vmul.f32 %v5784_v31, %v12448_v43  ;;  %v5604_v43 = vsel %vm12543_vm11, %v12501_v12, %v5599_v63  ;;  %vm5676_vm11 = vcmp.eq.f32.partialorder %v5675_v16, 8.507059e+37 }
 0xccb   :  { %v5794_v54 = vsel %vm5793_vm5, %v7066_v19, %v5790_v20  ;;  %v5835_v19 = vmul.f32 %v5664_v24, %v12413_v0  ;;  %v5679_v23 = vsel %vm5676_vm11, %v5678_v32, %v5674_v4  ;;  %v5831_v57 = vmul.f32 %v5604_v43, %v12410_v45 }
 0xccc   :  { %5859 = vmatpush.msrb.mxu0 %v5843_v33  ;;  %v5799_v5 = vsel %vm5796_vm12, %v5798_v42, %v5794_v54  ;;  %v5619_v0 = vsel %vm5616_vm9, %v5618_v41, %v5614_v53  ;;  %v5836_v3 = vmul.f32 %v5679_v23, %v12423_v37 }
 0xccd   :  { %v5844_v12 = vmul.f32 %v5799_v5, %v12459_v17  ;;  %v12653_v17 = vld [vmem:[%s12928_s4] sm:$0xf]  ;;  %v5832_v45 = vmul.f32 %v5619_v0, %v12418_v15  ;;  %s6448_s4 = sld [smem:[#allocation2 + $0x25]] }
 0xcce   :  { %5860 = vmatpush.msrb.mxu0 %v5839_v62 }
 0xccf   :  { %5879 = vmatpush.msrb.mxu1 %v5844_v12 }
 0xcd0   :  { %5861 = vmatpush.msrb.mxu0 %v5835_v19 }
 0xcd1   :  { %5880 = vmatpush.msrb.mxu1 %v5840_v51 }
 0xcd2   :  { %5862 = vmatpush.msrb.mxu0 %v5831_v57 }
 0xcd3   :  { %6443 = vmatmul.msk.f32.vlgmr.msrb.gmra.mxu0 %vm13591_vm15, %v12653_v17  ;;  %5881 = vmatpush.msrb.mxu1 %v5836_v3 }
 0xcd5   :  { %5882 = vmatpush.msrb.mxu1 %v5832_v45 }
 0xcd6   :  { %6444 = vmatmul.msk.f32.vlgmr.msrb.gmra.mxu1 %vm13592_vm6, %v12653_v17 }
 0xd0b   :  { %v5486_v28 = vpop.f32.mrf.mxu2  ;;  %v5515_v46 = vpop.f32.mrf.mxu3 }
 0xd0c   :  { %v12661_v37 = vadd.f32 %v5486_v28, %v12405_v58  ;;  %v12667_v16 = vadd.f32 %v5515_v46, %v12405_v58 }
 0xd0e   :  { %v6429_v15 = vmul.f32 -1.442695, %v12661_v37  ;;  %v6430_v35 = vmul.f32 -1.442695, %v12667_v16 }
 0xd10   :  { %7067 = vpow2.f32 %v6429_v15 }
 0xd13   :  { %v5489_v61 = vpop.f32.mrf.mxu2  ;;  %v5518_v26 = vpop.f32.mrf.mxu3 }
 0xd14   :  { %v12664_v10 = vadd.f32 %v5489_v61, %v12407_v1  ;;  %v12672_v56 = vadd.f32 %v5518_v26, %v12407_v1 }
 0xd16   :  { %v6433_v29 = vmul.f32 -1.442695, %v12664_v10  ;;  %v6434_v60 = vmul.f32 -1.442695, %v12672_v56  ;;  %v7068_v8 = vpop.eup %7067 }
 0xd17   :  { %v12684_v38 = vadd.f32 1.0, %v7068_v8 }
 0xd18   :  { %7069 = vpow2.f32 %v6433_v29 }
 0xd19   :  { %7071 = vpow2.f32 %v6430_v35  ;;  %v5632_v5 = vand.u32 2147483648, %v12684_v38  ;;  %v5630_v12 = vand.u32 2147483647, %v12684_v38  ;;  %vm5626_vm7 = vweird.f32 %v12684_v38 }
 0xd1a   :  { %7073 = vpow2.f32 %v6434_v60 }
 0xd1b   :  { %v5492_v25 = vpop.f32.mrf.mxu2  ;;  %v5521_v6 = vpop.f32.mrf.mxu3  ;;  %v12744_v46 = vor.u32 1.1754944e-38, %v5632_v5  ;;  %vm12786_vm11 = vcmp.eq.f32.partialorder %v5630_v12, 8.507059e+37 }
 0xd1c   :  { %v12677_v7 = vadd.f32 %v5492_v25, %v12426_v11  ;;  %v12680_v58 = vadd.f32 %v5521_v6, %v12426_v11 }
 0xd1e   :  { %v6437_v52 = vmul.f32 -1.442695, %v12677_v7  ;;  %v6438_v1 = vmul.f32 -1.442695, %v12680_v58  ;;  %v7070_v13 = vpop.eup %7069 }
 0xd1f   :  { %v7072_v49 = vpop.eup %7071  ;;  %v12686_v40 = vadd.f32 1.0, %v7070_v13 }
 0xd20   :  { %7075 = vpow2.f32 %v6437_v52  ;;  %v7074_v44 = vpop.eup %7073  ;;  %v12688_v11 = vadd.f32 1.0, %v7072_v49 }
 0xd21   :  { %7077 = vpow2.f32 %v6438_v1  ;;  %v12698_v21 = vadd.f32 1.0, %v7074_v44  ;;  %v5692_v41 = vand.u32 2147483648, %v12686_v40  ;;  %vm5686_vm0 = vweird.f32 %v12686_v40 }
 0xd22   :  { %7079 = vrcp.f32 %v12684_v38  ;;  %v5645_v0 = vand.u32 2147483647, %v12688_v11  ;;  %v5647_v61 = vand.u32 2147483648, %v12688_v11  ;;  %v5690_v35 = vand.u32 2147483647, %v12686_v40 }
 0xd23   :  { %v5495_v50 = vpop.f32.mrf.mxu2  ;;  %v5524_v34 = vpop.f32.mrf.mxu3  ;;  %7081 = vrcp.f32 %v12686_v40  ;;  %v12754_v60 = vor.u32 1.1754944e-38, %v5692_v41  ;;  %v5705_v13 = vand.u32 2147483647, %v12698_v21  ;;  %v5707_v49 = vand.u32 2147483648, %v12698_v21 }
 0xd24   :  { %v12691_v18 = vadd.f32 %v5495_v50, %v12401_v39  ;;  %v12702_v31 = vadd.f32 %v5524_v34, %v12401_v39  ;;  %vm5701_vm14 = vweird.f32 %v12698_v21  ;;  %vm12775_vm12 = vcmp.eq.f32.partialorder %v5690_v35, 8.507059e+37 }
 0xd26   :  { %v7076_v2 = vpop.eup %7075  ;;  %v6441_v14 = vmul.f32 -1.442695, %v12691_v18  ;;  %v6442_v33 = vmul.f32 -1.442695, %v12702_v31 }
 0xd27   :  { %v12694_v63 = vadd.f32 1.0, %v7076_v2  ;;  %v7078_v55 = vpop.eup %7077 }
 0xd28   :  { %v12705_v59 = vadd.f32 1.0, %v7078_v55  ;;  %v12707_v47 = vpop.eup %7079 }
 0xd29   :  { %7083 = vrcp.f32 %v12694_v63  ;;  %v12711_v20 = vpop.eup %7081  ;;  %v5622_v30 = vmul.f32 %v12707_v47, %v12684_v38  ;;  %vm5627_vm3 = vweird.f32 %v12707_v47  ;;  %v5750_v15 = vand.u32 2147483647, %v12694_v63 }
 0xd2a   :  { %7085 = vrcp.f32 %v12688_v11  ;;  %v5682_v42 = vmul.f32 %v12711_v20, %v12686_v40  ;;  %v5752_v29 = vand.u32 2147483648, %v12694_v63  ;;  %vm5687_vm1 = vweird.f32 %v12711_v20 }
 0xd2b   :  { %7087 = vpow2.f32 %v6441_v14  ;;  %v5623_v22 = vsub.f32 1.0, %v5622_v30  ;;  %vm5746_vm8 = vweird.f32 %v12694_v63  ;;  %vm12770_vm2 = vcmp.eq.f32.partialorder %v5750_v15, 8.507059e+37  ;;  %vm12795_vm15 = vmor %vm5686_vm0, %vm5687_vm1 }
 0xd2c   :  { %7089 = vrcp.f32 %v12698_v21  ;;  %v5683_v19 = vsub.f32 1.0, %v5682_v42  ;;  %v5753_v14 = vor.u32 1.1754944e-38, %v5752_v29  ;;  %vm5761_vm4 = vweird.f32 %v12705_v59 }
 0xd2d   :  { %7091 = vrcp.f32 %v12705_v59  ;;  %v5624_v28 = vmul.f32 %v12707_v47, %v5623_v22 }
 0xd2e   :  { %7093 = vpow2.f32 %v6442_v33  ;;  %v5684_v26 = vmul.f32 %v12711_v20, %v5683_v19  ;;  %v5765_v19 = vand.u32 2147483647, %v12705_v59 }
 0xd2f   :  { %v12714_v24 = vpop.eup %7083  ;;  %v12762_v50 = vadd.f32 %v12707_v47, %v5624_v28 }
 0xd30   :  { %v12716_v39 = vpop.eup %7085  ;;  %v5742_v62 = vmul.f32 %v12714_v24, %v12694_v63  ;;  %v5685_v2 = vadd.f32 %v12711_v20, %v5684_v26  ;;  %vm5747_vm13 = vweird.f32 %v12714_v24 }
 0xd31   :  { %v7088_v4 = vpop.eup %7087  ;;  %v5637_v43 = vmul.f32 %v12716_v39, %v12688_v11  ;;  %vm5642_vm5 = vweird.f32 %v12716_v39  ;;  %vm12808_vm9 = vmor %vm5746_vm8, %vm5747_vm13 }
 0xd32   :  { %v12724_v54 = vpop.eup %7089  ;;  %v12728_v27 = vadd.f32 1.0, %v7088_v4  ;;  %v5743_v23 = vsub.f32 1.0, %v5742_v62  ;;  %v5689_v12 = vsel %vm12795_vm15, %v12711_v20, %v5685_v2  ;;  %vm12825_vm15 = vmor %vm5626_vm7, %vm5627_vm3 }
 0xd33   :  { %v12730_v32 = vpop.eup %7091  ;;  %v5638_v51 = vsub.f32 1.0, %v5637_v43  ;;  %v5697_v3 = vmul.f32 %v12724_v54, %v12698_v21  ;;  %vm5702_vm10 = vweird.f32 %v12724_v54 }
 0xd34   :  { %v7094_v53 = vpop.eup %7093  ;;  %7095 = vrcp.f32 %v12728_v27  ;;  %v5757_v57 = vmul.f32 %v12730_v32, %v12705_v59  ;;  %v5744_v25 = vmul.f32 %v12714_v24, %v5743_v23  ;;  %v5810_v43 = vand.u32 2147483647, %v12728_v27  ;;  %vm12849_vm7 = vmor %vm5701_vm14, %vm5702_vm10 }
 0xd35   :  { %v12741_v45 = vadd.f32 1.0, %v7094_v53  ;;  %v5639_v1 = vmul.f32 %v12716_v39, %v5638_v51  ;;  %v5698_v8 = vsub.f32 1.0, %v5697_v3  ;;  %v5812_v22 = vand.u32 2147483648, %v12728_v27 }
 0xd36   :  { %v5758_v6 = vsub.f32 1.0, %v5757_v57  ;;  %v5745_v33 = vadd.f32 %v12714_v24, %v5744_v25  ;;  %vm5762_vm0 = vweird.f32 %v12730_v32  ;;  %v5767_v57 = vand.u32 2147483648, %v12705_v59 }
 0xd37   :  { %7097 = vrcp.f32 %v12741_v45  ;;  %v5699_v62 = vmul.f32 %v12724_v54, %v5698_v8  ;;  %vm5806_vm1 = vweird.f32 %v12728_v27  ;;  %vm5811_vm13 = vcmp.eq.f32.partialorder %v5810_v43, 8.507059e+37  ;;  %vm12841_vm3 = vmor %vm5761_vm4, %vm5762_vm0 }
 0xd38   :  { %v5759_v30 = vmul.f32 %v12730_v32, %v5758_v6  ;;  %v5749_v51 = vsel %vm12808_vm9, %v12714_v24, %v5745_v33  ;;  %v5813_v26 = vor.u32 1.1754944e-38, %v5812_v22  ;;  %v5827_v15 = vand.u32 2147483648, %v12741_v45 }
 0xd39   :  { %v5700_v63 = vadd.f32 %v12724_v54, %v5699_v62  ;;  %v5825_v35 = vand.u32 2147483647, %v12741_v45  ;;  %v5629_v25 = vsel %vm12825_vm15, %v12707_v47, %v12762_v50  ;;  %v5640_v6 = vadd.f32 %v12716_v39, %v5639_v1  ;;  %v6450_v62 = vld [vmem:[%s12930_s6 + $0x90] sm:$0xff] }
 0xd3a   :  { %v7096_v52 = vpop.eup %7095  ;;  %v5760_v20 = vadd.f32 %v12730_v32, %v5759_v30  ;;  %v5754_v8 = vsel %vm12770_vm2, %v5753_v14, %v5749_v51  ;;  %vm5821_vm2 = vweird.f32 %v12741_v45  ;;  %vm5766_vm4 = vcmp.eq.f32.partialorder %v5765_v19, 8.507059e+37 }
 0xd3b   :  { %v5802_v44 = vmul.f32 %v7096_v52, %v12728_v27  ;;  %vm5807_vm6 = vweird.f32 %v7096_v52  ;;  %v5768_v2 = vor.u32 1.1754944e-38, %v5767_v57  ;;  %v5828_v34 = vor.u32 1.1754944e-38, %v5827_v15 }
 0xd3c   :  { %vm5808_vm8 = vmor %vm5806_vm1, %vm5807_vm6  ;;  %v5764_v1 = vsel %vm12841_vm3, %v12730_v32, %v5760_v20  ;;  %v5704_v14 = vsel %vm12849_vm7, %v12724_v54, %v5700_v63  ;;  %v5841_v32 = vmul.f32 %v5754_v8, %v12677_v7  ;;  %vm5826_vm10 = vcmp.eq.f32.partialorder %v5825_v35, 8.507059e+37 }
 0xd3d   :  { %v5803_v42 = vsub.f32 1.0, %v5802_v44  ;;  %v7098_v4 = vpop.eup %7097  ;;  %v5694_v44 = vsel %vm12775_vm12, %v12754_v60, %v5689_v12  ;;  %vm13609_vm12 = vweird.f32 %v12688_v11  ;;  %v5708_v54 = vor.u32 1.1754944e-38, %v5707_v49 }
 0xd3e   :  { %v5817_v23 = vmul.f32 %v7098_v4, %v12741_v45  ;;  %vm5822_vm9 = vweird.f32 %v7098_v4  ;;  %vm12873_vm6 = vmor %vm13609_vm12, %vm5642_vm5  ;;  %v5769_v60 = vsel %vm5766_vm4, %v5768_v2, %v5764_v1  ;;  %v5837_v30 = vmul.f32 %v5694_v44, %v12664_v10 }
 0xd3f   :  { %v5804_v41 = vmul.f32 %v7096_v52, %v5803_v42  ;;  %vm5823_vm14 = vmor %vm5821_vm2, %vm5822_vm9  ;;  %v5644_v55 = vsel %vm12873_vm6, %v12716_v39, %v5640_v6  ;;  %v5648_v42 = vor.u32 1.1754944e-38, %v5647_v61  ;;  %vm5646_vm5 = vcmp.eq.f32.partialorder %v5645_v0, 8.507059e+37 }
 0xd40   :  { %v5818_v28 = vsub.f32 1.0, %v5817_v23  ;;  %v5842_v39 = vmul.f32 %v5769_v60, %v12680_v58  ;;  %vm13612_vm0 = vcmask 261120   ;;  %v5933_v11 = vstv %s6448_s4 }
 0xd41   :  { %v5805_v3 = vadd.f32 %v7096_v52, %v5804_v41  ;;  %v5649_v10 = vsel %vm5646_vm5, %v5648_v42, %v5644_v55  ;;  %vm13613_vm1 = vmmov %vm13612_vm0  ;;  %v5930_v61 = vstv %s12892_s25  ;;  %v5953_v43 = vstv %s12895_s26 }
 0xd42   :  { %v5819_v29 = vmul.f32 %v7098_v4, %v5818_v28  ;;  %v5931_v5 = vmul.f32 %v5930_v61, %v12363_v9  ;;  %v5954_v53 = vmul.f32 %v6450_v62, %v5953_v43  ;;  %v6451_v9 = vld [vmem:[%s12930_s6 + $0x98] sm:$0xff]  ;;  %v5932_v63 = vmul.f32 %v5930_v61, %v12394_v36 }
 0xd43   :  { %v5809_v24 = vsel %vm5808_vm8, %v7096_v52, %v5805_v3  ;;  %vm13614_vm8 = vcmask 1043456  }
 0xd44   :  { %v5814_v52 = vsel %vm5811_vm13, %v5813_v26, %v5809_v24  ;;  %v5820_v59 = vadd.f32 %v7098_v4, %v5819_v29  ;;  %v5955_v26 = vmul.f32 %v6451_v9, %v5953_v43  ;;  %vm13615_vm13 = vmmov %vm13614_vm8 }
 0xd45   :  { %v5845_v50 = vmul.f32 %v5814_v52, %v12691_v18  ;;  %v5634_v18 = vsel %vm12786_vm11, %v12744_v46, %v5629_v25  ;;  %vm5706_vm11 = vcmp.eq.f32.partialorder %v5705_v13, 8.507059e+37 }
 0xd46   :  { %v5824_v33 = vsel %vm5823_vm14, %v7098_v4, %v5820_v59  ;;  %v5709_v4 = vsel %vm5706_vm11, %v5708_v54, %v5704_v14  ;;  %v5833_v49 = vmul.f32 %v5634_v18, %v12661_v37  ;;  %v5834_v37 = vmul.f32 %v5649_v10, %v12667_v16 }
 0xd47   :  { %5899 = vmatpush.msrb.mxu2 %v5845_v50  ;;  %v5829_v7 = vsel %vm5826_vm10, %v5828_v34, %v5824_v33  ;;  %v5838_v21 = vmul.f32 %v5709_v4, %v12672_v56 }
 0xd48   :  { %v5846_v46 = vmul.f32 %v5829_v7, %v12702_v31 }
 0xd49   :  { %5900 = vmatpush.msrb.mxu2 %v5841_v32 }
 0xd4a   :  { %5919 = vmatpush.msrb.mxu3 %v5846_v46 }
 0xd4b   :  { %5901 = vmatpush.msrb.mxu2 %v5837_v30 }
 0xd4c   :  { %5920 = vmatpush.msrb.mxu3 %v5842_v39 }
 0xd4d   :  { %5902 = vmatpush.msrb.mxu2 %v5833_v49 }
 0xd4e   :  { %6445 = vmatmul.msk.f32.vlgmr.msrb.gmra.mxu2 %vm13612_vm0, %v12653_v17  ;;  %5921 = vmatpush.msrb.mxu3 %v5838_v21 }
 0xd50   :  { %v5864_v58 = vpop.f32.mrf.mxu0  ;;  %5922 = vmatpush.msrb.mxu3 %v5834_v37 }
 0xd51   :  { %6446 = vmatmul.msk.f32.vlgmr.msrb.gmra.mxu3 %vm13613_vm1, %v12653_v17  ;;  %v5865_v56 = vadd.f32 %v5864_v58, %v7811_v48 }
 0xd53   :  { %v5884_v31 = vpop.f32.mrf.mxu1  ;;  %v5934_v16 = vmul.f32 %v5933_v11, %v5865_v56 }
 0xd54   :  { %v5885_v0 = vadd.f32 %v5884_v31, %v7811_v48 }
 0xd56   :  { %v5935_v13 = vmul.f32 %v5933_v11, %v5885_v0 }
 0xd58   :  { %v5942_v22 = vrot.slane %v5935_v13, 4 }
 0xd5a   :  { %v5944_v17 = vsel %vm13614_vm8, %v5934_v16, %v5942_v22 }
 0xd5b   :  { %v5948_v19 = vadd.f32 %v5944_v17, %v5931_v5 }
 0xd5d   :  { %v5956_v41 = vadd.f32 %v5954_v53, %v5948_v19 }
 0xd5f   :  { %v6452_v23 = vclamps-f32 %v5956_v41, 1.0 }
 0xd61   :  { %5962 = vst [vmem:[%s12931_s7] sm:$0xff] %v6452_v23 }
 0xdd1   :  { %v5904_v12 = vpop.f32.mrf.mxu2 }
 0xdd2   :  { %v5905_v57 = vadd.f32 %v5904_v12, %v7811_v48 }
 0xdd4   :  { %v5924_v40 = vpop.f32.mrf.mxu3  ;;  %v5936_v3 = vmul.f32 %v5933_v11, %v5905_v57 }
 0xdd5   :  { %v5925_v51 = vadd.f32 %v5924_v40, %v7811_v48 }
 0xdd7   :  { %v5937_v20 = vmul.f32 %v5933_v11, %v5925_v51 }
 0xdd9   :  { %v5943_v28 = vrot.slane %v5937_v20, 4 }
 0xddb   :  { %v5945_v15 = vsel %vm13615_vm13, %v5936_v3, %v5943_v28 }
 0xddc   :  { %v5949_v27 = vadd.f32 %v5945_v15, %v5932_v63 }
 0xdde   :  { %v5957_v24 = vadd.f32 %v5955_v26, %v5949_v27 }
 0xde0   :  { %v6453_v29 = vclamps-f32 %v5957_v24, 1.0 }
 0xde2   :  { %5963 = vst [vmem:[%s12931_s7 + $0x8] sm:$0xff] %v6453_v29 }
 0xde3   :  { %5968 = vsyncpa [#allocation3], 1 }

</bundles_post_ra>
